<compile_context>
chip_gen: v5e
topology: v5e:2x2
jax: 0.10.0
libtpu: 0.0.40
codegen_flags: <defaults>
</compile_context>

<pallas_src>
import jax
import jax.numpy as jnp
from jax import lax
from jax.experimental import pallas as pl
from jax.experimental.pallas import tpu as pltpu


def _attn_basic_block_kernel(x_ref, w1_ref, b1_ref, w2_ref, b2_ref,
                             out_ref, pad_ref, acc_ref):
    """Fused conv1 -> bn1 -> relu -> conv2 -> bn2 -> (+identity) -> relu.

    x_ref  : (1, H, W, C)      one image, NHWC, f32                 [VMEM]
    w*_ref : (3, 3*C, C)       bf16 weights, (kh, kw*C+cin, cout),
                               BN scale folded in                    [VMEM]
    b*_ref : (1, C)            folded BN bias, f32                   [VMEM]
    out_ref: (1, H*W, C)       flattened-spatial output, f32         [VMEM]
    pad_ref: (H+2, W+2, C)     zero-halo padded image, bf16          [scratch]
    acc_ref: (H*W, C)          f32 conv accumulator                  [scratch]
    """
    _, H, W, C = x_ref.shape
    Cout = out_ref.shape[-1]
    HW = H * W

    # Zero the 1-pixel halo ring.  (Re-done every grid step on purpose: with
    # dimension_semantics=("parallel",) the batch axis may be split across
    # TensorCores, so "only at program_id==0" would leave core 1's scratch
    # uninitialized.  These are tiny bf16 stores.)
    zrow = jnp.zeros((1, W + 2, C), pad_ref.dtype)
    zcol = jnp.zeros((H + 2, 1, C), pad_ref.dtype)
    pad_ref[0:1, :, :] = zrow
    pad_ref[H + 1:H + 2, :, :] = zrow
    pad_ref[:, 0:1, :] = zcol
    pad_ref[:, W + 1:W + 2, :] = zcol

    x = x_ref[0]                                   # (H, W, C) f32 (residual)
    pad_ref[1:H + 1, 1:W + 1, :] = x.astype(pad_ref.dtype)

    def conv3x3_acc(w_ref, b_ref):
        # 3x3 conv as 3 MXU matmuls: the kw taps are folded into the
        # contraction (K = 3*C), bf16 operands, f32 accumulation into the
        # VMEM scratch accumulator.  kh slices the leading (non-tiled) axis.
        for kh in range(3):
            win = jnp.concatenate(
                [pad_ref[kh:kh + H, kw:kw + W, :] for kw in range(3)],
                axis=-1).reshape(HW, 3 * C)                       # bf16
            part = jnp.dot(win, w_ref[kh],
                           preferred_element_type=jnp.float32)    # (HW, Cout)
            if kh == 0:
                acc_ref[...] = part + b_ref[...]   # init: first taps + bias
            else:
                acc_ref[...] += part

    # conv1 + folded bn1 + ReLU.
    conv3x3_acc(w1_ref, b1_ref)
    mid = jnp.maximum(acc_ref[...], 0.0)                          # (HW, C) f32

    # Reuse the same padded scratch for conv2's input (halo stays zero).
    pad_ref[1:H + 1, 1:W + 1, :] = mid.reshape(H, W, Cout).astype(pad_ref.dtype)

    # conv2 + folded bn2 + residual add + final ReLU, fused.
    conv3x3_acc(w2_ref, b2_ref)
    # NOTE: for C < 128 this is a masked (partial-lane) store; with realistic
    # channel counts (>=128) it is lane-dense.
    out_ref[0, :, :] = jnp.maximum(acc_ref[...] + x.reshape(HW, C), 0.0)


def attn_basic_block(x, params, eps=1e-5):
    """x: (N, C, H, W) float32 NCHW.  Returns NCHW output."""
    N, Cin, H, W = x.shape
    Cout = params["w1"].shape[0]
    assert Cin == Cout, "identity residual requires inplanes == planes"
    C = Cin

    # TODO(synk): if the surrounding model stays NHWC these two full-tensor
    # layout passes disappear; the module-level interface here is NCHW.
    x_nhwc = jnp.transpose(x, (0, 2, 3, 1)).astype(jnp.float32)   # (N, H, W, C)

    def fold_bn(g, b, m, v):
        s = g / jnp.sqrt(v + eps)
        return s.astype(jnp.float32), (b - m * s).astype(jnp.float32)

    s1, t1 = fold_bn(params["g1"], params["b1"], params["m1"], params["v1"])
    s2, t2 = fold_bn(params["g2"], params["b2"], params["m2"], params["v2"])

    def fold_weight(w_oihw, scale):
        # OIHW -> (kh, kw, cin, cout); fold the BN scale into cout; flatten the
        # kw taps into the contraction axis -> (3, 3*C, Cout); cast to bf16.
        w = jnp.transpose(w_oihw, (2, 3, 1, 0)).astype(jnp.float32)
        w = w * scale[None, None, None, :]
        return w.reshape(3, 3 * C, Cout).astype(jnp.bfloat16)

    w1f = fold_weight(params["w1"], s1)
    w2f = fold_weight(params["w2"], s2)
    b1f = t1.reshape(1, Cout)
    b2f = t2.reshape(1, Cout)

    out_flat = pl.pallas_call(
        _attn_basic_block_kernel,
        out_shape=jax.ShapeDtypeStruct((N, H * W, Cout), jnp.float32),
        grid=(N,),
        in_specs=[
            pl.BlockSpec((1, H, W, C), lambda n: (n, 0, 0, 0)),       # x
            # For very large C (e.g. 512 on v7x) these constant-index weight
            # blocks could additionally use pipeline_mode=pl.Buffered(1) and/or
            # a Cout-tile grid axis to bound weight VMEM; bf16 already halves it.
            pl.BlockSpec((3, 3 * C, Cout), lambda n: (0, 0, 0)),      # w1
            pl.BlockSpec((1, Cout), lambda n: (0, 0)),                # b1
            pl.BlockSpec((3, 3 * C, Cout), lambda n: (0, 0, 0)),      # w2
            pl.BlockSpec((1, Cout), lambda n: (0, 0)),                # b2
        ],
        out_specs=pl.BlockSpec((1, H * W, Cout), lambda n: (n, 0, 0)),
        scratch_shapes=[
            pltpu.VMEM((H + 2, W + 2, C), jnp.bfloat16),   # padded image
            pltpu.VMEM((H * W, Cout), jnp.float32),        # f32 accumulator
        ],
        compiler_params=pltpu.CompilerParams(
            dimension_semantics=("parallel",),
            vmem_limit_bytes=32 * 1024 * 1024),
    )(x_nhwc, w1f, b1f, w2f, b2f)

    return jnp.transpose(out_flat.reshape(N, H, W, Cout), (0, 3, 1, 2))


# ----------------------- pure-JAX reference (for checking) -------------------
def _reference_forward(x, params, eps=1e-5):
    def conv(x, w):
        return lax.conv_general_dilated(
            x, w, window_strides=(1, 1), padding=((1, 1), (1, 1)),
            dimension_numbers=("NCHW", "OIHW", "NCHW"),
            precision=lax.Precision.HIGHEST)

    def bn(x, g, b, m, v):
        return (g[None, :, None, None] * (x - m[None, :, None, None])
                / jnp.sqrt(v[None, :, None, None] + eps)
                + b[None, :, None, None])

    identity = x
    out = jax.nn.relu(bn(conv(x, params["w1"]), params["g1"], params["b1"],
                         params["m1"], params["v1"]))
    out = bn(conv(out, params["w2"]), params["g2"], params["b2"],
             params["m2"], params["v2"]) + identity
    return jax.nn.relu(out)


def _init_params(key, inplanes, planes):
    ks = jax.random.split(key, 10)
    return {
        "w1": 0.1 * jax.random.normal(ks[0], (planes, inplanes, 3, 3), jnp.float32),
        "w2": 0.1 * jax.random.normal(ks[1], (planes, planes, 3, 3), jnp.float32),
        "g1": jax.random.uniform(ks[2], (planes,), jnp.float32, 0.5, 1.5),
        "b1": 0.1 * jax.random.normal(ks[3], (planes,), jnp.float32),
        "m1": 0.1 * jax.random.normal(ks[4], (planes,), jnp.float32),
        "v1": jax.random.uniform(ks[5], (planes,), jnp.float32, 0.5, 1.5),
        "g2": jax.random.uniform(ks[6], (planes,), jnp.float32, 0.5, 1.5),
        "b2": 0.1 * jax.random.normal(ks[7], (planes,), jnp.float32),
        "m2": 0.1 * jax.random.normal(ks[8], (planes,), jnp.float32),
        "v2": jax.random.uniform(ks[9], (planes,), jnp.float32, 0.5, 1.5),
    }


if __name__ == "__main__":
    key = jax.random.PRNGKey(0)
    k_x, k_p = jax.random.split(key)

    N, C, H, W = 2, 4, 16, 16          # inplanes = planes = 4, stride = 1
    x = jax.random.normal(k_x, (N, C, H, W), jnp.float32)
    params = _init_params(k_p, C, C)

    out = jax.block_until_ready(attn_basic_block(x, params))
    ref = jax.block_until_ready(_reference_forward(x, params))

    assert out.shape == (N, C, H, W)
    # bf16 MXU operands with f32 accumulation vs. an f32 reference: allow a
    # slightly looser tolerance than the pure-f32 version.
    assert jnp.allclose(out, ref, atol=3e-2, rtol=3e-2), "mismatch vs reference"

    print("KERNEL_OK")
</pallas_src>

<mosaic_0001>
module attributes {stable_mosaic.version = 11 : i64} {
  func.func @_attn_basic_block_kernel(%arg0: i32, %arg1: memref<1x16x16x4xf32, #tpu.memory_space<vmem>>, %arg2: memref<3x12x4xbf16, #tpu.memory_space<vmem>>, %arg3: memref<1x4xf32, #tpu.memory_space<vmem>>, %arg4: memref<3x12x4xbf16, #tpu.memory_space<vmem>>, %arg5: memref<1x4xf32, #tpu.memory_space<vmem>>, %arg6: memref<1x256x4xf32, #tpu.memory_space<vmem>>, %arg7: memref<18x18x4xbf16, #tpu.memory_space<vmem>>, %arg8: memref<256x4xf32, #tpu.memory_space<vmem>>) attributes {dimension_semantics = [#tpu.dimension_semantics<parallel>], iteration_bounds = array<i64: 2>, scalar_prefetch = 0 : i64, scratch_operands = 2 : i64, tpu.core_type = #tpu.core_type<tc>, window_params = [{transform_indices = @transform_0, window_bounds = array<i64: 1, 16, 16, 4>}, {pipeline_mode = #tpu.pipeline_mode<synchronous>, transform_indices = @transform_1, window_bounds = array<i64: 3, 12, 4>}, {pipeline_mode = #tpu.pipeline_mode<synchronous>, transform_indices = @transform_2, window_bounds = array<i64: 1, 4>}, {pipeline_mode = #tpu.pipeline_mode<synchronous>, transform_indices = @transform_3, window_bounds = array<i64: 3, 12, 4>}, {pipeline_mode = #tpu.pipeline_mode<synchronous>, transform_indices = @transform_4, window_bounds = array<i64: 1, 4>}, {transform_indices = @transform_5, window_bounds = array<i64: 1, 256, 4>}]} {
    %cst = arith.constant 0.000000e+00 : bf16
    %0 = vector.broadcast %cst : bf16 to vector<1x18x4xbf16>
    %cst_0 = arith.constant 0.000000e+00 : bf16
    %1 = vector.broadcast %cst_0 : bf16 to vector<18x1x4xbf16>
    %c0 = arith.constant 0 : index
    %c0_1 = arith.constant 0 : index
    %c0_2 = arith.constant 0 : index
    %2 = vector.load %arg7[%c0, %c0_1, %c0_2] : memref<18x18x4xbf16, #tpu.memory_space<vmem>>, vector<1x18x4xbf16>
    tpu.vector_store %arg7[%c0, %c0_1, %c0_2], %0 {strides = array<i32>} : memref<18x18x4xbf16, #tpu.memory_space<vmem>>, vector<1x18x4xbf16>,
    %c17 = arith.constant 17 : index
    %c0_3 = arith.constant 0 : index
    %c0_4 = arith.constant 0 : index
    %3 = vector.load %arg7[%c17, %c0_3, %c0_4] : memref<18x18x4xbf16, #tpu.memory_space<vmem>>, vector<1x18x4xbf16>
    tpu.vector_store %arg7[%c17, %c0_3, %c0_4], %0 {strides = array<i32>} : memref<18x18x4xbf16, #tpu.memory_space<vmem>>, vector<1x18x4xbf16>,
    %c0_5 = arith.constant 0 : index
    %c0_6 = arith.constant 0 : index
    %c0_7 = arith.constant 0 : index
    %4 = vector.load %arg7[%c0_5, %c0_6, %c0_7] : memref<18x18x4xbf16, #tpu.memory_space<vmem>>, vector<18x1x4xbf16>
    tpu.vector_store %arg7[%c0_5, %c0_6, %c0_7], %1 {strides = array<i32>} : memref<18x18x4xbf16, #tpu.memory_space<vmem>>, vector<18x1x4xbf16>,
    %c0_8 = arith.constant 0 : index
    %c17_9 = arith.constant 17 : index
    %c0_10 = arith.constant 0 : index
    %5 = vector.load %arg7[%c0_8, %c17_9, %c0_10] : memref<18x18x4xbf16, #tpu.memory_space<vmem>>, vector<18x1x4xbf16>
    tpu.vector_store %arg7[%c0_8, %c17_9, %c0_10], %1 {strides = array<i32>} : memref<18x18x4xbf16, #tpu.memory_space<vmem>>, vector<18x1x4xbf16>,
    %c0_11 = arith.constant 0 : index
    %c0_12 = arith.constant 0 : index
    %c0_13 = arith.constant 0 : index
    %c0_14 = arith.constant 0 : index
    %6 = vector.load %arg1[%c0_11, %c0_12, %c0_13, %c0_14] : memref<1x16x16x4xf32, #tpu.memory_space<vmem>>, vector<1x16x16x4xf32>
    %7 = vector.shape_cast %6 : vector<1x16x16x4xf32> to vector<16x16x4xf32>
    %8 = arith.truncf %7 : vector<16x16x4xf32> to vector<16x16x4xbf16>
    %c1 = arith.constant 1 : index
    %c1_15 = arith.constant 1 : index
    %c0_16 = arith.constant 0 : index
    %9 = vector.load %arg7[%c1, %c1_15, %c0_16] : memref<18x18x4xbf16, #tpu.memory_space<vmem>>, vector<16x16x4xbf16>
    tpu.vector_store %arg7[%c1, %c1_15, %c0_16], %8 {strides = array<i32>} : memref<18x18x4xbf16, #tpu.memory_space<vmem>>, vector<16x16x4xbf16>,
    %c0_17 = arith.constant 0 : index
    %c0_18 = arith.constant 0 : index
    %c0_19 = arith.constant 0 : index
    %10 = vector.load %arg7[%c0_17, %c0_18, %c0_19] : memref<18x18x4xbf16, #tpu.memory_space<vmem>>, vector<16x16x4xbf16>
    %c0_20 = arith.constant 0 : index
    %c1_21 = arith.constant 1 : index
    %c0_22 = arith.constant 0 : index
    %11 = vector.load %arg7[%c0_20, %c1_21, %c0_22] : memref<18x18x4xbf16, #tpu.memory_space<vmem>>, vector<16x16x4xbf16>
    %c0_23 = arith.constant 0 : index
    %c2 = arith.constant 2 : index
    %c0_24 = arith.constant 0 : index
    %12 = vector.load %arg7[%c0_23, %c2, %c0_24] : memref<18x18x4xbf16, #tpu.memory_space<vmem>>, vector<16x16x4xbf16>
    %13 = tpu.concatenate %10, %11, %12 in 2 : vector<16x16x4xbf16>, vector<16x16x4xbf16>, vector<16x16x4xbf16> -> vector<16x16x12xbf16>
    %14 = vector.shape_cast %13 : vector<16x16x12xbf16> to vector<256x12xbf16>
    %c0_25 = arith.constant 0 : index
    %c0_26 = arith.constant 0 : index
    %c0_27 = arith.constant 0 : index
    %15 = vector.load %arg2[%c0_25, %c0_26, %c0_27] : memref<3x12x4xbf16, #tpu.memory_space<vmem>>, vector<1x12x4xbf16>
    %16 = vector.shape_cast %15 : vector<1x12x4xbf16> to vector<12x4xbf16>
    %cst_28 = arith.constant dense<0.000000e+00> : vector<256x4xf32>
    %17 = tpu.matmul %14, %16, %cst_28 {dimension_numbers = #tpu.dot_dimension_numbers<[1], [0], [0], [1], [0, 0, 1, 1], [], []>} : vector<256x12xbf16>, vector<12x4xbf16>, vector<256x4xf32> -> vector<256x4xf32>
    %c0_29 = arith.constant 0 : index
    %c0_30 = arith.constant 0 : index
    %18 = vector.load %arg3[%c0_29, %c0_30] : memref<1x4xf32, #tpu.memory_space<vmem>>, vector<1x4xf32>
    %19 = vector.broadcast %18 : vector<1x4xf32> to vector<256x4xf32>
    %20 = arith.addf %17, %19 : vector<256x4xf32>
    %c0_31 = arith.constant 0 : index
    %c0_32 = arith.constant 0 : index
    %21 = vector.load %arg8[%c0_31, %c0_32] : memref<256x4xf32, #tpu.memory_space<vmem>>, vector<256x4xf32>
    tpu.vector_store %arg8[%c0_31, %c0_32], %20 {strides = array<i32>} : memref<256x4xf32, #tpu.memory_space<vmem>>, vector<256x4xf32>,
    %c1_33 = arith.constant 1 : index
    %c0_34 = arith.constant 0 : index
    %c0_35 = arith.constant 0 : index
    %22 = vector.load %arg7[%c1_33, %c0_34, %c0_35] : memref<18x18x4xbf16, #tpu.memory_space<vmem>>, vector<16x16x4xbf16>
    %c1_36 = arith.constant 1 : index
    %c1_37 = arith.constant 1 : index
    %c0_38 = arith.constant 0 : index
    %23 = vector.load %arg7[%c1_36, %c1_37, %c0_38] : memref<18x18x4xbf16, #tpu.memory_space<vmem>>, vector<16x16x4xbf16>
    %c1_39 = arith.constant 1 : index
    %c2_40 = arith.constant 2 : index
    %c0_41 = arith.constant 0 : index
    %24 = vector.load %arg7[%c1_39, %c2_40, %c0_41] : memref<18x18x4xbf16, #tpu.memory_space<vmem>>, vector<16x16x4xbf16>
    %25 = tpu.concatenate %22, %23, %24 in 2 : vector<16x16x4xbf16>, vector<16x16x4xbf16>, vector<16x16x4xbf16> -> vector<16x16x12xbf16>
    %26 = vector.shape_cast %25 : vector<16x16x12xbf16> to vector<256x12xbf16>
    %c1_42 = arith.constant 1 : index
    %c0_43 = arith.constant 0 : index
    %c0_44 = arith.constant 0 : index
    %27 = vector.load %arg2[%c1_42, %c0_43, %c0_44] : memref<3x12x4xbf16, #tpu.memory_space<vmem>>, vector<1x12x4xbf16>
    %28 = vector.shape_cast %27 : vector<1x12x4xbf16> to vector<12x4xbf16>
    %cst_45 = arith.constant dense<0.000000e+00> : vector<256x4xf32>
    %29 = tpu.matmul %26, %28, %cst_45 {dimension_numbers = #tpu.dot_dimension_numbers<[1], [0], [0], [1], [0, 0, 1, 1], [], []>} : vector<256x12xbf16>, vector<12x4xbf16>, vector<256x4xf32> -> vector<256x4xf32>
    %c0_46 = arith.constant 0 : index
    %c0_47 = arith.constant 0 : index
    %30 = vector.load %arg8[%c0_46, %c0_47] : memref<256x4xf32, #tpu.memory_space<vmem>>, vector<256x4xf32>
    %31 = arith.addf %30, %29 : vector<256x4xf32>
    %c0_48 = arith.constant 0 : index
    %c0_49 = arith.constant 0 : index
    %32 = vector.load %arg8[%c0_48, %c0_49] : memref<256x4xf32, #tpu.memory_space<vmem>>, vector<256x4xf32>
    tpu.vector_store %arg8[%c0_48, %c0_49], %31 {strides = array<i32>} : memref<256x4xf32, #tpu.memory_space<vmem>>, vector<256x4xf32>,
    %c2_50 = arith.constant 2 : index
    %c0_51 = arith.constant 0 : index
    %c0_52 = arith.constant 0 : index
    %33 = vector.load %arg7[%c2_50, %c0_51, %c0_52] : memref<18x18x4xbf16, #tpu.memory_space<vmem>>, vector<16x16x4xbf16>
    %c2_53 = arith.constant 2 : index
    %c1_54 = arith.constant 1 : index
    %c0_55 = arith.constant 0 : index
    %34 = vector.load %arg7[%c2_53, %c1_54, %c0_55] : memref<18x18x4xbf16, #tpu.memory_space<vmem>>, vector<16x16x4xbf16>
    %c2_56 = arith.constant 2 : index
    %c2_57 = arith.constant 2 : index
    %c0_58 = arith.constant 0 : index
    %35 = vector.load %arg7[%c2_56, %c2_57, %c0_58] : memref<18x18x4xbf16, #tpu.memory_space<vmem>>, vector<16x16x4xbf16>
    %36 = tpu.concatenate %33, %34, %35 in 2 : vector<16x16x4xbf16>, vector<16x16x4xbf16>, vector<16x16x4xbf16> -> vector<16x16x12xbf16>
    %37 = vector.shape_cast %36 : vector<16x16x12xbf16> to vector<256x12xbf16>
    %c2_59 = arith.constant 2 : index
    %c0_60 = arith.constant 0 : index
    %c0_61 = arith.constant 0 : index
    %38 = vector.load %arg2[%c2_59, %c0_60, %c0_61] : memref<3x12x4xbf16, #tpu.memory_space<vmem>>, vector<1x12x4xbf16>
    %39 = vector.shape_cast %38 : vector<1x12x4xbf16> to vector<12x4xbf16>
    %cst_62 = arith.constant dense<0.000000e+00> : vector<256x4xf32>
    %40 = tpu.matmul %37, %39, %cst_62 {dimension_numbers = #tpu.dot_dimension_numbers<[1], [0], [0], [1], [0, 0, 1, 1], [], []>} : vector<256x12xbf16>, vector<12x4xbf16>, vector<256x4xf32> -> vector<256x4xf32>
    %c0_63 = arith.constant 0 : index
    %c0_64 = arith.constant 0 : index
    %41 = vector.load %arg8[%c0_63, %c0_64] : memref<256x4xf32, #tpu.memory_space<vmem>>, vector<256x4xf32>
    %42 = arith.addf %41, %40 : vector<256x4xf32>
    %c0_65 = arith.constant 0 : index
    %c0_66 = arith.constant 0 : index
    %43 = vector.load %arg8[%c0_65, %c0_66] : memref<256x4xf32, #tpu.memory_space<vmem>>, vector<256x4xf32>
    tpu.vector_store %arg8[%c0_65, %c0_66], %42 {strides = array<i32>} : memref<256x4xf32, #tpu.memory_space<vmem>>, vector<256x4xf32>,
    %c0_67 = arith.constant 0 : index
    %c0_68 = arith.constant 0 : index
    %44 = vector.load %arg8[%c0_67, %c0_68] : memref<256x4xf32, #tpu.memory_space<vmem>>, vector<256x4xf32>
    %cst_69 = arith.constant 0.000000e+00 : f32
    %45 = vector.broadcast %cst_69 : f32 to vector<256x4xf32>
    %46 = arith.maximumf %44, %45 : vector<256x4xf32>
    %47 = vector.shape_cast %46 : vector<256x4xf32> to vector<16x16x4xf32>
    %48 = arith.truncf %47 : vector<16x16x4xf32> to vector<16x16x4xbf16>
    %c1_70 = arith.constant 1 : index
    %c1_71 = arith.constant 1 : index
    %c0_72 = arith.constant 0 : index
    %49 = vector.load %arg7[%c1_70, %c1_71, %c0_72] : memref<18x18x4xbf16, #tpu.memory_space<vmem>>, vector<16x16x4xbf16>
    tpu.vector_store %arg7[%c1_70, %c1_71, %c0_72], %48 {strides = array<i32>} : memref<18x18x4xbf16, #tpu.memory_space<vmem>>, vector<16x16x4xbf16>,
    %c0_73 = arith.constant 0 : index
    %c0_74 = arith.constant 0 : index
    %c0_75 = arith.constant 0 : index
    %50 = vector.load %arg7[%c0_73, %c0_74, %c0_75] : memref<18x18x4xbf16, #tpu.memory_space<vmem>>, vector<16x16x4xbf16>
    %c0_76 = arith.constant 0 : index
    %c1_77 = arith.constant 1 : index
    %c0_78 = arith.constant 0 : index
    %51 = vector.load %arg7[%c0_76, %c1_77, %c0_78] : memref<18x18x4xbf16, #tpu.memory_space<vmem>>, vector<16x16x4xbf16>
    %c0_79 = arith.constant 0 : index
    %c2_80 = arith.constant 2 : index
    %c0_81 = arith.constant 0 : index
    %52 = vector.load %arg7[%c0_79, %c2_80, %c0_81] : memref<18x18x4xbf16, #tpu.memory_space<vmem>>, vector<16x16x4xbf16>
    %53 = tpu.concatenate %50, %51, %52 in 2 : vector<16x16x4xbf16>, vector<16x16x4xbf16>, vector<16x16x4xbf16> -> vector<16x16x12xbf16>
    %54 = vector.shape_cast %53 : vector<16x16x12xbf16> to vector<256x12xbf16>
    %c0_82 = arith.constant 0 : index
    %c0_83 = arith.constant 0 : index
    %c0_84 = arith.constant 0 : index
    %55 = vector.load %arg4[%c0_82, %c0_83, %c0_84] : memref<3x12x4xbf16, #tpu.memory_space<vmem>>, vector<1x12x4xbf16>
    %56 = vector.shape_cast %55 : vector<1x12x4xbf16> to vector<12x4xbf16>
    %cst_85 = arith.constant dense<0.000000e+00> : vector<256x4xf32>
    %57 = tpu.matmul %54, %56, %cst_85 {dimension_numbers = #tpu.dot_dimension_numbers<[1], [0], [0], [1], [0, 0, 1, 1], [], []>} : vector<256x12xbf16>, vector<12x4xbf16>, vector<256x4xf32> -> vector<256x4xf32>
    %c0_86 = arith.constant 0 : index
    %c0_87 = arith.constant 0 : index
    %58 = vector.load %arg5[%c0_86, %c0_87] : memref<1x4xf32, #tpu.memory_space<vmem>>, vector<1x4xf32>
    %59 = vector.broadcast %58 : vector<1x4xf32> to vector<256x4xf32>
    %60 = arith.addf %57, %59 : vector<256x4xf32>
    %c0_88 = arith.constant 0 : index
    %c0_89 = arith.constant 0 : index
    %61 = vector.load %arg8[%c0_88, %c0_89] : memref<256x4xf32, #tpu.memory_space<vmem>>, vector<256x4xf32>
    tpu.vector_store %arg8[%c0_88, %c0_89], %60 {strides = array<i32>} : memref<256x4xf32, #tpu.memory_space<vmem>>, vector<256x4xf32>,
    %c1_90 = arith.constant 1 : index
    %c0_91 = arith.constant 0 : index
    %c0_92 = arith.constant 0 : index
    %62 = vector.load %arg7[%c1_90, %c0_91, %c0_92] : memref<18x18x4xbf16, #tpu.memory_space<vmem>>, vector<16x16x4xbf16>
    %c1_93 = arith.constant 1 : index
    %c1_94 = arith.constant 1 : index
    %c0_95 = arith.constant 0 : index
    %63 = vector.load %arg7[%c1_93, %c1_94, %c0_95] : memref<18x18x4xbf16, #tpu.memory_space<vmem>>, vector<16x16x4xbf16>
    %c1_96 = arith.constant 1 : index
    %c2_97 = arith.constant 2 : index
    %c0_98 = arith.constant 0 : index
    %64 = vector.load %arg7[%c1_96, %c2_97, %c0_98] : memref<18x18x4xbf16, #tpu.memory_space<vmem>>, vector<16x16x4xbf16>
    %65 = tpu.concatenate %62, %63, %64 in 2 : vector<16x16x4xbf16>, vector<16x16x4xbf16>, vector<16x16x4xbf16> -> vector<16x16x12xbf16>
    %66 = vector.shape_cast %65 : vector<16x16x12xbf16> to vector<256x12xbf16>
    %c1_99 = arith.constant 1 : index
    %c0_100 = arith.constant 0 : index
    %c0_101 = arith.constant 0 : index
    %67 = vector.load %arg4[%c1_99, %c0_100, %c0_101] : memref<3x12x4xbf16, #tpu.memory_space<vmem>>, vector<1x12x4xbf16>
    %68 = vector.shape_cast %67 : vector<1x12x4xbf16> to vector<12x4xbf16>
    %cst_102 = arith.constant dense<0.000000e+00> : vector<256x4xf32>
    %69 = tpu.matmul %66, %68, %cst_102 {dimension_numbers = #tpu.dot_dimension_numbers<[1], [0], [0], [1], [0, 0, 1, 1], [], []>} : vector<256x12xbf16>, vector<12x4xbf16>, vector<256x4xf32> -> vector<256x4xf32>
    %c0_103 = arith.constant 0 : index
    %c0_104 = arith.constant 0 : index
    %70 = vector.load %arg8[%c0_103, %c0_104] : memref<256x4xf32, #tpu.memory_space<vmem>>, vector<256x4xf32>
    %71 = arith.addf %70, %69 : vector<256x4xf32>
    %c0_105 = arith.constant 0 : index
    %c0_106 = arith.constant 0 : index
    %72 = vector.load %arg8[%c0_105, %c0_106] : memref<256x4xf32, #tpu.memory_space<vmem>>, vector<256x4xf32>
    tpu.vector_store %arg8[%c0_105, %c0_106], %71 {strides = array<i32>} : memref<256x4xf32, #tpu.memory_space<vmem>>, vector<256x4xf32>,
    %c2_107 = arith.constant 2 : index
    %c0_108 = arith.constant 0 : index
    %c0_109 = arith.constant 0 : index
    %73 = vector.load %arg7[%c2_107, %c0_108, %c0_109] : memref<18x18x4xbf16, #tpu.memory_space<vmem>>, vector<16x16x4xbf16>
    %c2_110 = arith.constant 2 : index
    %c1_111 = arith.constant 1 : index
    %c0_112 = arith.constant 0 : index
    %74 = vector.load %arg7[%c2_110, %c1_111, %c0_112] : memref<18x18x4xbf16, #tpu.memory_space<vmem>>, vector<16x16x4xbf16>
    %c2_113 = arith.constant 2 : index
    %c2_114 = arith.constant 2 : index
    %c0_115 = arith.constant 0 : index
    %75 = vector.load %arg7[%c2_113, %c2_114, %c0_115] : memref<18x18x4xbf16, #tpu.memory_space<vmem>>, vector<16x16x4xbf16>
    %76 = tpu.concatenate %73, %74, %75 in 2 : vector<16x16x4xbf16>, vector<16x16x4xbf16>, vector<16x16x4xbf16> -> vector<16x16x12xbf16>
    %77 = vector.shape_cast %76 : vector<16x16x12xbf16> to vector<256x12xbf16>
    %c2_116 = arith.constant 2 : index
    %c0_117 = arith.constant 0 : index
    %c0_118 = arith.constant 0 : index
    %78 = vector.load %arg4[%c2_116, %c0_117, %c0_118] : memref<3x12x4xbf16, #tpu.memory_space<vmem>>, vector<1x12x4xbf16>
    %79 = vector.shape_cast %78 : vector<1x12x4xbf16> to vector<12x4xbf16>
    %cst_119 = arith.constant dense<0.000000e+00> : vector<256x4xf32>
    %80 = tpu.matmul %77, %79, %cst_119 {dimension_numbers = #tpu.dot_dimension_numbers<[1], [0], [0], [1], [0, 0, 1, 1], [], []>} : vector<256x12xbf16>, vector<12x4xbf16>, vector<256x4xf32> -> vector<256x4xf32>
    %c0_120 = arith.constant 0 : index
    %c0_121 = arith.constant 0 : index
    %81 = vector.load %arg8[%c0_120, %c0_121] : memref<256x4xf32, #tpu.memory_space<vmem>>, vector<256x4xf32>
    %82 = arith.addf %81, %80 : vector<256x4xf32>
    %c0_122 = arith.constant 0 : index
    %c0_123 = arith.constant 0 : index
    %83 = vector.load %arg8[%c0_122, %c0_123] : memref<256x4xf32, #tpu.memory_space<vmem>>, vector<256x4xf32>
    tpu.vector_store %arg8[%c0_122, %c0_123], %82 {strides = array<i32>} : memref<256x4xf32, #tpu.memory_space<vmem>>, vector<256x4xf32>,
    %c0_124 = arith.constant 0 : index
    %c0_125 = arith.constant 0 : index
    %84 = vector.load %arg8[%c0_124, %c0_125] : memref<256x4xf32, #tpu.memory_space<vmem>>, vector<256x4xf32>
    %85 = vector.shape_cast %7 : vector<16x16x4xf32> to vector<256x4xf32>
    %86 = arith.addf %84, %85 : vector<256x4xf32>
    %cst_126 = arith.constant 0.000000e+00 : f32
    %87 = vector.broadcast %cst_126 : f32 to vector<256x4xf32>
    %88 = arith.maximumf %86, %87 : vector<256x4xf32>
    %c0_127 = arith.constant 0 : index
    %c0_128 = arith.constant 0 : index
    %c0_129 = arith.constant 0 : index
    %89 = vector.load %arg6[%c0_127, %c0_128, %c0_129] : memref<1x256x4xf32, #tpu.memory_space<vmem>>, vector<1x256x4xf32>
    %90 = vector.shape_cast %89 : vector<1x256x4xf32> to vector<256x4xf32>
    %91 = vector.shape_cast %88 : vector<256x4xf32> to vector<1x256x4xf32>
    tpu.vector_store %arg6[%c0_127, %c0_128, %c0_129], %91 {strides = array<i32>} : memref<1x256x4xf32, #tpu.memory_space<vmem>>, vector<1x256x4xf32>,
    return
  }
  func.func @transform_0(%arg0: i32) -> (i32, i32, i32, i32) {
    %c0_i32 = arith.constant 0 : i32
    %c0_i32_0 = arith.constant 0 : i32
    %c0_i32_1 = arith.constant 0 : i32
    %c0_i32_2 = arith.constant 0 : i32
    return %arg0, %c0_i32, %c0_i32_0, %c0_i32_1 : i32, i32, i32, i32
  }
  func.func @transform_1(%arg0: i32) -> (i32, i32, i32) {
    %c0_i32 = arith.constant 0 : i32
    %c0_i32_0 = arith.constant 0 : i32
    %c0_i32_1 = arith.constant 0 : i32
    %c0_i32_2 = arith.constant 0 : i32
    return %c0_i32, %c0_i32_0, %c0_i32_1 : i32, i32, i32
  }
  func.func @transform_2(%arg0: i32) -> (i32, i32) {
    %c0_i32 = arith.constant 0 : i32
    %c0_i32_0 = arith.constant 0 : i32
    %c0_i32_1 = arith.constant 0 : i32
    return %c0_i32, %c0_i32_0 : i32, i32
  }
  func.func @transform_3(%arg0: i32) -> (i32, i32, i32) {
    %c0_i32 = arith.constant 0 : i32
    %c0_i32_0 = arith.constant 0 : i32
    %c0_i32_1 = arith.constant 0 : i32
    %c0_i32_2 = arith.constant 0 : i32
    return %c0_i32, %c0_i32_0, %c0_i32_1 : i32, i32, i32
  }
  func.func @transform_4(%arg0: i32) -> (i32, i32) {
    %c0_i32 = arith.constant 0 : i32
    %c0_i32_0 = arith.constant 0 : i32
    %c0_i32_1 = arith.constant 0 : i32
    return %c0_i32, %c0_i32_0 : i32, i32
  }
  func.func @transform_5(%arg0: i32) -> (i32, i32, i32) {
    %c0_i32 = arith.constant 0 : i32
    %c0_i32_0 = arith.constant 0 : i32
    %c0_i32_1 = arith.constant 0 : i32
    return %arg0, %c0_i32, %c0_i32_0 : i32, i32, i32
  }
}

</mosaic_0001>

<bundles_post_ra>
// kernel: tpu_custom_call.1
= control target key start
LH: loop header
LB: loop body
LE: loop exit
PB: predicated region body
PF: predicated region fallthrough
CT: control target
= control target key end

     0   :  { %s7240_s18 = smov 0   ;;  %s9750_s0 = inlined_call_operand.vmem [shape: f32[2,16,16,4], index: 0, kind: input, shape index: {}]   ;;  %s9751_s1 = inlined_call_operand.vmem [shape: bf16[3,12,4], index: 1, kind: input, shape index: {}]   ;;  %s9752_s2 = inlined_call_operand.vmem [shape: f32[1,4], index: 2, kind: input, shape index: {}]   ;;  %s9753_s3 = inlined_call_operand.vmem [shape: bf16[3,12,4], index: 3, kind: input, shape index: {}]   ;;  %s9754_s4 = inlined_call_operand.vmem [shape: f32[1,4], index: 4, kind: input, shape index: {}]   ;;  %s9755_s5 = inlined_call_operand.vmem [shape: f32[2,256,4], index: 5, kind: output, shape index: {}]  }
   0x1 LB: > { %s6461_s19 = sadd.s32 4294967295, %s7205_s18   ;;  %p6465_p0 = scmp.ge.s32.totalorder %s7205_s18, 1  ;;  %s7205_s18 = sphi %s7240_s18, %s15_s18  }
   0x2   : > { %p187_p1 = scmp.lt.s32.totalorder %s7205_s18, 3 }
   0x4   : > { %p188_p2 = pnand %p6465_p0, %p187_p1 }
   0x6   : > { %191 = sbr.rel (%p188_p2) target bundleno = 1068 (0x42c), region = 40 }
   0xb   : > { %p215_p3 = scmp.lt.s32.totalorder %s6461_s19, 1  ;;  %vm229_vm0 = vcmask 24576   ;;  %vm236_vm1 = vsmask.f32 256  ;;  %v262_v1 = vld [vmem:[#allocation2 + $0x60] sm:$0x1] }
   0xc   : > { %vm7250_vm2 = vmand %vm229_vm0, %vm236_vm1  ;;  %vm292_vm3 = vsmask.f32 7938  ;;  %v318_v2 = vld [vmem:[#allocation2 + $0x68] sm:$0x1]  ;;  %vm412_vm5 = vsmask.f32 4368 }
   0xd   : > { %s9802_s19 = smov (!%p215_p3, %s6461_s19), 1  ;;  %v263_v3 = vsel %vm7250_vm2, 0, %v262_v1  ;;  %vm7260_vm4 = vmand %vm229_vm0, %vm292_vm3  ;;  %v265_v6 = vld [vmem:[#allocation2 + $0x6c] sm:$0x1]  ;;  %v321_v8 = vld [vmem:[#allocation2 + $0x74] sm:$0x1] }
   0xe   : > { %264 = vst [vmem:[#allocation2 + $0x60] sm:$0x1] %v263_v3  ;;  %v319_v5 = vsel %vm7260_vm4, 0, %v318_v2  ;;  %s6600_s20 = sshll.u32 %s9802_s19, 8  ;;  %v266_v7 = vsel %vm7250_vm2, 0, %v265_v6  ;;  %v322_v9 = vsel %vm7260_vm4, 0, %v321_v8  ;;  %vm7290_vm7 = vmor %vm236_vm1, %vm412_vm5 }
   0xf   : > { %320 = vst [vmem:[#allocation2 + $0x68] sm:$0x1] %v319_v5  ;;  %s7274_s23 = scalar_lea.vmem %s9750_s0, %s6600_s20  ;;  %v271_v10 = vld [vmem:[#allocation2 + $0x84] sm:$0x1]  ;;  %v327_v19 = vld [vmem:[#allocation2 + $0x8c] sm:$0x1]  ;;  %s9410_s14 = scalar_lea.vmem %s9755_s5, %s6600_s20 }
  0x10   : > { %267 = vst [vmem:[#allocation2 + $0x6c] sm:$0x1] %v266_v7  ;;  %v362_v11 = vld [vmem:[%s7274_s23 + $0x70] sm:$0xff]  ;;  %v363_v12 = vld [vmem:[%s7274_s23 + $0x78] sm:$0xff]  ;;  %v364_v13 = vld [vmem:[%s7274_s23 + $0x80] sm:$0xff]  ;;  %v272_v14 = vsel %vm7250_vm2, 0, %v271_v10 }
  0x11   : > { %323 = vst [vmem:[#allocation2 + $0x74] sm:$0x1] %v322_v9  ;;  %v394_v15 = vpack.c.bf16 %v362_v11, %v362_v11  ;;  %v395_v16 = vpack.c.bf16 %v363_v12, %v363_v12  ;;  %v365_v17 = vld [vmem:[%s7274_s23 + $0x88] sm:$0xff]  ;;  %v396_v18 = vpack.c.bf16 %v364_v13, %v364_v13  ;;  %vm226_vm6 = vcmask 27648   ;;  %v368_v22 = vld [vmem:[%s7274_s23 + $0xa0] sm:$0xff]  ;;  %v370_v60 = vld [vmem:[%s7274_s23 + $0xb0] sm:$0xff] }
  0x12   : > { %273 = vst [vmem:[#allocation2 + $0x84] sm:$0x1] %v272_v14  ;;  %v397_v20 = vpack.c.bf16 %v365_v17, %v365_v17  ;;  %v328_v21 = vsel %vm7260_vm4, 0, %v327_v19  ;;  %v369_v23 = vld [vmem:[%s7274_s23 + $0xa8] sm:$0xff]  ;;  %v274_v24 = vld [vmem:[#allocation2 + $0x90] sm:$0x1]  ;;  %v400_v36 = vpack.c.bf16 %v368_v22, %v368_v22  ;;  %vm7300_vm8 = vmand %vm226_vm6, %vm292_vm3  ;;  %v402_v9 = vpack.c.bf16 %v370_v60, %v370_v60 }
  0x13   : > { %v534_v25 = vshrl.u32 %v394_v15, 16  ;;  %v537_v26 = vshll.u32 %v394_v15, 16  ;;  %v542_v27 = vshrl.u32 %v395_v16, 16  ;;  %v545_v28 = vshll.u32 %v395_v16, 16  ;;  %329 = vst [vmem:[#allocation2 + $0x8c] sm:$0x1] %v328_v21 }
  0x14   : > { %v551_v29 = vshrl.u32 %v396_v18, 16  ;;  %v554_v30 = vshll.u32 %v396_v18, 16  ;;  %v559_v31 = vshrl.u32 %v397_v20, 16  ;;  %v562_v32 = vshll.u32 %v397_v20, 16  ;;  %v330_v38 = vld [vmem:[#allocation2 + $0x98] sm:$0x1] }
  0x15   : > { %v536_v33 = vrot.slane %v534_v25, 7  ;;  %v544_v34 = vrot.slane %v542_v27, 7  ;;  %v786_v35 = vld [vmem:[#allocation2 + $0x60] sm:$0xf]  ;;  %v401_v37 = vpack.c.bf16 %v369_v23, %v369_v23  ;;  %v275_v43 = vsel %vm7250_vm2, 0, %v274_v24  ;;  %v371_v61 = vld [vmem:[%s7274_s23 + $0xb8] sm:$0xff] }
  0x16   : > { %v790_v40 = vld [vmem:[#allocation2 + $0x68] sm:$0x1]  ;;  %v553_v41 = vrot.slane %v551_v29, 7  ;;  %v561_v42 = vrot.slane %v559_v31, 7  ;;  %v331_v44 = vsel %vm7260_vm4, 0, %v330_v38  ;;  %v585_v59 = vshrl.u32 %v400_v36, 16 }
  0x17   : > { %v539_v45 = vor.u32 %v537_v26, %v536_v33  ;;  %v540_v46 = vrot.slane %v536_v33, 4  ;;  %v547_v47 = vor.u32 %v545_v28, %v544_v34  ;;  %v549_v48 = vrot.slane %v544_v34, 4  ;;  %v793_v50 = vld [vmem:[#allocation2 + $0x6c] sm:$0xf]  ;;  %276 = vst [vmem:[#allocation2 + $0x90] sm:$0x1] %v275_v43 }
  0x18   : > { %v556_v51 = vor.u32 %v554_v30, %v553_v41  ;;  %v557_v52 = vrot.slane %v553_v41, 4  ;;  %v564_v53 = vor.u32 %v562_v32, %v561_v42  ;;  %v566_v54 = vrot.slane %v561_v42, 4  ;;  %v797_v55 = vld [vmem:[#allocation2 + $0x74] sm:$0x1]  ;;  %332 = vst [vmem:[#allocation2 + $0x98] sm:$0x1] %v331_v44 }
  0x19   : > { %v548_v56 = vsel %vm7290_vm7, %v540_v46, %v547_v47  ;;  %v787_v57 = vsel %vm7300_vm8, %v539_v45, %v786_v35  ;;  %v791_v58 = vsel %vm7250_vm2, %v549_v48, %v790_v40  ;;  %v268_v62 = vld [vmem:[#allocation2 + $0x78] sm:$0x1]  ;;  %v588_v2 = vshll.u32 %v400_v36, 16  ;;  %v807_v3 = vld [vmem:[#allocation2 + $0x84] sm:$0xf]  ;;  %v366_v5 = vld [vmem:[%s7274_s23 + $0x90] sm:$0xff] }
  0x1a   : > { %788 = vst [vmem:[#allocation2 + $0x60] sm:$0xf] %v787_v57  ;;  %v565_v63 = vsel %vm7290_vm7, %v557_v52, %v564_v53  ;;  %v794_v1 = vsel %vm7300_vm8, %v556_v51, %v793_v50  ;;  %v587_v6 = vrot.slane %v585_v59, 7  ;;  %v593_v7 = vshrl.u32 %v401_v37, 16  ;;  %v367_v10 = vld [vmem:[%s7274_s23 + $0x98] sm:$0xff]  ;;  %v372_v17 = vld [vmem:[%s7274_s23 + $0xc0] sm:$0xff] }
  0x1b   : > { %789 = vst.msk [vmem:[#allocation2 + $0x64] sm:$0xf] %vm226_vm6, %v548_v56  ;;  %v596_v8 = vshll.u32 %v401_v37, 16  ;;  %v798_v11 = vsel %vm7250_vm2, %v566_v54, %v797_v55  ;;  %v811_v12 = vld [vmem:[#allocation2 + $0x8c] sm:$0x1]  ;;  %v403_v13 = vpack.c.bf16 %v371_v61, %v371_v61  ;;  %v269_v14 = vsel %vm7250_vm2, 0, %v268_v62 }
  0x1c   : > { %792 = vst [vmem:[#allocation2 + $0x68] sm:$0x1] %v791_v58  ;;  %v7323_v15 = vld [vmem:[#allocation2 + $0x80] sm:$0x1]  ;;  %v7325_v16 = vpack.c.bf16 %v366_v5, %v366_v5  ;;  %v590_v18 = vor.u32 %v588_v2, %v587_v6  ;;  %v591_v19 = vrot.slane %v587_v6, 4  ;;  %v595_v20 = vrot.slane %v593_v7, 7 }
  0x1d   : > { %795 = vst [vmem:[#allocation2 + $0x6c] sm:$0xf] %v794_v1  ;;  %v602_v21 = vshrl.u32 %v402_v9, 16  ;;  %v373_v22 = vld [vmem:[%s7274_s23 + $0xc8] sm:$0xff]  ;;  %v605_v23 = vshll.u32 %v402_v9, 16  ;;  %v610_v24 = vshrl.u32 %v403_v13, 16  ;;  %v7335_v34 = vpack.c.bf16 %v367_v10, %v367_v10 }
  0x1e   : > { %796 = vst.msk [vmem:[#allocation2 + $0x70] sm:$0xf] %vm226_vm6, %v565_v63  ;;  %v613_v25 = vshll.u32 %v403_v13, 16  ;;  %v325_v26 = vsel %vm7260_vm4, 0, %v7323_v15  ;;  %vm1314_vm9 = vcmask 1046528   ;;  %v598_v27 = vor.u32 %v596_v8, %v595_v20  ;;  %v374_v43 = vld [vmem:[%s7274_s23 + $0xd0] sm:$0xff] }
  0x1f   : > { %799 = vst [vmem:[#allocation2 + $0x74] sm:$0x1] %v798_v11  ;;  %v600_v28 = vrot.slane %v595_v20, 4  ;;  %v808_v29 = vsel %vm7300_vm8, %v590_v18, %v807_v3  ;;  %v604_v30 = vrot.slane %v602_v21, 7  ;;  %v814_v31 = vld [vmem:[#allocation2 + $0x90] sm:$0xf]  ;;  %v7338_v36 = vpack.c.bf16 %v372_v17, %v372_v17 }
  0x20   : > { %809 = vst [vmem:[#allocation2 + $0x84] sm:$0xf] %v808_v29  ;;  %v612_v32 = vrot.slane %v610_v24, 7  ;;  %v818_v33 = vld [vmem:[#allocation2 + $0x98] sm:$0x1]  ;;  %v568_v35 = vshrl.u32 %v7325_v16, 16  ;;  %v599_v38 = vsel %vm7290_vm7, %v591_v19, %v598_v27  ;;  %v7346_v48 = vpack.c.bf16 %v373_v22, %v373_v22 }
  0x21   : > { %vm1041_vm10 = vsmask.f32 7424  ;;  %v6820_v37 = vld [vmem:[#allocation2 + $0x60] sm:$0xe]  ;;  %v812_v40 = vsel %vm7250_vm2, %v600_v28, %v811_v12  ;;  %v607_v41 = vor.u32 %v605_v23, %v604_v30  ;;  %v608_v42 = vrot.slane %v604_v30, 4  ;;  %s7207_s24 = smov 4  }
  0x22   : > { %270 = vst [vmem:[#allocation2 + $0x78] sm:$0x1] %v269_v14  ;;  %v6803_v44 = vld [vmem:[#allocation2 + $0x60] sm:$0xff]   ;;  %v615_v46 = vor.u32 %v613_v25, %v612_v32  ;;  %v617_v47 = vrot.slane %v612_v32, 4  ;;  %v7348_v50 = vpack.c.bf16 %v374_v43, %v374_v43  ;;  %v570_v60 = vrot.slane %v568_v35, 7  ;;  %s7208_s25 = smov 8  }
  0x23   : > { %v6819_v45 = vld [vmem:[#allocation2 + $0x60] sm:$0xf0]  ;;  %810 = vst.msk [vmem:[#allocation2 + $0x88] sm:$0xf] %vm226_vm6, %v599_v38  ;;  %v889_v51 = vld [vmem:[#allocation2 + $0x68] sm:$0x1]  ;;  %v815_v55 = vsel %vm7300_vm8, %v607_v41, %v814_v31 }
  0x24   : > { %v1139_v52 = vshrl.u32 %v6803_v44, 16  ;;  %v1141_v53 = vshll.u32 %v6803_v44, 16  ;;  %v6821_v54 = vor.u32 %v6820_v37, %v6819_v45  ;;  %813 = vst [vmem:[#allocation2 + $0x8c] sm:$0x1] %v812_v40  ;;  %v1017_v56 = vunpack.c.l.b16 %v889_v51  ;;  %v7056_v57 = vld [vmem:[#allocation2 + $0x6c] sm:$0xe] }
  0x25   : > { %v616_v58 = vsel %vm7290_vm7, %v608_v42, %v615_v46  ;;  %816 = vst [vmem:[#allocation2 + $0x90] sm:$0xf] %v815_v55  ;;  %v819_v59 = vsel %vm7250_vm2, %v617_v47, %v818_v33  ;;  %v7356_v62 = vld [vmem:[#allocation2 + $0x6c] sm:$0xff]   ;;  %v571_v2 = vshll.u32 %v7325_v16, 16  ;;  %v574_v6 = vrot.slane %v570_v60, 4 }
  0x26   : > { %v1143_v61 = vrot.slane %v1141_v53, 1  ;;  %v7055_v63 = vld [vmem:[#allocation2 + $0x6c] sm:$0xf0]  ;;  %v1339_v1 = vrot.slane %v6821_v54, 1  ;;  %817 = vst.msk [vmem:[#allocation2 + $0x94] sm:$0xf] %vm226_vm6, %v616_v58  ;;  %v1033_v3 = vpack.c.b16 %v1017_v56, %v1017_v56 }
  0x27   : > { %v890_v5 = vld [vmem:[#allocation2 + $0x74] sm:$0x1]  ;;  %820 = vst [vmem:[#allocation2 + $0x98] sm:$0x1] %v819_v59  ;;  %v7059_v9 = vld [vmem:[#allocation2 + $0x84] sm:$0xe]  ;;  %v573_v10 = vor.u32 %v571_v2, %v570_v60  ;;  %v7057_v14 = vor.u32 %v7056_v57, %v7055_v63 }
  0x28   : > { %v1144_v7 = vor.u32 %v1143_v61, %v1139_v52  ;;  %v1018_v8 = vunpack.c.l.b16 %v890_v5  ;;  %326 = vst [vmem:[#allocation2 + $0x80] sm:$0x1] %v325_v26  ;;  %v576_v11 = vshrl.u32 %v7335_v34, 16  ;;  %v1146_v12 = vshll.u32 %v1033_v3, 16  ;;  %v277_v44 = vld [vmem:[#allocation2 + $0x9c] sm:$0x1] }
  0x29   : > { %v1340_v13 = vrot.slane %v1033_v3, 1  ;;  %v579_v16 = vshll.u32 %v7335_v34, 16  ;;  %v1151_v21 = vshrl.u32 %v7356_v62, 16  ;;  %v1153_v22 = vshll.u32 %v7356_v62, 16  ;;  %v800_v43 = vld [vmem:[#allocation2 + $0x78] sm:$0xf] }
  0x2a   : > { %v1034_v15 = vpack.c.b16 %v1018_v8, %v1018_v8  ;;  %v7361_v17 = vld [vmem:[#allocation2 + $0x84] sm:$0xff]   ;;  %v578_v19 = vrot.slane %v576_v11, 7  ;;  %v1148_v20 = vrot.slane %v1146_v12, 1  ;;  %v1342_v26 = vrot.slane %v7057_v14, 1  ;;  %v336_v59 = vld [vmem:[#allocation2 + $0xb0] sm:$0x1] }
  0x2b   : > { %v7058_v18 = vld [vmem:[#allocation2 + $0x84] sm:$0xf0]  ;;  %v1341_v23 = vsel %vm1314_vm9, %v1339_v1, %v1340_v13  ;;  %v892_v24 = vld [vmem:[#allocation2 + $0x8c] sm:$0x1]  ;;  %v1155_v30 = vrot.slane %v1153_v22, 1  ;;  %v1175_v55 = vshrl.u32 %v7361_v17, 16  ;;  %v801_v1 = vsel %vm7300_vm8, %v573_v10, %v800_v43 }
  0x2c   : > { %v1158_v25 = vshll.u32 %v1034_v15, 16  ;;  %v1343_v27 = vrot.slane %v1034_v15, 1  ;;  %v6826_v28 = vld [vmem:[#allocation2 + $0x90] sm:$0xe]  ;;  %v1149_v29 = vsel %vm1041_vm10, %v1144_v7, %v1148_v20  ;;  %v1020_v31 = vunpack.c.l.b16 %v892_v24  ;;  %v333_v53 = vld [vmem:[#allocation2 + $0xa4] sm:$0x1] }
  0x2d   : > { %v6825_v32 = vld [vmem:[#allocation2 + $0x90] sm:$0xf0]  ;;  %1250 = vrot.lane.b32.xlu0 %v1149_v29, %s7207_s24  ;;  %v581_v38 = vor.u32 %v579_v16, %v578_v19  ;;  %v1156_v40 = vor.u32 %v1155_v30, %v1151_v21  ;;  %v7060_v42 = vor.u32 %v7059_v9, %v7058_v18  ;;  %v583_v51 = vrot.slane %v578_v19, 4  ;;  %v280_v58 = vld [vmem:[#allocation2 + $0xa8] sm:$0x1]  ;;  %v375_v11 = vld [vmem:[%s7274_s23 + $0xd8] sm:$0xff] }
  0x2e   : > { %v1160_v33 = vrot.slane %v1158_v25, 1  ;;  %v7370_v34 = vsel %vm1314_vm9, %v1342_v26, %v1343_v27  ;;  %v893_v35 = vld [vmem:[#allocation2 + $0x98] sm:$0x1]  ;;  %v6827_v37 = vor.u32 %v6826_v28, %v6825_v32  ;;  %v1036_v41 = vpack.c.b16 %v1020_v31, %v1020_v31  ;;  %802 = vst [vmem:[#allocation2 + $0x78] sm:$0xf] %v801_v1  ;;  %v376_v19 = vld [vmem:[%s7274_s23 + $0xe0] sm:$0xff] }
  0x2f   : > { %v1021_v45 = vunpack.c.l.b16 %v893_v35  ;;  %v582_v47 = vsel %vm7290_vm7, %v574_v6, %v581_v38  ;;  %v804_v52 = vld [vmem:[#allocation2 + $0x80] sm:$0x1]  ;;  %v1177_v56 = vshll.u32 %v7361_v17, 16  ;;  %v1348_v60 = vrot.slane %v7060_v42, 1  ;;  %v283_v18 = vld [vmem:[#allocation2 + $0xb4] sm:$0x1] }
  0x30   : > { %v1351_v46 = vrot.slane %v6827_v37, 1  ;;  %v1161_v54 = vsel %vm1041_vm10, %v1156_v40, %v1160_v33  ;;  %v1182_v57 = vshll.u32 %v1036_v41, 16  ;;  %803 = vst.msk [vmem:[#allocation2 + $0x7c] sm:$0xf] %vm226_vm6, %v582_v47  ;;  %v1349_v61 = vrot.slane %v1036_v41, 1  ;;  %v377_v22 = vld [vmem:[%s7274_s23 + $0xe8] sm:$0xff] }
  0x31   : > { %1252 = vrot.lane.b32.xlu1 %v1161_v54, %s7207_s24  ;;  %v7379_v63 = vpack.c.b16 %v1021_v45, %v1021_v45  ;;  %v1179_v2 = vrot.slane %v1177_v56, 1  ;;  %v805_v5 = vsel %vm7250_vm2, %v583_v51, %v804_v52  ;;  %v278_v6 = vsel %vm7250_vm2, 0, %v277_v44  ;;  %v339_v26 = vld [vmem:[#allocation2 + $0xbc] sm:$0x1]  ;;  %v348_v38 = vld [vmem:[%s7274_s23] sm:$0xff] }
  0x32   : > { %v1184_v3 = vrot.slane %v1182_v57, 1  ;;  %v7388_v7 = vsel %vm1314_vm9, %v1348_v60, %v1349_v61  ;;  %806 = vst [vmem:[#allocation2 + $0x80] sm:$0x1] %v805_v5  ;;  %v334_v9 = vsel %vm7260_vm4, 0, %v333_v53  ;;  %v619_v10 = vshrl.u32 %v7338_v36, 16 }
  0x33   : > { %v1352_v8 = vrot.slane %v7379_v63, 1  ;;  %v1180_v12 = vor.u32 %v1179_v2, %v1175_v55  ;;  %279 = vst [vmem:[#allocation2 + $0x9c] sm:$0x1] %v278_v6  ;;  %v622_v13 = vshll.u32 %v7338_v36, 16  ;;  %v627_v14 = vshrl.u32 %v7346_v48, 16 }
  0x34   : > { %v630_v15 = vshll.u32 %v7346_v48, 16  ;;  %335 = vst [vmem:[#allocation2 + $0xa4] sm:$0x1] %v334_v9  ;;  %v621_v20 = vrot.slane %v619_v10, 7  ;;  %v281_v21 = vsel %vm7250_vm2, 0, %v280_v58  ;;  %v337_v36 = vsel %vm7260_vm4, 0, %v336_v59 }
  0x35   : > { %1379 = vrot.lane.b32.xlu0 %v1341_v23, %s7208_s25  ;;  %v7401_v16 = vsel %vm1314_vm9, %v1351_v46, %v1352_v8  ;;  %v1185_v24 = vsel %vm1041_vm10, %v1180_v12, %v1184_v3  ;;  %v629_v48 = vrot.slane %v627_v14, 7  ;;  %282 = vst [vmem:[#allocation2 + $0xa8] sm:$0x1] %v281_v21  ;;  %v407_v25 = vpack.c.bf16 %v375_v11, %v375_v11  ;;  %v6823_v42 = vld [vmem:[#allocation2 + $0x78] sm:$0xe]  ;;  %v349_v8 = vld [vmem:[%s7274_s23 + $0x8] sm:$0xff] }
  0x36   : > { %v636_v23 = vshrl.u32 %v7348_v50, 16  ;;  %v624_v27 = vor.u32 %v622_v13, %v621_v20  ;;  %v625_v28 = vrot.slane %v621_v20, 4  ;;  %338 = vst [vmem:[#allocation2 + $0xb0] sm:$0x1] %v337_v36  ;;  %v639_v29 = vshll.u32 %v7348_v50, 16  ;;  %v6805_v36 = vld [vmem:[#allocation2 + $0x90] sm:$0xff]  }
  0x37   : > { %v7411_v30 = vpack.c.bf16 %v376_v19, %v376_v19  ;;  %v632_v31 = vor.u32 %v630_v15, %v629_v48  ;;  %v634_v32 = vrot.slane %v629_v48, 4  ;;  %v644_v35 = vshrl.u32 %v407_v25, 16  ;;  %v6822_v37 = vld [vmem:[#allocation2 + $0x78] sm:$0xf0]  ;;  %v7436_v14 = vld [vmem:[#allocation2 + $0xc] sm:$0x1] }
  0x38   : > { %v638_v33 = vrot.slane %v636_v23, 7  ;;  %v6804_v40 = vld [vmem:[#allocation2 + $0x78] sm:$0xff]   ;;  %v647_v41 = vshll.u32 %v407_v25, 16  ;;  %v284_v43 = vsel %vm7250_vm2, 0, %v283_v18  ;;  %v340_v50 = vsel %vm7260_vm4, 0, %v339_v26 }
  0x39   : > { %1381 = vrot.lane.b32.xlu1 %v7370_v34, %s7208_s25  ;;  %v7420_v44 = vpack.c.bf16 %v377_v22, %v377_v22  ;;  %v891_v45 = vld [vmem:[#allocation2 + $0x80] sm:$0x1]  ;;  %v1163_v46 = vshrl.u32 %v6804_v40, 16  ;;  %v1165_v47 = vshll.u32 %v6804_v40, 16  ;;  %v633_v51 = vsel %vm7290_vm7, %v625_v28, %v632_v31  ;;  %285 = vst [vmem:[#allocation2 + $0xb4] sm:$0x1] %v284_v43 }
  0x3a   : > { %v641_v52 = vor.u32 %v639_v29, %v638_v33  ;;  %v1019_v34 = vunpack.c.l.b16 %v891_v45  ;;  %v821_v53 = vld [vmem:[#allocation2 + $0x9c] sm:$0xf]  ;;  %824 = vst.msk [vmem:[#allocation2 + $0xa0] sm:$0xf] %vm226_vm6, %v633_v51  ;;  %v642_v54 = vrot.slane %v638_v33, 4  ;;  %v646_v55 = vrot.slane %v644_v35, 7 }
  0x3b   : > { %v6824_v56 = vor.u32 %v6823_v42, %v6822_v37  ;;  %v1167_v57 = vrot.slane %v1165_v47, 1  ;;  %v822_v58 = vsel %vm7300_vm8, %v624_v27, %v821_v53  ;;  %v825_v59 = vld [vmem:[#allocation2 + $0xa4] sm:$0x1]  ;;  %341 = vst [vmem:[#allocation2 + $0xbc] sm:$0x1] %v340_v50  ;;  %v653_v60 = vshrl.u32 %v7411_v30, 16 }
  0x3c   : > { %v7428_v61 = vpack.c.bf16 %v348_v38, %v348_v38  ;;  %v1035_v1 = vpack.c.b16 %v1019_v34, %v1019_v34  ;;  %823 = vst [vmem:[#allocation2 + $0x9c] sm:$0xf] %v822_v58  ;;  %v826_v2 = vsel %vm7250_vm2, %v634_v32, %v825_v59  ;;  %v649_v3 = vor.u32 %v647_v41, %v646_v55  ;;  %v828_v6 = vld [vmem:[#allocation2 + $0xa8] sm:$0xf]  ;;  %v7438_v15 = vld [vmem:[#allocation2 + $0x14] sm:$0x1] }
  0x3d   : > { %1256 = vrot.lane.b32.xlu0 %v1185_v24, %s7207_s24  ;;  %v651_v5 = vrot.slane %v646_v55, 4  ;;  %v1168_v9 = vor.u32 %v1167_v57, %v1163_v46  ;;  %827 = vst [vmem:[#allocation2 + $0xa4] sm:$0x1] %v826_v2  ;;  %v829_v10 = vsel %vm7300_vm8, %v641_v52, %v828_v6  ;;  %v832_v11 = vld [vmem:[#allocation2 + $0xb0] sm:$0x1]  ;;  %v1345_v12 = vrot.slane %v6824_v56, 1 }
  0x3e   : > { %v655_v13 = vrot.slane %v653_v60, 7  ;;  %v1170_v18 = vshll.u32 %v1035_v1, 16  ;;  %v650_v19 = vsel %vm7290_vm7, %v642_v54, %v649_v3  ;;  %830 = vst [vmem:[#allocation2 + $0xa8] sm:$0xf] %v829_v10  ;;  %v1346_v21 = vrot.slane %v1035_v1, 1  ;;  %v350_v45 = vld [vmem:[%s7274_s23 + $0x10] sm:$0xff] }
  0x3f   : > { %v833_v20 = vsel %vm7250_vm2, %v651_v5, %v832_v11  ;;  %831 = vst.msk [vmem:[#allocation2 + $0xac] sm:$0xf] %vm226_vm6, %v650_v19  ;;  %v656_v22 = vshll.u32 %v7411_v30, 16  ;;  %v661_v48 = vshrl.u32 %v7420_v44, 16  ;;  %v664_v25 = vshll.u32 %v7420_v44, 16  ;;  %v351_v11 = vld [vmem:[%s7274_s23 + $0x18] sm:$0xff] }
  0x40   : > { %v659_v24 = vrot.slane %v655_v13, 4  ;;  %v1172_v23 = vrot.slane %v1170_v18, 1  ;;  %834 = vst [vmem:[#allocation2 + $0xb0] sm:$0x1] %v833_v20  ;;  %v7451_v26 = vsel %vm1314_vm9, %v1345_v12, %v1346_v21  ;;  %v835_v27 = vld [vmem:[#allocation2 + $0xb4] sm:$0xf]  ;;  %v7453_v29 = vpack.c.bf16 %v349_v8, %v349_v8 }
  0x41   : > { %1385 = vrot.lane.b32.xlu1 %v7388_v7, %s7208_s25  ;;  %v1187_v28 = vshrl.u32 %v6805_v36, 16  ;;  %v658_v31 = vor.u32 %v656_v22, %v655_v13  ;;  %v663_v32 = vrot.slane %v661_v48, 7  ;;  %v1189_v30 = vshll.u32 %v6805_v36, 16  ;;  %v7466_v41 = vld [vmem:[#allocation2 + $0x9c] sm:$0xf0] }
  0x42   : > { %v1194_v33 = vshll.u32 %v7379_v63, 16  ;;  %v1173_v35 = vsel %vm1041_vm10, %v1168_v9, %v1172_v23  ;;  %v839_v37 = vld [vmem:[#allocation2 + $0xbc] sm:$0x1]  ;;  %v242_v7 = vsel %vm7250_vm2, 0, %v7436_v14  ;;  %v298_v38 = vsel %vm7260_vm4, 0, %v7438_v15 }
  0x43   : > { %1254 = vrot.lane.b32.xlu2 %v1173_v35, %s7207_s24  ;;  %v7464_v40 = vld [vmem:[#allocation2 + $0x9c] sm:$0xff]   ;;  %v666_v42 = vor.u32 %v664_v25, %v663_v32  ;;  %v668_v43 = vrot.slane %v663_v32, 4  ;;  %v836_v63 = vsel %vm7300_vm8, %v658_v31, %v835_v27  ;;  %v1191_v50 = vrot.slane %v1189_v30, 1  ;;  %243 = vst [vmem:[#allocation2 + $0xc] sm:$0x1] %v242_v7 }
  0x44   : > { %v7209_v44 = vmov 0   ;;  %v894_v46 = vld [vmem:[#allocation2 + $0xa4] sm:$0x1]  ;;  %837 = vst [vmem:[#allocation2 + $0xb4] sm:$0xf] %v836_v63  ;;  %v1196_v47 = vrot.slane %v1194_v33, 1  ;;  %v7483_v59 = vpack.c.bf16 %v350_v45, %v350_v45 }
  0x45   : > { %227 = vst.msk [vmem:[#allocation2] sm:$0xf] %vm226_vm6, %v7209_v44  ;;  %1387 = vrot.lane.b32.xlu0 %v7401_v16, %s7208_s25  ;;  %v415_v51 = vshrl.u32 %v7428_v61, 16  ;;  %v1022_v52 = vunpack.c.l.b16 %v894_v46  ;;  %v6829_v34 = vld [vmem:[#allocation2 + $0xa8] sm:$0xe]  ;;  %v667_v53 = vsel %vm7290_vm7, %v659_v24, %v666_v42  ;;  %v840_v54 = vsel %vm7250_vm2, %v668_v43, %v839_v37 }
  0x46   : > { %v1192_v55 = vor.u32 %v1191_v50, %v1187_v28  ;;  %228 = vst.msk [vmem:[#allocation2 + $0x4] sm:$0xf] %vm226_vm6, %v7209_v44  ;;  %v7062_v56 = vld [vmem:[#allocation2 + $0x9c] sm:$0xe]  ;;  %v6806_v57 = vld [vmem:[#allocation2 + $0xa8] sm:$0xff]   ;;  %v1199_v6 = vshrl.u32 %v7464_v40, 16  ;;  %v383_v43 = vpack.c.bf16 %v351_v11, %v351_v11 }
  0x47   : > { %v6828_v16 = vld [vmem:[#allocation2 + $0xa8] sm:$0xf0]  ;;  %838 = vst.msk [vmem:[#allocation2 + $0xb8] sm:$0xf] %vm226_vm6, %v667_v53  ;;  %v7481_v58 = vrot.slane %v415_v51, 7  ;;  %v7485_v60 = vpack.c.b16 %v1022_v52, %v1022_v52  ;;  %v1211_v2 = vshrl.u32 %v6806_v57, 16  ;;  %v7063_v24 = vor.u32 %v7062_v56, %v7466_v41 }
  0x48   : > { %v895_v1 = vld [vmem:[#allocation2 + $0xb0] sm:$0x1]  ;;  %v1213_v3 = vshll.u32 %v6806_v57, 16  ;;  %v6830_v5 = vor.u32 %v6829_v34, %v6828_v16  ;;  %841 = vst [vmem:[#allocation2 + $0xbc] sm:$0x1] %v840_v54  ;;  %v1201_v8 = vshll.u32 %v7464_v40, 16  ;;  %v1197_v10 = vsel %vm1041_vm10, %v1192_v55, %v1196_v47 }
  0x49   : > { %v1023_v9 = vunpack.c.l.b16 %v895_v1  ;;  %230 = vst.msk [vmem:[#allocation2 + $0x8] sm:$0x1] %vm229_vm0, %v7209_v44  ;;  %v1206_v12 = vshll.u32 %v7485_v60, 16  ;;  %v418_v19 = vshll.u32 %v7428_v61, 16  ;;  %v421_v22 = vrot.slane %v7481_v58, 4 }
  0x4a   : > { %v1215_v13 = vrot.slane %v1213_v3, 1  ;;  %v1357_v18 = vrot.slane %v6830_v5, 1  ;;  %232 = vst.msk [vmem:[#allocation2 + $0xcc] sm:$0xf] %vm226_vm6, %v7209_v44  ;;  %v1203_v20 = vrot.slane %v1201_v8, 1  ;;  %v426_v41 = vshll.u32 %v7453_v29, 16 }
  0x4b   : > { %v1039_v21 = vpack.c.b16 %v1023_v9, %v1023_v9  ;;  %233 = vst.msk [vmem:[#allocation2 + $0xd0] sm:$0xf] %vm226_vm6, %v7209_v44  ;;  %v1208_v48 = vrot.slane %v1206_v12, 1  ;;  %1383 = vrot.lane.b32.xlu2 %v7451_v26, %s7208_s25  ;;  %v7065_v23 = vld [vmem:[#allocation2 + $0xb4] sm:$0xe]  ;;  %v420_v61 = vor.u32 %v418_v19, %v7481_v58  ;;  %v423_v26 = vshrl.u32 %v7453_v29, 16 }
  0x4c   : > { %v238_v36 = vld [vmem:[#allocation2] sm:$0x1]  ;;  %v1216_v25 = vor.u32 %v1215_v13, %v1211_v2  ;;  %234 = vst.msk [vmem:[#allocation2 + $0xd4] sm:$0x1] %vm229_vm0, %v7209_v44  ;;  %v1204_v31 = vor.u32 %v1203_v20, %v1199_v6  ;;  %v244_v33 = vld [vmem:[#allocation2 + $0x18] sm:$0x1] }
  0x4d   : > { %v239_v27 = vsel %vm7250_vm2, 0, %v238_v36  ;;  %v300_v28 = vld [vmem:[#allocation2 + $0x20] sm:$0x1]  ;;  %v1218_v32 = vshll.u32 %v1039_v21, 16  ;;  %v1358_v30 = vrot.slane %v1039_v21, 1  ;;  %v1354_v42 = vrot.slane %v7063_v24, 1 }
  0x4e   : > { %240 = vst [vmem:[#allocation2] sm:$0x1] %v239_v27  ;;  %v7504_v35 = vld [vmem:[#allocation2 + $0xb4] sm:$0xff]   ;;  %v1209_v63 = vsel %vm1041_vm10, %v1204_v31, %v1208_v48  ;;  %v425_v46 = vrot.slane %v423_v26, 7  ;;  %v1355_v29 = vrot.slane %v7485_v60, 1  ;;  %v245_v52 = vsel %vm7250_vm2, 0, %v244_v33 }
  0x4f   : > { %v7064_v37 = vld [vmem:[#allocation2 + $0xb4] sm:$0xf0]  ;;  %v1220_v50 = vrot.slane %v1218_v32, 1  ;;  %v1359_v44 = vsel %vm1314_vm9, %v1357_v18, %v1358_v30  ;;  %v896_v45 = vld [vmem:[#allocation2 + $0xbc] sm:$0x1]  ;;  %1260 = vrot.lane.b32.xlu1 %v1209_v63, %s7207_s24  ;;  %v301_v34 = vsel %vm7260_vm4, 0, %v300_v28 }
  0x50   : > { %299 = vst [vmem:[#allocation2 + $0x14] sm:$0x1] %v298_v38  ;;  %v1024_v14 = vunpack.c.l.b16 %v896_v45  ;;  %v294_v7 = vld [vmem:[#allocation2 + $0x8] sm:$0x1]  ;;  %v7066_v38 = vor.u32 %v7065_v23, %v7064_v37  ;;  %v428_v53 = vor.u32 %v426_v41, %v425_v46  ;;  %v430_v54 = vrot.slane %v425_v46, 4  ;;  %v352_v3 = vld [vmem:[%s7274_s23 + $0x20] sm:$0xff] }
  0x51   : > { %v1221_v47 = vsel %vm1041_vm10, %v1216_v25, %v1220_v50  ;;  %v295_v51 = vsel %vm7260_vm4, 0, %v294_v7  ;;  %246 = vst [vmem:[#allocation2 + $0x18] sm:$0x1] %v245_v52  ;;  %v432_v55 = vshrl.u32 %v7483_v59, 16  ;;  %v435_v56 = vshll.u32 %v7483_v59, 16  ;;  %v353_v12 = vld [vmem:[%s7274_s23 + $0x28] sm:$0xff] }
  0x52   : > { %1262 = vrot.lane.b32.xlu0 %v1221_v47, %s7207_s24  ;;  %v1040_v15 = vpack.c.b16 %v1024_v14, %v1024_v14  ;;  %296 = vst [vmem:[#allocation2 + $0x8] sm:$0x1] %v295_v51  ;;  %v1360_v57 = vrot.slane %v7066_v38, 1  ;;  %v1356_v60 = vsel %vm1314_vm9, %v1354_v42, %v1355_v29  ;;  %v440_v1 = vshrl.u32 %v383_v43, 16  ;;  %v247_v2 = vld [vmem:[#allocation2 + $0x24] sm:$0x1] }
  0x53   : > { %1258 = vrot.lane.b32.xlu2 %v1197_v10, %s7207_s24  ;;  %302 = vst [vmem:[#allocation2 + $0x20] sm:$0x1] %v301_v34  ;;  %v429_v8 = vsel %vm7290_vm7, %v421_v22, %v428_v53  ;;  %v737_v9 = vld [vmem:[#allocation2 + $0xc] sm:$0xf]  ;;  %v434_v11 = vrot.slane %v432_v55, 7  ;;  %v443_v19 = vshll.u32 %v383_v43, 16  ;;  %v7547_v33 = vpack.c.bf16 %v352_v3, %v352_v3 }
  0x54   : > { %v1361_v16 = vrot.slane %v1040_v15, 1  ;;  %v738_v10 = vsel %vm7300_vm8, %v420_v61, %v737_v9  ;;  %740 = vst.msk [vmem:[#allocation2 + $0x10] sm:$0xf] %vm226_vm6, %v429_v8  ;;  %v442_v18 = vrot.slane %v440_v1, 7  ;;  %v6807_v24 = vld [vmem:[#allocation2] sm:$0xf0]  ;;  %v7549_v37 = vpack.c.bf16 %v353_v12, %v353_v12 }
  0x55   : > { %v6609_v58 = vld [vmem:[#allocation2] sm:$0xff]   ;;  %739 = vst [vmem:[#allocation2 + $0xc] sm:$0xf] %v738_v10  ;;  %v437_v36 = vor.u32 %v435_v56, %v434_v11  ;;  %v438_v22 = vrot.slane %v434_v11, 4  ;;  %v303_v48 = vld [vmem:[#allocation2 + $0x2c] sm:$0x1] }
  0x56   : > { %v1043_v5 = vshrl.u32 %v6609_v58, 16  ;;  %v1045_v6 = vshll.u32 %v6609_v58, 16  ;;  %v1362_v59 = vsel %vm1314_vm9, %v1360_v57, %v1361_v16  ;;  %v445_v25 = vor.u32 %v443_v19, %v442_v18  ;;  %v6808_v32 = vld [vmem:[#allocation2] sm:$0xe]  ;;  %v355_v9 = vld [vmem:[%s7274_s23 + $0x38] sm:$0xff] }
  0x57   : > { %v741_v13 = vld [vmem:[#allocation2 + $0x14] sm:$0x1]  ;;  %1391 = vrot.lane.b32.xlu1 %v1359_v44, %s7208_s25  ;;  %v447_v23 = vrot.slane %v442_v18, 4  ;;  %v1223_v27 = vshrl.u32 %v7504_v35, 16  ;;  %v1225_v61 = vshll.u32 %v7504_v35, 16  ;;  %v1230_v31 = vshll.u32 %v1040_v15, 16 }
  0x58   : > { %v1047_v20 = vrot.slane %v1045_v6, 1  ;;  %v742_v21 = vsel %vm7250_vm2, %v430_v54, %v741_v13  ;;  %v248_v30 = vsel %vm7250_vm2, 0, %v247_v2  ;;  %v446_v41 = vsel %vm7290_vm7, %v438_v22, %v445_v25  ;;  %v744_v42 = vld [vmem:[#allocation2 + $0x18] sm:$0xf] }
  0x59   : > { %743 = vst [vmem:[#allocation2 + $0x14] sm:$0x1] %v742_v21  ;;  %v881_v28 = vld [vmem:[#allocation2 + $0x8] sm:$0x1]  ;;  %v1227_v43 = vrot.slane %v1225_v61, 1  ;;  %v6809_v63 = vor.u32 %v6808_v32, %v6807_v24  ;;  %v745_v50 = vsel %vm7300_vm8, %v437_v36, %v744_v42  ;;  %v1232_v45 = vrot.slane %v1230_v31, 1 }
  0x5a   : > { %1393 = vrot.lane.b32.xlu0 %v1362_v59, %s7208_s25  ;;  %v1009_v26 = vunpack.c.l.b16 %v881_v28  ;;  %249 = vst [vmem:[#allocation2 + $0x24] sm:$0x1] %v248_v30  ;;  %v748_v44 = vld [vmem:[#allocation2 + $0x20] sm:$0x1]  ;;  %v304_v29 = vsel %vm7260_vm4, 0, %v303_v48  ;;  %v449_v51 = vshrl.u32 %v7547_v33, 16  ;;  %v1048_v15 = vor.u32 %v1047_v20, %v1043_v5 }
  0x5b   : > { %747 = vst.msk [vmem:[#allocation2 + $0x1c] sm:$0xf] %vm226_vm6, %v446_v41  ;;  %1389 = vrot.lane.b32.xlu2 %v1356_v60, %s7208_s25  ;;  %v749_v7 = vsel %vm7250_vm2, %v447_v23, %v748_v44  ;;  %v1228_v46 = vor.u32 %v1227_v43, %v1223_v27  ;;  %v7564_v47 = vrot.slane %v6809_v63, 1  ;;  %v452_v52 = vshll.u32 %v7547_v33, 16  ;;  %v7067_v54 = vld [vmem:[#allocation2 + $0xc] sm:$0xf0] }
  0x5c   : > { %v7557_v14 = vpack.c.b16 %v1009_v26, %v1009_v26  ;;  %746 = vst [vmem:[#allocation2 + $0x18] sm:$0xf] %v745_v50  ;;  %v457_v34 = vshrl.u32 %v7549_v37, 16  ;;  %v7570_v53 = vld [vmem:[#allocation2 + $0xc] sm:$0xff]   ;;  %v460_v16 = vshll.u32 %v7549_v37, 16  ;;  %v7578_v8 = vrot.slane %v449_v51, 7 }
  0x5d   : > { %750 = vst [vmem:[#allocation2 + $0x20] sm:$0x1] %v749_v7  ;;  %v7068_v55 = vld [vmem:[#allocation2 + $0xc] sm:$0xe]  ;;  %v7574_v57 = vld [vmem:[#allocation2 + $0xc] sm:$0xf0]  ;;  %v1233_v6 = vsel %vm1041_vm10, %v1228_v46, %v1232_v45  ;;  %v7589_v23 = vpack.c.bf16 %v355_v9, %v355_v9 }
  0x5e   : > { %v1050_v38 = vshll.u32 %v7557_v14, 16  ;;  %v7572_v56 = vld [vmem:[#allocation2 + $0xc] sm:$0xff]   ;;  %305 = vst [vmem:[#allocation2 + $0x2c] sm:$0x1] %v304_v29  ;;  %v7069_v5 = vor.u32 %v7068_v55, %v7067_v54  ;;  %v1823_v13 = vshrl.u32 %v7570_v53, 16  ;;  %v1825_v18 = vshll.u32 %v7570_v53, 16 }
  0x5f   : > { %v1316_v21 = vrot.slane %v7557_v14, 1  ;;  %v1057_v28 = vshll.u32 %v7572_v56, 16  ;;  %v1055_v26 = vshrl.u32 %v7572_v56, 16  ;;  %v454_v43 = vor.u32 %v452_v52, %v7578_v8  ;;  %v354_v14 = vld [vmem:[%s7274_s23 + $0x30] sm:$0xff] }
  0x60   : > { %v1662_v58 = vld [vmem:[#allocation2 + $0x14] sm:$0x1]  ;;  %v1052_v1 = vrot.slane %v1050_v38, 1  ;;  %v2094_v19 = vrot.slane %v7069_v5, 1  ;;  %v1827_v27 = vrot.slane %v1825_v18, 1  ;;  %vm1505_vm11 = vcmask 1045504  }
  0x61   : > { %v882_v60 = vld [vmem:[#allocation2 + $0x14] sm:$0x1]  ;;  %v1790_v2 = vunpack.c.l.b16 %v1662_v58  ;;  %v1059_v45 = vrot.slane %v1057_v28, 1  ;;  %v1317_v58 = vsel %vm1314_vm9, %v7564_v47, %v1316_v21  ;;  %v250_v52 = vld [vmem:[#allocation2 + $0x30] sm:$0x1]  ;;  %vm1395_vm12 = vcmask 31744  }
  0x62   : > { %v1010_v3 = vunpack.c.l.b16 %v882_v60  ;;  %v1053_v11 = vsel %vm1041_vm10, %v1048_v15, %v1052_v1  ;;  %v6870_v59 = vld [vmem:[#allocation2 + $0x18] sm:$0xf0]  ;;  %v1828_v63 = vor.u32 %v1827_v27, %v1823_v13  ;;  %v751_v15 = vld [vmem:[#allocation2 + $0x24] sm:$0xf]  ;;  %v7071_v5 = vld [vmem:[#allocation2 + $0xc] sm:$0xe] }
  0x63   : > { %v1806_v12 = vpack.c.b16 %v1790_v2, %v1790_v2  ;;  %1234 = vrot.lane.b32.xlu1 %v1053_v11, %s7207_s24  ;;  %v6871_v20 = vld [vmem:[#allocation2 + $0x18] sm:$0xe]  ;;  %1264 = vrot.lane.b32.xlu2 %v1233_v6, %s7207_s24  ;;  %v6839_v25 = vld [vmem:[#allocation2 + $0x18] sm:$0xf0]  ;;  %v1060_v60 = vor.u32 %v1059_v45, %v1055_v26  ;;  %v386_v6 = vpack.c.bf16 %v354_v14, %v354_v14  ;;  %v455_v11 = vrot.slane %v7578_v8, 4 }
  0x64   : > { %v7582_v10 = vpack.c.b16 %v1010_v3, %v1010_v3  ;;  %v2499_v24 = vld [vmem:[#allocation2 + $0x20] sm:$0x1]  ;;  %v6872_v48 = vor.u32 %v6871_v20, %v6870_v59  ;;  %v6831_v32 = vld [vmem:[#allocation2 + $0x18] sm:$0xff]   ;;  %v752_v47 = vsel %vm7300_vm8, %v454_v43, %v751_v15  ;;  %v477_v43 = vshll.u32 %v7589_v23, 16 }
  0x65   : > { %v1830_v36 = vshll.u32 %v1806_v12, 16  ;;  %v2095_v22 = vrot.slane %v1806_v12, 1  ;;  %v2627_v61 = vunpack.c.l.b16 %v2499_v24  ;;  %v1663_v30 = vld [vmem:[#allocation2 + $0x20] sm:$0x1]  ;;  %v6840_v42 = vld [vmem:[#allocation2 + $0x18] sm:$0xe] }
  0x66   : > { %v1062_v31 = vshll.u32 %v7582_v10, 16  ;;  %v1791_v41 = vunpack.c.l.b16 %v1663_v30  ;;  %v2931_v7 = vrot.slane %v6872_v48, 1  ;;  %v1837_v29 = vshll.u32 %v6831_v32, 16  ;;  %v883_v3 = vld [vmem:[#allocation2 + $0x20] sm:$0x1] }
  0x67   : > { %v1832_v33 = vrot.slane %v1830_v36, 1  ;;  %v2096_v50 = vsel %vm1314_vm9, %v2094_v19, %v2095_v22  ;;  %v2643_v44 = vpack.c.b16 %v2627_v61, %v2627_v61  ;;  %v6841_v51 = vor.u32 %v6840_v42, %v6839_v25  ;;  %v755_v59 = vld [vmem:[#allocation2 + $0x2c] sm:$0x1]  ;;  %753 = vst [vmem:[#allocation2 + $0x24] sm:$0xf] %v752_v47 }
  0x68   : > { %v7597_v46 = vpack.c.b16 %v1791_v41, %v1791_v41  ;;  %v1064_v55 = vrot.slane %v1062_v31, 1  ;;  %v1835_v1 = vshrl.u32 %v6831_v32, 16  ;;  %v1839_v2 = vrot.slane %v1837_v29, 1  ;;  %v306_v22 = vld [vmem:[#allocation2 + $0x38] sm:$0x1] }
  0x69   : > { %v1833_v38 = vsel %vm1041_vm10, %v1828_v63, %v1832_v33  ;;  %v2932_v54 = vrot.slane %v2643_v44, 1  ;;  %v459_v12 = vrot.slane %v457_v34, 7  ;;  %v2097_v18 = vrot.slane %v6841_v51, 1  ;;  %v253_v27 = vld [vmem:[#allocation2 + $0x3c] sm:$0x1] }
  0x6a   : > { %2014 = vrot.lane.b32.xlu0 %v1833_v38, %s7207_s24  ;;  %v1842_v9 = vshll.u32 %v7597_v46, 16  ;;  %v2098_v19 = vrot.slane %v7597_v46, 1  ;;  %v2667_v20 = vshll.u32 %v2643_v44, 16  ;;  %v1011_v36 = vunpack.c.l.b16 %v883_v3  ;;  %v309_v31 = vld [vmem:[#allocation2 + $0x44] sm:$0x1] }
  0x6b   : > { %2142 = vrot.lane.b32.xlu1 %v2096_v50, %s7208_s25  ;;  %v2933_v13 = vsel %vm1314_vm9, %v2931_v7, %v2932_v54  ;;  %1363 = vrot.lane.b32.xlu2 %v1317_v58, %s7208_s25  ;;  %v462_v21 = vor.u32 %v460_v16, %v459_v12  ;;  %v464_v8 = vrot.slane %v459_v12, 4  ;;  %v1065_v34 = vsel %vm1041_vm10, %v1060_v60, %v1064_v55  ;;  %v356_v7 = vld [vmem:[%s7274_s23 + $0x40] sm:$0xff] }
  0x6c   : > { %v7616_v24 = vor.u32 %v1839_v2, %v1835_v1  ;;  %v2669_v48 = vrot.slane %v2667_v20, 1  ;;  %v251_v25 = vsel %vm7250_vm2, 0, %v250_v52  ;;  %v1844_v61 = vrot.slane %v1842_v9, 1 }
  0x6d   : > { %v463_v28 = vsel %vm7290_vm7, %v455_v11, %v462_v21  ;;  %v756_v37 = vsel %vm7250_vm2, %v464_v8, %v755_v59  ;;  %v7072_v16 = vor.u32 %v7071_v5, %v7574_v57  ;;  %252 = vst [vmem:[#allocation2 + $0x30] sm:$0x1] %v251_v25  ;;  %v1319_v32 = vrot.slane %v7582_v10, 1 }
  0x6e   : > { %754 = vst.msk [vmem:[#allocation2 + $0x28] sm:$0xf] %vm226_vm6, %v463_v28  ;;  %v307_v30 = vsel %vm7260_vm4, 0, %v306_v22  ;;  %v466_v33 = vshrl.u32 %v386_v6, 16  ;;  %v469_v26 = vshll.u32 %v386_v6, 16  ;;  %v2670_v41 = vsel %vm1041_vm10, %v7616_v24, %v2669_v48 }
  0x6f   : > { %757 = vst [vmem:[#allocation2 + $0x2c] sm:$0x1] %v756_v37  ;;  %v7631_v42 = vpack.c.b16 %v1011_v36, %v1011_v36  ;;  %v474_v57 = vshrl.u32 %v7589_v23, 16  ;;  %v1318_v63 = vrot.slane %v7072_v16, 1  ;;  %v254_v50 = vsel %vm7250_vm2, 0, %v253_v27 }
  0x70   : > { %308 = vst [vmem:[#allocation2 + $0x38] sm:$0x1] %v307_v30  ;;  %v468_v10 = vrot.slane %v466_v33, 7  ;;  %v310_v44 = vsel %vm7260_vm4, 0, %v309_v31  ;;  %v7074_v45 = vld [vmem:[#allocation2 + $0x24] sm:$0xe]  ;;  %v1845_v51 = vsel %vm1041_vm10, %v7616_v24, %v1844_v61  ;;  %v2099_v15 = vsel %vm1314_vm9, %v2097_v18, %v2098_v19 }
  0x71   : > { %v476_v14 = vrot.slane %v474_v57, 7  ;;  %v7077_v46 = vld [vmem:[#allocation2 + $0x24] sm:$0xe]  ;;  %255 = vst [vmem:[#allocation2 + $0x3c] sm:$0x1] %v254_v50  ;;  %v1074_v54 = vshll.u32 %v7631_v42, 16  ;;  %v1320_v55 = vsel %vm1314_vm9, %v1318_v63, %v1319_v32  ;;  %v7648_v52 = vpack.c.bf16 %v356_v7, %v356_v7 }
  0x72   : > { %2979 = vrot.lane.b32.xlu0 %v2933_v13, %s7208_s25  ;;  %v471_v23 = vor.u32 %v469_v26, %v468_v10  ;;  %v472_v29 = vrot.slane %v468_v10, 4  ;;  %311 = vst [vmem:[#allocation2 + $0x44] sm:$0x1] %v310_v44  ;;  %v6811_v63 = vld [vmem:[#allocation2 + $0x18] sm:$0xe]  ;;  %v357_v10 = vld [vmem:[%s7274_s23 + $0x48] sm:$0xff] }
  0x73   : > { %1236 = vrot.lane.b32.xlu1 %v1065_v34, %s7207_s24  ;;  %2851 = vrot.lane.b32.xlu2 %v2670_v41, %s7207_s24  ;;  %v479_v38 = vor.u32 %v477_v43, %v476_v14  ;;  %v481_v6 = vrot.slane %v476_v14, 4  ;;  %v1076_v21 = vrot.slane %v1074_v54, 1  ;;  %v483_v61 = vshrl.u32 %v7648_v52, 16  ;;  %v6810_v43 = vld [vmem:[#allocation2 + $0x18] sm:$0xf0] }
  0x74   : > { %v758_v58 = vld [vmem:[#allocation2 + $0x30] sm:$0xf]  ;;  %vm1428_vm13 = vcmask 64512   ;;  %vm1472_vm14 = vcmask 97280  }
  0x75   : > { %v7650_v60 = vld [vmem:[#allocation2 + $0x24] sm:$0xff]   ;;  %v480_v5 = vsel %vm7290_vm7, %v472_v29, %v479_v38  ;;  %v759_v9 = vsel %vm7300_vm8, %v471_v23, %v758_v58  ;;  %v1077_v50 = vsel %vm1041_vm10, %v7616_v24, %v1076_v21  ;;  %v485_v58 = vrot.slane %v483_v61, 7 }
  0x76   : > { %v7073_v1 = vld [vmem:[#allocation2 + $0x24] sm:$0xf0]  ;;  %v2500_v47 = vld [vmem:[#allocation2 + $0x2c] sm:$0x1]  ;;  %760 = vst [vmem:[#allocation2 + $0x30] sm:$0xf] %v759_v9  ;;  %v389_v9 = vpack.c.bf16 %v357_v10, %v357_v10 }
  0x77   : > { %v7652_v2 = vld [vmem:[#allocation2 + $0x24] sm:$0xff]   ;;  %v1664_v59 = vld [vmem:[#allocation2 + $0x2c] sm:$0x1]  ;;  %v2628_v13 = vunpack.c.l.b16 %v2500_v47  ;;  %761 = vst.msk [vmem:[#allocation2 + $0x34] sm:$0xf] %vm226_vm6, %v480_v5  ;;  %v7075_v20 = vor.u32 %v7074_v45, %v7073_v1  ;;  %v2672_v31 = vshrl.u32 %v7650_v60, 16 }
  0x78   : > { %v7076_v3 = vld [vmem:[#allocation2 + $0x24] sm:$0xf0]  ;;  %v1792_v18 = vunpack.c.l.b16 %v1664_v59  ;;  %v762_v19 = vld [vmem:[#allocation2 + $0x38] sm:$0x1]  ;;  %v884_v48 = vld [vmem:[#allocation2 + $0x2c] sm:$0x1] }
  0x79   : > { %v7658_v11 = vld [vmem:[#allocation2 + $0x24] sm:$0xff]   ;;  %v2644_v8 = vpack.c.b16 %v2628_v13, %v2628_v13  ;;  %v7078_v22 = vor.u32 %v7077_v46, %v7076_v3  ;;  %v763_v34 = vsel %vm7250_vm2, %v481_v6, %v762_v19  ;;  %v2934_v25 = vrot.slane %v7075_v20, 1 }
  0x7a   : > { %v7660_v12 = vld [vmem:[#allocation2 + $0x24] sm:$0xf0]  ;;  %2016 = vrot.lane.b32.xlu0 %v1845_v51, %s7207_s24  ;;  %v1808_v36 = vpack.c.b16 %v1792_v18, %v1792_v18  ;;  %v1849_v27 = vshll.u32 %v7652_v2, 16  ;;  %764 = vst [vmem:[#allocation2 + $0x38] sm:$0x1] %v763_v34  ;;  %v1847_v37 = vshrl.u32 %v7652_v2, 16  ;;  %v1012_v26 = vunpack.c.l.b16 %v884_v48 }
  0x7b   : > { %2144 = vrot.lane.b32.xlu1 %v2099_v15, %s7208_s25  ;;  %1365 = vrot.lane.b32.xlu2 %v1320_v55, %s7208_s25  ;;  %v2935_v28 = vrot.slane %v2644_v8, 1  ;;  %v2674_v30 = vshll.u32 %v7650_v60, 16  ;;  %v2679_v33 = vshll.u32 %v2644_v8, 16  ;;  %v2100_v57 = vrot.slane %v7078_v22, 1  ;;  %v358_v34 = vld [vmem:[%s7274_s23 + $0x50] sm:$0xff] }
  0x7c   : > { %v1854_v16 = vshll.u32 %v1808_v36, 16  ;;  %v1851_v32 = vrot.slane %v1849_v27, 1  ;;  %v7677_v46 = vpack.c.b16 %v1012_v26, %v1012_v26  ;;  %v2101_v51 = vrot.slane %v1808_v36, 1 }
  0x7d   : > { %v2936_v41 = vsel %vm1314_vm9, %v2934_v25, %v2935_v28  ;;  %v6874_v45 = vld [vmem:[#allocation2 + $0x30] sm:$0xe]  ;;  %v2676_v14 = vrot.slane %v2674_v30, 1  ;;  %v2681_v7 = vrot.slane %v2679_v33, 1  ;;  %v1081_v15 = vshll.u32 %v7658_v11, 16 }
  0x7e   : > { %v6873_v44 = vld [vmem:[#allocation2 + $0x30] sm:$0xf0]  ;;  %v1852_v23 = vor.u32 %v1851_v32, %v1847_v37  ;;  %v1856_v29 = vrot.slane %v1854_v16, 1  ;;  %v6812_v55 = vor.u32 %v6811_v63, %v6810_v43  ;;  %v1079_v3 = vshrl.u32 %v7658_v11, 16  ;;  %v6843_v20 = vld [vmem:[#allocation2 + $0x30] sm:$0xe] }
  0x7f   : > { %v2677_v38 = vor.u32 %v2676_v14, %v2672_v31  ;;  %v6832_v54 = vld [vmem:[#allocation2 + $0x30] sm:$0xff]   ;;  %v6875_v1 = vor.u32 %v6874_v45, %v6873_v44  ;;  %v1086_v5 = vshll.u32 %v7677_v46, 16  ;;  %v1083_v13 = vrot.slane %v1081_v15, 1  ;;  %v765_v32 = vld [vmem:[#allocation2 + $0x3c] sm:$0xf] }
  0x80   : > { %v6842_v19 = vld [vmem:[#allocation2 + $0x30] sm:$0xf0]  ;;  %v1857_v21 = vsel %vm1041_vm10, %v1852_v23, %v1856_v29  ;;  %v2102_v8 = vsel %vm1314_vm9, %v2100_v57, %v2101_v51  ;;  %v1859_v36 = vshrl.u32 %v6832_v54, 16  ;;  %v1861_v22 = vshll.u32 %v6832_v54, 16  ;;  %v312_v44 = vld [vmem:[#allocation2 + $0x50] sm:$0x1] }
  0x81   : > { %v2501_v24 = vld [vmem:[#allocation2 + $0x38] sm:$0x1]  ;;  %v2682_v59 = vsel %vm1041_vm10, %v2677_v38, %v2681_v7  ;;  %v1321_v25 = vrot.slane %v6812_v55, 1  ;;  %v1322_v27 = vrot.slane %v7631_v42, 1  ;;  %v486_v61 = vshll.u32 %v7648_v52, 16 }
  0x82   : > { %2981 = vrot.lane.b32.xlu0 %v2936_v41, %s7208_s25  ;;  %v1665_v6 = vld [vmem:[#allocation2 + $0x38] sm:$0x1]  ;;  %v2629_v47 = vunpack.c.l.b16 %v2501_v24  ;;  %v2937_v28 = vrot.slane %v6875_v1, 1  ;;  %v6844_v16 = vor.u32 %v6843_v20, %v6842_v19  ;;  %v491_v31 = vshrl.u32 %v389_v9, 16  ;;  %v256_v42 = vld [vmem:[#allocation2 + $0x48] sm:$0x1] }
  0x83   : > { %1238 = vrot.lane.b32.xlu1 %v1077_v50, %s7207_s24  ;;  %v1793_v18 = vunpack.c.l.b16 %v1665_v6  ;;  %2853 = vrot.lane.b32.xlu2 %v2682_v59, %s7207_s24  ;;  %v1084_v30 = vor.u32 %v1083_v13, %v1079_v3  ;;  %v1088_v33 = vrot.slane %v1086_v5, 1  ;;  %v488_v26 = vor.u32 %v486_v61, %v485_v58  ;;  %v885_v41 = vld [vmem:[#allocation2 + $0x38] sm:$0x1]  ;;  %v769_v7 = vld [vmem:[#allocation2 + $0x44] sm:$0x1] }
  0x84   : > { %v2645_v48 = vpack.c.b16 %v2629_v47, %v2629_v47  ;;  %v7693_v57 = vpack.c.bf16 %v358_v34, %v358_v34  ;;  %v1863_v43 = vrot.slane %v1861_v22, 1  ;;  %v489_v63 = vrot.slane %v485_v58, 4  ;;  %v7080_v29 = vld [vmem:[#allocation2 + $0x24] sm:$0xe]  ;;  %v359_v55 = vld [vmem:[%s7274_s23 + $0x58] sm:$0xff] }
  0x85   : > { %v7691_v37 = vpack.c.b16 %v1793_v18, %v1793_v18  ;;  %v493_v10 = vrot.slane %v491_v31, 7  ;;  %v494_v50 = vshll.u32 %v389_v9, 16  ;;  %v1323_v45 = vsel %vm1314_vm9, %v1321_v25, %v1322_v27  ;;  %v259_v6 = vld [vmem:[#allocation2 + $0x54] sm:$0x1]  ;;  %v6472_v61 = vld [vmem:[%s9751_s1] sm:$0xf] }
  0x86   : > { %v2938_v52 = vrot.slane %v2645_v48, 1  ;;  %v766_v14 = vsel %vm7300_vm8, %v488_v26, %v765_v32  ;;  %v2691_v23 = vshll.u32 %v2645_v48, 16  ;;  %v1013_v54 = vunpack.c.l.b16 %v885_v41 }
  0x87   : > { %v1866_v51 = vshll.u32 %v7691_v37, 16  ;;  %v496_v15 = vor.u32 %v494_v50, %v493_v10  ;;  %v498_v38 = vrot.slane %v493_v10, 4  ;;  %767 = vst [vmem:[#allocation2 + $0x3c] sm:$0xf] %v766_v14  ;;  %v1089_v58 = vsel %vm1041_vm10, %v1084_v30, %v1088_v33 }
  0x88   : > { %v2103_v24 = vrot.slane %v6844_v16, 1  ;;  %v7703_v1 = vor.u32 %v1863_v43, %v1859_v36  ;;  %v2693_v9 = vrot.slane %v2691_v23, 1  ;;  %v257_v47 = vsel %vm7250_vm2, 0, %v256_v42 }
  0x89   : > { %v497_v3 = vsel %vm7290_vm7, %v489_v63, %v496_v15  ;;  %v770_v5 = vsel %vm7250_vm2, %v498_v38, %v769_v7  ;;  %v313_v59 = vsel %vm7260_vm4, 0, %v312_v44  ;;  %v391_v13 = vpack.c.bf16 %v359_v55, %v359_v55  ;;  %258 = vst [vmem:[#allocation2 + $0x48] sm:$0x1] %v257_v47 }
  0x8a   : > { %2018 = vrot.lane.b32.xlu0 %v1857_v21, %s7207_s24  ;;  %768 = vst.msk [vmem:[#allocation2 + $0x40] sm:$0xf] %vm226_vm6, %v497_v3  ;;  %v2939_v18 = vsel %vm1314_vm9, %v2937_v28, %v2938_v52  ;;  %v1868_v19 = vrot.slane %v1866_v51, 1  ;;  %v7716_v20 = vpack.c.b16 %v1013_v54, %v1013_v54  ;;  %v500_v21 = vshrl.u32 %v7693_v57, 16  ;;  %v6516_v54 = vld [vmem:[%s9751_s1 + $0x10] sm:$0xf] }
  0x8b   : > { %2146 = vrot.lane.b32.xlu1 %v2102_v8, %s7208_s25  ;;  %1367 = vrot.lane.b32.xlu2 %v1323_v45, %s7208_s25  ;;  %771 = vst [vmem:[#allocation2 + $0x44] sm:$0x1] %v770_v5  ;;  %v315_v8 = vld [vmem:[#allocation2 + $0x5c] sm:$0x1]  ;;  %v2104_v36 = vrot.slane %v7691_v37, 1  ;;  %v503_v22 = vshll.u32 %v7693_v57, 16  ;;  %v7081_v25 = vor.u32 %v7080_v29, %v7660_v12  ;;  %v2694_v37 = vsel %vm1041_vm10, %v7703_v1, %v2693_v9 }
  0x8c   : > { %v508_v34 = vshrl.u32 %v391_v13, 16  ;;  %v511_v48 = vshll.u32 %v391_v13, 16  ;;  %314 = vst [vmem:[#allocation2 + $0x50] sm:$0x1] %v313_v59  ;;  %v502_v27 = vrot.slane %v500_v21, 7  ;;  %v260_v28 = vsel %vm7250_vm2, 0, %v259_v6 }
  0x8d   : > { %v316_v12 = vsel %vm7260_vm4, 0, %v315_v8  ;;  %v1869_v30 = vsel %vm1041_vm10, %v7703_v1, %v1868_v19  ;;  %v1098_v33 = vshll.u32 %v7716_v20, 16  ;;  %v1325_v26 = vrot.slane %v7677_v46, 1  ;;  %v6602_v57 = vld [vmem:[%s9751_s1] sm:$0x30] }
  0x8e   : > { %v7083_v16 = vld [vmem:[#allocation2 + $0x3c] sm:$0xe]  ;;  %v510_v32 = vrot.slane %v508_v34, 7  ;;  %v506_v41 = vrot.slane %v502_v27, 4  ;;  %v6473_v63 = vor.u32 %v6602_v57, %v6472_v61  ;;  %261 = vst [vmem:[#allocation2 + $0x54] sm:$0x1] %v260_v28  ;;  %v505_v45 = vor.u32 %v503_v22, %v502_v27 }
  0x8f   : > { %v7730_v31 = vld [vmem:[#allocation2 + $0x3c] sm:$0xe]  ;;  %v1324_v52 = vrot.slane %v7081_v25, 1  ;;  %317 = vst [vmem:[#allocation2 + $0x5c] sm:$0x1] %v316_v12  ;;  %v2105_v55 = vsel %vm1314_vm9, %v2103_v24, %v2104_v36 }
  0x90   : > { %v513_v43 = vor.u32 %v511_v48, %v510_v32  ;;  %v515_v46 = vrot.slane %v510_v32, 4  ;;  %v772_v15 = vld [vmem:[#allocation2 + $0x48] sm:$0xf]  ;;  %v1507_v38 = vsel %vm1505_vm11, %v6473_v63, 0  ;;  %v6604_v5 = vld [vmem:[%s9751_s1 + $0x10] sm:$0x30] }
  0x91   : > { %v7742_v10 = vld [vmem:[#allocation2 + $0x3c] sm:$0xff]   ;;  %v773_v47 = vsel %vm7300_vm8, %v505_v45, %v772_v15  ;;  %6988 = vmatpush.bf16.msra.mxu2 %v1507_v38  ;;  %v1326_v21 = vsel %vm1314_vm9, %v1324_v52, %v1325_v26  ;;  %1516 = vmatpush.bf16.msra.mxu0 %v1507_v38  ;;  %v6517_v34 = vor.u32 %v6604_v5, %v6516_v54 }
  0x92   : > { %2983 = vrot.lane.b32.xlu0 %v2939_v18, %s7208_s25  ;;  %9775 = vst [vmem:[#allocation4_spill] sm:$0xff] %v7742_v10  ;;  %v7082_v50 = vld [vmem:[#allocation2 + $0x3c] sm:$0xf0]  ;;  %v2502_v14 = vld [vmem:[#allocation2 + $0x44] sm:$0x1]  ;;  %v514_v51 = vsel %vm7290_vm7, %v506_v41, %v513_v43  ;;  %v1100_v18 = vrot.slane %v1098_v33, 1 }
  0x93   : > { %1240 = vrot.lane.b32.xlu1 %v1089_v58, %s7207_s24  ;;  %2855 = vrot.lane.b32.xlu2 %v2694_v37, %s7207_s24  ;;  %v7745_v42 = vld [vmem:[#allocation2 + $0x3c] sm:$0xff]   ;;  %v1666_v7 = vld [vmem:[#allocation2 + $0x44] sm:$0x1]  ;;  %v2630_v23 = vunpack.c.l.b16 %v2502_v14  ;;  %v7084_v58 = vor.u32 %v7083_v16, %v7082_v50  ;;  %775 = vst.msk [vmem:[#allocation2 + $0x4c] sm:$0xf] %vm226_vm6, %v514_v51  ;;  %v2696_v48 = vshrl.u32 %v7742_v10, 16 }
  0x94   : > { %9776 = vst [vmem:[#allocation5_spill] sm:$0xff] %v7745_v42  ;;  %v7085_v44 = vld [vmem:[#allocation2 + $0x3c] sm:$0xf0]  ;;  %v1794_v29 = vunpack.c.l.b16 %v1666_v7  ;;  %v776_v3 = vld [vmem:[#allocation2 + $0x50] sm:$0x1]  ;;  %v1873_v19 = vshll.u32 %v7745_v42, 16  ;;  %v1101_v50 = vsel %vm1041_vm10, %v7703_v1, %v1100_v18 }
  0x95   : > { %v2646_v6 = vpack.c.b16 %v2630_v23, %v2630_v23  ;;  %v777_v59 = vsel %vm7250_vm2, %v515_v46, %v776_v3  ;;  %v7764_v13 = vld [vmem:[#allocation2 + $0x3c] sm:$0xff]   ;;  %774 = vst [vmem:[#allocation2 + $0x48] sm:$0xf] %v773_v47  ;;  %v2940_v8 = vrot.slane %v7084_v58, 1  ;;  %v7087_v22 = vor.u32 %v7730_v31, %v7085_v44  ;;  %v886_v61 = vld [vmem:[#allocation2 + $0x44] sm:$0x1] }
  0x96   : > { %v7758_v9 = vpack.c.b16 %v1794_v29, %v1794_v29  ;;  %9777 = vst [vmem:[#allocation6_spill] sm:$0xff] %v7764_v13  ;;  %v7766_v24 = vld [vmem:[#allocation2 + $0x3c] sm:$0xf0]  ;;  %v2698_v25 = vshll.u32 %v7742_v10, 16  ;;  %v1871_v28 = vshrl.u32 %v7745_v42, 16  ;;  %v1875_v16 = vrot.slane %v1873_v19, 1 }
  0x97   : > { %v2941_v36 = vrot.slane %v2646_v6, 1  ;;  %778 = vst [vmem:[#allocation2 + $0x50] sm:$0x1] %v777_v59  ;;  %v2703_v27 = vshll.u32 %v2646_v6, 16  ;;  %v6814_v33 = vld [vmem:[#allocation2 + $0x30] sm:$0xe]  ;;  %v1014_v57 = vunpack.c.l.b16 %v886_v61 }
  0x98   : > { %v1878_v37 = vshll.u32 %v7758_v9, 16  ;;  %v2700_v12 = vrot.slane %v2698_v25, 1  ;;  %v3116_v43 = vsel %vm1505_vm11, %v6517_v34, 0  ;;  %v360_v63 = vld [vmem:[%s7274_s23 + $0x60] sm:$0xff]  ;;  %v2106_v44 = vrot.slane %v7087_v22, 1  ;;  %v361_v23 = vld [vmem:[%s7274_s23 + $0x68] sm:$0xff] }
  0x99   : > { %v2705_v31 = vrot.slane %v2703_v27, 1  ;;  %v2942_v26 = vsel %vm1314_vm9, %v2940_v8, %v2941_v36  ;;  %3125 = vmatpush.bf16.msrb.mxu2 %v3116_v43  ;;  %v1876_v45 = vor.u32 %v1875_v16, %v1871_v28  ;;  %v2107_v14 = vrot.slane %v7758_v9, 1  ;;  %v7003_v47 = vld [vmem:[#allocation2 + $0x60] sm:$0xff]   ;;  %v2509_v10 = vld [vmem:[#allocation2 + $0x98] sm:$0x1] }
  0x9a   : > { %2020 = vrot.lane.b32.xlu0 %v1869_v30, %s7207_s24  ;;  %v6813_v30 = vld [vmem:[#allocation2 + $0x30] sm:$0xf0]  ;;  %v2701_v52 = vor.u32 %v2700_v12, %v2696_v48  ;;  %v1880_v46 = vrot.slane %v1878_v37, 1  ;;  %v392_v15 = vpack.c.bf16 %v360_v63, %v360_v63  ;;  %v7790_v1 = vpack.c.b16 %v1014_v57, %v1014_v57  ;;  %v6876_v58 = vld [vmem:[#allocation2 + $0x48] sm:$0xf0] }
  0x9b   : > { %2148 = vrot.lane.b32.xlu1 %v2105_v55, %s7208_s25  ;;  %1369 = vrot.lane.b32.xlu2 %v1326_v21, %s7208_s25  ;;  %v6815_v7 = vor.u32 %v6814_v33, %v6813_v30  ;;  %v1105_v5 = vshll.u32 %v7764_v13, 16  ;;  %v393_v6 = vpack.c.bf16 %v361_v23, %v361_v23  ;;  %v2108_v18 = vsel %vm1314_vm9, %v2106_v44, %v2107_v14  ;;  %v6858_v42 = vld [vmem:[#allocation2 + $0xa8] sm:$0xe] }
  0x9c   : > { %v2706_v51 = vsel %vm1041_vm10, %v2701_v52, %v2705_v31  ;;  %v6877_v3 = vld [vmem:[#allocation2 + $0x48] sm:$0xe]  ;;  %v1881_v9 = vsel %vm1041_vm10, %v1876_v45, %v1880_v46  ;;  %v1328_v22 = vrot.slane %v7716_v20, 1  ;;  %v517_v34 = vshrl.u32 %v392_v15, 16  ;;  %v779_v20 = vld [vmem:[#allocation2 + $0x54] sm:$0xf] }
  0x9d   : > { %v7778_v32 = vpop.permute.xlu2 %1254  ;;  %v6833_v19 = vld [vmem:[#allocation2 + $0x48] sm:$0xff]   ;;  %v1327_v21 = vrot.slane %v6815_v7, 1  ;;  %v520_v48 = vshll.u32 %v392_v15, 16  ;;  %v6878_v27 = vor.u32 %v6877_v3, %v6876_v58  ;;  %v1103_v28 = vshrl.u32 %v7764_v13, 16  ;;  %v7089_v7 = vld [vmem:[#allocation2 + $0x3c] sm:$0xe] }
  0x9e   : > { %v2503_v29 = vld [vmem:[#allocation2 + $0x50] sm:$0x1]  ;;  %v1110_v16 = vshll.u32 %v7790_v1, 16  ;;  %v1107_v37 = vrot.slane %v1105_v5, 1  ;;  %v1885_v31 = vshll.u32 %v6833_v19, 16  ;;  %v519_v30 = vrot.slane %v517_v34, 7 }
  0x9f   : > { %v1251_v41 = vpop.permute.xlu0 %1250  ;;  %v2631_v38 = vunpack.c.l.b16 %v2503_v29  ;;  %v1667_v54 = vld [vmem:[#allocation2 + $0x50] sm:$0x1]  ;;  %v1883_v33 = vshrl.u32 %v6833_v19, 16  ;;  %v1329_v43 = vsel %vm1314_vm9, %v1327_v21, %v1328_v22  ;;  %v2943_v52 = vrot.slane %v6878_v27, 1  ;;  %v6845_v15 = vld [vmem:[#allocation2 + $0x48] sm:$0xf0] }
  0xa0   : > { %v1413_v59 = vsel %vm1395_vm12, %v7003_v47, %v1251_v41  ;;  %v1795_v36 = vunpack.c.l.b16 %v1667_v54  ;;  %v528_v41 = vshll.u32 %v393_v6, 16  ;;  %v522_v63 = vor.u32 %v520_v48, %v519_v30  ;;  %v887_v54 = vld [vmem:[#allocation2 + $0x50] sm:$0x1]  ;;  %v6846_v58 = vld [vmem:[#allocation2 + $0x48] sm:$0xe] }
  0xa1   : > { %v2647_v25 = vpack.c.b16 %v2631_v38, %v2631_v38  ;;  %v523_v46 = vrot.slane %v519_v30, 4  ;;  %v1108_v23 = vor.u32 %v1107_v37, %v1103_v28  ;;  %v1112_v29 = vrot.slane %v1110_v16, 1  ;;  %v7816_v19 = vld [vmem:[#allocation2 + $0x6c] sm:$0xf0]  ;;  %v1670_v28 = vld [vmem:[#allocation2 + $0x74] sm:$0x1] }
  0xa2   : > { %2985 = vrot.lane.b32.xlu0 %v2942_v26, %s7208_s25  ;;  %v525_v26 = vshrl.u32 %v393_v6, 16  ;;  %v1811_v57 = vpack.c.b16 %v1795_v36, %v1795_v36  ;;  %v780_v38 = vsel %vm7300_vm8, %v522_v63, %v779_v20  ;;  %v1015_v34 = vunpack.c.l.b16 %v887_v54 }
  0xa3   : > { %1242 = vrot.lane.b32.xlu1 %v1101_v50, %s7207_s24  ;;  %v7792_v55 = vpop.permute.xlu1 %1252  ;;  %2857 = vrot.lane.b32.xlu2 %v2706_v51, %s7207_s24  ;;  %v783_v50 = vld [vmem:[#allocation2 + $0x5c] sm:$0x1]  ;;  %v2715_v44 = vshll.u32 %v2647_v25, 16  ;;  %v2944_v45 = vrot.slane %v2647_v25, 1  ;;  %v1887_v51 = vrot.slane %v1885_v31, 1  ;;  %v1113_v48 = vsel %vm1041_vm10, %v1108_v23, %v1112_v29 }
  0xa4   : > { %v527_v14 = vrot.slane %v525_v26, 7  ;;  %781 = vst [vmem:[#allocation2 + $0x54] sm:$0xf] %v780_v38  ;;  %v6847_v27 = vor.u32 %v6846_v58, %v6845_v15  ;;  %v7090_v16 = vor.u32 %v7089_v7, %v7766_v24  ;;  %v1798_v20 = vunpack.c.l.b16 %v1670_v28  ;;  %v7095_v23 = vld [vmem:[#allocation2 + $0x6c] sm:$0xe] }
  0xa5   : > { %v7799_v8 = vpop.permute.xlu2 %1383  ;;  %v2945_v21 = vsel %vm1314_vm9, %v2943_v52, %v2944_v45  ;;  %v1888_v25 = vor.u32 %v1887_v51, %v1883_v33  ;;  %v2110_v33 = vrot.slane %v1811_v57, 1  ;;  %v1331_v63 = vrot.slane %v7790_v1, 1 }
  0xa6   : > { %v530_v3 = vor.u32 %v528_v41, %v527_v14  ;;  %v532_v5 = vrot.slane %v527_v14, 4  ;;  %v2109_v30 = vrot.slane %v6847_v27, 1  ;;  %v1415_v41 = vsel %vm1395_vm12, %v7356_v62, %v7792_v55 }
  0xa7   : > { %v1380_v61 = vpop.permute.xlu0 %1379  ;;  %v1330_v24 = vrot.slane %v7090_v16, 1  ;;  %v7849_v7 = vpack.c.b16 %v1798_v20, %v1798_v20 }
  0xa8   : > { %v1446_v12 = vsel %vm1428_vm13, %v1413_v59, %v1380_v61  ;;  %v2717_v59 = vrot.slane %v2715_v44, 1  ;;  %v531_v36 = vsel %vm7290_vm7, %v523_v46, %v530_v3  ;;  %v784_v22 = vsel %vm7250_vm2, %v532_v5, %v783_v50 }
  0xa9   : > { %6482 = vmatmul.msk.bf16.vlgmr.msra.gmra.mxu2 %vm1472_vm14, %v1446_v12  ;;  %782 = vst.msk [vmem:[#allocation2 + $0x58] sm:$0xf] %vm226_vm6, %v531_v36  ;;  %v7829_v12 = vpack.c.b16 %v1015_v34, %v1015_v34  ;;  %v2111_v45 = vsel %vm1314_vm9, %v2109_v30, %v2110_v33  ;;  %v1332_v51 = vsel %vm1314_vm9, %v1330_v24, %v1331_v63  ;;  %v6816_v30 = vld [vmem:[#allocation2 + $0x48] sm:$0xf0]  ;;  %v6817_v33 = vld [vmem:[#allocation2 + $0x48] sm:$0xe] }
  0xaa   : > { %2022 = vrot.lane.b32.xlu0 %v1881_v9, %s7207_s24  ;;  %v1890_v9 = vshll.u32 %v1811_v57, 16  ;;  %785 = vst [vmem:[#allocation2 + $0x5c] sm:$0x1] %v784_v22  ;;  %v2718_v61 = vsel %vm1041_vm10, %v1888_v25, %v2717_v59 }
  0xab   : > { %2150 = vrot.lane.b32.xlu1 %v2108_v18, %s7208_s25  ;;  %1371 = vrot.lane.b32.xlu2 %v1329_v43, %s7208_s25  ;;  %v1382_v6 = vpop.permute.xlu1 %1381  ;;  %v7814_v18 = vld [vmem:[#allocation2 + $0x6c] sm:$0xff]   ;;  %v7092_v26 = vld [vmem:[#allocation2 + $0x54] sm:$0xe]  ;;  %v1122_v57 = vshll.u32 %v7829_v12, 16 }
  0xac   : > { %v1892_v37 = vrot.slane %v1890_v9, 1  ;;  %v1448_v55 = vsel %vm1428_vm13, %v1415_v41, %v1382_v6  ;;  %v1921_v1 = vshll.u32 %v7814_v18, 16  ;;  %v1919_v54 = vshrl.u32 %v7814_v18, 16  ;;  %v2505_v6 = vld [vmem:[#allocation2 + $0x68] sm:$0x1] }
  0xad   : > { %v7812_v47 = vpop.permute.xlu2 %1258  ;;  %v1124_v38 = vrot.slane %v1122_v57, 1  ;;  %v7096_v41 = vor.u32 %v7095_v23, %v7816_v19  ;;  %v7098_v24 = vld [vmem:[#allocation2 + $0x54] sm:$0xe] }
  0xae   : > { %v1893_v50 = vsel %vm1041_vm10, %v1888_v25, %v1892_v37  ;;  %v1923_v59 = vrot.slane %v1921_v1, 1  ;;  %v2633_v37 = vunpack.c.l.b16 %v2505_v6  ;;  %v1671_v1 = vld [vmem:[#allocation2 + $0x80] sm:$0x1] }
  0xaf   : > { %v7831_v31 = vpop.permute.xlu0 %1256 }
  0xb0   : > { %v7841_v44 = vld [vmem:[#allocation2 + $0x54] sm:$0xff]   ;;  %v7878_v23 = vpack.c.b16 %v2633_v37, %v2633_v37 }
  0xb1   : > { %v7091_v52 = vld [vmem:[#allocation2 + $0x54] sm:$0xf0]  ;;  %v2504_v62 = vld [vmem:[#allocation2 + $0x5c] sm:$0x1]  ;;  %v2720_v3 = vshrl.u32 %v7841_v44, 16  ;;  %v2722_v5 = vshll.u32 %v7841_v44, 16 }
  0xb2   : > { %2987 = vrot.lane.b32.xlu0 %v2945_v21, %s7208_s25  ;;  %v2632_v14 = vunpack.c.l.b16 %v2504_v62  ;;  %v7093_v29 = vor.u32 %v7092_v26, %v7091_v52  ;;  %v1926_v21 = vshll.u32 %v7849_v7, 16  ;;  %v7860_v36 = vld [vmem:[#allocation2 + $0x54] sm:$0xff]   ;;  %v1125_v26 = vsel %vm1041_vm10, %v1888_v25, %v1124_v38  ;;  %v1668_v20 = vld [vmem:[#allocation2 + $0x5c] sm:$0x1] }
  0xb3   : > { %1244 = vrot.lane.b32.xlu1 %v1113_v48, %s7207_s24  ;;  %2859 = vrot.lane.b32.xlu2 %v2718_v61, %s7207_s24  ;;  %v7845_v46 = vpop.permute.xlu1 %1385  ;;  %9778 = vst [vmem:[#allocation7_spill] sm:$0xff] %v7860_v36  ;;  %v7097_v22 = vld [vmem:[#allocation2 + $0x54] sm:$0xf0]  ;;  %v2724_v61 = vrot.slane %v2722_v5, 1  ;;  %v1924_v52 = vor.u32 %v1923_v59, %v1919_v54  ;;  %v6818_v25 = vor.u32 %v6817_v33, %v6816_v30  ;;  %v1796_v19 = vunpack.c.l.b16 %v1668_v20  ;;  %v888_v5 = vld [vmem:[#allocation2 + $0x5c] sm:$0x1] }
  0xb4   : > { %v2648_v15 = vpack.c.b16 %v2632_v14, %v2632_v14  ;;  %v2946_v58 = vrot.slane %v7093_v29, 1  ;;  %v1928_v57 = vrot.slane %v1926_v21, 1  ;;  %v7871_v62 = vld [vmem:[#allocation2 + $0x54] sm:$0xf0]  ;;  %v1895_v20 = vshrl.u32 %v7860_v36, 16 }
  0xb5   : > { %v7837_v43 = vpop.permute.xlu2 %1389  ;;  %v2725_v63 = vor.u32 %v2724_v61, %v2720_v3  ;;  %v7004_v38 = vld [vmem:[#allocation2 + $0x78] sm:$0xff]   ;;  %v1799_v3 = vunpack.c.l.b16 %v1671_v1  ;;  %v1333_v21 = vrot.slane %v6818_v25, 1  ;;  %v1812_v61 = vpack.c.b16 %v1796_v19, %v1796_v19  ;;  %v1669_v19 = vld [vmem:[#allocation2 + $0x68] sm:$0x1] }
  0xb6   : > { %v2947_v9 = vrot.slane %v2648_v15, 1  ;;  %v2727_v34 = vshll.u32 %v2648_v15, 16  ;;  %v2119_v15 = vrot.slane %v7849_v7, 1  ;;  %v1417_v54 = vsel %vm1395_vm12, %v7004_v38, %v7778_v32 }
  0xb7   : > { %v7862_v48 = vpop.permute.xlu0 %1387  ;;  %v1897_v7 = vshll.u32 %v7860_v36, 16  ;;  %v2739_v32 = vshll.u32 %v7878_v23, 16  ;;  %v1450_v33 = vsel %vm1428_vm13, %v1417_v54, %v7799_v8  ;;  %v7109_v36 = vld [vmem:[#allocation2 + $0x84] sm:$0xf0] }
  0xb8   : > { %v2948_v28 = vsel %vm1314_vm9, %v2946_v58, %v2947_v9  ;;  %v2729_v16 = vrot.slane %v2727_v34, 1  ;;  %v1929_v58 = vsel %vm1041_vm10, %v1924_v52, %v1928_v57  ;;  %v7887_v9 = vld [vmem:[#allocation2 + $0x78] sm:$0xff]   ;;  %v1334_v34 = vrot.slane %v7829_v12, 1 }
  0xb9   : > { %6483 = vmatmul.msk.bf16.gmra.mxu2 %vm1472_vm14, %v1448_v55  ;;  %9780 = vst [vmem:[#allocation9_spill] sm:$0xff] %v7887_v9  ;;  %v1933_v12 = vshll.u32 %v7887_v9, 16  ;;  %v2113_v52 = vrot.slane %v1812_v61, 1 }
  0xba   : > { %2024 = vrot.lane.b32.xlu0 %v1893_v50, %s7207_s24  ;;  %v6865_v50 = vld [vmem:[#allocation2 + $0x60] sm:$0xff]   ;;  %v2730_v14 = vsel %vm1041_vm10, %v2725_v63, %v2729_v16  ;;  %v1902_v63 = vshll.u32 %v1812_v61, 16 }
  0xbb   : > { %2152 = vrot.lane.b32.xlu1 %v2111_v45, %s7208_s25  ;;  %1373 = vrot.lane.b32.xlu2 %v1332_v51, %s7208_s25  ;;  %v7869_v45 = vld [vmem:[#allocation2 + $0x54] sm:$0xff]   ;;  %v2734_v29 = vshll.u32 %v6865_v50, 16  ;;  %v2118_v51 = vrot.slane %v7096_v41, 1  ;;  %v2732_v59 = vshrl.u32 %v6865_v50, 16  ;;  %v7898_v41 = vpack.c.b16 %v1799_v3, %v1799_v3 }
  0xbc   : > { %9779 = vst [vmem:[#allocation8_spill] sm:$0xff] %v7869_v45  ;;  %v1129_v25 = vshll.u32 %v7869_v45, 16  ;;  %v1904_v54 = vrot.slane %v1902_v63, 1 }
  0xbd   : > { %v7864_v27 = vpop.permute.xlu2 %1264  ;;  %v2736_v16 = vrot.slane %v2734_v29, 1  ;;  %v2120_v30 = vsel %vm1314_vm9, %v2118_v51, %v2119_v15  ;;  %v1931_v29 = vshrl.u32 %v7887_v9, 16  ;;  %v1935_v51 = vrot.slane %v1933_v12, 1  ;;  %v6857_v9 = vld [vmem:[#allocation2 + $0xa8] sm:$0xf0] }
  0xbe   : > { %v1938_v3 = vshll.u32 %v7898_v41, 16  ;;  %v1131_v61 = vrot.slane %v1129_v25, 1 }
  0xbf   : > { %v7907_v57 = vor.u32 %v2736_v16, %v2732_v59  ;;  %v6879_v59 = vld [vmem:[#allocation2 + $0x60] sm:$0xf0]  ;;  %v7922_v16 = vld [vmem:[#allocation2 + $0x6c] sm:$0xff]   ;;  %v7932_v12 = vor.u32 %v1935_v51, %v1931_v29  ;;  %v2950_v29 = vrot.slane %v7878_v23, 1 }
  0xc0   : > { %9781 = vst [vmem:[#allocation10_spill] sm:$0xff] %v7922_v16 }
  0xc1   : > { %v7874_v55 = vpop.permute.xlu1 %1260 }
  0xc2   : > { %2989 = vrot.lane.b32.xlu0 %v2948_v28, %s7208_s25  ;;  %v7099_v28 = vor.u32 %v7098_v24, %v7097_v22  ;;  %v1335_v22 = vsel %vm1314_vm9, %v1333_v21, %v1334_v34  ;;  %v1899_v24 = vrot.slane %v1897_v7, 1  ;;  %v6880_v21 = vld [vmem:[#allocation2 + $0x60] sm:$0xe]  ;;  %v7101_v34 = vld [vmem:[#allocation2 + $0x54] sm:$0xe]  ;;  %v1127_v7 = vshrl.u32 %v7869_v45, 16 }
  0xc3   : > { %1246 = vrot.lane.b32.xlu1 %v1125_v26, %s7207_s24  ;;  %2861 = vrot.lane.b32.xlu2 %v2730_v14, %s7207_s24  ;;  %v1016_v26 = vunpack.c.l.b16 %v888_v5  ;;  %v2741_v14 = vrot.slane %v2739_v32, 1  ;;  %v7924_v32 = vld [vmem:[#allocation2 + $0x6c] sm:$0xf0] }
  0xc4   : > { %v7892_v37 = vpop.permute.xlu0 %1262  ;;  %v2112_v8 = vrot.slane %v7099_v28, 1  ;;  %v1900_v38 = vor.u32 %v1899_v24, %v1895_v20  ;;  %v6881_v20 = vor.u32 %v6880_v21, %v6879_v59  ;;  %v1940_v24 = vrot.slane %v1938_v3, 1  ;;  %v6852_v3 = vld [vmem:[#allocation2 + $0x78] sm:$0xe] }
  0xc5   : > { %v7885_v6 = vpop.permute.xlu2 %1363  ;;  %v7909_v1 = vpack.c.b16 %v1016_v26, %v1016_v26  ;;  %v2742_v5 = vsel %vm1041_vm10, %v7907_v57, %v2741_v14  ;;  %v1132_v63 = vor.u32 %v1131_v61, %v1127_v7 }
  0xc6   : > { %v1941_v51 = vsel %vm1041_vm10, %v7932_v12, %v1940_v24  ;;  %v2507_v24 = vld [vmem:[#allocation2 + $0x80] sm:$0x1] }
  0xc7   : > { %v1134_v28 = vshll.u32 %v7909_v1, 16  ;;  %v1337_v61 = vrot.slane %v7909_v1, 1  ;;  %v6848_v1 = vld [vmem:[#allocation2 + $0x60] sm:$0xf0] }
  0xc9   : > { %6484 = vmatmul.msk.bf16.gmra.mxu2 %vm1472_vm14, %v1450_v33  ;;  %v7905_v50 = vpop.permute.xlu1 %1391  ;;  %v1419_v33 = vsel %vm1395_vm12, %v7361_v17, %v7831_v31 }
  0xca   : > { %2030 = vrot.lane.b32.xlu0 %v1929_v58, %s7207_s24  ;;  %v2114_v58 = vsel %vm1314_vm9, %v2112_v8, %v2113_v52  ;;  %v1136_v8 = vrot.slane %v1134_v28, 1  ;;  %v2506_v52 = vld [vmem:[#allocation2 + $0x74] sm:$0x1]  ;;  %v1452_v17 = vsel %vm1428_vm13, %v1419_v33, %v7845_v46  ;;  %v7104_v46 = vld [vmem:[#allocation2 + $0x6c] sm:$0xe] }
  0xcb   : > { %2158 = vrot.lane.b32.xlu1 %v2120_v30, %s7208_s25  ;;  %1375 = vrot.lane.b32.xlu2 %v1335_v22, %s7208_s25  ;;  %v1797_v30 = vunpack.c.l.b16 %v1669_v19  ;;  %v1905_v22 = vsel %vm1041_vm10, %v1900_v38, %v1904_v54  ;;  %v2949_v19 = vrot.slane %v6881_v20, 1  ;;  %v7102_v38 = vor.u32 %v7101_v34, %v7871_v62  ;;  %v7106_v20 = vld [vmem:[#allocation2 + $0x84] sm:$0xf0] }
  0xcc   : > { %v7930_v26 = vpop.permute.xlu0 %1393  ;;  %v2634_v54 = vunpack.c.l.b16 %v2506_v52  ;;  %v2746_v34 = vshll.u32 %v7922_v16, 16  ;;  %v6849_v52 = vld [vmem:[#allocation2 + $0x60] sm:$0xe] }
  0xcd   : > { %v7914_v15 = vpop.permute.xlu2 %2851  ;;  %v7936_v14 = vpack.c.b16 %v1797_v30, %v1797_v30  ;;  %v2951_v21 = vsel %vm1314_vm9, %v2949_v19, %v2950_v29  ;;  %v1336_v7 = vrot.slane %v7102_v38, 1  ;;  %v2744_v19 = vshrl.u32 %v7922_v16, 16 }
  0xce   : > { %v2650_v62 = vpack.c.b16 %v2634_v54, %v2634_v54  ;;  %v2748_v29 = vrot.slane %v2746_v34, 1 }
  0xcf   : > { %v1914_v59 = vshll.u32 %v7936_v14, 16 }
  0xd0   : > { %v2749_v34 = vor.u32 %v2748_v29, %v2744_v19 }
  0xd1   : > { %v1916_v30 = vrot.slane %v1914_v59, 1  ;;  %v2635_v59 = vunpack.c.l.b16 %v2507_v24 }
  0xd2   : > { %2154 = vrot.lane.b32.xlu0 %v2114_v58, %s7208_s25  ;;  %v6851_v58 = vld [vmem:[#allocation2 + $0x78] sm:$0xf0] }
  0xd3   : > { %2863 = vrot.lane.b32.xlu1 %v2742_v5, %s7207_s24  ;;  %2026 = vrot.lane.b32.xlu2 %v1905_v22, %s7207_s24  ;;  %v1137_v5 = vsel %vm1041_vm10, %v1132_v63, %v1136_v8  ;;  %v6853_v23 = vor.u32 %v6852_v3, %v6851_v58  ;;  %v7962_v22 = vld [vmem:[#allocation2 + $0x84] sm:$0xff]   ;;  %v2122_v8 = vrot.slane %v7898_v41, 1  ;;  %v1917_v54 = vsel %vm1041_vm10, %v7907_v57, %v1916_v30  ;;  %v1672_v58 = vld [vmem:[#allocation2 + $0x8c] sm:$0x1]  ;;  %v7005_v41 = vld [vmem:[#allocation2 + $0x90] sm:$0xff]  }
  0xd4   : > { %9782 = vst [vmem:[#allocation11_spill] sm:$0xff] %v7962_v22  ;;  %v7107_v3 = vld [vmem:[#allocation2 + $0x84] sm:$0xe]  ;;  %v1800_v57 = vunpack.c.l.b16 %v1672_v58  ;;  %v7995_v58 = vld [vmem:[#allocation2 + $0x9c] sm:$0xf0] }
  0xd5   : > { %v7938_v25 = vpop.permute.xlu1 %1234  ;;  %v7943_v31 = vpop.permute.xlu2 %1365  ;;  %v2121_v63 = vrot.slane %v6853_v23, 1  ;;  %v1421_v23 = vsel %vm1395_vm12, %v7005_v41, %v7812_v47  ;;  %v7108_v29 = vor.u32 %v7107_v3, %v7106_v20 }
  0xd7   : > { %v2124_v41 = vrot.slane %v7108_v29, 1 }
  0xd9   : > { %6485 = vmatmul.msk.bf16.gmra.mxu2 %vm1472_vm14, %v1452_v17  ;;  %v1338_v17 = vsel %vm1314_vm9, %v1336_v7, %v1337_v61  ;;  %v2123_v7 = vsel %vm1314_vm9, %v2121_v63, %v2122_v8  ;;  %v1673_v61 = vld [vmem:[#allocation2 + $0x98] sm:$0x1]  ;;  %v2116_v63 = vrot.slane %v7936_v14, 1  ;;  %v1454_v8 = vsel %vm1428_vm13, %v1421_v23, %v7862_v48 }
  0xda   : > { %2032 = vrot.lane.b32.xlu0 %v1941_v51, %s7207_s24  ;;  %v2751_v51 = vshll.u32 %v2650_v62, 16  ;;  %v1801_v47 = vunpack.c.l.b16 %v1673_v61 }
  0xdb   : > { %1248 = vrot.lane.b32.xlu1 %v1137_v5, %s7207_s24  ;;  %2991 = vrot.lane.b32.xlu2 %v2951_v21, %s7208_s25  ;;  %v7105_v5 = vor.u32 %v7104_v46, %v7924_v32  ;;  %v6850_v21 = vor.u32 %v6849_v52, %v6848_v1  ;;  %v2953_v32 = vrot.slane %v2650_v62, 1  ;;  %v7979_v46 = vpack.c.b16 %v2635_v59, %v2635_v59  ;;  %v7987_v52 = vld [vmem:[#allocation2 + $0x90] sm:$0xff]  }
  0xdc   : > { %v7957_v28 = vpop.permute.xlu0 %2014  ;;  %v2753_v16 = vrot.slane %v2751_v51, 1  ;;  %9783 = vst [vmem:[#allocation12_spill] sm:$0xff] %v7987_v52  ;;  %v1816_v62 = vpack.c.b16 %v1800_v57, %v1800_v57  ;;  %v1817_v48 = vpack.c.b16 %v1801_v47, %v1801_v47  ;;  %v1957_v59 = vshll.u32 %v7987_v52, 16 }
  0xdd   : > { %v7959_v33 = vpop.permute.xlu1 %2142  ;;  %v7967_v38 = vpop.permute.xlu2 %2853  ;;  %v2952_v45 = vrot.slane %v7105_v5, 1  ;;  %v2115_v1 = vrot.slane %v6850_v21, 1  ;;  %v2763_v14 = vshll.u32 %v7979_v46, 16 }
  0xde   : > { %v2754_v19 = vsel %vm1041_vm10, %v2749_v34, %v2753_v16  ;;  %v1943_v16 = vshrl.u32 %v7962_v22, 16  ;;  %v1950_v3 = vshll.u32 %v1816_v62, 16  ;;  %v2125_v23 = vrot.slane %v1816_v62, 1 }
  0xdf   : > { %v2954_v5 = vsel %vm1314_vm9, %v2952_v45, %v2953_v32  ;;  %v2117_v21 = vsel %vm1314_vm9, %v2115_v1, %v2116_v63  ;;  %v1674_v45 = vld [vmem:[#allocation2 + $0xa4] sm:$0x1]  ;;  %v2765_v61 = vrot.slane %v2763_v14, 1  ;;  %v1955_v34 = vshrl.u32 %v7987_v52, 16  ;;  %v6854_v1 = vld [vmem:[#allocation2 + $0x90] sm:$0xf0] }
  0xe0   : > { %v1959_v32 = vrot.slane %v1957_v59, 1  ;;  %v1962_v47 = vshll.u32 %v1817_v48, 16  ;;  %v6855_v63 = vld [vmem:[#allocation2 + $0x90] sm:$0xe]  ;;  %v2126_v62 = vsel %vm1314_vm9, %v2124_v41, %v2125_v23  ;;  %v8016_v52 = vld [vmem:[#allocation2 + $0x84] sm:$0xff]  }
  0xe1   : > { %v6856_v14 = vor.u32 %v6855_v63, %v6854_v1  ;;  %9786 = vst [vmem:[#allocation15_spill] sm:$0xff] %v8016_v52  ;;  %v2508_v59 = vld [vmem:[#allocation2 + $0x8c] sm:$0x1] }
  0xe2   : > { %1377 = vrot.lane.b32.xlu0 %v1338_v17, %s7208_s25  ;;  %v1945_v17 = vshll.u32 %v7962_v22, 16  ;;  %v7110_v22 = vld [vmem:[#allocation2 + $0x84] sm:$0xe]  ;;  %v8018_v13 = vor.u32 %v1959_v32, %v1955_v34  ;;  %v2636_v41 = vunpack.c.l.b16 %v2508_v59  ;;  %v2637_v34 = vunpack.c.l.b16 %v2509_v10  ;;  %v6882_v32 = vld [vmem:[#allocation2 + $0x78] sm:$0xf0] }
  0xe3   : > { %2028 = vrot.lane.b32.xlu1 %v1917_v54, %s7207_s24  ;;  %2160 = vrot.lane.b32.xlu2 %v2123_v7, %s7208_s25  ;;  %v7993_v54 = vld [vmem:[#allocation2 + $0x9c] sm:$0xff]   ;;  %v2956_v10 = vrot.slane %v7979_v46, 1 }
  0xe4   : > { %v7977_v30 = vpop.permute.xlu0 %2979  ;;  %9784 = vst [vmem:[#allocation13_spill] sm:$0xff] %v7993_v54  ;;  %v1947_v20 = vrot.slane %v1945_v17, 1  ;;  %v1952_v17 = vrot.slane %v1950_v3, 1 }
  0xe5   : > { %v7981_v24 = vpop.permute.xlu1 %1236  ;;  %v7991_v51 = vpop.permute.xlu2 %1367 }
  0xe9   : > { %6486 = vmatmul.msk.bf16.gmra.mxu2 %vm1472_vm14, %v1454_v8  ;;  %v1948_v8 = vor.u32 %v1947_v20, %v1943_v16  ;;  %v1423_v16 = vsel %vm1395_vm12, %v7464_v40, %v7874_v55 }
  0xea   : > { %2865 = vrot.lane.b32.xlu0 %v2754_v19, %s7207_s24  ;;  %v1802_v19 = vunpack.c.l.b16 %v1674_v45  ;;  %v2127_v45 = vrot.slane %v6856_v14, 1  ;;  %v1456_v55 = vsel %vm1428_vm13, %v1423_v16, %v7837_v43  ;;  %v7006_v43 = vld [vmem:[#allocation2] sm:$0xff]  }
  0xeb   : > { %2993 = vrot.lane.b32.xlu1 %v2954_v5, %s7208_s25  ;;  %2156 = vrot.lane.b32.xlu2 %v2117_v21, %s7208_s25  ;;  %v2766_v5 = vsel %vm1041_vm10, %v7932_v12, %v2765_v61  ;;  %v1964_v21 = vrot.slane %v1962_v47, 1  ;;  %v1953_v20 = vsel %vm1041_vm10, %v1948_v8, %v1952_v17  ;;  %v1969_v12 = vshll.u32 %v7993_v54, 16  ;;  %v6883_v47 = vld [vmem:[#allocation2 + $0x78] sm:$0xe] }
  0xec   : > { %v8005_v7 = vpop.permute.xlu0 %2016  ;;  %v8025_v3 = vpack.c.b16 %v1802_v19, %v1802_v19  ;;  %v2128_v61 = vrot.slane %v1817_v48, 1  ;;  %v6884_v63 = vor.u32 %v6883_v47, %v6882_v32  ;;  %v1967_v8 = vshrl.u32 %v7993_v54, 16  ;;  %v6885_v32 = vld [vmem:[#allocation2 + $0x90] sm:$0xf0] }
  0xed   : > { %v8008_v57 = vpop.permute.xlu1 %2144  ;;  %v8012_v29 = vpop.permute.xlu2 %2855  ;;  %v1965_v40 = vsel %vm1041_vm10, %v8018_v13, %v1964_v21  ;;  %v1971_v17 = vrot.slane %v1969_v12, 1  ;;  %v8044_v21 = vpack.c.b16 %v2637_v34, %v2637_v34  ;;  %v1397_v16 = vsel %vm1395_vm12, %v7006_v43, %v7938_v25  ;;  %v1675_v34 = vld [vmem:[#allocation2 + $0xb0] sm:$0x1] }
  0xee   : > { %9785 = vst [vmem:[#allocation14_spill] sm:$0xff] %v8012_v29  ;;  %v1974_v19 = vshll.u32 %v8025_v3, 16  ;;  %v2955_v14 = vrot.slane %v6884_v63, 1  ;;  %v2129_v59 = vsel %vm1314_vm9, %v2127_v45, %v2128_v61  ;;  %v1430_v25 = vsel %vm1428_vm13, %v1397_v16, %v7885_v6  ;;  %v6494_v63 = vld [vmem:[%s9751_s1 + $0x8] sm:$0xf] }
  0xef   : > { %v1972_v12 = vor.u32 %v1971_v17, %v1967_v8  ;;  %v2787_v61 = vshll.u32 %v8044_v21, 16  ;;  %6474 = vmatmul.msk.bf16.vlgmr.msra.gmra.mxu0 %vm1472_vm14, %v1430_v25  ;;  %v7007_v8 = vld [vmem:[#allocation2 + $0xa8] sm:$0xff]  }
  0xf0   : > { %v2957_v46 = vsel %vm1314_vm9, %v2955_v14, %v2956_v10  ;;  %v1425_v17 = vsel %vm1395_vm12, %v7007_v8, %v7892_v37  ;;  %v6603_v10 = vld [vmem:[%s9751_s1 + $0x8] sm:$0x30]  ;;  %v8073_v14 = vld [vmem:[#allocation2 + $0x9c] sm:$0xf0]  ;;  %v1803_v8 = vunpack.c.l.b16 %v1675_v34 }
  0xf1   : > { %v2789_v25 = vrot.slane %v2787_v61, 1 }
  0xf2   : > { %2162 = vrot.lane.b32.xlu0 %v2126_v62, %s7208_s25  ;;  %v2652_v62 = vpack.c.b16 %v2636_v41, %v2636_v41  ;;  %v2770_v41 = vshll.u32 %v8016_v52, 16 }
  0xf3   : > { %2867 = vrot.lane.b32.xlu1 %v2766_v5, %s7207_s24  ;;  %2034 = vrot.lane.b32.xlu2 %v1953_v20, %s7207_s24  ;;  %v7111_v5 = vor.u32 %v7110_v22, %v7109_v36  ;;  %v1976_v20 = vrot.slane %v1974_v19, 1  ;;  %v2790_v61 = vsel %vm1041_vm10, %v8018_v13, %v2789_v25  ;;  %v8104_v13 = vld [vmem:[#allocation2 + $0xb4] sm:$0xf0] }
  0xf4   : > { %v8029_v23 = vpop.permute.xlu0 %2981  ;;  %v2959_v22 = vrot.slane %v2652_v62, 1  ;;  %v2772_v6 = vrot.slane %v2770_v41, 1  ;;  %v2775_v19 = vshll.u32 %v2652_v62, 16  ;;  %v2510_v62 = vld [vmem:[#allocation2 + $0xa4] sm:$0x1] }
  0xf5   : > { %v8031_v1 = vpop.permute.xlu1 %1238  ;;  %v8041_v48 = vpop.permute.xlu2 %1369  ;;  %v2958_v36 = vrot.slane %v7111_v5, 1  ;;  %v8071_v5 = vld [vmem:[#allocation2 + $0x9c] sm:$0xff]   ;;  %v1977_v43 = vsel %vm1041_vm10, %v1972_v12, %v1976_v20  ;;  %v2638_v20 = vunpack.c.l.b16 %v2510_v62  ;;  %v2175_v12 = vsel %vm1395_vm12, %v7570_v53, %v7957_v28 }
  0xf6   : > { %v2777_v37 = vrot.slane %v2775_v19, 1  ;;  %v8097_v53 = vpack.c.b16 %v1803_v8, %v1803_v8  ;;  %v6859_v28 = vor.u32 %v6858_v42, %v6857_v9  ;;  %v379_v9 = vld [vmem:[%s7274_s23 + $0xf8] sm:$0xff] }
  0xf7   : > { %v2960_v16 = vsel %vm1314_vm9, %v2958_v36, %v2959_v22  ;;  %v1458_v36 = vsel %vm1428_vm13, %v1425_v17, %v7905_v50  ;;  %v2131_v17 = vrot.slane %v8025_v3, 1 }
  0xf8   : > { %v2133_v25 = vrot.slane %v6859_v28, 1 }
  0xf9   : > { %6487 = vmatmul.msk.bf16.gmra.mxu2 %vm1472_vm14, %v1456_v55  ;;  %v6886_v55 = vld [vmem:[#allocation2 + $0x90] sm:$0xe] }
  0xfa   : > { %2036 = vrot.lane.b32.xlu0 %v1965_v40, %s7207_s24  ;;  %v2768_v40 = vshrl.u32 %v8016_v52, 16  ;;  %v6887_v41 = vor.u32 %v6886_v55, %v6885_v32  ;;  %v8093_v32 = vpack.c.b16 %v2638_v20, %v2638_v20  ;;  %v8102_v55 = vld [vmem:[#allocation2 + $0xb4] sm:$0xff]  }
  0xfb   : > { %2164 = vrot.lane.b32.xlu1 %v2129_v59, %s7208_s25  ;;  %2995 = vrot.lane.b32.xlu2 %v2957_v46, %s7208_s25  ;;  %v6495_v46 = vor.u32 %v6603_v10, %v6494_v63  ;;  %v342_v63 = vld [vmem:[#allocation2 + $0xc8] sm:$0x1]  ;;  %v1676_v10 = vld [vmem:[#allocation2 + $0xbc] sm:$0x1]  ;;  %v7116_v20 = vld [vmem:[#allocation2 + $0xb4] sm:$0xe] }
  0xfc   : > { %v8053_v45 = vpop.permute.xlu0 %2018  ;;  %v2773_v52 = vor.u32 %v2772_v6, %v2768_v40  ;;  %v2961_v34 = vrot.slane %v6887_v41, 1  ;;  %v2792_v6 = vshrl.u32 %v8071_v5, 16  ;;  %v2799_v42 = vshll.u32 %v8093_v32, 16 }
  0xfd   : > { %v8058_v47 = vpop.permute.xlu1 %2146  ;;  %v8075_v59 = vpop.permute.xlu2 %2857  ;;  %v2279_v54 = vsel %vm1505_vm11, %v6495_v46, 0  ;;  %v343_v3 = vsel %vm7260_vm4, 0, %v342_v63  ;;  %v378_v46 = vld [vmem:[%s7274_s23 + $0xf0] sm:$0xff] }
  0xfe   : > { %9787 = vst [vmem:[#allocation16_spill] sm:$0xff] %v8075_v59  ;;  %v2778_v29 = vsel %vm1041_vm10, %v2773_v52, %v2777_v37  ;;  %2288 = vmatpush.bf16.msra.mxu1 %v2279_v54  ;;  %v7113_v59 = vld [vmem:[#allocation2 + $0x9c] sm:$0xe]  ;;  %6989 = vmatpush.bf16.msra.mxu3 %v2279_v54  ;;  %v2962_v52 = vrot.slane %v8044_v21, 1  ;;  %v2794_v54 = vshll.u32 %v8071_v5, 16  ;;  %v2207_v21 = vsel %vm1428_vm13, %v2175_v12, %v7959_v33 }
  0xff   : > { %v7114_v50 = vor.u32 %v7113_v59, %v7995_v58  ;;  %v286_v59 = vld [vmem:[#allocation2 + $0xc0] sm:$0x1]  ;;  %v2134_v37 = vrot.slane %v8097_v53, 1  ;;  %v2801_v8 = vrot.slane %v2799_v42, 1  ;;  %344 = vst [vmem:[#allocation2 + $0xc8] sm:$0x1] %v343_v3  ;;  %v410_v12 = vpack.c.bf16 %v378_v46, %v378_v46 }
 0x100   : > { %v2796_v19 = vrot.slane %v2794_v54, 1  ;;  %v287_v33 = vsel %vm7250_vm2, 0, %v286_v59 }
 0x101   : > { %6496 = vmatmul.msk.bf16.vlgmr.msra.gmra.mxu1 %vm1472_vm14, %v2207_v21  ;;  %v2130_v58 = vrot.slane %v7114_v50, 1  ;;  %288 = vst [vmem:[#allocation2 + $0xc0] sm:$0x1] %v287_v33  ;;  %v1993_v50 = vshll.u32 %v8102_v55, 16  ;;  %v670_v28 = vshrl.u32 %v410_v12, 16  ;;  %v2135_v21 = vsel %vm1314_vm9, %v2133_v25, %v2134_v37  ;;  %v8138_v25 = vld [vmem:[#allocation2 + $0xa8] sm:$0xff]  }
 0x102   : > { %2997 = vrot.lane.b32.xlu0 %v2960_v16, %s7208_s25  ;;  %v1804_v16 = vunpack.c.l.b16 %v1676_v10  ;;  %v2797_v62 = vor.u32 %v2796_v19, %v2792_v6  ;;  %v673_v6 = vshll.u32 %v410_v12, 16 }
 0x103   : > { %2038 = vrot.lane.b32.xlu1 %v1977_v43, %s7207_s24  ;;  %2869 = vrot.lane.b32.xlu2 %v2778_v29, %s7207_s24  ;;  %v2963_v43 = vsel %vm1314_vm9, %v2961_v34, %v2962_v52  ;;  %v2132_v41 = vsel %vm1314_vm9, %v2130_v58, %v2131_v17  ;;  %v411_v34 = vpack.c.bf16 %v379_v9, %v379_v9  ;;  %v672_v17 = vrot.slane %v670_v28, 7 }
 0x104   : > { %v8088_v22 = vpop.permute.xlu0 %2983  ;;  %v1820_v52 = vpack.c.b16 %v1804_v16, %v1804_v16  ;;  %v1991_v58 = vshrl.u32 %v8102_v55, 16  ;;  %v1995_v19 = vrot.slane %v1993_v50, 1 }
 0x105   : > { %v8095_v40 = vpop.permute.xlu1 %1240  ;;  %v8112_v29 = vpop.permute.xlu2 %1371  ;;  %v678_v54 = vshrl.u32 %v411_v34, 16  ;;  %v681_v59 = vshll.u32 %v411_v34, 16  ;;  %v675_v16 = vor.u32 %v673_v6, %v672_v17  ;;  %v676_v33 = vrot.slane %v672_v17, 4 }
 0x106   : > { %v1998_v10 = vshll.u32 %v1820_v52, 16  ;;  %v2137_v50 = vrot.slane %v1820_v52, 1  ;;  %v1986_v17 = vshll.u32 %v8097_v53, 16 }
 0x107   : > { %v680_v42 = vrot.slane %v678_v54, 7  ;;  %v1979_v54 = vshrl.u32 %v8138_v25, 16 }
 0x108   : > { %v842_v46 = vld [vmem:[#allocation2 + $0xc0] sm:$0xf]  ;;  %v2000_v34 = vrot.slane %v1998_v10, 1 }
 0x109   : > { %6488 = vmatmul.msk.bf16.gmra.mxu2 %vm1472_vm14, %v1458_v36  ;;  %v685_v3 = vrot.slane %v680_v42, 4  ;;  %v683_v37 = vor.u32 %v681_v59, %v680_v42  ;;  %v843_v12 = vsel %vm7300_vm8, %v675_v16, %v842_v46 }
 0x10a   : > { %2871 = vrot.lane.b32.xlu0 %v2790_v61, %s7207_s24  ;;  %v2802_v61 = vsel %vm1041_vm10, %v2797_v62, %v2801_v8  ;;  %v1399_v62 = vsel %vm1395_vm12, %v7572_v56, %v7981_v24  ;;  %v1981_v8 = vshll.u32 %v8138_v25, 16  ;;  %844 = vst [vmem:[#allocation2 + $0xc0] sm:$0xf] %v843_v12 }
 0x10b   : > { %2999 = vrot.lane.b32.xlu1 %v2963_v43, %s7208_s25  ;;  %2166 = vrot.lane.b32.xlu2 %v2132_v41, %s7208_s25  ;;  %v7117_v43 = vor.u32 %v7116_v20, %v8104_v13  ;;  %v846_v41 = vld [vmem:[#allocation2 + $0xc8] sm:$0x1]  ;;  %v1996_v20 = vor.u32 %v1995_v19, %v1991_v58  ;;  %v684_v28 = vsel %vm7290_vm7, %v676_v33, %v683_v37  ;;  %v1988_v58 = vrot.slane %v1986_v17, 1 }
 0x10c   : > { %v8127_v36 = vpop.permute.xlu0 %2020  ;;  %v847_v13 = vsel %vm7250_vm2, %v685_v3, %v846_v41  ;;  %845 = vst.msk [vmem:[#allocation2 + $0xc4] sm:$0xf] %vm226_vm6, %v684_v28  ;;  %v1432_v52 = vsel %vm1428_vm13, %v1399_v62, %v7943_v31  ;;  %v7008_v31 = vld [vmem:[#allocation2 + $0x18] sm:$0xff]   ;;  %v2965_v17 = vrot.slane %v8093_v32, 1 }
 0x10d   : > { %v8129_v63 = vpop.permute.xlu1 %2148  ;;  %v8134_v9 = vpop.permute.xlu2 %2859  ;;  %v2136_v24 = vrot.slane %v7117_v43, 1  ;;  %848 = vst [vmem:[#allocation2 + $0xc8] sm:$0x1] %v847_v13  ;;  %v2001_v19 = vsel %vm1041_vm10, %v1996_v20, %v2000_v34  ;;  %6475 = vmatmul.msk.bf16.gmra.mxu0 %vm1472_vm14, %v1432_v52  ;;  %v7119_v20 = vld [vmem:[#allocation2 + $0x9c] sm:$0xe]  ;;  %v3012_v34 = vsel %vm1395_vm12, %v7008_v31, %v7914_v15 }
 0x10e   : > { %v2511_v52 = vld [vmem:[#allocation2 + $0xb0] sm:$0x1] }
 0x10f   : > { %v2138_v10 = vsel %vm1314_vm9, %v2136_v24, %v2137_v50 }
 0x112   : > { %2168 = vrot.lane.b32.xlu0 %v2135_v21, %s7208_s25  ;;  %v1983_v21 = vrot.slane %v1981_v8, 1 }
 0x113   : > { %2873 = vrot.lane.b32.xlu1 %v2802_v61, %s7207_s24  ;;  %v1427_v61 = vsel %vm1395_vm12, %v7504_v35, %v7864_v27  ;;  %v8176_v27 = vld [vmem:[#allocation2 + $0xc0] sm:$0xff]  }
 0x114   : > { %v8152_v56 = vpop.permute.xlu0 %2985  ;;  %v1984_v42 = vor.u32 %v1983_v21, %v1979_v54  ;;  %v1460_v53 = vsel %vm1428_vm13, %v1427_v61, %v7930_v26  ;;  %v2177_v26 = vsel %vm1395_vm12, %v7008_v31, %v8005_v7  ;;  %v1677_v16 = vld [vmem:[#allocation2 + $0xc8] sm:$0x1]  ;;  %v2005_v33 = vshll.u32 %v8176_v27, 16 }
 0x115   : > { %v8160_v6 = vpop.permute.xlu1 %1242  ;;  %v8171_v35 = vpop.permute.xlu2 %1373  ;;  %v1805_v46 = vunpack.c.l.b16 %v1677_v16  ;;  %v2003_v37 = vshrl.u32 %v8176_v27, 16  ;;  %v2209_v8 = vsel %vm1428_vm13, %v2177_v26, %v8008_v57  ;;  %v1401_v7 = vsel %vm1395_vm12, %v7008_v31, %v8031_v1 }
 0x116   : > { %v1989_v59 = vsel %vm1041_vm10, %v1984_v42, %v1988_v58  ;;  %v2007_v41 = vrot.slane %v2005_v33, 1  ;;  %6497 = vmatmul.msk.bf16.gmra.mxu1 %vm1472_vm14, %v2209_v8  ;;  %v1434_v54 = vsel %vm1428_vm13, %v1401_v7, %v7991_v51  ;;  %v7120_v1 = vor.u32 %v7119_v20, %v8073_v14  ;;  %v8213_v51 = vld [vmem:[%s9752_s2] ss:$0 sm:$0xff]  ;;  %v6860_v7 = vld [vmem:[#allocation2 + $0xc0] sm:$0xf0] }
 0x117   : > { %2040 = vrot.lane.b32.xlu2 %v1989_v59, %s7207_s24  ;;  %v1821_v62 = vpack.c.b16 %v1805_v46, %v1805_v46  ;;  %v3044_v61 = vsel %vm1428_vm13, %v3012_v34, %v7977_v30  ;;  %v2639_v58 = vunpack.c.l.b16 %v2511_v52  ;;  %v2179_v30 = vsel %vm1395_vm12, %v7652_v2, %v8053_v45 }
 0x118   : > { %v8191_v12 = vor.u32 %v2007_v41, %v2003_v37  ;;  %v2964_v15 = vrot.slane %v7120_v1, 1  ;;  %v2211_v33 = vsel %vm1428_vm13, %v2179_v30, %v8058_v47  ;;  %v1403_v2 = vsel %vm1395_vm12, %v7658_v11, %v8095_v40 }
 0x119   : > { %6489 = vmatmul.msk.bf16.gmra.mxu2 %vm1472_vm14, %v1460_v53  ;;  %v2010_v13 = vshll.u32 %v1821_v62, 16  ;;  %v8217_v32 = vpack.c.b16 %v2639_v58, %v2639_v58  ;;  %v3014_v37 = vsel %vm1395_vm12, %v7650_v60, %v7967_v38  ;;  %v1436_v47 = vsel %vm1428_vm13, %v1403_v2, %v8041_v48 }
 0x11a   : > { %2042 = vrot.lane.b32.xlu0 %v2001_v19, %s7207_s24  ;;  %v2966_v14 = vsel %vm1314_vm9, %v2964_v15, %v2965_v17  ;;  %v2140_v20 = vrot.slane %v1821_v62, 1  ;;  %v3046_v34 = vsel %vm1428_vm13, %v3014_v37, %v8029_v23  ;;  %v9788_v15 = vld [vmem:[#allocation14_spill] sm:$0xff] }
 0x11b   : > { %2170 = vrot.lane.b32.xlu1 %v2138_v10, %s7208_s25  ;;  %v2012_v28 = vrot.slane %v2010_v13, 1  ;;  %v2811_v26 = vshll.u32 %v8217_v32, 16  ;;  %v6861_v13 = vld [vmem:[#allocation2 + $0xc0] sm:$0xe] }
 0x11c   : > { %v8180_v43 = vpop.permute.xlu0 %2022 }
 0x11d   : > { %v8183_v3 = vpop.permute.xlu1 %2150  ;;  %v2862_v50 = vpop.permute.xlu2 %2861  ;;  %v2013_v21 = vsel %vm1041_vm10, %v8191_v12, %v2012_v28  ;;  %6476 = vmatmul.msk.bf16.gmra.mxu0 %vm1472_vm14, %v1434_v54  ;;  %v2813_v16 = vrot.slane %v2811_v26, 1 }
 0x11e   : > { %v3022_v46 = vsel %vm1395_vm12, %v7841_v44, %v2862_v50  ;;  %v7009_v50 = vld [vmem:[#allocation2 + $0x30] sm:$0xff]  }
 0x11f   : > { %3001 = vrot.lane.b32.xlu2 %v2966_v14, %s7208_s25  ;;  %v2814_v45 = vsel %vm1041_vm10, %v1984_v42, %v2813_v16  ;;  %v6862_v42 = vor.u32 %v6861_v13, %v6860_v7  ;;  %v2181_v28 = vsel %vm1395_vm12, %v7009_v50, %v8127_v36  ;;  %v3016_v52 = vsel %vm1395_vm12, %v7009_v50, %v9788_v15  ;;  %v9793_v7 = vld [vmem:[#allocation6_spill] sm:$0xff] }
 0x120   : > { %v2213_v17 = vsel %vm1428_vm13, %v2181_v28, %v8129_v63 }
 0x121   : > { %v2139_v38 = vrot.slane %v6862_v42, 1 }
 0x123   : > { %2044 = vrot.lane.b32.xlu1 %v2013_v21, %s7207_s24  ;;  %v2141_v48 = vsel %vm1314_vm9, %v2139_v38, %v2140_v20 }
 0x124   : > { %v8195_v24 = vpop.permute.xlu0 %2987 }
 0x125   : > { %v8199_v57 = vpop.permute.xlu1 %1244  ;;  %v8226_v59 = vpop.permute.xlu2 %1375 }
 0x126   : > { %6498 = vmatmul.msk.bf16.gmra.mxu1 %vm1472_vm14, %v2211_v33  ;;  %v1407_v13 = vsel %vm1395_vm12, %v9793_v7, %v8199_v57  ;;  %v6888_v57 = vld [vmem:[#allocation2 + $0xa8] sm:$0xf0] }
 0x127   : > { %2875 = vrot.lane.b32.xlu2 %v2814_v45, %s7207_s24  ;;  %v9790_v45 = vld [vmem:[#allocation9_spill] sm:$0xff] }
 0x129   : > { %6518 = vmatmul.msk.bf16.vlgmr.msrb.gmra.mxu2 %vm1472_vm14, %v3044_v61 }
 0x12c   : > { %v8222_v19 = vpop.permute.xlu0 %2024  ;;  %v1558_v53 = vpop.f32.mrf.mxu2 }
 0x12d   : > { %v8224_v10 = vpop.permute.xlu1 %2152  ;;  %v1559_v31 = vadd.f32 %v8213_v51, %v1558_v53  ;;  %v8254_v60 = vpop.permute.xlu2 %2026  ;;  %6477 = vmatmul.msk.bf16.gmra.mxu0 %vm1472_vm14, %v1436_v47  ;;  %v3048_v53 = vsel %vm1428_vm13, %v3016_v52, %v8088_v22 }
 0x12f   : > { %1614 = vst.msk [vmem:[#allocation3 + $0x80] sm:$0xff] %vm1395_vm12, %v1559_v31  ;;  %2172 = vrot.lane.b32.xlu2 %v2141_v48, %s7208_s25  ;;  %v1440_v48 = vsel %vm1428_vm13, %v1407_v13, %v8171_v35 }
 0x134   : > { %v2990_v41 = vpop.permute.xlu0 %2989  ;;  %v1560_v8 = vpop.f32.mrf.mxu2 }
 0x135   : > { %v8247_v11 = vsel %vm1428_vm13, %v3022_v46, %v2990_v41  ;;  %v8249_v40 = vpop.permute.xlu1 %1246  ;;  %v1561_v44 = vadd.f32 %v8213_v51, %v1560_v8  ;;  %v8272_v36 = vpop.permute.xlu2 %2991  ;;  %v9792_v8 = vld [vmem:[#allocation4_spill] sm:$0xff] }
 0x136   : > { %6499 = vmatmul.msk.bf16.gmra.mxu1 %vm1472_vm14, %v2213_v17 }
 0x137   : > { %1615 = vst.msk [vmem:[#allocation3 + $0x88] sm:$0xff] %vm1395_vm12, %v1561_v44 }
 0x139   : > { %6519 = vmatmul.msk.bf16.gmra.mxu2 %vm1472_vm14, %v3046_v34 }
 0x13c   : > { %v2031_v62 = vpop.permute.xlu0 %2030  ;;  %v1563_v54 = vpop.f32.mrf.mxu2 }
 0x13d   : > { %v2191_v23 = vsel %vm1395_vm12, %v7814_v18, %v2031_v62  ;;  %v2159_v21 = vpop.permute.xlu1 %2158  ;;  %v1564_v1 = vadd.f32 %v8213_v51, %v1563_v54  ;;  %v1405_v18 = vsel %vm1395_vm12, %v7009_v50, %v8160_v6  ;;  %v9789_v6 = vld [vmem:[#allocation5_spill] sm:$0xff]  ;;  %v2161_v16 = vpop.permute.xlu2 %2160  ;;  %v6889_v50 = vld [vmem:[#allocation2 + $0xa8] sm:$0xe]  ;;  %v2968_v62 = vrot.slane %v8217_v32, 1 }
 0x13e   : > { %v2223_v61 = vsel %vm1428_vm13, %v2191_v23, %v2159_v21  ;;  %v1438_v31 = vsel %vm1428_vm13, %v1405_v18, %v8112_v29  ;;  %v2183_v26 = vsel %vm1395_vm12, %v9789_v6, %v8180_v43  ;;  %v9791_v43 = vld [vmem:[#allocation16_spill] sm:$0xff]  ;;  %v6890_v28 = vor.u32 %v6889_v50, %v6888_v57  ;;  %v7010_v54 = vld [vmem:[#allocation2 + $0x48] sm:$0xff]  }
 0x13f   : > { %6504 = vmatmul.msk.bf16.vlgmr.msra.gmra.mxu3 %vm1472_vm14, %v2223_v61  ;;  %1616 = vst.msk [vmem:[#allocation3 + $0x90] sm:$0xff] %vm1395_vm12, %v1564_v1  ;;  %6478 = vmatmul.msk.bf16.gmra.mxu0 %vm1472_vm14, %v1438_v31  ;;  %v2215_v37 = vsel %vm1428_vm13, %v2183_v26, %v8183_v3  ;;  %v3018_v47 = vsel %vm1395_vm12, %v9792_v8, %v9791_v43  ;;  %v8346_v6 = vld [vmem:[#allocation2 + $0xb4] sm:$0xff]  }
 0x140   : > { %v3050_v38 = vsel %vm1428_vm13, %v3018_v47, %v8152_v56  ;;  %v2185_v23 = vsel %vm1395_vm12, %v7010_v54, %v8222_v19  ;;  %v2967_v21 = vrot.slane %v6890_v28, 1  ;;  %v9794_v19 = vld [vmem:[#allocation11_spill] sm:$0xff]  ;;  %v3020_v18 = vsel %vm1395_vm12, %v7010_v54, %v8134_v9  ;;  %v7121_v26 = vld [vmem:[#allocation2 + $0xb4] sm:$0xf0] }
 0x141   : > { %v2217_v32 = vsel %vm1428_vm13, %v2185_v23, %v8224_v10  ;;  %v9796_v28 = vld [vmem:[#allocation12_spill] sm:$0xff] }
 0x142   : > { %v2969_v35 = vsel %vm1314_vm9, %v2967_v21, %v2968_v62 }
 0x143   : > { %3003 = vrot.lane.b32.xlu0 %v2969_v35, %s7208_s25 }
 0x144   : > { %v8278_v14 = vpop.permute.xlu0 %2154  ;;  %v1565_v58 = vpop.f32.mrf.mxu2 }
 0x145   : > { %v8280_v63 = vpop.permute.xlu1 %2863  ;;  %v1566_v30 = vadd.f32 %v8213_v51, %v1565_v58  ;;  %v8312_v3 = vpop.permute.xlu2 %2156  ;;  %v1409_v58 = vsel %vm1395_vm12, %v7010_v54, %v8249_v40  ;;  %v2512_v40 = vld [vmem:[#allocation2 + $0xbc] sm:$0x1] }
 0x146   : > { %6500 = vmatmul.msk.bf16.gmra.mxu1 %vm1472_vm14, %v2215_v37  ;;  %v1442_v9 = vsel %vm1428_vm13, %v1409_v58, %v8226_v59  ;;  %v2816_v37 = vshrl.u32 %v8346_v6, 16 }
 0x147   : > { %1617 = vst.msk [vmem:[#allocation3 + $0x98] sm:$0xff] %vm1395_vm12, %v1566_v30 }
 0x149   : > { %6520 = vmatmul.msk.bf16.gmra.mxu2 %vm1472_vm14, %v3048_v53 }
 0x14c   : > { %v2033_v33 = vpop.permute.xlu0 %2032  ;;  %v1568_v2 = vpop.f32.mrf.mxu2 }
 0x14d   : > { %v2193_v46 = vsel %vm1395_vm12, %v9790_v45, %v2033_v33  ;;  %v8295_v22 = vpop.permute.xlu1 %1248  ;;  %v1569_v29 = vadd.f32 %v8213_v51, %v1568_v2  ;;  %v2035_v15 = vpop.permute.xlu2 %2034  ;;  %v7122_v2 = vld [vmem:[#allocation2 + $0xb4] sm:$0xe]  ;;  %v2640_v45 = vunpack.c.l.b16 %v2512_v40 }
 0x14e   : > { %v2225_v41 = vsel %vm1428_vm13, %v2193_v46, %v2161_v16  ;;  %v2195_v52 = vsel %vm1395_vm12, %v9794_v19, %v2035_v15  ;;  %v3052_v16 = vsel %vm1428_vm13, %v3020_v18, %v8195_v24  ;;  %v9795_v46 = vld [vmem:[#allocation7_spill] sm:$0xff]  ;;  %v7123_v43 = vor.u32 %v7122_v2, %v7121_v26  ;;  %v2513_v19 = vld [vmem:[#allocation2 + $0xc8] sm:$0x1] }
 0x14f   : > { %6505 = vmatmul.msk.bf16.gmra.mxu3 %vm1472_vm14, %v2225_v41  ;;  %1618 = vst.msk [vmem:[#allocation3 + $0xa0] sm:$0xff] %vm1395_vm12, %v1569_v29  ;;  %6479 = vmatmul.msk.bf16.gmra.mxu0 %vm1472_vm14, %v1440_v48  ;;  %v2187_v29 = vsel %vm1395_vm12, %v9795_v46, %v8254_v60  ;;  %v2656_v24 = vpack.c.b16 %v2640_v45, %v2640_v45  ;;  %v2818_v41 = vshll.u32 %v8346_v6, 16 }
 0x150   : > { %v2970_v13 = vrot.slane %v7123_v43, 1  ;;  %v2219_v60 = vsel %vm1428_vm13, %v2187_v29, %v8278_v14  ;;  %v9797_v14 = vld [vmem:[#allocation8_spill] sm:$0xff] }
 0x151   : > { %v2820_v47 = vrot.slane %v2818_v41, 1  ;;  %v2823_v7 = vshll.u32 %v2656_v24, 16  ;;  %v1411_v21 = vsel %vm1395_vm12, %v9797_v14, %v8295_v22  ;;  %v7011_v22 = vld [vmem:[#allocation2 + $0x60] sm:$0xff]  }
 0x152   : > { %v3024_v29 = vsel %vm1395_vm12, %v7011_v22, %v8280_v63  ;;  %v8421_v63 = vld [vmem:[#allocation2] sm:$0xff]  }
 0x153   : > { %v2821_v48 = vor.u32 %v2820_v47, %v2816_v37  ;;  %v2825_v57 = vrot.slane %v2823_v7, 1  ;;  %v3056_v47 = vsel %vm1428_vm13, %v3024_v29, %v8272_v36 }
 0x154   : > { %v8310_v44 = vpop.permute.xlu0 %1377  ;;  %v1570_v42 = vpop.f32.mrf.mxu2 }
 0x155   : > { %v8314_v20 = vpop.permute.xlu1 %2028  ;;  %v1571_v34 = vadd.f32 %v8213_v51, %v1570_v42  ;;  %v8363_v59 = vpop.permute.xlu2 %2995  ;;  %v2971_v42 = vrot.slane %v2656_v24, 1  ;;  %v2826_v23 = vsel %vm1041_vm10, %v2821_v48, %v2825_v57  ;;  %v1444_v15 = vsel %vm1428_vm13, %v1411_v21, %v8310_v44 }
 0x156   : > { %6501 = vmatmul.msk.bf16.gmra.mxu1 %vm1472_vm14, %v2217_v32  ;;  %2877 = vrot.lane.b32.xlu0 %v2826_v23, %s7207_s24  ;;  %v2189_v18 = vsel %vm1395_vm12, %v7011_v22, %v8314_v20  ;;  %v9798_v20 = vld [vmem:[#allocation13_spill] sm:$0xff] }
 0x157   : > { %1619 = vst.msk [vmem:[#allocation3 + $0xa8] sm:$0xff] %vm1395_vm12, %v1571_v34  ;;  %v2972_v50 = vsel %vm1314_vm9, %v2970_v13, %v2971_v42  ;;  %v3863_v13 = vld [vmem:[#allocation2 + $0x8] sm:$0x1] }
 0x158   : > { %3005 = vrot.lane.b32.xlu1 %v2972_v50, %s7208_s25  ;;  %v3991_v42 = vunpack.c.l.b16 %v3863_v13 }
 0x159   : > { %6521 = vmatmul.msk.bf16.gmra.mxu2 %vm1472_vm14, %v3050_v38 }
 0x15c   : > { %v8327_v56 = vpop.permute.xlu0 %2865  ;;  %v1573_v1 = vpop.f32.mrf.mxu2 }
 0x15d   : > { %v8330_v17 = vpop.permute.xlu1 %2993  ;;  %v1574_v61 = vadd.f32 %v8213_v51, %v1573_v1  ;;  %v8382_v32 = vpop.permute.xlu2 %2869 }
 0x15f   : > { %1620 = vst.msk [vmem:[#allocation3 + $0xb0] sm:$0xff] %vm1395_vm12, %v1574_v61  ;;  %6480 = vmatmul.msk.bf16.gmra.mxu0 %vm1472_vm14, %v1442_v9 }
 0x164   : > { %v2163_v30 = vpop.permute.xlu0 %2162  ;;  %v1575_v53 = vpop.f32.mrf.mxu2 }
 0x165   : > { %v2227_v31 = vsel %vm1428_vm13, %v2195_v52, %v2163_v30  ;;  %v1576_v10 = vadd.f32 %v8213_v51, %v1575_v53  ;;  %v8351_v33 = vpop.permute.xlu1 %2867  ;;  %v2641_v52 = vunpack.c.l.b16 %v2513_v19  ;;  %v2167_v2 = vpop.permute.xlu2 %2166  ;;  %v9799_v19 = vld [vmem:[#allocation10_spill] sm:$0xff] }
 0x166   : > { %6506 = vmatmul.msk.bf16.gmra.mxu3 %vm1472_vm14, %v2227_v31  ;;  %6502 = vmatmul.msk.bf16.gmra.mxu1 %vm1472_vm14, %v2219_v60  ;;  %v8427_v60 = vpack.c.b16 %v3991_v42, %v3991_v42 }
 0x167   : > { %1621 = vst.msk [vmem:[#allocation3 + $0xb8] sm:$0xff] %vm1395_vm12, %v1576_v10  ;;  %v8392_v30 = vpack.c.b16 %v2641_v52, %v2641_v52  ;;  %v3026_v52 = vsel %vm1395_vm12, %v9799_v19, %v8327_v56 }
 0x169   : > { %6522 = vmatmul.msk.bf16.gmra.mxu2 %vm1472_vm14, %v3052_v16  ;;  %v2835_v10 = vshll.u32 %v8392_v30, 16 }
 0x16b   : > { %v2837_v9 = vrot.slane %v2835_v10, 1 }
 0x16c   : > { %v1578_v8 = vpop.f32.mrf.mxu2  ;;  %v2037_v34 = vpop.permute.xlu0 %2036 }
 0x16d   : > { %v1579_v38 = vadd.f32 %v8213_v51, %v1578_v8  ;;  %v2197_v62 = vsel %vm1395_vm12, %v9796_v28, %v2037_v34  ;;  %v2165_v54 = vpop.permute.xlu1 %2164  ;;  %v1518_v58 = vpop.f32.mrf.mxu0  ;;  %v2838_v45 = vsel %vm1041_vm10, %v8191_v12, %v2837_v9  ;;  %v4024_v34 = vshrl.u32 %v8421_v63, 16 }
 0x16e   : > { %v2229_v1 = vsel %vm1428_vm13, %v2197_v62, %v2165_v54  ;;  %v1519_v53 = vadd.f32 %v8213_v51, %v1518_v58  ;;  %2879 = vrot.lane.b32.xlu1 %v2838_v45, %s7207_s24  ;;  %v4031_v62 = vshll.u32 %v8427_v60, 16 }
 0x16f   : > { %1622 = vst.msk [vmem:[#allocation3 + $0xc0] sm:$0xff] %vm1395_vm12, %v1579_v38  ;;  %6481 = vmatmul.msk.bf16.gmra.mxu0 %vm1472_vm14, %v1444_v15  ;;  %v4026_v38 = vshll.u32 %v8421_v63, 16 }
 0x170   : > { %1598 = vst.msk [vmem:[#allocation3] sm:$0xff] %vm1395_vm12, %v1519_v53  ;;  %v6891_v53 = vld [vmem:[#allocation2 + $0xc0] sm:$0xf0] }
 0x171   : > { %v4028_v48 = vrot.slane %v4026_v38, 1  ;;  %v2041_v54 = vpop.permute.xlu2 %2040 }
 0x173   : > { %v4029_v28 = vor.u32 %v4028_v48, %v4024_v34 }
 0x174   : > { %v1580_v35 = vpop.f32.mrf.mxu2  ;;  %v8395_v31 = vpop.permute.xlu0 %2997 }
 0x175   : > { %v1581_v61 = vadd.f32 %v8213_v51, %v1580_v35  ;;  %v2039_v26 = vpop.permute.xlu1 %2038  ;;  %v1520_v46 = vpop.f32.mrf.mxu0  ;;  %v2201_v35 = vsel %vm1395_vm12, %v8138_v25, %v2041_v54 }
 0x176   : > { %6507 = vmatmul.msk.bf16.gmra.mxu3 %vm1472_vm14, %v2229_v1  ;;  %v2199_v40 = vsel %vm1395_vm12, %v9798_v20, %v2039_v26  ;;  %v1521_v24 = vadd.f32 %v8213_v51, %v1520_v46  ;;  %v4033_v1 = vrot.slane %v4031_v62, 1  ;;  %v2974_v20 = vrot.slane %v8392_v30, 1 }
 0x177   : > { %1623 = vst.msk [vmem:[#allocation3 + $0xc8] sm:$0xff] %vm1395_vm12, %v1581_v61  ;;  %v2370_v41 = vld [vmem:[#allocation3] sm:$0xff] }
 0x178   : > { %1599 = vst.msk [vmem:[#allocation3 + $0x8] sm:$0xff] %vm1395_vm12, %v1521_v24  ;;  %v4034_v15 = vsel %vm1041_vm10, %v4029_v28, %v4033_v1  ;;  %v6901_v1 = vld [vmem:[#allocation2] sm:$0xf0] }
 0x179   : > { %6523 = vmatmul.msk.bf16.gmra.mxu2 %vm1472_vm14, %v8247_v11  ;;  %v2221_v11 = vsel %vm1428_vm13, %v2189_v18, %v8312_v3  ;;  %v2231_v3 = vsel %vm1428_vm13, %v2199_v40, %v2167_v2  ;;  %4215 = vrot.lane.b32.xlu2 %v4034_v15, %s7207_s24  ;;  %v8456_v2 = vpop.permute.xlu2 %3001  ;;  %v6902_v15 = vld [vmem:[#allocation2] sm:$0xe] }
 0x17a   : > { %6503 = vmatmul.msk.bf16.gmra.mxu1 %vm1472_vm14, %v2221_v11  ;;  %v3058_v11 = vsel %vm1428_vm13, %v3026_v52, %v8330_v17  ;;  %v6903_v19 = vor.u32 %v6902_v15, %v6901_v1  ;;  %v4296_v52 = vrot.slane %v8427_v60, 1 }
 0x17c   : > { %v1583_v44 = vpop.f32.mrf.mxu2  ;;  %v8416_v12 = vpop.permute.xlu0 %2871 }
 0x17d   : > { %v1584_v16 = vadd.f32 %v8213_v51, %v1583_v44  ;;  %v8429_v57 = vpop.permute.xlu1 %2999  ;;  %v6892_v44 = vld [vmem:[#allocation2 + $0xc0] sm:$0xe] }
 0x17e   : > { %v2290_v8 = vpop.f32.mrf.mxu1 }
 0x17f   : > { %1624 = vst.msk [vmem:[#allocation3 + $0xd0] sm:$0xff] %vm1395_vm12, %v1584_v16  ;;  %v2402_v7 = vadd.f32 %v2370_v41, %v2290_v8  ;;  %v2371_v50 = vld [vmem:[#allocation3 + $0x8] sm:$0xff]  ;;  %v6893_v16 = vor.u32 %v6892_v44, %v6891_v53  ;;  %v4295_v44 = vrot.slane %v6903_v19, 1 }
 0x181   : > { %2434 = vst.msk [vmem:[#allocation3] sm:$0xff] %vm1395_vm12, %v2402_v7  ;;  %v2973_v56 = vrot.slane %v6893_v16, 1  ;;  %v8472_v38 = vpop.permute.xlu2 %2875 }
 0x183   : > { %v2975_v40 = vsel %vm1314_vm9, %v2973_v56, %v2974_v20 }
 0x184   : > { %v1585_v37 = vpop.f32.mrf.mxu2  ;;  %v2169_v61 = vpop.permute.xlu0 %2168  ;;  %3007 = vrot.lane.b32.xlu2 %v2975_v40, %s7208_s25 }
 0x185   : > { %v1586_v43 = vadd.f32 %v8213_v51, %v1585_v37  ;;  %v2233_v22 = vsel %vm1428_vm13, %v2201_v35, %v2169_v61  ;;  %v8448_v9 = vpop.permute.xlu1 %2873 }
 0x186   : > { %6508 = vmatmul.msk.bf16.gmra.mxu3 %vm1472_vm14, %v2231_v3  ;;  %v2292_v14 = vpop.f32.mrf.mxu1 }
 0x187   : > { %1625 = vst.msk [vmem:[#allocation3 + $0xd8] sm:$0xff] %vm1395_vm12, %v1586_v43  ;;  %v2403_v21 = vadd.f32 %v2371_v50, %v2292_v14  ;;  %v7012_v43 = vld [vmem:[#allocation2 + $0x78] sm:$0xff]  }
 0x188   : > { %v3028_v8 = vsel %vm1395_vm12, %v7012_v43, %v8351_v33  ;;  %v3207_v62 = vld [vmem:[#allocation3] sm:$0xff] }
 0x189   : > { %6524 = vmatmul.msk.bf16.gmra.mxu2 %vm1472_vm14, %v3056_v47  ;;  %2435 = vst.msk [vmem:[#allocation3 + $0x8] sm:$0xff] %vm1395_vm12, %v2403_v21  ;;  %v2173_v61 = vpop.permute.xlu2 %2172 }
 0x18a   : > { %v1523_v58 = vpop.f32.mrf.mxu0 }
 0x18b   : > { %v1524_v26 = vadd.f32 %v8213_v51, %v1523_v58 }
 0x18c   : > { %v1588_v36 = vpop.f32.mrf.mxu2  ;;  %v2043_v45 = vpop.permute.xlu0 %2042 }
 0x18d   : > { %v1589_v23 = vadd.f32 %v8213_v51, %v1588_v36  ;;  %1600 = vst.msk [vmem:[#allocation3 + $0x10] sm:$0xff] %vm1395_vm12, %v1524_v26  ;;  %v2203_v24 = vsel %vm1395_vm12, %v8102_v55, %v2043_v45  ;;  %v2171_v37 = vpop.permute.xlu1 %2170  ;;  %v3060_v55 = vsel %vm1428_vm13, %v3028_v8, %v8363_v59  ;;  %v3719_v8 = vld [vmem:[#allocation2 + $0xc] sm:$0xf] }
 0x18e   : > { %v2235_v47 = vsel %vm1428_vm13, %v2203_v24, %v2171_v37 }
 0x18f   : > { %1626 = vst.msk [vmem:[#allocation3 + $0xe0] sm:$0xff] %vm1395_vm12, %v1589_v23 }
 0x190   : > { %v3208_v26 = vld [vmem:[#allocation3 + $0x8] sm:$0xff] }
 0x192   : > { %v1525_v29 = vpop.f32.mrf.mxu0 }
 0x193   : > { %v1526_v3 = vadd.f32 %v8213_v51, %v1525_v29  ;;  %v2295_v30 = vpop.f32.mrf.mxu1 }
 0x194   : > { %v1590_v18 = vpop.f32.mrf.mxu2  ;;  %v2372_v41 = vld [vmem:[#allocation3 + $0x10] sm:$0xff] }
 0x195   : > { %v1591_v10 = vadd.f32 %v8213_v51, %v1590_v18  ;;  %1601 = vst.msk [vmem:[#allocation3 + $0x18] sm:$0xff] %vm1395_vm12, %v1526_v3  ;;  %v2404_v7 = vadd.f32 %v2372_v41, %v2295_v30  ;;  %v2045_v59 = vpop.permute.xlu1 %2044 }
 0x196   : > { %6509 = vmatmul.msk.bf16.gmra.mxu3 %vm1472_vm14, %v2233_v22  ;;  %v2205_v35 = vsel %vm1395_vm12, %v8176_v27, %v2045_v59  ;;  %v9800_v22 = vld [vmem:[#allocation15_spill] sm:$0xff]  ;;  %v4297_v27 = vsel %vm1314_vm9, %v4295_v44, %v4296_v52 }
 0x197   : > { %1627 = vst.msk [vmem:[#allocation3 + $0xe8] sm:$0xff] %vm1395_vm12, %v1591_v10  ;;  %v3030_v18 = vsel %vm1395_vm12, %v9800_v22, %v8382_v32  ;;  %v2237_v58 = vsel %vm1428_vm13, %v2205_v35, %v2173_v61  ;;  %4343 = vrot.lane.b32.xlu0 %v4297_v27, %s7208_s25 }
 0x198   : > { %2436 = vst.msk [vmem:[#allocation3 + $0x10] sm:$0xff] %vm1395_vm12, %v2404_v7  ;;  %v3062_v20 = vsel %vm1428_vm13, %v3030_v18, %v8395_v31 }
 0x199   : > { %6525 = vmatmul.msk.bf16.gmra.mxu2 %vm1472_vm14, %v3058_v11 }
 0x19a   : > { %v1528_v34 = vpop.f32.mrf.mxu0 }
 0x19b   : > { %v2297_v48 = vpop.f32.mrf.mxu1  ;;  %v1529_v50 = vadd.f32 %v8213_v51, %v1528_v34 }
 0x19c   : > { %v1593_v17 = vpop.f32.mrf.mxu2  ;;  %v2373_v33 = vld [vmem:[#allocation3 + $0x18] sm:$0xff] }
 0x19d   : > { %v1594_v46 = vadd.f32 %v8213_v51, %v1593_v17  ;;  %v2405_v36 = vadd.f32 %v2373_v33, %v2297_v48  ;;  %1602 = vst.msk [vmem:[#allocation3 + $0x20] sm:$0xff] %vm1395_vm12, %v1529_v50  ;;  %v289_v33 = vld [vmem:[#allocation2 + $0xcc] sm:$0x1] }
 0x19e   : > { %v290_v59 = vsel %vm7250_vm2, 0, %v289_v33  ;;  %v8538_v33 = vsel %vm1395_vm12, %v8138_v25, %v8472_v38 }
 0x19f   : > { %1628 = vst.msk [vmem:[#allocation3 + $0xf0] sm:$0xff] %vm1395_vm12, %v1594_v46  ;;  %v3209_v29 = vld [vmem:[#allocation3 + $0x10] sm:$0xff] }
 0x1a0   : > { %2437 = vst.msk [vmem:[#allocation3 + $0x18] sm:$0xff] %vm1395_vm12, %v2405_v36  ;;  %v345_v36 = vld [vmem:[#allocation2 + $0xd4] sm:$0x1] }
 0x1a1   : > { %v346_v1 = vsel %vm7260_vm4, 0, %v345_v36  ;;  %291 = vst [vmem:[#allocation2 + $0xcc] sm:$0x1] %v290_v59  ;;  %v2388_v59 = vld [vmem:[#allocation3 + $0x90] sm:$0xff] }
 0x1a2   : > { %v1530_v23 = vpop.f32.mrf.mxu0  ;;  %347 = vst [vmem:[#allocation2 + $0xd4] sm:$0x1] %v346_v1 }
 0x1a3   : > { %v1531_v14 = vadd.f32 %v8213_v51, %v1530_v23  ;;  %v2300_v21 = vpop.f32.mrf.mxu1 }
 0x1a4   : > { %v1595_v13 = vpop.f32.mrf.mxu2  ;;  %v2374_v53 = vld [vmem:[#allocation3 + $0x20] sm:$0xff] }
 0x1a5   : > { %v1596_v42 = vadd.f32 %v8213_v51, %v1595_v13  ;;  %1603 = vst.msk [vmem:[#allocation3 + $0x28] sm:$0xff] %vm1395_vm12, %v1531_v14  ;;  %v2406_v16 = vadd.f32 %v2374_v53, %v2300_v21 }
 0x1a6   : > { %6510 = vmatmul.msk.bf16.gmra.mxu3 %vm1472_vm14, %v2235_v47 }
 0x1a7   : > { %1629 = vst.msk [vmem:[#allocation3 + $0xf8] sm:$0xff] %vm1395_vm12, %v1596_v42 }
 0x1a8   : > { %2438 = vst.msk [vmem:[#allocation3 + $0x20] sm:$0xff] %vm1395_vm12, %v2406_v16 }
 0x1a9   : > { %6526 = vmatmul.msk.bf16.gmra.mxu2 %vm1472_vm14, %v3060_v55 }
 0x1aa   : > { %v1533_v56 = vpop.f32.mrf.mxu0 }
 0x1ab   : > { %v2302_v40 = vpop.f32.mrf.mxu1  ;;  %v1534_v3 = vadd.f32 %v8213_v51, %v1533_v56  ;;  %v2387_v56 = vld [vmem:[#allocation3 + $0x88] sm:$0xff] }
 0x1ac   : > { %v3127_v28 = vpop.f32.mrf.mxu2  ;;  %v2375_v17 = vld [vmem:[#allocation3 + $0x28] sm:$0xff] }
 0x1ad   : > { %v3239_v54 = vadd.f32 %v3207_v62, %v3127_v28  ;;  %v2407_v45 = vadd.f32 %v2375_v17, %v2302_v40  ;;  %1604 = vst.msk [vmem:[#allocation3 + $0x30] sm:$0xff] %vm1395_vm12, %v1534_v3  ;;  %v2386_v28 = vld [vmem:[#allocation3 + $0x80] sm:$0xff]  ;;  %v3210_v62 = vld [vmem:[#allocation3 + $0x18] sm:$0xff]  ;;  %v7125_v17 = vld [vmem:[#allocation2 + $0xcc] sm:$0xe] }
 0x1ae   : > { %v8526_v3 = vld [vmem:[#allocation2 + $0xcc] sm:$0xff]  }
 0x1af   : > { %3271 = vst.msk [vmem:[#allocation3] sm:$0xff] %vm1395_vm12, %v3239_v54  ;;  %v7013_v54 = vld [vmem:[#allocation2 + $0x90] sm:$0xff]   ;;  %v2842_v1 = vshll.u32 %v8526_v3, 16 }
 0x1b0   : > { %2439 = vst.msk [vmem:[#allocation3 + $0x28] sm:$0xff] %vm1395_vm12, %v2407_v45  ;;  %v3032_v23 = vsel %vm1395_vm12, %v7013_v54, %v8416_v12 }
 0x1b1   : > { %v3064_v12 = vsel %vm1428_vm13, %v3032_v23, %v8429_v57 }
 0x1b2   : > { %v1535_v43 = vpop.f32.mrf.mxu0 }
 0x1b3   : > { %v2305_v42 = vpop.f32.mrf.mxu1  ;;  %v1536_v34 = vadd.f32 %v8213_v51, %v1535_v43 }
 0x1b4   : > { %v3129_v10 = vpop.f32.mrf.mxu2  ;;  %v2376_v61 = vld [vmem:[#allocation3 + $0x30] sm:$0xff] }
 0x1b5   : > { %v3240_v11 = vadd.f32 %v3208_v26, %v3129_v10  ;;  %1605 = vst.msk [vmem:[#allocation3 + $0x38] sm:$0xff] %vm1395_vm12, %v1536_v34  ;;  %v2408_v22 = vadd.f32 %v2376_v61, %v2305_v42 }
 0x1b6   : > { %6511 = vmatmul.msk.bf16.gmra.mxu3 %vm1472_vm14, %v2237_v58  ;;  %v3303_v60 = vld [vmem:[#allocation3] sm:$0xff]  ;;  %v3723_v58 = vld [vmem:[#allocation2 + $0x14] sm:$0x1] }
 0x1b7   : > { %v3335_v32 = vmax.f32 %v3303_v60, 0.0  ;;  %3272 = vst.msk [vmem:[#allocation3 + $0x8] sm:$0xff] %vm1395_vm12, %v3240_v11  ;;  %v3212_v54 = vld [vmem:[#allocation3 + $0x28] sm:$0xff] }
 0x1b8   : > { %2440 = vst.msk [vmem:[#allocation3 + $0x30] sm:$0xff] %vm1395_vm12, %v2408_v22 }
 0x1b9   : > { %v3367_v46 = vpack.c.bf16 %v3335_v32, %v3335_v32  ;;  %6527 = vmatmul.msk.bf16.gmra.mxu2 %vm1472_vm14, %v3062_v20  ;;  %v3034_v20 = vsel %vm1395_vm12, %v8071_v5, %v8448_v9  ;;  %v3211_v32 = vld [vmem:[#allocation3 + $0x20] sm:$0xff] }
 0x1bb   : > { %v3400_v31 = vshrl.u32 %v3367_v46, 16  ;;  %v3403_v37 = vshll.u32 %v3367_v46, 16  ;;  %v2307_v16 = vpop.f32.mrf.mxu1 }
 0x1bc   : > { %v3132_v30 = vpop.f32.mrf.mxu2  ;;  %v1538_v18 = vpop.f32.mrf.mxu0  ;;  %v2377_v40 = vld [vmem:[#allocation3 + $0x38] sm:$0xff] }
 0x1bd   : > { %v3402_v24 = vrot.slane %v3400_v31, 7  ;;  %v3241_v41 = vadd.f32 %v3209_v29, %v3132_v30  ;;  %v1539_v31 = vadd.f32 %v8213_v51, %v1538_v18  ;;  %v7124_v30 = vld [vmem:[#allocation2 + $0xcc] sm:$0xf0] }
 0x1be   : > { %v3304_v47 = vld [vmem:[#allocation3 + $0x8] sm:$0xff] }
 0x1bf   : > { %v3405_v7 = vor.u32 %v3403_v37, %v3402_v24  ;;  %v3336_v13 = vmax.f32 %v3304_v47, 0.0  ;;  %3273 = vst.msk [vmem:[#allocation3 + $0x10] sm:$0xff] %vm1395_vm12, %v3241_v41  ;;  %v3406_v44 = vrot.slane %v3402_v24, 4  ;;  %v2409_v37 = vadd.f32 %v2377_v40, %v2307_v16  ;;  %v3726_v47 = vld [vmem:[#allocation2 + $0x18] sm:$0xf] }
 0x1c0   : > { %1606 = vst.msk [vmem:[#allocation3 + $0x40] sm:$0xff] %vm1395_vm12, %v1539_v31 }
 0x1c1   : > { %v3720_v55 = vsel %vm7300_vm8, %v3405_v7, %v3719_v8  ;;  %v3368_v48 = vpack.c.bf16 %v3336_v13, %v3336_v13  ;;  %v2514_v8 = vld [vmem:[#allocation2 + $0xd4] sm:$0x1]  ;;  %2441 = vst.msk [vmem:[#allocation3 + $0x38] sm:$0xff] %vm1395_vm12, %v2409_v37  ;;  %v2844_v37 = vrot.slane %v2842_v1, 1 }
 0x1c2   : > { %3721 = vst [vmem:[#allocation2 + $0xc] sm:$0xf] %v3720_v55  ;;  %v2330_v50 = vpop.f32.mrf.mxu3  ;;  %v2642_v34 = vunpack.c.l.b16 %v2514_v8  ;;  %v7126_v55 = vor.u32 %v7125_v17, %v7124_v30  ;;  %v2389_v8 = vld [vmem:[#allocation3 + $0x98] sm:$0xff] }
 0x1c3   : > { %v3408_v14 = vshrl.u32 %v3368_v48, 16  ;;  %v2418_v21 = vadd.f32 %v2386_v28, %v2330_v50  ;;  %v3411_v19 = vshll.u32 %v3368_v48, 16  ;;  %v3066_v48 = vsel %vm1428_vm13, %v3034_v20, %v8456_v2  ;;  %v8542_v28 = vpop.f32.mrf.mxu1  ;;  %v3730_v20 = vld [vmem:[#allocation2 + $0x20] sm:$0x1] }
 0x1c4   : > { %v3134_v35 = vpop.f32.mrf.mxu2  ;;  %v1540_v43 = vpop.f32.mrf.mxu0  ;;  %v8546_v23 = vpack.c.b16 %v2642_v34, %v2642_v34  ;;  %v8548_v2 = vrot.slane %v7126_v55, 1  ;;  %v3213_v34 = vld [vmem:[#allocation3 + $0x30] sm:$0xff] }
 0x1c5   : > { %v3410_v15 = vrot.slane %v3408_v14, 7  ;;  %2450 = vst.msk [vmem:[#allocation3 + $0x80] sm:$0xff] %vm1395_vm12, %v2418_v21  ;;  %v3242_v52 = vadd.f32 %v3210_v62, %v3134_v35  ;;  %v1541_v42 = vadd.f32 %v8213_v51, %v1540_v43 }
 0x1c6   : > { %v3305_v53 = vld [vmem:[#allocation3 + $0x10] sm:$0xff] }
 0x1c7   : > { %v3413_v10 = vor.u32 %v3411_v19, %v3410_v15  ;;  %v3415_v4 = vrot.slane %v3410_v15, 4  ;;  %v3337_v26 = vmax.f32 %v3305_v53, 0.0  ;;  %3274 = vst.msk [vmem:[#allocation3 + $0x18] sm:$0xff] %vm1395_vm12, %v3242_v52 }
 0x1c8   : > { %1607 = vst.msk [vmem:[#allocation3 + $0x48] sm:$0xff] %vm1395_vm12, %v1541_v42 }
 0x1c9   : > { %v3724_v11 = vsel %vm7250_vm2, %v3415_v4, %v3723_v58  ;;  %v3369_v27 = vpack.c.bf16 %v3337_v26, %v3337_v26  ;;  %6528 = vmatmul.msk.bf16.gmra.mxu2 %vm1472_vm14, %v3064_v12  ;;  %v3414_v57 = vsel %vm7290_vm7, %v3406_v44, %v3413_v10  ;;  %v7186_v9 = vld [vmem:[#allocation2 + $0xc] sm:$0xe]  ;;  %v2977_v12 = vrot.slane %v8546_v23, 1 }
 0x1ca   : > { %3725 = vst [vmem:[#allocation2 + $0x14] sm:$0x1] %v3724_v11  ;;  %v2332_v60 = vpop.f32.mrf.mxu3  ;;  %v7189_v13 = vld [vmem:[#allocation2 + $0xc] sm:$0xe]  ;;  %v2840_v58 = vshrl.u32 %v8526_v3, 16 }
 0x1cb   : > { %v3417_v45 = vshrl.u32 %v3369_v27, 16  ;;  %v3420_v46 = vshll.u32 %v3369_v27, 16  ;;  %v2419_v29 = vadd.f32 %v2387_v56, %v2332_v60  ;;  %3722 = vst.msk [vmem:[#allocation2 + $0x10] sm:$0xf] %vm226_vm6, %v3414_v57 }
 0x1cc   : > { %v3137_v24 = vpop.f32.mrf.mxu2  ;;  %v1543_v57 = vpop.f32.mrf.mxu0 }
 0x1cd   : > { %v8528_v41 = vrot.slane %v3417_v45, 7  ;;  %2451 = vst.msk [vmem:[#allocation3 + $0x88] sm:$0xff] %vm1395_vm12, %v2419_v29  ;;  %v3243_v5 = vadd.f32 %v3211_v32, %v3137_v24 }
 0x1ce   : > { %v3306_v7 = vld [vmem:[#allocation3 + $0x18] sm:$0xff] }
 0x1cf   : > { %v3422_v36 = vor.u32 %v3420_v46, %v8528_v41  ;;  %v3338_v50 = vmax.f32 %v3306_v7, 0.0  ;;  %3275 = vst.msk [vmem:[#allocation3 + $0x20] sm:$0xff] %vm1395_vm12, %v3243_v5  ;;  %v3423_v62 = vrot.slane %v8528_v41, 4  ;;  %v2312_v41 = vpop.f32.mrf.mxu1  ;;  %v2378_v7 = vld [vmem:[#allocation3 + $0x40] sm:$0xff] }
 0x1d1   : > { %v3727_v25 = vsel %vm7300_vm8, %v3422_v36, %v3726_v47  ;;  %v3370_v38 = vpack.c.bf16 %v3338_v50, %v3338_v50  ;;  %v4638_v14 = vld [vmem:[#allocation2 + $0x14] sm:$0x1] }
 0x1d2   : > { %v3864_v21 = vld [vmem:[#allocation2 + $0x14] sm:$0x1]  ;;  %3728 = vst [vmem:[#allocation2 + $0x18] sm:$0xf] %v3727_v25  ;;  %v2335_v35 = vpop.f32.mrf.mxu3  ;;  %v8554_v61 = vld [vmem:[#allocation2 + $0xc] sm:$0xff]   ;;  %v4766_v19 = vunpack.c.l.b16 %v4638_v14  ;;  %v3004_v25 = vpop.permute.xlu0 %3003 }
 0x1d3   : > { %v7185_v15 = vld [vmem:[#allocation2 + $0xc] sm:$0xf0]  ;;  %v3992_v18 = vunpack.c.l.b16 %v3864_v21  ;;  %v3425_v53 = vshrl.u32 %v3370_v38, 16  ;;  %v3428_v44 = vshll.u32 %v3370_v38, 16  ;;  %v2420_v10 = vadd.f32 %v2388_v59, %v2335_v35 }
 0x1d4   : > { %v8556_v52 = vld [vmem:[#allocation2 + $0xc] sm:$0xff]   ;;  %v3139_v4 = vpop.f32.mrf.mxu2  ;;  %v4782_v26 = vpack.c.b16 %v4766_v19, %v4766_v19  ;;  %v7187_v56 = vor.u32 %v7186_v9, %v7185_v15  ;;  %v4801_v24 = vshll.u32 %v8554_v61, 16  ;;  %v4799_v55 = vshrl.u32 %v8554_v61, 16 }
 0x1d5   : > { %v7188_v22 = vld [vmem:[#allocation2 + $0xc] sm:$0xf0]  ;;  %v4008_v16 = vpack.c.b16 %v3992_v18, %v3992_v18  ;;  %v3427_v11 = vrot.slane %v3425_v53, 7  ;;  %2452 = vst.msk [vmem:[#allocation3 + $0x90] sm:$0xff] %vm1395_vm12, %v2420_v10  ;;  %v3244_v27 = vadd.f32 %v3212_v54, %v3139_v4  ;;  %v2410_v35 = vadd.f32 %v2378_v7, %v8542_v28  ;;  %v2379_v53 = vld [vmem:[#allocation3 + $0x48] sm:$0xff] }
 0x1d6   : > { %v3307_v60 = vld [vmem:[#allocation3 + $0x20] sm:$0xff]  ;;  %v5071_v32 = vrot.slane %v4782_v26, 1  ;;  %v7190_v40 = vor.u32 %v7189_v13, %v7188_v22  ;;  %v5070_v31 = vrot.slane %v7187_v56, 1  ;;  %v4803_v36 = vrot.slane %v4801_v24, 1  ;;  %v3733_v10 = vld [vmem:[#allocation2 + $0x24] sm:$0xf] }
 0x1d7   : > { %v4299_v17 = vrot.slane %v4008_v16, 1  ;;  %v3430_v45 = vor.u32 %v3428_v44, %v3427_v11  ;;  %v3432_v46 = vrot.slane %v3427_v11, 4  ;;  %v3339_v29 = vmax.f32 %v3307_v60, 0.0  ;;  %3276 = vst.msk [vmem:[#allocation3 + $0x28] sm:$0xff] %vm1395_vm12, %v3244_v27  ;;  %v1545_v44 = vpop.f32.mrf.mxu0 }
 0x1d8   : > { %v4298_v30 = vrot.slane %v7190_v40, 1  ;;  %v5072_v47 = vsel %vm1314_vm9, %v5070_v31, %v5071_v32  ;;  %v4806_v50 = vshll.u32 %v4782_v26, 16  ;;  %v4804_v14 = vor.u32 %v4803_v36, %v4799_v55  ;;  %2442 = vst.msk [vmem:[#allocation3 + $0x40] sm:$0xff] %vm1395_vm12, %v2410_v35  ;;  %v3737_v35 = vld [vmem:[#allocation2 + $0x2c] sm:$0x1] }
 0x1d9   : > { %v3431_v5 = vsel %vm7290_vm7, %v3423_v62, %v3430_v45  ;;  %v3731_v9 = vsel %vm7250_vm2, %v3432_v46, %v3730_v20  ;;  %v3371_v43 = vpack.c.bf16 %v3339_v29, %v3339_v29  ;;  %6529 = vmatmul.msk.bf16.gmra.mxu2 %vm1472_vm14, %v3066_v48  ;;  %5118 = vrot.lane.b32.xlu0 %v5072_v47, %s7208_s25  ;;  %v4038_v48 = vshll.u32 %v8556_v52, 16  ;;  %v6965_v32 = vld [vmem:[#allocation2 + $0x18] sm:$0xe] }
 0x1da   : > { %3729 = vst.msk [vmem:[#allocation2 + $0x1c] sm:$0xf] %vm226_vm6, %v3431_v5  ;;  %v2337_v13 = vpop.f32.mrf.mxu3  ;;  %v4300_v42 = vsel %vm1314_vm9, %v4298_v30, %v4299_v17  ;;  %v4808_v21 = vrot.slane %v4806_v50, 1  ;;  %v4043_v1 = vshll.u32 %v4008_v16, 16  ;;  %v4036_v22 = vshrl.u32 %v8556_v52, 16  ;;  %v3214_v17 = vld [vmem:[#allocation3 + $0x38] sm:$0xff] }
 0x1db   : > { %3732 = vst [vmem:[#allocation2 + $0x20] sm:$0x1] %v3731_v9  ;;  %v3434_v62 = vshrl.u32 %v3371_v43, 16  ;;  %v3437_v59 = vshll.u32 %v3371_v43, 16  ;;  %v2421_v54 = vadd.f32 %v2389_v8, %v2337_v13  ;;  %4345 = vrot.lane.b32.xlu2 %v4300_v42, %s7208_s25  ;;  %v4040_v18 = vrot.slane %v4038_v48, 1 }
 0x1dc   : > { %v3142_v38 = vpop.f32.mrf.mxu2  ;;  %v4809_v26 = vsel %vm1041_vm10, %v4804_v14, %v4808_v21  ;;  %v4045_v11 = vrot.slane %v4043_v1, 1  ;;  %v2978_v28 = vsel %vm1314_vm9, %v8548_v2, %v2977_v12  ;;  %v1544_v16 = vadd.f32 %v8213_v51, %v1543_v57  ;;  %v6905_v40 = vld [vmem:[#allocation2 + $0x18] sm:$0xe] }
 0x1dd   : > { %v8576_v15 = vrot.slane %v3434_v62, 7  ;;  %2453 = vst.msk [vmem:[#allocation3 + $0x98] sm:$0xff] %vm1395_vm12, %v2421_v54  ;;  %v3245_v19 = vadd.f32 %v3213_v34, %v3142_v38  ;;  %4990 = vrot.lane.b32.xlu1 %v4809_v26, %s7207_s24  ;;  %v4041_v20 = vor.u32 %v4040_v18, %v4036_v22  ;;  %v8592_v60 = vsel %vm1428_vm13, %v8538_v33, %v3004_v25  ;;  %v8603_v9 = vld [vmem:[#allocation2 + $0x18] sm:$0xe]  ;;  %v2878_v34 = vpop.permute.xlu0 %2877 }
 0x1de   : > { %v3308_v4 = vld [vmem:[#allocation3 + $0x28] sm:$0xff]  ;;  %1608 = vst.msk [vmem:[#allocation3 + $0x50] sm:$0xff] %vm1395_vm12, %v1544_v16  ;;  %v2845_v2 = vor.u32 %v2844_v37, %v2840_v58  ;;  %v2847_v12 = vshll.u32 %v8546_v23, 16  ;;  %v2411_v57 = vadd.f32 %v2379_v53, %v2312_v41  ;;  %v1546_v45 = vadd.f32 %v8213_v51, %v1545_v44  ;;  %v2315_v41 = vpop.f32.mrf.mxu1 }
 0x1df   : > { %v3439_v27 = vor.u32 %v3437_v59, %v8576_v15  ;;  %v3340_v56 = vmax.f32 %v3308_v4, 0.0  ;;  %3277 = vst.msk [vmem:[#allocation3 + $0x30] sm:$0xff] %vm1395_vm12, %v3245_v19  ;;  %v3440_v46 = vrot.slane %v8576_v15, 4  ;;  %v4046_v31 = vsel %vm1041_vm10, %v4041_v20, %v4045_v11  ;;  %v1548_v21 = vpop.f32.mrf.mxu0 }
 0x1e0   : > { %v2849_v23 = vrot.slane %v2847_v12, 1  ;;  %2443 = vst.msk [vmem:[#allocation3 + $0x48] sm:$0xff] %vm1395_vm12, %v2411_v57  ;;  %v3038_v18 = vsel %vm1395_vm12, %v8346_v6, %v2878_v34  ;;  %v3215_v57 = vld [vmem:[#allocation3 + $0x40] sm:$0xff] }
 0x1e1   : > { %v3734_v29 = vsel %vm7300_vm8, %v3439_v27, %v3733_v10  ;;  %v3372_v33 = vpack.c.bf16 %v3340_v56, %v3340_v56  ;;  %v6964_v30 = vld [vmem:[#allocation2 + $0x18] sm:$0xf0]  ;;  %4217 = vrot.lane.b32.xlu0 %v4046_v31, %s7207_s24  ;;  %1609 = vst.msk [vmem:[#allocation3 + $0x58] sm:$0xff] %vm1395_vm12, %v1546_v45 }
 0x1e2   : > { %v6769_v24 = vld [vmem:[#allocation2 + $0x18] sm:$0xff]   ;;  %3735 = vst [vmem:[#allocation2 + $0x24] sm:$0xf] %v3734_v29  ;;  %v5474_v58 = vld [vmem:[#allocation2 + $0x20] sm:$0x1]  ;;  %v6966_v37 = vor.u32 %v6965_v32, %v6964_v30  ;;  %v2850_v36 = vsel %vm1041_vm10, %v2845_v2, %v2849_v23 }
 0x1e3   : > { %v6904_v5 = vld [vmem:[#allocation2 + $0x18] sm:$0xf0]  ;;  %v5635_v51 = vshrl.u32 %v6769_v24, 16  ;;  %v3442_v8 = vshrl.u32 %v3372_v33, 16  ;;  %v3445_v47 = vshll.u32 %v3372_v33, 16  ;;  %v5602_v7 = vunpack.c.l.b16 %v5474_v58 }
 0x1e4   : > { %v6906_v43 = vor.u32 %v6905_v40, %v6904_v5  ;;  %v5637_v13 = vshll.u32 %v6769_v24, 16  ;;  %v4639_v42 = vld [vmem:[#allocation2 + $0x20] sm:$0x1]  ;;  %v3144_v55 = vpop.f32.mrf.mxu2  ;;  %v5906_v50 = vrot.slane %v6966_v37, 1  ;;  %v6933_v1 = vld [vmem:[#allocation2 + $0x18] sm:$0xf0]  ;;  %v3006_v5 = vpop.permute.xlu1 %3005 }
 0x1e5   : > { %v4767_v62 = vunpack.c.l.b16 %v4639_v42  ;;  %v3865_v59 = vld [vmem:[#allocation2 + $0x20] sm:$0x1]  ;;  %v3444_v48 = vrot.slane %v3442_v8, 7  ;;  %v3246_v25 = vadd.f32 %v3214_v17, %v3144_v55  ;;  %v5618_v38 = vpack.c.b16 %v5602_v7, %v5602_v7  ;;  %3009 = vrot.lane.b32.xlu1 %v2978_v28, %s7208_s25  ;;  %v2380_v20 = vld [vmem:[#allocation3 + $0x50] sm:$0xff]  ;;  %v2390_v17 = vld [vmem:[#allocation3 + $0xa0] sm:$0xff] }
 0x1e6   : > { %v8609_v54 = vrot.slane %v6906_v43, 1  ;;  %v5639_v14 = vrot.slane %v5637_v13, 1  ;;  %v3309_v15 = vld [vmem:[#allocation3 + $0x30] sm:$0xff]  ;;  %v3993_v22 = vunpack.c.l.b16 %v3865_v59  ;;  %v6935_v53 = vor.u32 %v8603_v9, %v6933_v1 }
 0x1e7   : > { %v8611_v19 = vpack.c.b16 %v4767_v62, %v4767_v62  ;;  %v3447_v44 = vor.u32 %v3445_v47, %v3444_v48  ;;  %v3449_v10 = vrot.slane %v3444_v48, 4  ;;  %v3341_v4 = vmax.f32 %v3309_v15, 0.0  ;;  %3278 = vst.msk [vmem:[#allocation3 + $0x38] sm:$0xff] %vm1395_vm12, %v3246_v25  ;;  %v1550_v42 = vpop.f32.mrf.mxu0  ;;  %v3216_v15 = vld [vmem:[#allocation3 + $0x48] sm:$0xff] }
 0x1e8   : > { %v5907_v26 = vrot.slane %v5618_v38, 1  ;;  %v5640_v11 = vor.u32 %v5639_v14, %v5635_v51  ;;  %v5642_v16 = vshll.u32 %v5618_v38, 16  ;;  %v4009_v56 = vpack.c.b16 %v3993_v22, %v3993_v22  ;;  %v2381_v9 = vld [vmem:[#allocation3 + $0x58] sm:$0xff]  ;;  %v2317_v51 = vpop.f32.mrf.mxu1 }
 0x1e9   : > { %v4818_v27 = vshll.u32 %v8611_v19, 16  ;;  %v3448_v32 = vsel %vm7290_vm7, %v3440_v46, %v3447_v44  ;;  %v3738_v6 = vsel %vm7250_vm2, %v3449_v10, %v3737_v35  ;;  %v2340_v40 = vpop.f32.mrf.mxu3  ;;  %v3373_v2 = vpack.c.bf16 %v3341_v4, %v3341_v4  ;;  %6530 = vmatmul.msk.bf16.gmra.mxu2 %vm1472_vm14, %v8592_v60  ;;  %2881 = vrot.lane.b32.xlu0 %v2850_v36, %s7207_s24  ;;  %v3740_v60 = vld [vmem:[#allocation2 + $0x30] sm:$0xf]  ;;  %v7192_v13 = vld [vmem:[#allocation2 + $0x24] sm:$0xe]  ;;  %v4216_v4 = vpop.permute.xlu2 %4215 }
 0x1ea   : > { %v5908_v12 = vsel %vm1314_vm9, %v5906_v50, %v5907_v26  ;;  %3736 = vst.msk [vmem:[#allocation2 + $0x28] sm:$0xf] %vm226_vm6, %v3448_v32  ;;  %v2422_v28 = vadd.f32 %v2390_v17, %v2340_v40  ;;  %v5644_v45 = vrot.slane %v5642_v16, 1  ;;  %v4055_v29 = vshll.u32 %v4009_v56, 16  ;;  %v8641_v34 = vld [vmem:[#allocation2 + $0x24] sm:$0xe] }
 0x1eb   : > { %5954 = vrot.lane.b32.xlu2 %v5908_v12, %s7208_s25  ;;  %v4820_v46 = vrot.slane %v4818_v27, 1  ;;  %3739 = vst [vmem:[#allocation2 + $0x2c] sm:$0x1] %v3738_v6  ;;  %v3451_v33 = vshrl.u32 %v3373_v2, 16  ;;  %v3454_v31 = vshll.u32 %v3373_v2, 16  ;;  %v2412_v30 = vadd.f32 %v2380_v20, %v2315_v41  ;;  %v2391_v35 = vld [vmem:[#allocation3 + $0xa8] sm:$0xff] }
 0x1ec   : > { %v4302_v24 = vrot.slane %v4009_v56, 1  ;;  %2454 = vst.msk [vmem:[#allocation3 + $0xa0] sm:$0xff] %vm1395_vm12, %v2422_v28  ;;  %v3147_v23 = vpop.f32.mrf.mxu2  ;;  %v5645_v58 = vsel %vm1041_vm10, %v5640_v11, %v5644_v45  ;;  %v4057_v37 = vrot.slane %v4055_v29, 1  ;;  %v8638_v41 = vld [vmem:[%s9752_s2] ss:$0 sm:$0xff]  ;;  %v8644_v36 = vsel %vm1428_vm13, %v3038_v18, %v3006_v5 }
 0x1ed   : > { %v8631_v43 = vrot.slane %v3451_v33, 7  ;;  %v3247_v8 = vadd.f32 %v3215_v57, %v3147_v23  ;;  %v4821_v47 = vsel %vm1041_vm10, %v5640_v11, %v4820_v46  ;;  %2444 = vst.msk [vmem:[#allocation3 + $0x50] sm:$0xff] %vm1395_vm12, %v2412_v30  ;;  %v1549_v7 = vadd.f32 %v8638_v41, %v1548_v21  ;;  %v8647_v48 = vld [vmem:[#allocation2 + $0x24] sm:$0xe]  ;;  %5826 = vrot.lane.b32.xlu1 %v5645_v58, %s7207_s24  ;;  %v3744_v33 = vld [vmem:[#allocation2 + $0x38] sm:$0x1] }
 0x1ee   : > { %v3310_v55 = vld [vmem:[#allocation3 + $0x38] sm:$0xff]  ;;  %v5073_v50 = vrot.slane %v6935_v53, 1  ;;  %v5074_v62 = vrot.slane %v8611_v19, 1  ;;  %v2413_v59 = vadd.f32 %v2381_v9, %v2317_v51  ;;  %v4058_v14 = vsel %vm1041_vm10, %v5640_v11, %v4057_v37 }
 0x1ef   : > { %v3456_v25 = vor.u32 %v3454_v31, %v8631_v43  ;;  %v3342_v38 = vmax.f32 %v3310_v55, 0.0  ;;  %3279 = vst.msk [vmem:[#allocation3 + $0x40] sm:$0xff] %vm1395_vm12, %v3247_v8  ;;  %v4303_v21 = vsel %vm1314_vm9, %v8609_v54, %v4302_v24  ;;  %v3457_v1 = vrot.slane %v8631_v43, 4  ;;  %v2392_v55 = vld [vmem:[#allocation3 + $0xb0] sm:$0xff] }
 0x1f0   : > { %1610 = vst.msk [vmem:[#allocation3 + $0x60] sm:$0xff] %vm1395_vm12, %v1549_v7  ;;  %v5075_v19 = vsel %vm1314_vm9, %v5073_v50, %v5074_v62  ;;  %v1551_v22 = vadd.f32 %v8638_v41, %v1550_v42  ;;  %v8676_v32 = vsel %vm1395_vm12, %v8421_v63, %v4216_v4  ;;  %v2320_v5 = vpop.f32.mrf.mxu1  ;;  %v1553_v4 = vpop.f32.mrf.mxu0 }
 0x1f1   : > { %v3741_v18 = vsel %vm7300_vm8, %v3456_v25, %v3740_v60  ;;  %v2342_v53 = vpop.f32.mrf.mxu3  ;;  %v3374_v44 = vpack.c.bf16 %v3342_v38, %v3342_v38  ;;  %2445 = vst.msk [vmem:[#allocation3 + $0x58] sm:$0xff] %vm1395_vm12, %v2413_v59  ;;  %v8662_v10 = vld [vmem:[#allocation2 + $0x24] sm:$0xff]   ;;  %4992 = vrot.lane.b32.xlu0 %v4821_v47, %s7207_s24 }
 0x1f2   : > { %v7191_v54 = vld [vmem:[#allocation2 + $0x24] sm:$0xf0]  ;;  %3742 = vst [vmem:[#allocation2 + $0x30] sm:$0xf] %v3741_v18  ;;  %v2423_v56 = vadd.f32 %v2391_v35, %v2342_v53  ;;  %v5475_v20 = vld [vmem:[#allocation2 + $0x2c] sm:$0x1] }
 0x1f3   : > { %v8664_v26 = vld [vmem:[#allocation2 + $0x24] sm:$0xff]   ;;  %4219 = vrot.lane.b32.xlu2 %v4058_v14, %s7207_s24  ;;  %v3866_v6 = vld [vmem:[#allocation2 + $0x2c] sm:$0x1]  ;;  %v3459_v40 = vshrl.u32 %v3374_v44, 16  ;;  %v3462_v17 = vshll.u32 %v3374_v44, 16  ;;  %v5603_v2 = vunpack.c.l.b16 %v5475_v20  ;;  %1611 = vst.msk [vmem:[#allocation3 + $0x68] sm:$0xff] %vm1395_vm12, %v1551_v22  ;;  %v7193_v28 = vor.u32 %v7192_v13, %v7191_v54 }
 0x1f4   : > { %v8666_v11 = vld [vmem:[#allocation2 + $0x24] sm:$0xf0]  ;;  %2455 = vst.msk [vmem:[#allocation3 + $0xa8] sm:$0xff] %vm1395_vm12, %v2423_v56  ;;  %v3149_v12 = vpop.f32.mrf.mxu2  ;;  %v3994_v57 = vunpack.c.l.b16 %v3866_v6  ;;  %v5647_v63 = vshrl.u32 %v8662_v10, 16  ;;  %v5649_v24 = vshll.u32 %v8662_v10, 16  ;;  %v4060_v8 = vshrl.u32 %v8664_v26, 16 }
 0x1f5   : > { %v8668_v16 = vld [vmem:[#allocation2 + $0x24] sm:$0xff]   ;;  %v3461_v45 = vrot.slane %v3459_v40, 7  ;;  %v3248_v46 = vadd.f32 %v3216_v15, %v3149_v12  ;;  %v5619_v29 = vpack.c.b16 %v5603_v2, %v5603_v2  ;;  %v5909_v30 = vrot.slane %v7193_v28, 1  ;;  %4347 = vrot.lane.b32.xlu1 %v4303_v21, %s7208_s25  ;;  %v4640_v59 = vld [vmem:[#allocation2 + $0x2c] sm:$0x1] }
 0x1f6   : > { %v8670_v27 = vld [vmem:[#allocation2 + $0x24] sm:$0xf0]  ;;  %v3311_v31 = vld [vmem:[#allocation3 + $0x40] sm:$0xff]  ;;  %v5651_v37 = vrot.slane %v5649_v24, 1  ;;  %v4010_v43 = vpack.c.b16 %v3994_v57, %v3994_v57  ;;  %v4768_v54 = vunpack.c.l.b16 %v4640_v59  ;;  %v7129_v6 = vor.u32 %v8641_v34, %v8666_v11  ;;  %v2880_v57 = vpop.permute.xlu1 %2879 }
 0x1f7   : > { %v3464_v9 = vor.u32 %v3462_v17, %v3461_v45  ;;  %v3466_v60 = vrot.slane %v3461_v45, 4  ;;  %v3343_v23 = vmax.f32 %v3311_v31, 0.0  ;;  %3280 = vst.msk [vmem:[#allocation3 + $0x48] sm:$0xff] %vm1395_vm12, %v3248_v46  ;;  %v5910_v58 = vrot.slane %v5619_v29, 1  ;;  %v2382_v47 = vld [vmem:[#allocation3 + $0x60] sm:$0xff]  ;;  %v3217_v38 = vld [vmem:[#allocation3 + $0x50] sm:$0xff]  ;;  %v3008_v31 = vpop.permute.xlu2 %3007 }
 0x1f8   : > { %v5654_v51 = vshll.u32 %v5619_v29, 16  ;;  %v5652_v14 = vor.u32 %v5651_v37, %v5647_v63  ;;  %v4067_v22 = vshll.u32 %v4010_v43, 16  ;;  %v2414_v18 = vadd.f32 %v2382_v47, %v2320_v5  ;;  %v3747_v40 = vld [vmem:[#allocation2 + $0x3c] sm:$0xf]  ;;  %v3218_v11 = vld [vmem:[#allocation3 + $0x58] sm:$0xff] }
 0x1f9   : > { %v3465_v7 = vsel %vm7290_vm7, %v3457_v1, %v3464_v9  ;;  %v3745_v13 = vsel %vm7250_vm2, %v3466_v60, %v3744_v33  ;;  %v2345_v42 = vpop.f32.mrf.mxu3  ;;  %v3375_v50 = vpack.c.bf16 %v3343_v23, %v3343_v23  ;;  %6531 = vmatmul.msk.bf16.gmra.mxu2 %vm1472_vm14, %v8644_v36  ;;  %v5911_v62 = vsel %vm1314_vm9, %v5909_v30, %v5910_v58  ;;  %v2393_v30 = vld [vmem:[#allocation3 + $0xb8] sm:$0xff]  ;;  %v2322_v9 = vpop.f32.mrf.mxu1 }
 0x1fa   : > { %3743 = vst.msk [vmem:[#allocation2 + $0x34] sm:$0xf] %vm226_vm6, %v3465_v7  ;;  %v2424_v25 = vadd.f32 %v2392_v55, %v2345_v42  ;;  %v5656_v21 = vrot.slane %v5654_v51, 1  ;;  %v4062_v1 = vshll.u32 %v8664_v26, 16  ;;  %v4069_v20 = vrot.slane %v4067_v22, 1  ;;  %v7015_v51 = vld [vmem:[#allocation2 + $0xc0] sm:$0xff]  }
 0x1fb   : > { %5120 = vrot.lane.b32.xlu2 %v5075_v19, %s7208_s25  ;;  %3746 = vst [vmem:[#allocation2 + $0x38] sm:$0x1] %v3745_v13  ;;  %v3468_v35 = vshrl.u32 %v3375_v50, 16  ;;  %v3471_v15 = vshll.u32 %v3375_v50, 16  ;;  %v8703_v12 = vpack.c.b16 %v4768_v54, %v4768_v54  ;;  %v4305_v28 = vrot.slane %v4010_v43, 1 }
 0x1fc   : > { %2456 = vst.msk [vmem:[#allocation3 + $0xb0] sm:$0xff] %vm1395_vm12, %v2424_v25  ;;  %v3152_v36 = vpop.f32.mrf.mxu2  ;;  %v5657_v53 = vsel %vm1041_vm10, %v5652_v14, %v5656_v21  ;;  %v4064_v44 = vrot.slane %v4062_v1, 1  ;;  %v4304_v33 = vrot.slane %v7129_v6, 1  ;;  %v4823_v63 = vshrl.u32 %v8668_v16, 16  ;;  %v6968_v7 = vld [vmem:[#allocation2 + $0x30] sm:$0xe] }
 0x1fd   : > { %v8697_v56 = vrot.slane %v3468_v35, 7  ;;  %v3249_v19 = vadd.f32 %v3217_v38, %v3152_v36  ;;  %5828 = vrot.lane.b32.xlu0 %v5657_v53, %s7207_s24  ;;  %2446 = vst.msk [vmem:[#allocation3 + $0x60] sm:$0xff] %vm1395_vm12, %v2414_v18  ;;  %5956 = vrot.lane.b32.xlu1 %v5911_v62, %s7208_s25  ;;  %v4825_v24 = vshll.u32 %v8668_v16, 16  ;;  %v4830_v5 = vshll.u32 %v8703_v12, 16  ;;  %v6536_v62 = vld [vmem:[%s9753_s3] sm:$0xf] }
 0x1fe   : > { %v3312_v17 = vld [vmem:[#allocation3 + $0x48] sm:$0xff]  ;;  %v4065_v2 = vor.u32 %v4064_v44, %v4060_v8  ;;  %v4306_v37 = vsel %vm1314_vm9, %v4304_v33, %v4305_v28  ;;  %v3040_v43 = vsel %vm1395_vm12, %v7015_v51, %v2880_v57  ;;  %v7132_v38 = vor.u32 %v8647_v48, %v8670_v27  ;;  %v6908_v51 = vld [vmem:[#allocation2 + $0x30] sm:$0xe] }
 0x1ff   : > { %v3473_v45 = vor.u32 %v3471_v15, %v8697_v56  ;;  %v3474_v46 = vrot.slane %v8697_v56, 4  ;;  %v3344_v29 = vmax.f32 %v3312_v17, 0.0  ;;  %3281 = vst.msk [vmem:[#allocation3 + $0x50] sm:$0xff] %vm1395_vm12, %v3249_v19  ;;  %v2383_v8 = vld [vmem:[#allocation3 + $0x68] sm:$0xff]  ;;  %v4827_v42 = vrot.slane %v4825_v24, 1 }
 0x200   : > { %v4070_v34 = vsel %vm1041_vm10, %v4065_v2, %v4069_v20  ;;  %v4832_v55 = vrot.slane %v4830_v5, 1  ;;  %v3072_v50 = vsel %vm1428_vm13, %v3040_v43, %v3008_v31  ;;  %v5077_v14 = vrot.slane %v8703_v12, 1  ;;  %v6605_v21 = vld [vmem:[%s9753_s3] sm:$0x30] }
 0x201   : > { %v3748_v60 = vsel %vm7300_vm8, %v3473_v45, %v3747_v40  ;;  %v2347_v23 = vpop.f32.mrf.mxu3  ;;  %v3376_v58 = vpack.c.bf16 %v3344_v29, %v3344_v29  ;;  %v6967_v47 = vld [vmem:[#allocation2 + $0x30] sm:$0xf0]  ;;  %v4828_v35 = vor.u32 %v4827_v42, %v4823_v63  ;;  %v1554_v15 = vadd.f32 %v8638_v41, %v1553_v4  ;;  %v3751_v20 = vld [vmem:[#allocation2 + $0x44] sm:$0x1]  ;;  %v1555_v4 = vpop.f32.mrf.mxu0 }
 0x202   : > { %3749 = vst [vmem:[#allocation2 + $0x3c] sm:$0xf] %v3748_v60  ;;  %v2425_v13 = vadd.f32 %v2393_v30, %v2347_v23  ;;  %v2415_v22 = vadd.f32 %v2383_v8, %v2322_v9  ;;  %v6537_v18 = vor.u32 %v6605_v21, %v6536_v62  ;;  %v5476_v36 = vld [vmem:[#allocation2 + $0x38] sm:$0x1]  ;;  %v5076_v54 = vrot.slane %v7132_v38, 1  ;;  %v6957_v48 = vld [vmem:[#allocation2 + $0x30] sm:$0xff]  }
 0x203   : > { %4221 = vrot.lane.b32.xlu2 %v4070_v34, %s7207_s24  ;;  %v3476_v59 = vshrl.u32 %v3376_v58, 16  ;;  %v3479_v25 = vshll.u32 %v3376_v58, 16  ;;  %v5604_v19 = vunpack.c.l.b16 %v5476_v36  ;;  %v3867_v27 = vld [vmem:[#allocation2 + $0x38] sm:$0x1]  ;;  %v4833_v40 = vsel %vm1041_vm10, %v4828_v35, %v4832_v55  ;;  %1612 = vst.msk [vmem:[#allocation3 + $0x70] sm:$0xff] %vm1395_vm12, %v1554_v15 }
 0x204   : > { %2457 = vst.msk [vmem:[#allocation3 + $0xb8] sm:$0xff] %vm1395_vm12, %v2425_v13  ;;  %v3154_v1 = vpop.f32.mrf.mxu2  ;;  %v4483_v17 = vsel %vm1505_vm11, %v6537_v18, 0  ;;  %v6969_v2 = vor.u32 %v6968_v7, %v6967_v47  ;;  %v5659_v12 = vshrl.u32 %v6957_v48, 16  ;;  %v5078_v29 = vsel %vm1314_vm9, %v5076_v54, %v5077_v14  ;;  %v4641_v63 = vld [vmem:[#allocation2 + $0x38] sm:$0x1] }
 0x205   : > { %v3478_v53 = vrot.slane %v3476_v59, 7  ;;  %v3250_v44 = vadd.f32 %v3218_v11, %v3154_v1  ;;  %4994 = vrot.lane.b32.xlu0 %v4833_v40, %s7207_s24  ;;  %4349 = vrot.lane.b32.xlu1 %v4306_v37, %s7208_s25  ;;  %2447 = vst.msk [vmem:[#allocation3 + $0x68] sm:$0xff] %vm1395_vm12, %v2415_v22  ;;  %v5620_v33 = vpack.c.b16 %v5604_v19, %v5604_v19  ;;  %v5661_v30 = vshll.u32 %v6957_v48, 16  ;;  %v2325_v11 = vpop.f32.mrf.mxu1  ;;  %v2394_v60 = vld [vmem:[#allocation3 + $0xc0] sm:$0xff]  ;;  %v6907_v37 = vld [vmem:[#allocation2 + $0x30] sm:$0xf0] }
 0x206   : > { %v3313_v6 = vld [vmem:[#allocation3 + $0x50] sm:$0xff]  ;;  %4492 = vmatpush.bf16.msrb.mxu3 %v4483_v17  ;;  %v5912_v31 = vrot.slane %v6969_v2, 1  ;;  %v3995_v34 = vunpack.c.l.b16 %v3867_v27  ;;  %v1556_v58 = vadd.f32 %v8638_v41, %v1555_v4  ;;  %v3219_v56 = vld [vmem:[#allocation3 + $0x60] sm:$0xff]  ;;  %v4769_v55 = vunpack.c.l.b16 %v4641_v63  ;;  %v6937_v14 = vld [vmem:[#allocation2 + $0x30] sm:$0xe] }
 0x207   : > { %v3481_v28 = vor.u32 %v3479_v25, %v3478_v53  ;;  %v3483_v57 = vrot.slane %v3478_v53, 4  ;;  %v3345_v45 = vmax.f32 %v3313_v6, 0.0  ;;  %3282 = vst.msk [vmem:[#allocation3 + $0x58] sm:$0xff] %vm1395_vm12, %v3250_v44  ;;  %v5913_v8 = vrot.slane %v5620_v33, 1  ;;  %v6936_v18 = vld [vmem:[#allocation2 + $0x30] sm:$0xf0] }
 0x208   : > { %v5666_v47 = vshll.u32 %v5620_v33, 16  ;;  %v4011_v42 = vpack.c.b16 %v3995_v34, %v3995_v34  ;;  %v6909_v38 = vor.u32 %v6908_v51, %v6907_v37  ;;  %1613 = vst.msk [vmem:[#allocation3 + $0x78] sm:$0xff] %vm1395_vm12, %v1556_v58  ;;  %v4785_v22 = vpack.c.b16 %v4769_v55, %v4769_v55  ;;  %v2395_v17 = vld [vmem:[#allocation3 + $0xc8] sm:$0xff]  ;;  %v6606_v51 = vld [vmem:[%s9753_s3 + $0x8] sm:$0x30] }
 0x209   : > { %v3482_v24 = vsel %vm7290_vm7, %v3474_v46, %v3481_v28  ;;  %v3752_v5 = vsel %vm7250_vm2, %v3483_v57, %v3751_v20  ;;  %v2350_v9 = vpop.f32.mrf.mxu3  ;;  %v3377_v23 = vpack.c.bf16 %v3345_v45, %v3345_v45  ;;  %6532 = vmatmul.msk.bf16.gmra.mxu2 %vm1472_vm14, %v3072_v50  ;;  %v5663_v46 = vrot.slane %v5661_v30, 1  ;;  %v3754_v50 = vld [vmem:[#allocation2 + $0x48] sm:$0xf]  ;;  %v7195_v48 = vld [vmem:[#allocation2 + $0x3c] sm:$0xe] }
 0x20a   : > { %3750 = vst.msk [vmem:[#allocation2 + $0x40] sm:$0xf] %vm226_vm6, %v3482_v24  ;;  %v2426_v43 = vadd.f32 %v2394_v60, %v2350_v9  ;;  %v5914_v62 = vsel %vm1314_vm9, %v5912_v31, %v5913_v8  ;;  %v5668_v25 = vrot.slane %v5666_v47, 1  ;;  %v4079_v35 = vshll.u32 %v4011_v42, 16  ;;  %v2384_v15 = vld [vmem:[#allocation3 + $0x70] sm:$0xff] }
 0x20b   : > { %5122 = vrot.lane.b32.xlu2 %v5078_v29, %s7208_s25  ;;  %3753 = vst [vmem:[#allocation2 + $0x44] sm:$0x1] %v3752_v5  ;;  %v3485_v7 = vshrl.u32 %v3377_v23, 16  ;;  %v3488_v13 = vshll.u32 %v3377_v23, 16  ;;  %v5664_v59 = vor.u32 %v5663_v46, %v5659_v12  ;;  %v2416_v44 = vadd.f32 %v2384_v15, %v2325_v11  ;;  %v6558_v23 = vld [vmem:[%s9753_s3 + $0x8] sm:$0xf] }
 0x20c   : > { %2458 = vst.msk [vmem:[#allocation3 + $0xc0] sm:$0xff] %vm1395_vm12, %v2426_v43  ;;  %v3157_v41 = vpop.f32.mrf.mxu2  ;;  %v4307_v54 = vrot.slane %v6909_v38, 1  ;;  %v4308_v19 = vrot.slane %v4011_v42, 1  ;;  %v4081_v40 = vrot.slane %v4079_v35, 1  ;;  %v4842_v2 = vshll.u32 %v4785_v22, 16  ;;  %v3220_v31 = vld [vmem:[#allocation3 + $0x68] sm:$0xff] }
 0x20d   : > { %v8750_v21 = vrot.slane %v3485_v7, 7  ;;  %v3251_v1 = vadd.f32 %v3219_v56, %v3157_v41  ;;  %v5669_v53 = vsel %vm1041_vm10, %v5664_v59, %v5668_v25  ;;  %5958 = vrot.lane.b32.xlu1 %v5914_v62, %s7208_s25  ;;  %2448 = vst.msk [vmem:[#allocation3 + $0x70] sm:$0xff] %vm1395_vm12, %v2416_v44  ;;  %v6938_v4 = vor.u32 %v6937_v14, %v6936_v18  ;;  %v2327_v60 = vpop.f32.mrf.mxu1  ;;  %v3758_v62 = vld [vmem:[#allocation2 + $0x50] sm:$0x1]  ;;  %v2396_v18 = vld [vmem:[#allocation3 + $0xd0] sm:$0xff] }
 0x20e   : > { %v3314_v36 = vld [vmem:[#allocation3 + $0x58] sm:$0xff]  ;;  %5830 = vrot.lane.b32.xlu0 %v5669_v53, %s7207_s24  ;;  %v4309_v12 = vsel %vm1314_vm9, %v4307_v54, %v4308_v19  ;;  %v5080_v28 = vrot.slane %v4785_v22, 1  ;;  %v4082_v33 = vsel %vm1041_vm10, %v5664_v59, %v4081_v40  ;;  %v4844_v5 = vrot.slane %v4842_v2, 1 }
 0x20f   : > { %v3490_v27 = vor.u32 %v3488_v13, %v8750_v21  ;;  %v3491_v20 = vrot.slane %v8750_v21, 4  ;;  %v3346_v6 = vmax.f32 %v3314_v36, 0.0  ;;  %3283 = vst.msk [vmem:[#allocation3 + $0x60] sm:$0xff] %vm1395_vm12, %v3251_v1  ;;  %v5079_v9 = vrot.slane %v6938_v4, 1  ;;  %v2385_v47 = vld [vmem:[#allocation3 + $0x78] sm:$0xff] }
 0x210   : > { %v4845_v8 = vsel %vm1041_vm10, %v5664_v59, %v4844_v5  ;;  %v6559_v7 = vor.u32 %v6606_v51, %v6558_v23 }
 0x211   : > { %v3755_v57 = vsel %vm7300_vm8, %v3490_v27, %v3754_v50  ;;  %v2352_v45 = vpop.f32.mrf.mxu3  ;;  %v3378_v29 = vpack.c.bf16 %v3346_v6, %v3346_v6  ;;  %v8764_v30 = vld [vmem:[#allocation2 + $0x3c] sm:$0xff]   ;;  %v5081_v46 = vsel %vm1314_vm9, %v5079_v9, %v5080_v28  ;;  %v2417_v50 = vadd.f32 %v2385_v47, %v2327_v60 }
 0x212   : > { %v7194_v34 = vld [vmem:[#allocation2 + $0x3c] sm:$0xf0]  ;;  %3756 = vst [vmem:[#allocation2 + $0x48] sm:$0xf] %v3755_v57  ;;  %v2427_v24 = vadd.f32 %v2395_v17, %v2352_v45  ;;  %v5477_v43 = vld [vmem:[#allocation2 + $0x44] sm:$0x1] }
 0x213   : > { %v8766_v11 = vld [vmem:[#allocation2 + $0x3c] sm:$0xff]   ;;  %4223 = vrot.lane.b32.xlu2 %v4082_v33, %s7207_s24  ;;  %v3493_v58 = vshrl.u32 %v3378_v29, 16  ;;  %v3496_v37 = vshll.u32 %v3378_v29, 16  ;;  %v5605_v13 = vunpack.c.l.b16 %v5477_v43  ;;  %v7196_v41 = vor.u32 %v7195_v48, %v7194_v34  ;;  %v3868_v22 = vld [vmem:[#allocation2 + $0x44] sm:$0x1]  ;;  %2449 = vst.msk [vmem:[#allocation3 + $0x78] sm:$0xff] %vm1395_vm12, %v2417_v50 }
 0x214   : > { %v8768_v63 = vld [vmem:[#allocation2 + $0x3c] sm:$0xf0]  ;;  %2459 = vst.msk [vmem:[#allocation3 + $0xc8] sm:$0xff] %vm1395_vm12, %v2427_v24  ;;  %v3159_v56 = vpop.f32.mrf.mxu2  ;;  %v5255_v38 = vsel %vm1505_vm11, %v6559_v7, 0  ;;  %v5671_v53 = vshrl.u32 %v8764_v30, 16  ;;  %v5673_v44 = vshll.u32 %v8764_v30, 16  ;;  %v3996_v33 = vunpack.c.l.b16 %v3868_v22 }
 0x215   : > { %v3495_v42 = vrot.slane %v3493_v58, 7  ;;  %v3252_v55 = vadd.f32 %v3220_v31, %v3159_v56  ;;  %v5621_v14 = vpack.c.b16 %v5605_v13, %v5605_v13  ;;  %4351 = vrot.lane.b32.xlu1 %v4309_v12, %s7208_s25  ;;  %v5915_v59 = vrot.slane %v7196_v41, 1  ;;  %5264 = vmatpush.bf16.msrb.mxu0 %v5255_v38  ;;  %v8793_v40 = vld [vmem:[#allocation2 + $0x3c] sm:$0xff]   ;;  %v4642_v2 = vld [vmem:[#allocation2 + $0x44] sm:$0x1]  ;;  %v3221_v21 = vld [vmem:[#allocation3 + $0x70] sm:$0xff] }
 0x216   : > { %v3315_v25 = vld [vmem:[#allocation3 + $0x60] sm:$0xff]  ;;  %4996 = vrot.lane.b32.xlu0 %v4845_v8, %s7207_s24  ;;  %v8795_v17 = vld [vmem:[#allocation2 + $0x3c] sm:$0xf0]  ;;  %v4084_v31 = vshrl.u32 %v8766_v11, 16  ;;  %v4086_v5 = vshll.u32 %v8766_v11, 16  ;;  %v4012_v23 = vpack.c.b16 %v3996_v33, %v3996_v33  ;;  %v4770_v58 = vunpack.c.l.b16 %v4642_v2  ;;  %v2397_v38 = vld [vmem:[#allocation3 + $0xd8] sm:$0xff] }
 0x217   : > { %v3498_v1 = vor.u32 %v3496_v37, %v3495_v42  ;;  %v3500_v35 = vrot.slane %v3495_v42, 4  ;;  %v3347_v15 = vmax.f32 %v3315_v25, 0.0  ;;  %3284 = vst.msk [vmem:[#allocation3 + $0x68] sm:$0xff] %vm1395_vm12, %v3252_v55  ;;  %v5916_v36 = vrot.slane %v5621_v14, 1  ;;  %v7134_v12 = vld [vmem:[#allocation2 + $0x3c] sm:$0xe] }
 0x218   : > { %v5678_v54 = vshll.u32 %v5621_v14, 16  ;;  %v3761_v37 = vld [vmem:[#allocation2 + $0x54] sm:$0xf]  ;;  %v4088_v56 = vrot.slane %v4086_v5, 1  ;;  %v4091_v7 = vshll.u32 %v4012_v23, 16  ;;  %v8811_v42 = vpack.c.b16 %v4770_v58, %v4770_v58 }
 0x219   : > { %v3499_v19 = vsel %vm7290_vm7, %v3491_v20, %v3498_v1  ;;  %v3759_v48 = vsel %vm7250_vm2, %v3500_v35, %v3758_v62  ;;  %v2355_v27 = vpop.f32.mrf.mxu3  ;;  %v3379_v6 = vpack.c.bf16 %v3347_v15, %v3347_v15  ;;  %v5917_v28 = vsel %vm1314_vm9, %v5915_v59, %v5916_v36  ;;  %v7137_v41 = vld [vmem:[#allocation2 + $0x3c] sm:$0xe]  ;;  %v6580_v15 = vld [vmem:[%s9753_s3 + $0x10] sm:$0xf]  ;;  %v6607_v59 = vld [vmem:[%s9753_s3 + $0x10] sm:$0x30] }
 0x21a   : > { %3757 = vst.msk [vmem:[#allocation2 + $0x4c] sm:$0xf] %vm226_vm6, %v3499_v19  ;;  %v2428_v4 = vadd.f32 %v2396_v18, %v2355_v27  ;;  %v5675_v20 = vrot.slane %v5673_v44, 1  ;;  %v5680_v57 = vrot.slane %v5678_v54, 1  ;;  %v4089_v13 = vor.u32 %v4088_v56, %v4084_v31  ;;  %v3222_v18 = vld [vmem:[#allocation3 + $0x78] sm:$0xff] }
 0x21b   : > { %5124 = vrot.lane.b32.xlu2 %v5081_v46, %s7208_s25  ;;  %3760 = vst [vmem:[#allocation2 + $0x50] sm:$0x1] %v3759_v48  ;;  %v3502_v45 = vshrl.u32 %v3379_v6, 16  ;;  %v3505_v29 = vshll.u32 %v3379_v6, 16  ;;  %v4847_v55 = vshrl.u32 %v8793_v40, 16  ;;  %v4849_v50 = vshll.u32 %v8793_v40, 16 }
 0x21c   : > { %2460 = vst.msk [vmem:[#allocation3 + $0xd0] sm:$0xff] %vm1395_vm12, %v2428_v4  ;;  %v3162_v34 = vpop.f32.mrf.mxu2  ;;  %v5676_v24 = vor.u32 %v5675_v20, %v5671_v53  ;;  %v4093_v1 = vrot.slane %v4091_v7, 1  ;;  %v7135_v35 = vor.u32 %v7134_v12, %v8768_v63  ;;  %v4854_v53 = vshll.u32 %v8811_v42, 16  ;;  %v3765_v31 = vld [vmem:[#allocation2 + $0x5c] sm:$0x1] }
 0x21d   : > { %v8803_v9 = vrot.slane %v3502_v45, 7  ;;  %v3253_v60 = vadd.f32 %v3221_v21, %v3162_v34  ;;  %5960 = vrot.lane.b32.xlu1 %v5917_v28, %s7208_s25  ;;  %v4851_v36 = vrot.slane %v4849_v50, 1  ;;  %v4311_v44 = vrot.slane %v4012_v23, 1  ;;  %v6971_v28 = vld [vmem:[#allocation2 + $0x48] sm:$0xe] }
 0x21e   : > { %v3316_v51 = vld [vmem:[#allocation3 + $0x68] sm:$0xff]  ;;  %v5681_v43 = vsel %vm1041_vm10, %v5676_v24, %v5680_v57  ;;  %v4094_v48 = vsel %vm1041_vm10, %v4089_v13, %v4093_v1  ;;  %v4310_v63 = vrot.slane %v7135_v35, 1  ;;  %v4856_v12 = vrot.slane %v4854_v53, 1  ;;  %v6911_v56 = vld [vmem:[#allocation2 + $0x48] sm:$0xe] }
 0x21f   : > { %v3507_v8 = vor.u32 %v3505_v29, %v8803_v9  ;;  %v3508_v46 = vrot.slane %v8803_v9, 4  ;;  %v3348_v47 = vmax.f32 %v3316_v51, 0.0  ;;  %3285 = vst.msk [vmem:[#allocation3 + $0x70] sm:$0xff] %vm1395_vm12, %v3253_v60  ;;  %5832 = vrot.lane.b32.xlu0 %v5681_v43, %s7207_s24  ;;  %v4852_v2 = vor.u32 %v4851_v36, %v4847_v55  ;;  %v6940_v1 = vld [vmem:[#allocation2 + $0x48] sm:$0xe] }
 0x220   : > { %v6581_v4 = vor.u32 %v6607_v59, %v6580_v15  ;;  %v4312_v45 = vsel %vm1314_vm9, %v4310_v63, %v4311_v44  ;;  %v5083_v29 = vrot.slane %v8811_v42, 1  ;;  %v7138_v60 = vor.u32 %v7137_v41, %v8795_v17  ;;  %v2398_v41 = vld [vmem:[#allocation3 + $0xe0] sm:$0xff]  ;;  %v4344_v44 = vpop.permute.xlu0 %4343 }
 0x221   : > { %v3762_v62 = vsel %vm7300_vm8, %v3507_v8, %v3761_v37  ;;  %v2357_v25 = vpop.f32.mrf.mxu3  ;;  %v3380_v14 = vpack.c.bf16 %v3348_v47, %v3348_v47  ;;  %v6970_v21 = vld [vmem:[#allocation2 + $0x48] sm:$0xf0]  ;;  %v4857_v24 = vsel %vm1041_vm10, %v4852_v2, %v4856_v12 }
 0x222   : > { %3763 = vst [vmem:[#allocation2 + $0x54] sm:$0xf] %v3762_v62  ;;  %v2429_v22 = vadd.f32 %v2397_v38, %v2357_v25  ;;  %v5478_v27 = vld [vmem:[#allocation2 + $0x50] sm:$0x1]  ;;  %v6958_v33 = vld [vmem:[#allocation2 + $0x48] sm:$0xff]   ;;  %v6091_v5 = vsel %vm1505_vm11, %v6581_v4, 0  ;;  %v6972_v43 = vor.u32 %v6971_v28, %v6970_v21 }
 0x223   : > { %v3510_v54 = vshrl.u32 %v3380_v14, 16  ;;  %v3513_v19 = vshll.u32 %v3380_v14, 16  ;;  %4225 = vrot.lane.b32.xlu2 %v4094_v48, %s7207_s24  ;;  %v5606_v23 = vunpack.c.l.b16 %v5478_v27  ;;  %6100 = vmatpush.bf16.msrb.mxu1 %v6091_v5  ;;  %v5082_v8 = vrot.slane %v7138_v60, 1  ;;  %v3869_v42 = vld [vmem:[#allocation2 + $0x50] sm:$0x1] }
 0x224   : > { %2461 = vst.msk [vmem:[#allocation3 + $0xd8] sm:$0xff] %vm1395_vm12, %v2429_v22  ;;  %v3164_v6 = vpop.f32.mrf.mxu2  ;;  %v5683_v7 = vshrl.u32 %v6958_v33, 16  ;;  %v5685_v13 = vshll.u32 %v6958_v33, 16  ;;  %v5918_v25 = vrot.slane %v6972_v43, 1  ;;  %v4643_v38 = vld [vmem:[#allocation2 + $0x50] sm:$0x1]  ;;  %v3997_v53 = vunpack.c.l.b16 %v3869_v42 }
 0x225   : > { %v3512_v20 = vrot.slane %v3510_v54, 7  ;;  %v3254_v57 = vadd.f32 %v3222_v18, %v3164_v6  ;;  %4353 = vrot.lane.b32.xlu1 %v4312_v45, %s7208_s25  ;;  %v5622_v47 = vpack.c.b16 %v5606_v23, %v5606_v23  ;;  %v6910_v14 = vld [vmem:[#allocation2 + $0x48] sm:$0xf0]  ;;  %v5084_v15 = vsel %vm1314_vm9, %v5082_v8, %v5083_v29  ;;  %v3768_v28 = vld [vmem:[#allocation2 + $0x60] sm:$0xf] }
 0x226   : > { %v3317_v34 = vld [vmem:[#allocation3 + $0x70] sm:$0xff]  ;;  %v5687_v9 = vrot.slane %v5685_v13, 1  ;;  %v4771_v27 = vunpack.c.l.b16 %v4643_v38  ;;  %v6912_v6 = vor.u32 %v6911_v56, %v6910_v14  ;;  %v4013_v21 = vpack.c.b16 %v3997_v53, %v3997_v53  ;;  %v2399_v56 = vld [vmem:[#allocation3 + $0xe8] sm:$0xff] }
 0x227   : > { %v3515_v58 = vor.u32 %v3513_v19, %v3512_v20  ;;  %v3517_v37 = vrot.slane %v3512_v20, 4  ;;  %v3349_v51 = vmax.f32 %v3317_v34, 0.0  ;;  %3286 = vst.msk [vmem:[#allocation3 + $0x78] sm:$0xff] %vm1395_vm12, %v3254_v57  ;;  %4998 = vrot.lane.b32.xlu0 %v4857_v24, %s7207_s24  ;;  %v5919_v59 = vrot.slane %v5622_v47, 1  ;;  %v6939_v22 = vld [vmem:[#allocation2 + $0x48] sm:$0xf0] }
 0x228   : > { %v5690_v36 = vshll.u32 %v5622_v47, 16  ;;  %v3223_v19 = vld [vmem:[#allocation3 + $0x80] sm:$0xff]  ;;  %v5688_v63 = vor.u32 %v5687_v9, %v5683_v7  ;;  %v4787_v57 = vpack.c.b16 %v4771_v27, %v4771_v27  ;;  %v4313_v45 = vrot.slane %v6912_v6, 1  ;;  %v3224_v9 = vld [vmem:[#allocation3 + $0x88] sm:$0xff]  ;;  %v3772_v53 = vld [vmem:[#allocation2 + $0x68] sm:$0x1] }
 0x229   : > { %v3516_v17 = vsel %vm7290_vm7, %v3508_v46, %v3515_v58  ;;  %v3766_v55 = vsel %vm7250_vm2, %v3517_v37, %v3765_v31  ;;  %v2360_v50 = vpop.f32.mrf.mxu3  ;;  %v3381_v62 = vpack.c.bf16 %v3349_v51, %v3349_v51  ;;  %v5920_v48 = vsel %vm1314_vm9, %v5918_v25, %v5919_v59  ;;  %v7198_v31 = vld [vmem:[#allocation2 + $0x54] sm:$0xe] }
 0x22a   : > { %3764 = vst.msk [vmem:[#allocation2 + $0x58] sm:$0xf] %vm226_vm6, %v3516_v17  ;;  %v2430_v35 = vadd.f32 %v2398_v41, %v2360_v50  ;;  %v5692_v4 = vrot.slane %v5690_v36, 1  ;;  %v6941_v29 = vor.u32 %v6940_v1, %v6939_v22  ;;  %v4408_v33 = vsel %vm1428_vm13, %v8676_v32, %v4344_v44 }
 0x22b   : > { %3767 = vst [vmem:[#allocation2 + $0x5c] sm:$0x1] %v3766_v55  ;;  %v3519_v46 = vshrl.u32 %v3381_v62, 16  ;;  %v3522_v18 = vshll.u32 %v3381_v62, 16  ;;  %5126 = vrot.lane.b32.xlu2 %v5084_v15, %s7208_s25  ;;  %6538 = vmatmul.msk.bf16.vlgmr.msrb.gmra.mxu3 %vm1472_vm14, %v4408_v33  ;;  %v4103_v23 = vshll.u32 %v4013_v21, 16  ;;  %v4866_v58 = vshll.u32 %v4787_v57, 16 }
 0x22c   : > { %2462 = vst.msk [vmem:[#allocation3 + $0xe0] sm:$0xff] %vm1395_vm12, %v2430_v35  ;;  %v3167_v54 = vpop.f32.mrf.mxu2  ;;  %v5693_v60 = vsel %vm1041_vm10, %v5688_v63, %v5692_v4  ;;  %v4314_v37 = vrot.slane %v4013_v21, 1  ;;  %v5085_v32 = vrot.slane %v6941_v29, 1  ;;  %v5086_v47 = vrot.slane %v4787_v57, 1 }
 0x22d   : > { %v8847_v2 = vrot.slane %v3519_v46, 7  ;;  %v3255_v12 = vadd.f32 %v3223_v19, %v3167_v54  ;;  %5962 = vrot.lane.b32.xlu1 %v5920_v48, %s7208_s25  ;;  %v4105_v50 = vrot.slane %v4103_v23, 1  ;;  %v4868_v41 = vrot.slane %v4866_v58, 1 }
 0x22e   : > { %v3318_v20 = vld [vmem:[#allocation3 + $0x78] sm:$0xff]  ;;  %v4315_v62 = vsel %vm1314_vm9, %v4313_v45, %v4314_v37  ;;  %v5087_v1 = vsel %vm1314_vm9, %v5085_v32, %v5086_v47  ;;  %v2400_v45 = vld [vmem:[#allocation3 + $0xf0] sm:$0xff] }
 0x22f   : > { %v3524_v34 = vor.u32 %v3522_v18, %v8847_v2  ;;  %v3525_v24 = vrot.slane %v8847_v2, 4  ;;  %v3350_v5 = vmax.f32 %v3318_v20, 0.0  ;;  %3287 = vst.msk [vmem:[#allocation3 + $0x80] sm:$0xff] %vm1395_vm12, %v3255_v12  ;;  %5834 = vrot.lane.b32.xlu0 %v5693_v60, %s7207_s24  ;;  %v4106_v15 = vsel %vm1041_vm10, %v5688_v63, %v4105_v50 }
 0x230   : > { %v4869_v22 = vsel %vm1041_vm10, %v5688_v63, %v4868_v41 }
 0x231   : > { %v3769_v51 = vsel %vm7300_vm8, %v3524_v34, %v3768_v28  ;;  %v2362_v43 = vpop.f32.mrf.mxu3  ;;  %v3382_v8 = vpack.c.bf16 %v3350_v5, %v3350_v5  ;;  %v8860_v7 = vld [vmem:[#allocation2 + $0x54] sm:$0xff]  }
 0x232   : > { %v7197_v13 = vld [vmem:[#allocation2 + $0x54] sm:$0xf0]  ;;  %3770 = vst [vmem:[#allocation2 + $0x60] sm:$0xf] %v3769_v51  ;;  %v2431_v55 = vadd.f32 %v2399_v56, %v2362_v43  ;;  %v5479_v25 = vld [vmem:[#allocation2 + $0x5c] sm:$0x1] }
 0x233   : > { %v8862_v42 = vld [vmem:[#allocation2 + $0x54] sm:$0xff]   ;;  %v3527_v38 = vshrl.u32 %v3382_v8, 16  ;;  %v3530_v14 = vshll.u32 %v3382_v8, 16  ;;  %v3870_v35 = vld [vmem:[#allocation2 + $0x5c] sm:$0x1]  ;;  %v5607_v46 = vunpack.c.l.b16 %v5479_v25  ;;  %4227 = vrot.lane.b32.xlu2 %v4106_v15, %s7207_s24  ;;  %v7199_v19 = vor.u32 %v7198_v31, %v7197_v13  ;;  %v3225_v13 = vld [vmem:[#allocation3 + $0x90] sm:$0xff] }
 0x234   : > { %v8864_v17 = vld [vmem:[#allocation2 + $0x54] sm:$0xf0]  ;;  %2463 = vst.msk [vmem:[#allocation3 + $0xe8] sm:$0xff] %vm1395_vm12, %v2431_v55  ;;  %v3169_v59 = vpop.f32.mrf.mxu2  ;;  %v3998_v48 = vunpack.c.l.b16 %v3870_v35  ;;  %v5695_v4 = vshrl.u32 %v8860_v7, 16  ;;  %v5697_v21 = vshll.u32 %v8860_v7, 16  ;;  %v4108_v56 = vshrl.u32 %v8862_v42, 16 }
 0x235   : > { %v3529_v18 = vrot.slane %v3527_v38, 7  ;;  %v3256_v36 = vadd.f32 %v3224_v9, %v3169_v59  ;;  %v5623_v54 = vpack.c.b16 %v5607_v46, %v5607_v46  ;;  %4355 = vrot.lane.b32.xlu1 %v4315_v62, %s7208_s25  ;;  %v5921_v63 = vrot.slane %v7199_v19, 1  ;;  %v8881_v31 = vld [vmem:[#allocation2 + $0x54] sm:$0xff]   ;;  %v8889_v8 = vpop.permute.xlu2 %4345 }
 0x236   : > { %v3319_v44 = vld [vmem:[#allocation3 + $0x80] sm:$0xff]  ;;  %v7140_v5 = vld [vmem:[#allocation2 + $0x54] sm:$0xe]  ;;  %v5699_v58 = vrot.slane %v5697_v21, 1  ;;  %v4014_v37 = vpack.c.b16 %v3998_v48, %v3998_v48  ;;  %v4110_v50 = vshll.u32 %v8862_v42, 16 }
 0x237   : > { %v3532_v27 = vor.u32 %v3530_v14, %v3529_v18  ;;  %v3534_v6 = vrot.slane %v3529_v18, 4  ;;  %v3351_v2 = vmax.f32 %v3319_v44, 0.0  ;;  %3288 = vst.msk [vmem:[#allocation3 + $0x88] sm:$0xff] %vm1395_vm12, %v3256_v36  ;;  %5000 = vrot.lane.b32.xlu0 %v4869_v22, %s7207_s24  ;;  %v5922_v12 = vrot.slane %v5623_v54, 1  ;;  %v8883_v34 = vld [vmem:[#allocation2 + $0x54] sm:$0xf0] }
 0x238   : > { %v5702_v33 = vshll.u32 %v5623_v54, 16  ;;  %v5700_v55 = vor.u32 %v5699_v58, %v5695_v4  ;;  %v4115_v41 = vshll.u32 %v4014_v37, 16  ;;  %v3775_v14 = vld [vmem:[#allocation2 + $0x6c] sm:$0xf]  ;;  %v4112_v59 = vrot.slane %v4110_v50, 1  ;;  %v3226_v58 = vld [vmem:[#allocation3 + $0x98] sm:$0xff] }
 0x239   : > { %v3533_v28 = vsel %vm7290_vm7, %v3525_v24, %v3532_v27  ;;  %v3773_v20 = vsel %vm7250_vm2, %v3534_v6, %v3772_v53  ;;  %v2365_v57 = vpop.f32.mrf.mxu3  ;;  %v3383_v29 = vpack.c.bf16 %v3351_v2, %v3351_v2  ;;  %v5923_v23 = vsel %vm1314_vm9, %v5921_v63, %v5922_v12  ;;  %v4644_v24 = vld [vmem:[#allocation2 + $0x5c] sm:$0x1]  ;;  %v7143_v54 = vld [vmem:[#allocation2 + $0x54] sm:$0xe]  ;;  %v6974_v12 = vld [vmem:[#allocation2 + $0x60] sm:$0xe] }
 0x23a   : > { %3771 = vst.msk [vmem:[#allocation2 + $0x64] sm:$0xf] %vm226_vm6, %v3533_v28  ;;  %v2432_v60 = vadd.f32 %v2400_v45, %v2365_v57  ;;  %v5704_v43 = vrot.slane %v5702_v33, 1  ;;  %v4772_v38 = vunpack.c.l.b16 %v4644_v24  ;;  %v4117_v9 = vrot.slane %v4115_v41, 1  ;;  %v2401_v27 = vld [vmem:[#allocation3 + $0xf8] sm:$0xff] }
 0x23b   : > { %3774 = vst [vmem:[#allocation2 + $0x68] sm:$0x1] %v3773_v20  ;;  %v3536_v32 = vshrl.u32 %v3383_v29, 16  ;;  %v3539_v51 = vshll.u32 %v3383_v29, 16  ;;  %5128 = vrot.lane.b32.xlu2 %v5087_v1, %s7208_s25  ;;  %v4113_v1 = vor.u32 %v4112_v59, %v4108_v56  ;;  %v7141_v53 = vor.u32 %v7140_v5, %v8864_v17 }
 0x23c   : > { %2464 = vst.msk [vmem:[#allocation3 + $0xf0] sm:$0xff] %vm1395_vm12, %v2432_v60  ;;  %v3172_v47 = vpop.f32.mrf.mxu2  ;;  %v5705_v15 = vsel %vm1041_vm10, %v5700_v55, %v5704_v43  ;;  %v8901_v36 = vpack.c.b16 %v4772_v38, %v4772_v38  ;;  %v4317_v44 = vrot.slane %v4014_v37, 1  ;;  %v4871_v2 = vshrl.u32 %v8881_v31, 16  ;;  %v3779_v55 = vld [vmem:[#allocation2 + $0x74] sm:$0x1] }
 0x23d   : > { %v8892_v62 = vrot.slane %v3536_v32, 7  ;;  %v3257_v25 = vadd.f32 %v3225_v13, %v3172_v47  ;;  %5964 = vrot.lane.b32.xlu1 %v5923_v23, %s7208_s25  ;;  %v4873_v63 = vshll.u32 %v8881_v31, 16  ;;  %v4118_v21 = vsel %vm1041_vm10, %v4113_v1, %v4117_v9  ;;  %v6943_v1 = vld [vmem:[#allocation2 + $0x60] sm:$0xe] }
 0x23e   : > { %v3320_v35 = vld [vmem:[#allocation3 + $0x88] sm:$0xff]  ;;  %v4878_v28 = vshll.u32 %v8901_v36, 16  ;;  %v4316_v17 = vrot.slane %v7141_v53, 1  ;;  %v5089_v32 = vrot.slane %v8901_v36, 1  ;;  %v7144_v13 = vor.u32 %v7143_v54, %v8883_v34 }
 0x23f   : > { %v3541_v22 = vor.u32 %v3539_v51, %v8892_v62  ;;  %v3542_v46 = vrot.slane %v8892_v62, 4  ;;  %v3352_v18 = vmax.f32 %v3320_v35, 0.0  ;;  %3289 = vst.msk [vmem:[#allocation3 + $0x90] sm:$0xff] %vm1395_vm12, %v3257_v25  ;;  %5836 = vrot.lane.b32.xlu0 %v5705_v15, %s7207_s24  ;;  %v4875_v29 = vrot.slane %v4873_v63, 1 }
 0x240   : > { %v4880_v37 = vrot.slane %v4878_v28, 1  ;;  %v4318_v24 = vsel %vm1314_vm9, %v4316_v17, %v4317_v44  ;;  %v5088_v34 = vrot.slane %v7144_v13, 1 }
 0x241   : > { %v3776_v19 = vsel %vm7300_vm8, %v3541_v22, %v3775_v14  ;;  %v2367_v48 = vpop.f32.mrf.mxu3  ;;  %v3384_v6 = vpack.c.bf16 %v3352_v18, %v3352_v18  ;;  %v6973_v33 = vld [vmem:[#allocation2 + $0x60] sm:$0xf0]  ;;  %v4876_v47 = vor.u32 %v4875_v29, %v4871_v2  ;;  %v6914_v18 = vld [vmem:[#allocation2 + $0x60] sm:$0xe] }
 0x242   : > { %3777 = vst [vmem:[#allocation2 + $0x6c] sm:$0xf] %v3776_v19  ;;  %v2433_v4 = vadd.f32 %v2401_v27, %v2367_v48  ;;  %v5480_v20 = vld [vmem:[#allocation2 + $0x68] sm:$0x1]  ;;  %v6959_v5 = vld [vmem:[#allocation2 + $0x60] sm:$0xff]   ;;  %v6975_v25 = vor.u32 %v6974_v12, %v6973_v33  ;;  %v5090_v12 = vsel %vm1314_vm9, %v5088_v34, %v5089_v32 }
 0x243   : > { %v3544_v57 = vshrl.u32 %v3384_v6, 16  ;;  %v3547_v45 = vshll.u32 %v3384_v6, 16  ;;  %v5608_v51 = vunpack.c.l.b16 %v5480_v20  ;;  %4229 = vrot.lane.b32.xlu2 %v4118_v21, %s7207_s24  ;;  %v5707_v38 = vshrl.u32 %v6959_v5, 16  ;;  %v3871_v22 = vld [vmem:[#allocation2 + $0x68] sm:$0x1] }
 0x244   : > { %2465 = vst.msk [vmem:[#allocation3 + $0xf8] sm:$0xff] %vm1395_vm12, %v2433_v4  ;;  %v3174_v23 = vpop.f32.mrf.mxu2  ;;  %v5709_v14 = vshll.u32 %v6959_v5, 16  ;;  %v4881_v9 = vsel %vm1041_vm10, %v4876_v47, %v4880_v37  ;;  %v5924_v36 = vrot.slane %v6975_v25, 1  ;;  %v4645_v54 = vld [vmem:[#allocation2 + $0x68] sm:$0x1]  ;;  %v3999_v21 = vunpack.c.l.b16 %v3871_v22 }
 0x245   : > { %v8911_v60 = vpop.permute.xlu2 %5954  ;;  %v3546_v43 = vrot.slane %v3544_v57, 7  ;;  %v3258_v56 = vadd.f32 %v3226_v58, %v3174_v23  ;;  %v5624_v41 = vpack.c.b16 %v5608_v51, %v5608_v51  ;;  %4357 = vrot.lane.b32.xlu1 %v4318_v24, %s7208_s25  ;;  %v6913_v2 = vld [vmem:[#allocation2 + $0x60] sm:$0xf0]  ;;  %v4773_v17 = vunpack.c.l.b16 %v4645_v54  ;;  %v3227_v24 = vld [vmem:[#allocation3 + $0xa0] sm:$0xff] }
 0x246   : > { %v3321_v50 = vld [vmem:[#allocation3 + $0x90] sm:$0xff]  ;;  %v5711_v44 = vrot.slane %v5709_v14, 1  ;;  %v6942_v63 = vld [vmem:[#allocation2 + $0x60] sm:$0xf0]  ;;  %v6915_v29 = vor.u32 %v6914_v18, %v6913_v2 }
 0x247   : > { %v3549_v35 = vor.u32 %v3547_v45, %v3546_v43  ;;  %v3551_v15 = vrot.slane %v3546_v43, 4  ;;  %v3353_v59 = vmax.f32 %v3321_v50, 0.0  ;;  %3290 = vst.msk [vmem:[#allocation3 + $0x98] sm:$0xff] %vm1395_vm12, %v3258_v56  ;;  %5002 = vrot.lane.b32.xlu0 %v4881_v9, %s7207_s24  ;;  %v5925_v53 = vrot.slane %v5624_v41, 1  ;;  %v3782_v43 = vld [vmem:[#allocation2 + $0x78] sm:$0xf] }
 0x248   : > { %v5714_v6 = vshll.u32 %v5624_v41, 16  ;;  %v8929_v4 = vor.u32 %v5711_v44, %v5707_v38  ;;  %v4015_v45 = vpack.c.b16 %v3999_v21, %v3999_v21  ;;  %v6944_v33 = vor.u32 %v6943_v1, %v6942_v63 }
 0x249   : > { %v3550_v19 = vsel %vm7290_vm7, %v3542_v46, %v3549_v35  ;;  %v3780_v48 = vsel %vm7250_vm2, %v3551_v15, %v3779_v55  ;;  %v3385_v27 = vpack.c.bf16 %v3353_v59, %v3353_v59  ;;  %v5926_v57 = vsel %vm1314_vm9, %v5924_v36, %v5925_v53  ;;  %v8932_v5 = vld [vmem:[#allocation2 + $0x6c] sm:$0xe]  ;;  %v8947_v15 = vld [vmem:[#allocation2 + $0x18] sm:$0xff]  }
 0x24a   : > { %3778 = vst.msk [vmem:[#allocation2 + $0x70] sm:$0xf] %vm226_vm6, %v3550_v19  ;;  %v5716_v62 = vrot.slane %v5714_v6, 1  ;;  %v8939_v51 = vpack.c.b16 %v4773_v17, %v4773_v17  ;;  %v4127_v13 = vshll.u32 %v4015_v45, 16  ;;  %v4319_v55 = vrot.slane %v6915_v29, 1 }
 0x24b   : > { %3781 = vst [vmem:[#allocation2 + $0x74] sm:$0x1] %v3780_v48  ;;  %v3553_v28 = vshrl.u32 %v3385_v27, 16  ;;  %v5119_v20 = vpop.permute.xlu0 %5118  ;;  %v3556_v58 = vshll.u32 %v3385_v27, 16  ;;  %5130 = vrot.lane.b32.xlu2 %v5090_v12, %s7208_s25  ;;  %v4320_v50 = vrot.slane %v4015_v45, 1  ;;  %v5091_v22 = vrot.slane %v6944_v33, 1 }
 0x24c   : > { %v3177_v37 = vpop.f32.mrf.mxu2  ;;  %v5717_v32 = vsel %vm1041_vm10, %v8929_v4, %v5716_v62  ;;  %v4890_v38 = vshll.u32 %v8939_v51, 16  ;;  %v8944_v14 = vld [vmem:[#allocation2 + $0x6c] sm:$0xe]  ;;  %v4129_v9 = vrot.slane %v4127_v13, 1  ;;  %v5092_v53 = vrot.slane %v8939_v51, 1  ;;  %v3228_v33 = vld [vmem:[#allocation3 + $0xa8] sm:$0xff] }
 0x24d   : > { %v4220_v46 = vpop.permute.xlu2 %4219  ;;  %v8934_v23 = vrot.slane %v3553_v28, 7  ;;  %v3259_v47 = vadd.f32 %v3227_v24, %v3177_v37  ;;  %5966 = vrot.lane.b32.xlu1 %v5926_v57, %s7208_s25  ;;  %v4321_v2 = vsel %vm1314_vm9, %v4319_v55, %v4320_v50  ;;  %v3786_v37 = vld [vmem:[#allocation2 + $0x80] sm:$0x1] }
 0x24e   : > { %v3322_v56 = vld [vmem:[#allocation3 + $0x98] sm:$0xff]  ;;  %v8951_v59 = vsel %vm1395_vm12, %v8947_v15, %v4220_v46  ;;  %v4892_v36 = vrot.slane %v4890_v38, 1  ;;  %v4130_v6 = vsel %vm1041_vm10, %v8929_v4, %v4129_v9  ;;  %v5093_v38 = vsel %vm1314_vm9, %v5091_v22, %v5092_v53 }
 0x24f   : > { %v3558_v41 = vor.u32 %v3556_v58, %v8934_v23  ;;  %v3354_v25 = vmax.f32 %v3322_v56, 0.0  ;;  %v3559_v35 = vrot.slane %v8934_v23, 4  ;;  %3291 = vst.msk [vmem:[#allocation3 + $0xa0] sm:$0xff] %vm1395_vm12, %v3259_v47  ;;  %5838 = vrot.lane.b32.xlu0 %v5717_v32, %s7207_s24  ;;  %v4991_v34 = vpop.permute.xlu1 %4990 }
 0x250   : > { %v5151_v27 = vsel %vm1395_vm12, %v8554_v61, %v4991_v34  ;;  %v4893_v23 = vsel %vm1041_vm10, %v8929_v4, %v4892_v36 }
 0x251   : > { %v3783_v18 = vsel %vm7300_vm8, %v3558_v41, %v3782_v43  ;;  %v3386_v1 = vpack.c.bf16 %v3354_v25, %v3354_v25  ;;  %v8958_v44 = vld [vmem:[#allocation2 + $0x6c] sm:$0xff]   ;;  %v5183_v62 = vsel %vm1428_vm13, %v5151_v27, %v5119_v20 }
 0x252   : > { %v7200_v54 = vld [vmem:[#allocation2 + $0x6c] sm:$0xf0]  ;;  %3784 = vst [vmem:[#allocation2 + $0x78] sm:$0xf] %v3783_v18  ;;  %v5481_v63 = vld [vmem:[#allocation2 + $0x74] sm:$0x1]  ;;  %6560 = vmatmul.msk.bf16.vlgmr.msrb.gmra.mxu0 %vm1472_vm14, %v5183_v62 }
 0x253   : > { %v8960_v19 = vld [vmem:[#allocation2 + $0x6c] sm:$0xff]   ;;  %v3872_v12 = vld [vmem:[#allocation2 + $0x74] sm:$0x1]  ;;  %v3561_v21 = vshrl.u32 %v3386_v1, 16  ;;  %v3564_v28 = vshll.u32 %v3386_v1, 16  ;;  %v4218_v17 = vpop.permute.xlu0 %4217  ;;  %v5609_v57 = vunpack.c.l.b16 %v5481_v63  ;;  %4231 = vrot.lane.b32.xlu2 %v4130_v6, %s7207_s24  ;;  %v7202_v51 = vor.u32 %v8932_v5, %v7200_v54 }
 0x254   : > { %v8962_v48 = vld [vmem:[#allocation2 + $0x6c] sm:$0xf0]  ;;  %v4378_v61 = vsel %vm1395_vm12, %v8556_v52, %v4218_v17  ;;  %v3179_v29 = vpop.f32.mrf.mxu2  ;;  %v4000_v58 = vunpack.c.l.b16 %v3872_v12  ;;  %v5721_v9 = vshll.u32 %v8958_v44, 16  ;;  %v4646_v18 = vld [vmem:[#allocation2 + $0x74] sm:$0x1]  ;;  %v5719_v34 = vshrl.u32 %v8958_v44, 16 }
 0x255   : > { %v8971_v46 = vpop.permute.xlu2 %5120  ;;  %v3563_v45 = vrot.slane %v3561_v21, 7  ;;  %v3260_v20 = vadd.f32 %v3228_v33, %v3179_v29  ;;  %v4410_v24 = vsel %vm1428_vm13, %v4378_v61, %v8889_v8  ;;  %v5625_v32 = vpack.c.b16 %v5609_v57, %v5609_v57  ;;  %4359 = vrot.lane.b32.xlu1 %v4321_v2, %s7208_s25  ;;  %v8983_v52 = vld [vmem:[#allocation2 + $0x6c] sm:$0xff]  }
 0x256   : > { %v3323_v47 = vld [vmem:[#allocation3 + $0xa0] sm:$0xff]  ;;  %6539 = vmatmul.msk.bf16.gmra.mxu3 %vm1472_vm14, %v4410_v24  ;;  %v8985_v13 = vld [vmem:[#allocation2 + $0x6c] sm:$0xf0]  ;;  %v5927_v8 = vrot.slane %v7202_v51, 1  ;;  %v8997_v36 = vpack.c.b16 %v4000_v58, %v4000_v58  ;;  %v4134_v27 = vshll.u32 %v8960_v19, 16  ;;  %v4774_v12 = vunpack.c.l.b16 %v4646_v18  ;;  %v3229_v62 = vld [vmem:[#allocation3 + $0xb0] sm:$0xff] }
 0x257   : > { %v3566_v43 = vor.u32 %v3564_v28, %v3563_v45  ;;  %v3568_v56 = vrot.slane %v3563_v45, 4  ;;  %v3355_v4 = vmax.f32 %v3323_v47, 0.0  ;;  %3292 = vst.msk [vmem:[#allocation3 + $0xa8] sm:$0xff] %vm1395_vm12, %v3260_v20  ;;  %5004 = vrot.lane.b32.xlu0 %v4893_v23, %s7207_s24  ;;  %v5928_v55 = vrot.slane %v5625_v32, 1  ;;  %v3010_v25 = vpop.permute.xlu1 %3009  ;;  %v3789_v58 = vld [vmem:[#allocation2 + $0x84] sm:$0xf] }
 0x258   : > { %v5726_v50 = vshll.u32 %v5625_v32, 16  ;;  %v4139_v53 = vshll.u32 %v8997_v36, 16  ;;  %v4132_v57 = vshrl.u32 %v8960_v19, 16  ;;  %v4136_v45 = vrot.slane %v4134_v27, 1  ;;  %v7149_v47 = vld [vmem:[#allocation2 + $0x6c] sm:$0xe] }
 0x259   : > { %v3567_v5 = vsel %vm7290_vm7, %v3559_v35, %v3566_v43  ;;  %v3787_v41 = vsel %vm7250_vm2, %v3568_v56, %v3786_v37  ;;  %v3387_v1 = vpack.c.bf16 %v3355_v4, %v3355_v4  ;;  %v5929_v54 = vsel %vm1314_vm9, %v5927_v8, %v5928_v55 }
 0x25a   : > { %3785 = vst.msk [vmem:[#allocation2 + $0x7c] sm:$0xf] %vm226_vm6, %v3567_v5  ;;  %v5723_v35 = vrot.slane %v5721_v9, 1  ;;  %v5728_v22 = vrot.slane %v5726_v50, 1  ;;  %v4141_v24 = vrot.slane %v4139_v53, 1  ;;  %v9017_v43 = vpack.c.b16 %v4774_v12, %v4774_v12  ;;  %v3230_v53 = vld [vmem:[#allocation3 + $0xb8] sm:$0xff] }
 0x25b   : > { %3788 = vst [vmem:[#allocation2 + $0x80] sm:$0x1] %v3787_v41  ;;  %v3570_v6 = vshrl.u32 %v3387_v1, 16  ;;  %v2882_v2 = vpop.permute.xlu0 %2881  ;;  %5132 = vrot.lane.b32.xlu2 %v5093_v38, %s7208_s25  ;;  %v3573_v29 = vshll.u32 %v3387_v1, 16  ;;  %v4323_v56 = vrot.slane %v8997_v36, 1  ;;  %v4895_v55 = vshrl.u32 %v8983_v52, 16 }
 0x25c   : > { %v3042_v21 = vsel %vm1395_vm12, %v8526_v3, %v2882_v2  ;;  %v3182_v28 = vpop.f32.mrf.mxu2  ;;  %v5724_v17 = vor.u32 %v5723_v35, %v5719_v34  ;;  %v4137_v3 = vor.u32 %v4136_v45, %v4132_v57  ;;  %v4897_v50 = vshll.u32 %v8983_v52, 16  ;;  %v6977_v45 = vld [vmem:[#allocation2 + $0x78] sm:$0xe] }
 0x25d   : > { %v9001_v63 = vpop.permute.xlu2 %4221  ;;  %v9008_v61 = vrot.slane %v3570_v6, 7  ;;  %v3261_v33 = vadd.f32 %v3229_v62, %v3182_v28  ;;  %v3074_v23 = vsel %vm1428_vm13, %v3042_v21, %v3010_v25  ;;  %5968 = vrot.lane.b32.xlu1 %v5929_v54, %s7208_s25  ;;  %v7147_v5 = vor.u32 %v8944_v14, %v8962_v48 }
 0x25e   : > { %v3324_v37 = vld [vmem:[#allocation3 + $0xa8] sm:$0xff]  ;;  %v5729_v20 = vsel %vm1041_vm10, %v5724_v17, %v5728_v22  ;;  %6533 = vmatmul.msk.bf16.gmra.mxu2 %vm1472_vm14, %v3074_v23  ;;  %v4902_v9 = vshll.u32 %v9017_v43, 16  ;;  %v4899_v1 = vrot.slane %v4897_v50, 1  ;;  %v4142_v14 = vsel %vm1041_vm10, %v4137_v3, %v4141_v24  ;;  %v3793_v23 = vld [vmem:[#allocation2 + $0x8c] sm:$0x1] }
 0x25f   : > { %v3575_v32 = vor.u32 %v3573_v29, %v9008_v61  ;;  %v3356_v51 = vmax.f32 %v3324_v37, 0.0  ;;  %3293 = vst.msk [vmem:[#allocation3 + $0xb0] sm:$0xff] %vm1395_vm12, %v3261_v33  ;;  %5840 = vrot.lane.b32.xlu0 %v5729_v20, %s7207_s24  ;;  %v3576_v4 = vrot.slane %v9008_v61, 4  ;;  %v5827_v8 = vpop.permute.xlu1 %5826  ;;  %v4322_v34 = vrot.slane %v7147_v5, 1 }
 0x260   : > { %v5987_v38 = vsel %vm1395_vm12, %v8947_v15, %v5827_v8  ;;  %v4904_v6 = vrot.slane %v4902_v9, 1  ;;  %v4900_v12 = vor.u32 %v4899_v1, %v4895_v55  ;;  %v7150_v28 = vor.u32 %v7149_v47, %v8985_v13  ;;  %v6917_v9 = vld [vmem:[#allocation2 + $0x78] sm:$0xe] }
 0x261   : > { %v3790_v41 = vsel %vm7300_vm8, %v3575_v32, %v3789_v58  ;;  %v3388_v25 = vpack.c.bf16 %v3356_v51, %v3356_v51  ;;  %v6019_v18 = vsel %vm1428_vm13, %v5987_v38, %v8911_v60  ;;  %v6976_v2 = vld [vmem:[#allocation2 + $0x78] sm:$0xf0]  ;;  %v4324_v21 = vsel %vm1314_vm9, %v4322_v34, %v4323_v56 }
 0x262   : > { %3791 = vst [vmem:[#allocation2 + $0x84] sm:$0xf] %v3790_v41  ;;  %v5482_v36 = vld [vmem:[#allocation2 + $0x80] sm:$0x1]  ;;  %6582 = vmatmul.msk.bf16.vlgmr.msrb.gmra.mxu1 %vm1472_vm14, %v6019_v18  ;;  %v6960_v29 = vld [vmem:[#allocation2 + $0x78] sm:$0xff]   ;;  %v5094_v37 = vrot.slane %v7150_v28, 1  ;;  %v6978_v20 = vor.u32 %v6977_v45, %v6976_v2 }
 0x263   : > { %v3578_v54 = vshrl.u32 %v3388_v25, 16  ;;  %v3581_v35 = vshll.u32 %v3388_v25, 16  ;;  %v4993_v48 = vpop.permute.xlu0 %4992  ;;  %4233 = vrot.lane.b32.xlu2 %v4142_v14, %s7207_s24  ;;  %v5610_v61 = vunpack.c.l.b16 %v5482_v36  ;;  %v3873_v33 = vld [vmem:[#allocation2 + $0x80] sm:$0x1]  ;;  %v5095_v13 = vrot.slane %v9017_v43, 1 }
 0x264   : > { %v5153_v22 = vsel %vm1395_vm12, %v8947_v15, %v4993_v48  ;;  %v3184_v60 = vpop.f32.mrf.mxu2  ;;  %v4905_v15 = vsel %vm1041_vm10, %v4900_v12, %v4904_v6  ;;  %v4647_v51 = vld [vmem:[#allocation2 + $0x80] sm:$0x1]  ;;  %v5930_v47 = vrot.slane %v6978_v20, 1  ;;  %v5731_v8 = vshrl.u32 %v6960_v29, 16  ;;  %v6916_v5 = vld [vmem:[#allocation2 + $0x78] sm:$0xf0] }
 0x265   : > { %v9034_v27 = vpop.permute.xlu2 %5122  ;;  %v3580_v62 = vrot.slane %v3578_v54, 7  ;;  %v3262_v17 = vadd.f32 %v3230_v53, %v3184_v60  ;;  %v5185_v57 = vsel %vm1428_vm13, %v5153_v22, %v8971_v46  ;;  %4361 = vrot.lane.b32.xlu1 %v4324_v21, %s7208_s25  ;;  %v5626_v46 = vpack.c.b16 %v5610_v61, %v5610_v61  ;;  %v6945_v6 = vld [vmem:[#allocation2 + $0x78] sm:$0xf0]  ;;  %v3796_v45 = vld [vmem:[#allocation2 + $0x90] sm:$0xf] }
 0x266   : > { %v3325_v58 = vld [vmem:[#allocation3 + $0xb0] sm:$0xff]  ;;  %6561 = vmatmul.msk.bf16.gmra.mxu0 %vm1472_vm14, %v5185_v57  ;;  %v5733_v55 = vshll.u32 %v6960_v29, 16  ;;  %v4001_v50 = vunpack.c.l.b16 %v3873_v33  ;;  %v4775_v14 = vunpack.c.l.b16 %v4647_v51  ;;  %v6918_v48 = vor.u32 %v6917_v9, %v6916_v5  ;;  %v3231_v22 = vld [vmem:[#allocation3 + $0xc0] sm:$0xff] }
 0x267   : > { %v3583_v3 = vor.u32 %v3581_v35, %v3580_v62  ;;  %v3585_v24 = vrot.slane %v3580_v62, 4  ;;  %v3357_v32 = vmax.f32 %v3325_v58, 0.0  ;;  %3294 = vst.msk [vmem:[#allocation3 + $0xb8] sm:$0xff] %vm1395_vm12, %v3262_v17  ;;  %5006 = vrot.lane.b32.xlu0 %v4905_v15, %s7207_s24  ;;  %v4348_v56 = vpop.permute.xlu1 %4347  ;;  %v5931_v18 = vrot.slane %v5626_v46, 1  ;;  %v6946_v57 = vld [vmem:[#allocation2 + $0x78] sm:$0xe] }
 0x268   : > { %v4412_v38 = vsel %vm1428_vm13, %v8951_v59, %v4348_v56  ;;  %v5735_v1 = vrot.slane %v5733_v55, 1  ;;  %v5738_v34 = vshll.u32 %v5626_v46, 16  ;;  %v4017_v36 = vpack.c.b16 %v4001_v50, %v4001_v50 }
 0x269   : > { %v3584_v41 = vsel %vm7290_vm7, %v3576_v4, %v3583_v3  ;;  %v3794_v43 = vsel %vm7250_vm2, %v3585_v24, %v3793_v23  ;;  %v3389_v25 = vpack.c.bf16 %v3357_v32, %v3357_v32  ;;  %6540 = vmatmul.msk.bf16.gmra.mxu3 %vm1472_vm14, %v4412_v38  ;;  %v5096_v4 = vsel %vm1314_vm9, %v5094_v37, %v5095_v13  ;;  %v7152_v5 = vld [vmem:[#allocation2 + $0x84] sm:$0xe] }
 0x26a   : > { %3792 = vst.msk [vmem:[#allocation2 + $0x88] sm:$0xf] %vm226_vm6, %v3584_v41  ;;  %v5932_v60 = vsel %vm1314_vm9, %v5930_v47, %v5931_v18  ;;  %v5736_v53 = vor.u32 %v5735_v1, %v5731_v8  ;;  %v5740_v12 = vrot.slane %v5738_v34, 1  ;;  %v4151_v62 = vshll.u32 %v4017_v36, 16 }
 0x26b   : > { %3795 = vst [vmem:[#allocation2 + $0x8c] sm:$0x1] %v3794_v43  ;;  %v3587_v54 = vshrl.u32 %v3389_v25, 16  ;;  %v3590_v2 = vshll.u32 %v3389_v25, 16  ;;  %5134 = vrot.lane.b32.xlu2 %v5096_v4, %s7208_s25  ;;  %v9064_v17 = vpack.c.b16 %v4775_v14, %v4775_v14  ;;  %v4325_v23 = vrot.slane %v6918_v48, 1  ;;  %v3232_v14 = vld [vmem:[#allocation3 + $0xc8] sm:$0xff] }
 0x26c   : > { %v3187_v59 = vpop.f32.mrf.mxu2  ;;  %v5741_v29 = vsel %vm1041_vm10, %v5736_v53, %v5740_v12  ;;  %v4326_v58 = vrot.slane %v4017_v36, 1  ;;  %v6947_v15 = vor.u32 %v6946_v57, %v6945_v6  ;;  %v9071_v37 = vsel %vm1395_vm12, %v8664_v26, %v9001_v63 }
 0x26d   : > { %v9058_v35 = vpop.permute.xlu2 %4223  ;;  %v9062_v21 = vrot.slane %v3587_v54, 7  ;;  %v3263_v28 = vadd.f32 %v3231_v22, %v3187_v59  ;;  %5970 = vrot.lane.b32.xlu1 %v5932_v60, %s7208_s25  ;;  %v4153_v46 = vrot.slane %v4151_v62, 1  ;;  %v4914_v51 = vshll.u32 %v9064_v17, 16  ;;  %v3800_v22 = vld [vmem:[#allocation2 + $0x98] sm:$0x1] }
 0x26e   : > { %v3326_v61 = vld [vmem:[#allocation3 + $0xb8] sm:$0xff]  ;;  %v4327_v56 = vsel %vm1314_vm9, %v4325_v23, %v4326_v58  ;;  %v5097_v8 = vrot.slane %v6947_v15, 1  ;;  %v5098_v25 = vrot.slane %v9064_v17, 1 }
 0x26f   : > { %v5829_v33 = vpop.permute.xlu0 %5828  ;;  %v3592_v13 = vor.u32 %v3590_v2, %v9062_v21  ;;  %v3358_v20 = vmax.f32 %v3326_v61, 0.0  ;;  %3295 = vst.msk [vmem:[#allocation3 + $0xc0] sm:$0xff] %vm1395_vm12, %v3263_v28  ;;  %5842 = vrot.lane.b32.xlu0 %v5741_v29, %s7207_s24  ;;  %v3593_v24 = vrot.slane %v9062_v21, 4  ;;  %v5957_v32 = vpop.permute.xlu1 %5956  ;;  %v4916_v43 = vrot.slane %v4914_v51, 1 }
 0x270   : > { %v5989_v3 = vsel %vm1395_vm12, %v8662_v10, %v5829_v33  ;;  %v4154_v1 = vsel %vm1041_vm10, %v5736_v53, %v4153_v46  ;;  %v5099_v51 = vsel %vm1314_vm9, %v5097_v8, %v5098_v25 }
 0x271   : > { %v3797_v26 = vsel %vm7300_vm8, %v3592_v13, %v3796_v45  ;;  %v3390_v63 = vpack.c.bf16 %v3358_v20, %v3358_v20  ;;  %v6021_v47 = vsel %vm1428_vm13, %v5989_v3, %v5957_v32  ;;  %v9084_v55 = vld [vmem:[#allocation2 + $0x84] sm:$0xff]   ;;  %v4917_v48 = vsel %vm1041_vm10, %v5736_v53, %v4916_v43 }
 0x272   : > { %v7151_v50 = vld [vmem:[#allocation2 + $0x84] sm:$0xf0]  ;;  %3798 = vst [vmem:[#allocation2 + $0x90] sm:$0xf] %v3797_v26  ;;  %v5483_v38 = vld [vmem:[#allocation2 + $0x8c] sm:$0x1]  ;;  %6583 = vmatmul.msk.bf16.gmra.mxu1 %vm1472_vm14, %v6021_v47 }
 0x273   : > { %v9086_v10 = vld [vmem:[#allocation2 + $0x84] sm:$0xff]   ;;  %v3595_v9 = vshrl.u32 %v3390_v63, 16  ;;  %v3598_v18 = vshll.u32 %v3390_v63, 16  ;;  %v5611_v36 = vunpack.c.l.b16 %v5483_v38  ;;  %v3874_v54 = vld [vmem:[#allocation2 + $0x8c] sm:$0x1]  ;;  %4235 = vrot.lane.b32.xlu2 %v4154_v1, %s7207_s24  ;;  %v7153_v12 = vor.u32 %v7152_v5, %v7151_v50 }
 0x274   : > { %v9088_v41 = vld [vmem:[#allocation2 + $0x84] sm:$0xf0]  ;;  %v3189_v4 = vpop.f32.mrf.mxu2  ;;  %v5743_v21 = vshrl.u32 %v9084_v55, 16  ;;  %v5745_v28 = vshll.u32 %v9084_v55, 16  ;;  %v4002_v62 = vunpack.c.l.b16 %v3874_v54  ;;  %v4648_v5 = vld [vmem:[#allocation2 + $0x8c] sm:$0x1] }
 0x275   : > { %v9093_v34 = vpop.permute.xlu2 %5124  ;;  %v3597_v6 = vrot.slane %v3595_v9, 7  ;;  %v3264_v2 = vadd.f32 %v3232_v14, %v3189_v4  ;;  %v5627_v59 = vpack.c.b16 %v5611_v36, %v5611_v36  ;;  %4363 = vrot.lane.b32.xlu1 %v4327_v56, %s7208_s25  ;;  %v5933_v33 = vrot.slane %v7153_v12, 1  ;;  %v9108_v32 = vld [vmem:[#allocation2 + $0x84] sm:$0xff]   ;;  %v3803_v38 = vld [vmem:[#allocation2 + $0x9c] sm:$0xf] }
 0x276   : > { %v3327_v60 = vld [vmem:[#allocation3 + $0xc0] sm:$0xff]  ;;  %v5747_v23 = vrot.slane %v5745_v28, 1  ;;  %v9110_v46 = vld [vmem:[#allocation2 + $0x84] sm:$0xf0]  ;;  %v9121_v50 = vpack.c.b16 %v4002_v62, %v4002_v62  ;;  %v4156_v4 = vshrl.u32 %v9086_v10, 16 }
 0x277   : > { %v3600_v17 = vor.u32 %v3598_v18, %v3597_v6  ;;  %v3602_v57 = vrot.slane %v3597_v6, 4  ;;  %v3359_v45 = vmax.f32 %v3327_v60, 0.0  ;;  %3296 = vst.msk [vmem:[#allocation3 + $0xc8] sm:$0xff] %vm1395_vm12, %v3264_v2  ;;  %5008 = vrot.lane.b32.xlu0 %v4917_v48, %s7207_s24  ;;  %v5934_v53 = vrot.slane %v5627_v59, 1  ;;  %v4995_v61 = vpop.permute.xlu0 %4994  ;;  %v4350_v29 = vpop.permute.xlu1 %4349  ;;  %v3233_v43 = vld [vmem:[#allocation3 + $0xd0] sm:$0xff] }
 0x278   : > { %v5750_v58 = vshll.u32 %v5627_v59, 16  ;;  %v5155_v3 = vsel %vm1395_vm12, %v8668_v16, %v4995_v61  ;;  %v4414_v56 = vsel %vm1428_vm13, %v9071_v37, %v4350_v29  ;;  %v5748_v26 = vor.u32 %v5747_v23, %v5743_v21  ;;  %v7155_v6 = vld [vmem:[#allocation2 + $0x84] sm:$0xe]  ;;  %v7017_v61 = vld [vmem:[#allocation2 + $0x30] sm:$0xff]  }
 0x279   : > { %v3601_v15 = vsel %vm7290_vm7, %v3593_v24, %v3600_v17  ;;  %v3801_v13 = vsel %vm7250_vm2, %v3602_v57, %v3800_v22  ;;  %v3391_v20 = vpack.c.bf16 %v3359_v45, %v3359_v45  ;;  %v5187_v24 = vsel %vm1428_vm13, %v5155_v3, %v9034_v27  ;;  %6541 = vmatmul.msk.bf16.gmra.mxu3 %vm1472_vm14, %v4414_v56 }
 0x27a   : > { %3799 = vst.msk [vmem:[#allocation2 + $0x94] sm:$0xf] %vm226_vm6, %v3601_v15  ;;  %6562 = vmatmul.msk.bf16.gmra.mxu0 %vm1472_vm14, %v5187_v24  ;;  %v5935_v16 = vsel %vm1314_vm9, %v5933_v33, %v5934_v53  ;;  %v5752_v47 = vrot.slane %v5750_v58, 1  ;;  %v4158_v27 = vshll.u32 %v9086_v10, 16  ;;  %v4163_v36 = vshll.u32 %v9121_v50, 16 }
 0x27b   : > { %3802 = vst [vmem:[#allocation2 + $0x98] sm:$0x1] %v3801_v13  ;;  %v3604_v63 = vshrl.u32 %v3391_v20, 16  ;;  %v3607_v8 = vshll.u32 %v3391_v20, 16  ;;  %5136 = vrot.lane.b32.xlu2 %v5099_v51, %s7208_s25  ;;  %v4776_v48 = vunpack.c.l.b16 %v4648_v5  ;;  %v4919_v17 = vshrl.u32 %v9108_v32, 16 }
 0x27c   : > { %v3192_v37 = vpop.f32.mrf.mxu2  ;;  %v5753_v1 = vsel %vm1041_vm10, %v5748_v26, %v5752_v47  ;;  %v4160_v14 = vrot.slane %v4158_v27, 1  ;;  %v4165_v60 = vrot.slane %v4163_v36, 1  ;;  %v4921_v57 = vshll.u32 %v9108_v32, 16  ;;  %v7158_v33 = vld [vmem:[#allocation2 + $0x84] sm:$0xe] }
 0x27d   : > { %v9125_v25 = vrot.slane %v3604_v63, 7  ;;  %v9127_v9 = vpop.permute.xlu2 %4225  ;;  %v3265_v18 = vadd.f32 %v3233_v43, %v3192_v37  ;;  %5972 = vrot.lane.b32.xlu1 %v5935_v16, %s7208_s25  ;;  %v9137_v62 = vpack.c.b16 %v4776_v48, %v4776_v48  ;;  %v4384_v23 = vsel %vm1395_vm12, %v7017_v61, %v9058_v35  ;;  %v3234_v16 = vld [vmem:[#allocation3 + $0xd8] sm:$0xff] }
 0x27e   : > { %v3328_v54 = vld [vmem:[#allocation3 + $0xc8] sm:$0xff]  ;;  %v4161_v28 = vor.u32 %v4160_v14, %v4156_v4  ;;  %v4923_v15 = vrot.slane %v4921_v57, 1  ;;  %v7156_v56 = vor.u32 %v7155_v6, %v9088_v41  ;;  %v4329_v24 = vrot.slane %v9121_v50, 1 }
 0x27f   : > { %v3609_v2 = vor.u32 %v3607_v8, %v9125_v25  ;;  %v3610_v59 = vrot.slane %v9125_v25, 4  ;;  %v3360_v22 = vmax.f32 %v3328_v54, 0.0  ;;  %3297 = vst.msk [vmem:[#allocation3 + $0xd0] sm:$0xff] %vm1395_vm12, %v3265_v18  ;;  %5844 = vrot.lane.b32.xlu0 %v5753_v1, %s7207_s24  ;;  %v5959_v21 = vpop.permute.xlu1 %5958  ;;  %v4926_v13 = vshll.u32 %v9137_v62, 16  ;;  %v6980_v25 = vld [vmem:[#allocation2 + $0x90] sm:$0xe] }
 0x280   : > { %v5831_v12 = vpop.permute.xlu0 %5830  ;;  %v4166_v51 = vsel %vm1041_vm10, %v4161_v28, %v4165_v60  ;;  %v4924_v47 = vor.u32 %v4923_v15, %v4919_v17  ;;  %v4328_v27 = vrot.slane %v7156_v56, 1  ;;  %v3807_v1 = vld [vmem:[#allocation2 + $0xa4] sm:$0x1]  ;;  %v7159_v36 = vor.u32 %v7158_v33, %v9110_v46 }
 0x281   : > { %v3804_v45 = vsel %vm7300_vm8, %v3609_v2, %v3803_v38  ;;  %v3392_v53 = vpack.c.bf16 %v3360_v22, %v3360_v22  ;;  %v5991_v29 = vsel %vm1395_vm12, %v7017_v61, %v5831_v12  ;;  %v6979_v26 = vld [vmem:[#allocation2 + $0x90] sm:$0xf0]  ;;  %v4928_v5 = vrot.slane %v4926_v13, 1 }
 0x282   : > { %3805 = vst [vmem:[#allocation2 + $0x9c] sm:$0xf] %v3804_v45  ;;  %v6023_v58 = vsel %vm1428_vm13, %v5991_v29, %v5959_v21  ;;  %v5484_v20 = vld [vmem:[#allocation2 + $0x98] sm:$0x1]  ;;  %v6961_v18 = vld [vmem:[#allocation2 + $0x90] sm:$0xff]   ;;  %v5101_v54 = vrot.slane %v9137_v62, 1  ;;  %v6981_v4 = vor.u32 %v6980_v25, %v6979_v26  ;;  %v4330_v2 = vsel %vm1314_vm9, %v4328_v27, %v4329_v24 }
 0x283   : > { %v3612_v3 = vshrl.u32 %v3392_v53, 16  ;;  %6584 = vmatmul.msk.bf16.gmra.mxu1 %vm1472_vm14, %v6023_v58  ;;  %v3615_v63 = vshll.u32 %v3392_v53, 16  ;;  %4237 = vrot.lane.b32.xlu2 %v4166_v51, %s7207_s24  ;;  %v5612_v38 = vunpack.c.l.b16 %v5484_v20  ;;  %v4929_v50 = vsel %vm1041_vm10, %v4924_v47, %v4928_v5  ;;  %v3875_v53 = vld [vmem:[#allocation2 + $0x98] sm:$0x1]  ;;  %v6919_v33 = vld [vmem:[#allocation2 + $0x90] sm:$0xf0] }
 0x284   : > { %v3194_v35 = vpop.f32.mrf.mxu2  ;;  %v5100_v12 = vrot.slane %v7159_v36, 1  ;;  %v5755_v28 = vshrl.u32 %v6961_v18, 16  ;;  %v5757_v46 = vshll.u32 %v6961_v18, 16  ;;  %v4649_v29 = vld [vmem:[#allocation2 + $0x98] sm:$0x1]  ;;  %v5936_v20 = vrot.slane %v6981_v4, 1 }
 0x285   : > { %v3614_v8 = vrot.slane %v3612_v3, 7  ;;  %v9153_v37 = vpop.permute.xlu2 %5126  ;;  %v3266_v43 = vadd.f32 %v3234_v16, %v3194_v35  ;;  %4365 = vrot.lane.b32.xlu1 %v4330_v2, %s7208_s25  ;;  %v5628_v21 = vpack.c.b16 %v5612_v38, %v5612_v38  ;;  %v6920_v58 = vld [vmem:[#allocation2 + $0x90] sm:$0xe]  ;;  %v4003_v35 = vunpack.c.l.b16 %v3875_v53  ;;  %v3810_v25 = vld [vmem:[#allocation2 + $0xa8] sm:$0xf] }
 0x286   : > { %v3329_v41 = vld [vmem:[#allocation3 + $0xd0] sm:$0xff]  ;;  %v5102_v56 = vsel %vm1314_vm9, %v5100_v12, %v5101_v54  ;;  %v6921_v16 = vor.u32 %v6920_v58, %v6919_v33  ;;  %v6949_v27 = vld [vmem:[#allocation2 + $0x90] sm:$0xe] }
 0x287   : > { %v3617_v14 = vor.u32 %v3615_v63, %v3614_v8  ;;  %v3619_v48 = vrot.slane %v3614_v8, 4  ;;  %v3361_v6 = vmax.f32 %v3329_v41, 0.0  ;;  %3298 = vst.msk [vmem:[#allocation3 + $0xd8] sm:$0xff] %vm1395_vm12, %v3266_v43  ;;  %5010 = vrot.lane.b32.xlu0 %v4929_v50, %s7207_s24  ;;  %v4352_v60 = vpop.permute.xlu1 %4351  ;;  %v5937_v3 = vrot.slane %v5628_v21, 1  ;;  %v3235_v63 = vld [vmem:[#allocation3 + $0xe0] sm:$0xff] }
 0x288   : > { %v4997_v22 = vpop.permute.xlu0 %4996  ;;  %v4416_v15 = vsel %vm1428_vm13, %v4384_v23, %v4352_v60  ;;  %v5762_v24 = vshll.u32 %v5628_v21, 16  ;;  %v4019_v41 = vpack.c.b16 %v4003_v35, %v4003_v35  ;;  %v3814_v35 = vld [vmem:[#allocation2 + $0xb0] sm:$0x1] }
 0x289   : > { %v3618_v62 = vsel %vm7290_vm7, %v3610_v59, %v3617_v14  ;;  %v3808_v17 = vsel %vm7250_vm2, %v3619_v48, %v3807_v1  ;;  %v3393_v57 = vpack.c.bf16 %v3361_v6, %v3361_v6  ;;  %v5157_v45 = vsel %vm1395_vm12, %v7017_v61, %v4997_v22  ;;  %v6948_v59 = vld [vmem:[#allocation2 + $0x90] sm:$0xf0]  ;;  %6542 = vmatmul.msk.bf16.gmra.mxu3 %vm1472_vm14, %v4416_v15  ;;  %v7161_v53 = vld [vmem:[#allocation2 + $0x9c] sm:$0xe] }
 0x28a   : > { %3806 = vst.msk [vmem:[#allocation2 + $0xa0] sm:$0xf] %vm226_vm6, %v3618_v62  ;;  %v5189_v13 = vsel %vm1428_vm13, %v5157_v45, %v9093_v34  ;;  %v5759_v61 = vrot.slane %v5757_v46, 1  ;;  %v4777_v34 = vunpack.c.l.b16 %v4649_v29  ;;  %v5938_v8 = vsel %vm1314_vm9, %v5936_v20, %v5937_v3 }
 0x28b   : > { %3809 = vst [vmem:[#allocation2 + $0xa4] sm:$0x1] %v3808_v17  ;;  %v3621_v51 = vshrl.u32 %v3393_v57, 16  ;;  %6563 = vmatmul.msk.bf16.gmra.mxu0 %vm1472_vm14, %v5189_v13  ;;  %v3624_v26 = vshll.u32 %v3393_v57, 16  ;;  %5138 = vrot.lane.b32.xlu2 %v5102_v56, %s7208_s25  ;;  %v5764_v43 = vrot.slane %v5762_v24, 1  ;;  %v6950_v36 = vor.u32 %v6949_v27, %v6948_v59 }
 0x28c   : > { %v3197_v23 = vpop.f32.mrf.mxu2  ;;  %v5760_v1 = vor.u32 %v5759_v61, %v5755_v28  ;;  %v9180_v50 = vpack.c.b16 %v4777_v34, %v4777_v34  ;;  %v4331_v48 = vrot.slane %v6921_v16, 1  ;;  %v4175_v60 = vshll.u32 %v4019_v41, 16 }
 0x28d   : > { %v9175_v47 = vrot.slane %v3621_v51, 7  ;;  %v3267_v5 = vadd.f32 %v3235_v63, %v3197_v23  ;;  %v9178_v18 = vpop.permute.xlu2 %4227  ;;  %5974 = vrot.lane.b32.xlu1 %v5938_v8, %s7208_s25  ;;  %v4332_v21 = vrot.slane %v4019_v41, 1  ;;  %v5103_v17 = vrot.slane %v6950_v36, 1 }
 0x28e   : > { %v3330_v38 = vld [vmem:[#allocation3 + $0xd8] sm:$0xff]  ;;  %v5765_v6 = vsel %vm1041_vm10, %v5760_v1, %v5764_v43  ;;  %v4938_v12 = vshll.u32 %v9180_v50, 16  ;;  %v4386_v29 = vsel %vm1395_vm12, %v8766_v11, %v9127_v9  ;;  %v4177_v33 = vrot.slane %v4175_v60, 1  ;;  %v3236_v11 = vld [vmem:[#allocation3 + $0xe8] sm:$0xff] }
 0x28f   : > { %v3626_v54 = vor.u32 %v3624_v26, %v9175_v47  ;;  %v3627_v4 = vrot.slane %v9175_v47, 4  ;;  %v3362_v14 = vmax.f32 %v3330_v38, 0.0  ;;  %3299 = vst.msk [vmem:[#allocation3 + $0xe0] sm:$0xff] %vm1395_vm12, %v3267_v5  ;;  %v5961_v22 = vpop.permute.xlu1 %5960  ;;  %5846 = vrot.lane.b32.xlu0 %v5765_v6, %s7207_s24  ;;  %v5104_v9 = vrot.slane %v9180_v50, 1 }
 0x290   : > { %v4940_v15 = vrot.slane %v4938_v12, 1  ;;  %v4178_v56 = vsel %vm1041_vm10, %v5760_v1, %v4177_v33 }
 0x291   : > { %v5833_v2 = vpop.permute.xlu0 %5832  ;;  %v3811_v28 = vsel %vm7300_vm8, %v3626_v54, %v3810_v25  ;;  %v3394_v46 = vpack.c.bf16 %v3362_v14, %v3362_v14  ;;  %v9193_v57 = vld [vmem:[#allocation2 + $0x9c] sm:$0xff]  }
 0x292   : > { %v5993_v62 = vsel %vm1395_vm12, %v8764_v30, %v5833_v2  ;;  %v7160_v45 = vld [vmem:[#allocation2 + $0x9c] sm:$0xf0]  ;;  %3812 = vst [vmem:[#allocation2 + $0xa8] sm:$0xf] %v3811_v28  ;;  %v5485_v13 = vld [vmem:[#allocation2 + $0xa4] sm:$0x1]  ;;  %v4333_v30 = vsel %vm1314_vm9, %v4331_v48, %v4332_v21  ;;  %v4941_v63 = vsel %vm1041_vm10, %v5760_v1, %v4940_v15 }
 0x293   : > { %v6025_v58 = vsel %vm1428_vm13, %v5993_v62, %v5961_v22  ;;  %v3629_v20 = vshrl.u32 %v3394_v46, 16  ;;  %v3632_v3 = vshll.u32 %v3394_v46, 16  ;;  %v9201_v59 = vld [vmem:[#allocation2 + $0x9c] sm:$0xff]   ;;  %v5613_v24 = vunpack.c.l.b16 %v5485_v13  ;;  %4239 = vrot.lane.b32.xlu2 %v4178_v56, %s7207_s24  ;;  %v3876_v2 = vld [vmem:[#allocation2 + $0xa4] sm:$0x1] }
 0x294   : > { %6585 = vmatmul.msk.bf16.gmra.mxu1 %vm1472_vm14, %v6025_v58  ;;  %v9203_v51 = vld [vmem:[#allocation2 + $0x9c] sm:$0xf0]  ;;  %v3199_v61 = vpop.f32.mrf.mxu2  ;;  %v7162_v27 = vor.u32 %v7161_v53, %v7160_v45  ;;  %v5767_v50 = vshrl.u32 %v9193_v57, 16  ;;  %v5769_v1 = vshll.u32 %v9193_v57, 16  ;;  %v5105_v62 = vsel %vm1314_vm9, %v5103_v17, %v5104_v9  ;;  %v7164_v58 = vld [vmem:[#allocation2 + $0x9c] sm:$0xe] }
 0x295   : > { %v3631_v26 = vrot.slane %v3629_v20, 7  ;;  %v3268_v23 = vadd.f32 %v3236_v11, %v3199_v61  ;;  %v9209_v16 = vpop.permute.xlu2 %5128  ;;  %v5629_v47 = vpack.c.b16 %v5613_v24, %v5613_v24  ;;  %4367 = vrot.lane.b32.xlu1 %v4333_v30, %s7208_s25  ;;  %v9222_v22 = vld [vmem:[#allocation2 + $0x9c] sm:$0xff]   ;;  %v4004_v33 = vunpack.c.l.b16 %v3876_v2  ;;  %v3817_v13 = vld [vmem:[#allocation2 + $0xb4] sm:$0xf] }
 0x296   : > { %v3331_v34 = vld [vmem:[#allocation3 + $0xe0] sm:$0xff]  ;;  %v9224_v60 = vld [vmem:[#allocation2 + $0x9c] sm:$0xf0]  ;;  %v5939_v21 = vrot.slane %v7162_v27, 1  ;;  %v5771_v28 = vrot.slane %v5769_v1, 1  ;;  %v4180_v24 = vshrl.u32 %v9201_v59, 16  ;;  %v7165_v27 = vor.u32 %v7164_v58, %v9203_v51 }
 0x297   : > { %v3634_v5 = vor.u32 %v3632_v3, %v3631_v26  ;;  %v3636_v8 = vrot.slane %v3631_v26, 4  ;;  %v3363_v43 = vmax.f32 %v3331_v34, 0.0  ;;  %3300 = vst.msk [vmem:[#allocation3 + $0xe8] sm:$0xff] %vm1395_vm12, %v3268_v23  ;;  %v4354_v38 = vpop.permute.xlu1 %4353  ;;  %v5940_v41 = vrot.slane %v5629_v47, 1  ;;  %5012 = vrot.lane.b32.xlu0 %v4941_v63, %s7207_s24  ;;  %v7018_v34 = vld [vmem:[#allocation2 + $0x48] sm:$0xff]  }
 0x298   : > { %v5774_v36 = vshll.u32 %v5629_v47, 16  ;;  %v4418_v12 = vsel %vm1428_vm13, %v4386_v29, %v4354_v38  ;;  %v5772_v45 = vor.u32 %v5771_v28, %v5767_v50  ;;  %v4020_v56 = vpack.c.b16 %v4004_v33, %v4004_v33 }
 0x299   : > { %v4999_v25 = vpop.permute.xlu0 %4998  ;;  %v3635_v54 = vsel %vm7290_vm7, %v3627_v4, %v3634_v5  ;;  %v3815_v14 = vsel %vm7250_vm2, %v3636_v8, %v3814_v35  ;;  %v3395_v48 = vpack.c.bf16 %v3363_v43, %v3363_v43  ;;  %6543 = vmatmul.msk.bf16.gmra.mxu3 %vm1472_vm14, %v4418_v12  ;;  %v5941_v17 = vsel %vm1314_vm9, %v5939_v21, %v5940_v41 }
 0x29a   : > { %v5159_v6 = vsel %vm1395_vm12, %v8793_v40, %v4999_v25  ;;  %3813 = vst.msk [vmem:[#allocation2 + $0xac] sm:$0xf] %vm226_vm6, %v3635_v54  ;;  %v4650_v40 = vld [vmem:[#allocation2 + $0xa4] sm:$0x1]  ;;  %v5776_v53 = vrot.slane %v5774_v36, 1  ;;  %v4187_v63 = vshll.u32 %v4020_v56, 16  ;;  %v4388_v47 = vsel %vm1395_vm12, %v7018_v34, %v9178_v18 }
 0x29b   : > { %v5191_v4 = vsel %vm1428_vm13, %v5159_v6, %v9153_v37  ;;  %3816 = vst [vmem:[#allocation2 + $0xb0] sm:$0x1] %v3815_v14  ;;  %v3638_v46 = vshrl.u32 %v3395_v48, 16  ;;  %v3641_v29 = vshll.u32 %v3395_v48, 16  ;;  %5140 = vrot.lane.b32.xlu2 %v5105_v62, %s7208_s25  ;;  %v4182_v37 = vshll.u32 %v9201_v59, 16 }
 0x29c   : > { %6564 = vmatmul.msk.bf16.gmra.mxu0 %vm1472_vm14, %v5191_v4  ;;  %v5777_v30 = vsel %vm1041_vm10, %v5772_v45, %v5776_v53  ;;  %v4778_v61 = vunpack.c.l.b16 %v4650_v40  ;;  %v7167_v25 = vld [vmem:[#allocation2 + $0x9c] sm:$0xe]  ;;  %v4189_v50 = vrot.slane %v4187_v63, 1  ;;  %v4335_v1 = vrot.slane %v4020_v56, 1  ;;  %v3821_v45 = vld [vmem:[#allocation2 + $0xbc] sm:$0x1] }
 0x29d   : > { %v9233_v15 = vrot.slane %v3638_v46, 7  ;;  %v9237_v3 = vpop.permute.xlu2 %4229  ;;  %5976 = vrot.lane.b32.xlu1 %v5941_v17, %s7208_s25  ;;  %v4184_v23 = vrot.slane %v4182_v37, 1  ;;  %v4943_v14 = vshrl.u32 %v9222_v22, 16  ;;  %v4945_v48 = vshll.u32 %v9222_v22, 16  ;;  %v6983_v17 = vld [vmem:[#allocation2 + $0xa8] sm:$0xe] }
 0x29e   : > { %v3332_v20 = vld [vmem:[#allocation3 + $0xe8] sm:$0xff]  ;;  %v9244_v35 = vpack.c.b16 %v4778_v61, %v4778_v61  ;;  %v4334_v2 = vrot.slane %v7165_v27, 1 }
 0x29f   : > { %v3643_v11 = vor.u32 %v3641_v29, %v9233_v15  ;;  %v3364_v9 = vmax.f32 %v3332_v20, 0.0  ;;  %v5963_v26 = vpop.permute.xlu1 %5962  ;;  %5848 = vrot.lane.b32.xlu0 %v5777_v30, %s7207_s24  ;;  %v4185_v41 = vor.u32 %v4184_v23, %v4180_v24  ;;  %v4947_v21 = vrot.slane %v4945_v48, 1 }
 0x2a0   : > { %v4950_v51 = vshll.u32 %v9244_v35, 16  ;;  %v3644_v40 = vrot.slane %v9233_v15, 4  ;;  %v4336_v58 = vsel %vm1314_vm9, %v4334_v2, %v4335_v1  ;;  %v7168_v29 = vor.u32 %v7167_v25, %v9224_v60 }
 0x2a1   : > { %v3818_v5 = vsel %vm7300_vm8, %v3643_v11, %v3817_v13  ;;  %v3396_v8 = vpack.c.bf16 %v3364_v9, %v3364_v9  ;;  %v5835_v43 = vpop.permute.xlu0 %5834  ;;  %v4190_v6 = vsel %vm1041_vm10, %v4185_v41, %v4189_v50  ;;  %v6982_v28 = vld [vmem:[#allocation2 + $0xa8] sm:$0xf0]  ;;  %v4948_v20 = vor.u32 %v4947_v21, %v4943_v14  ;;  %v6923_v21 = vld [vmem:[#allocation2 + $0xa8] sm:$0xe] }
 0x2a2   : > { %3819 = vst [vmem:[#allocation2 + $0xb4] sm:$0xf] %v3818_v5  ;;  %v5995_v38 = vsel %vm1395_vm12, %v7018_v34, %v5835_v43  ;;  %v5486_v36 = vld [vmem:[#allocation2 + $0xb0] sm:$0x1]  ;;  %v9260_v62 = vld [vmem:[#allocation2 + $0xa8] sm:$0xff]   ;;  %v4952_v33 = vrot.slane %v4950_v51, 1  ;;  %v6984_v9 = vor.u32 %v6983_v17, %v6982_v28 }
 0x2a3   : > { %v3646_v54 = vshrl.u32 %v3396_v8, 16  ;;  %v6027_v18 = vsel %vm1428_vm13, %v5995_v38, %v5963_v26  ;;  %v3649_v4 = vshll.u32 %v3396_v8, 16  ;;  %4241 = vrot.lane.b32.xlu2 %v4190_v6, %s7207_s24  ;;  %v5614_v46 = vunpack.c.l.b16 %v5486_v36  ;;  %v3877_v56 = vld [vmem:[#allocation2 + $0xb0] sm:$0x1]  ;;  %v6922_v48 = vld [vmem:[#allocation2 + $0xa8] sm:$0xf0] }
 0x2a4   : > { %6586 = vmatmul.msk.bf16.gmra.mxu1 %vm1472_vm14, %v6027_v18  ;;  %v5106_v11 = vrot.slane %v7168_v29, 1  ;;  %v5107_v15 = vrot.slane %v9244_v35, 1  ;;  %v5781_v24 = vshll.u32 %v9260_v62, 16  ;;  %v4651_v26 = vld [vmem:[#allocation2 + $0xb0] sm:$0x1]  ;;  %v4953_v63 = vsel %vm1041_vm10, %v4948_v20, %v4952_v33 }
 0x2a5   : > { %v3648_v12 = vrot.slane %v3646_v54, 7  ;;  %v9263_v53 = vpop.permute.xlu2 %5130  ;;  %v5630_v30 = vpack.c.b16 %v5614_v46, %v5614_v46  ;;  %4369 = vrot.lane.b32.xlu1 %v4336_v58, %s7208_s25  ;;  %v4005_v41 = vunpack.c.l.b16 %v3877_v56  ;;  %v4779_v50 = vunpack.c.l.b16 %v4651_v26  ;;  %v9296_v28 = vld [vmem:[%s9754_s4] ss:$0 sm:$0xff]  ;;  %v6952_v58 = vld [vmem:[#allocation2 + $0xa8] sm:$0xe] }
 0x2a6   : > { %v5783_v27 = vrot.slane %v5781_v24, 1  ;;  %v5108_v1 = vsel %vm1314_vm9, %v5106_v11, %v5107_v15  ;;  %v6924_v33 = vor.u32 %v6923_v21, %v6922_v48 }
 0x2a7   : > { %v3651_v37 = vor.u32 %v3649_v4, %v3648_v12  ;;  %v3653_v13 = vrot.slane %v3648_v12, 4  ;;  %v4356_v61 = vpop.permute.xlu1 %4355  ;;  %5014 = vrot.lane.b32.xlu0 %v4953_v63, %s7207_s24  ;;  %v5943_v43 = vrot.slane %v5630_v30, 1  ;;  %v5786_v38 = vshll.u32 %v5630_v30, 16  ;;  %v6951_v12 = vld [vmem:[#allocation2 + $0xa8] sm:$0xf0] }
 0x2a8   : > { %v4420_v8 = vsel %vm1428_vm13, %v4388_v47, %v4356_v61  ;;  %v5942_v47 = vrot.slane %v6984_v9, 1  ;;  %v4021_v54 = vpack.c.b16 %v4005_v41, %v4005_v41  ;;  %v9286_v18 = vpack.c.b16 %v4779_v50, %v4779_v50 }
 0x2a9   : > { %v3652_v23 = vsel %vm7290_vm7, %v3644_v40, %v3651_v37  ;;  %v3822_v60 = vsel %vm7250_vm2, %v3653_v13, %v3821_v45  ;;  %v5001_v5 = vpop.permute.xlu0 %5000  ;;  %6544 = vmatmul.msk.bf16.gmra.mxu3 %vm1472_vm14, %v4420_v8  ;;  %v5788_v36 = vrot.slane %v5786_v38, 1  ;;  %v6953_v61 = vor.u32 %v6952_v58, %v6951_v12  ;;  %v7170_v15 = vld [vmem:[#allocation2 + $0xb4] sm:$0xe] }
 0x2aa   : > { %3820 = vst.msk [vmem:[#allocation2 + $0xb8] sm:$0xf] %vm226_vm6, %v3652_v23  ;;  %v5161_v35 = vsel %vm1395_vm12, %v7018_v34, %v5001_v5  ;;  %v5779_v34 = vshrl.u32 %v9260_v62, 16  ;;  %v4199_v51 = vshll.u32 %v4021_v54, 16  ;;  %v4962_v2 = vshll.u32 %v9286_v18, 16 }
 0x2ab   : > { %3823 = vst [vmem:[#allocation2 + $0xbc] sm:$0x1] %v3822_v60  ;;  %v5193_v25 = vsel %vm1428_vm13, %v5161_v35, %v9209_v16  ;;  %5142 = vrot.lane.b32.xlu2 %v5108_v1, %s7208_s25  ;;  %v5944_v16 = vsel %vm1314_vm9, %v5942_v47, %v5943_v43  ;;  %v4338_v56 = vrot.slane %v4021_v54, 1  ;;  %v7173_v21 = vld [vmem:[#allocation2 + $0xb4] sm:$0xe] }
 0x2ac   : > { %6565 = vmatmul.msk.bf16.gmra.mxu0 %vm1472_vm14, %v5193_v25  ;;  %v5784_v6 = vor.u32 %v5783_v27, %v5779_v34  ;;  %v4201_v45 = vrot.slane %v4199_v51, 1  ;;  %v4964_v60 = vrot.slane %v4962_v2, 1  ;;  %v4390_v25 = vsel %vm1395_vm12, %v8862_v42, %v9237_v3 }
 0x2ad   : > { %v9288_v14 = vpop.permute.xlu2 %4231  ;;  %5978 = vrot.lane.b32.xlu1 %v5944_v16, %s7208_s25 }
 0x2ae   : > { %v5789_v46 = vsel %vm1041_vm10, %v5784_v6, %v5788_v36  ;;  %v4494_v13 = vpop.f32.mrf.mxu3  ;;  %v4202_v23 = vsel %vm1041_vm10, %v5784_v6, %v4201_v45  ;;  %v4965_v47 = vsel %vm1041_vm10, %v5784_v6, %v4964_v60  ;;  %v5110_v36 = vrot.slane %v9286_v18, 1  ;;  %v7176_v60 = vld [vmem:[#allocation2 + $0xb4] sm:$0xe] }
 0x2af   : > { %v5965_v4 = vpop.permute.xlu1 %5964  ;;  %5850 = vrot.lane.b32.xlu0 %v5789_v46, %s7207_s24  ;;  %v4495_v8 = vadd.f32 %v9296_v28, %v4494_v13  ;;  %v5109_v6 = vrot.slane %v6953_v61, 1 }
 0x2b1   : > { %v5837_v40 = vpop.permute.xlu0 %5836  ;;  %v9299_v29 = vld [vmem:[#allocation2 + $0xb4] sm:$0xff]   ;;  %4574 = vst.msk [vmem:[#allocation3] sm:$0xff] %vm1395_vm12, %v4495_v8  ;;  %v5111_v58 = vsel %vm1314_vm9, %v5109_v6, %v5110_v36 }
 0x2b2   : > { %v7169_v37 = vld [vmem:[#allocation2 + $0xb4] sm:$0xf0]  ;;  %v5997_v30 = vsel %vm1395_vm12, %v8860_v7, %v5837_v40  ;;  %v5487_v11 = vld [vmem:[#allocation2 + $0xbc] sm:$0x1]  ;;  %v4337_v7 = vrot.slane %v6924_v33, 1  ;;  %v5793_v50 = vshll.u32 %v9299_v29, 16 }
 0x2b3   : > { %v9301_v20 = vld [vmem:[#allocation2 + $0xb4] sm:$0xff]   ;;  %v6029_v26 = vsel %vm1428_vm13, %v5997_v30, %v5965_v4  ;;  %v3878_v63 = vld [vmem:[#allocation2 + $0xbc] sm:$0x1]  ;;  %v5615_v5 = vunpack.c.l.b16 %v5487_v11  ;;  %4243 = vrot.lane.b32.xlu2 %v4202_v23, %s7207_s24  ;;  %v7171_v41 = vor.u32 %v7170_v15, %v7169_v37  ;;  %v5791_v54 = vshrl.u32 %v9299_v29, 16 }
 0x2b4   : > { %v9303_v17 = vld [vmem:[#allocation2 + $0xb4] sm:$0xf0]  ;;  %6587 = vmatmul.msk.bf16.gmra.mxu1 %vm1472_vm14, %v6029_v26  ;;  %v4006_v27 = vunpack.c.l.b16 %v3878_v63  ;;  %v4339_v38 = vsel %vm1314_vm9, %v4337_v7, %v4338_v56  ;;  %v4652_v1 = vld [vmem:[#allocation2 + $0xbc] sm:$0x1]  ;;  %v4206_v48 = vshll.u32 %v9301_v20, 16  ;;  %v5795_v3 = vrot.slane %v5793_v50, 1 }
 0x2b5   : > { %v9308_v9 = vld [vmem:[#allocation2 + $0xb4] sm:$0xff]   ;;  %v9317_v35 = vpop.permute.xlu2 %5132  ;;  %v5631_v43 = vpack.c.b16 %v5615_v5, %v5615_v5  ;;  %4371 = vrot.lane.b32.xlu1 %v4339_v38, %s7208_s25  ;;  %v4780_v4 = vunpack.c.l.b16 %v4652_v1  ;;  %v5945_v40 = vrot.slane %v7171_v41, 1  ;;  %v4204_v61 = vshrl.u32 %v9301_v20, 16 }
 0x2b6   : > { %v9310_v24 = vld [vmem:[#allocation2 + $0xb4] sm:$0xf0]  ;;  %v4022_v12 = vpack.c.b16 %v4006_v27, %v4006_v27  ;;  %v4496_v46 = vpop.f32.mrf.mxu3  ;;  %v5796_v33 = vor.u32 %v5795_v3, %v5791_v54  ;;  %v4208_v37 = vrot.slane %v4206_v48, 1  ;;  %v4969_v13 = vshll.u32 %v9308_v9, 16 }
 0x2b7   : > { %v4358_v34 = vpop.permute.xlu1 %4357  ;;  %v5798_v51 = vshll.u32 %v5631_v43, 16  ;;  %5016 = vrot.lane.b32.xlu0 %v4965_v47, %s7207_s24  ;;  %v5946_v45 = vrot.slane %v5631_v43, 1  ;;  %v4497_v30 = vadd.f32 %v9296_v28, %v4496_v46  ;;  %v4796_v26 = vpack.c.b16 %v4780_v4, %v4780_v4  ;;  %v7019_v43 = vld [vmem:[#allocation2 + $0x60] sm:$0xff]  }
 0x2b8   : > { %v4422_v42 = vsel %vm1428_vm13, %v4390_v25, %v4358_v34  ;;  %v4211_v11 = vshll.u32 %v4022_v12, 16  ;;  %v7174_v23 = vor.u32 %v7173_v21, %v9303_v17  ;;  %v4209_v5 = vor.u32 %v4208_v37, %v4204_v61 }
 0x2b9   : > { %v5003_v16 = vpop.permute.xlu0 %5002  ;;  %6545 = vmatmul.msk.bf16.gmra.mxu3 %vm1472_vm14, %v4422_v42  ;;  %4575 = vst.msk [vmem:[#allocation3 + $0x8] sm:$0xff] %vm1395_vm12, %v4497_v30  ;;  %v4971_v7 = vrot.slane %v4969_v13, 1  ;;  %v4967_v38 = vshrl.u32 %v9308_v9, 16  ;;  %v4974_v17 = vshll.u32 %v4796_v26, 16  ;;  %v4341_v1 = vrot.slane %v4022_v12, 1 }
 0x2ba   : > { %v5163_v2 = vsel %vm1395_vm12, %v8881_v31, %v5003_v16  ;;  %v5800_v31 = vrot.slane %v5798_v51, 1  ;;  %v4213_v25 = vrot.slane %v4211_v11, 1  ;;  %v4340_v50 = vrot.slane %v7174_v23, 1 }
 0x2bb   : > { %v5195_v18 = vsel %vm1428_vm13, %v5163_v2, %v9263_v53  ;;  %5144 = vrot.lane.b32.xlu2 %v5111_v58, %s7208_s25  ;;  %v5947_v53 = vsel %vm1314_vm9, %v5945_v40, %v5946_v45  ;;  %v7177_v34 = vor.u32 %v7176_v60, %v9310_v24  ;;  %v4972_v36 = vor.u32 %v4971_v7, %v4967_v38 }
 0x2bc   : > { %6566 = vmatmul.msk.bf16.gmra.mxu0 %vm1472_vm14, %v5195_v18  ;;  %v5801_v15 = vsel %vm1041_vm10, %v5796_v33, %v5800_v31  ;;  %v4214_v47 = vsel %vm1041_vm10, %v4209_v5, %v4213_v25  ;;  %v4976_v48 = vrot.slane %v4974_v17, 1  ;;  %v4342_v16 = vsel %vm1314_vm9, %v4340_v50, %v4341_v1  ;;  %v5346_v18 = vld [vmem:[#allocation3] sm:$0xff] }
 0x2bd   : > { %v4234_v56 = vpop.permute.xlu2 %4233  ;;  %5980 = vrot.lane.b32.xlu1 %v5947_v53, %s7208_s25  ;;  %v4392_v42 = vsel %vm1395_vm12, %v7019_v43, %v9288_v14  ;;  %v5112_v51 = vrot.slane %v7177_v34, 1  ;;  %v5113_v2 = vrot.slane %v4796_v26, 1  ;;  %v7020_v25 = vld [vmem:[#allocation2 + $0x78] sm:$0xff]  }
 0x2be   : > { %v4977_v6 = vsel %vm1041_vm10, %v4972_v36, %v4976_v48  ;;  %v4394_v13 = vsel %vm1395_vm12, %v8960_v19, %v4234_v56 }
 0x2bf   : > { %v5967_v63 = vpop.permute.xlu1 %5966  ;;  %5852 = vrot.lane.b32.xlu0 %v5801_v15, %s7207_s24  ;;  %v5114_v14 = vsel %vm1314_vm9, %v5112_v51, %v5113_v2 }
 0x2c0   : > { %v5347_v61 = vld [vmem:[#allocation3 + $0x8] sm:$0xff] }
 0x2c1   : > { %v5839_v8 = vpop.permute.xlu0 %5838 }
 0x2c2   : > { %v5999_v27 = vsel %vm1395_vm12, %v7019_v43, %v5839_v8 }
 0x2c3   : > { %v6031_v41 = vsel %vm1428_vm13, %v5999_v27, %v5967_v63  ;;  %4245 = vrot.lane.b32.xlu2 %v4214_v47, %s7207_s24  ;;  %v3237_v27 = vld [vmem:[#allocation3 + $0xf0] sm:$0xff] }
 0x2c4   : > { %6588 = vmatmul.msk.bf16.gmra.mxu1 %vm1472_vm14, %v6031_v41 }
 0x2c5   : > { %v5135_v54 = vpop.permute.xlu2 %5134  ;;  %4373 = vrot.lane.b32.xlu1 %v4342_v16, %s7208_s25 }
 0x2c7   : > { %v4360_v3 = vpop.permute.xlu1 %4359  ;;  %5018 = vrot.lane.b32.xlu0 %v4977_v6, %s7207_s24 }
 0x2c8   : > { %v4424_v24 = vsel %vm1428_vm13, %v4392_v42, %v4360_v3 }
 0x2c9   : > { %v5005_v12 = vpop.permute.xlu0 %5004  ;;  %6546 = vmatmul.msk.bf16.gmra.mxu3 %vm1472_vm14, %v4424_v24 }
 0x2ca   : > { %v5165_v4 = vsel %vm1395_vm12, %v7019_v43, %v5005_v12  ;;  %v3238_v12 = vld [vmem:[#allocation3 + $0xf8] sm:$0xff] }
 0x2cb   : > { %v5197_v21 = vsel %vm1428_vm13, %v5165_v4, %v9317_v35  ;;  %5146 = vrot.lane.b32.xlu2 %v5114_v14, %s7208_s25  ;;  %v7021_v14 = vld [vmem:[%s7274_s23] sm:$0xff] }
 0x2cc   : > { %6567 = vmatmul.msk.bf16.gmra.mxu0 %vm1472_vm14, %v5197_v21 }
 0x2cd   : > { %v4236_v46 = vpop.permute.xlu2 %4235 }
 0x2cf   : > { %v5266_v40 = vpop.f32.mrf.mxu0  ;;  %v5969_v45 = vpop.permute.xlu1 %5968 }
 0x2d0   : > { %v5378_v58 = vadd.f32 %v5346_v18, %v5266_v40 }
 0x2d1   : > { %v5841_v33 = vpop.permute.xlu0 %5840 }
 0x2d2   : > { %v6001_v37 = vsel %vm1395_vm12, %v8958_v44, %v5841_v33  ;;  %5410 = vst.msk [vmem:[#allocation3] sm:$0xff] %vm1395_vm12, %v5378_v58 }
 0x2d3   : > { %v6033_v31 = vsel %vm1428_vm13, %v6001_v37, %v5969_v45 }
 0x2d4   : > { %6589 = vmatmul.msk.bf16.gmra.mxu1 %vm1472_vm14, %v6033_v31 }
 0x2d5   : > { %v5137_v35 = vpop.permute.xlu2 %5136 }
 0x2d7   : > { %v5268_v30 = vpop.f32.mrf.mxu0  ;;  %v4362_v11 = vpop.permute.xlu1 %4361 }
 0x2d8   : > { %v5379_v15 = vadd.f32 %v5347_v61, %v5268_v30  ;;  %v4426_v26 = vsel %vm1428_vm13, %v4394_v13, %v4362_v11 }
 0x2d9   : > { %v5007_v53 = vpop.permute.xlu0 %5006  ;;  %v4499_v23 = vpop.f32.mrf.mxu3  ;;  %6547 = vmatmul.msk.bf16.gmra.mxu3 %vm1472_vm14, %v4426_v26  ;;  %v6182_v5 = vld [vmem:[#allocation3] sm:$0xff] }
 0x2da   : > { %v5167_v44 = vsel %vm1395_vm12, %v8983_v52, %v5007_v53  ;;  %v4500_v60 = vadd.f32 %v9296_v28, %v4499_v23  ;;  %5411 = vst.msk [vmem:[#allocation3 + $0x8] sm:$0xff] %vm1395_vm12, %v5379_v15 }
 0x2db   : > { %v5199_v63 = vsel %vm1428_vm13, %v5167_v44, %v5135_v54  ;;  %v4396_v54 = vsel %vm1395_vm12, %v7020_v25, %v4236_v46 }
 0x2dc   : > { %4576 = vst.msk [vmem:[#allocation3 + $0x10] sm:$0xff] %vm1395_vm12, %v4500_v60  ;;  %6568 = vmatmul.msk.bf16.gmra.mxu0 %vm1472_vm14, %v5199_v63 }
 0x2dd   : > { %v9386_v19 = vpop.permute.xlu2 %4237 }
 0x2de   : > { %v4398_v49 = vsel %vm1395_vm12, %v9086_v10, %v9386_v19 }
 0x2df   : > { %v6102_v56 = vpop.f32.mrf.mxu1  ;;  %v5971_v8 = vpop.permute.xlu1 %5970 }
 0x2e0   : > { %v6214_v43 = vadd.f32 %v6182_v5, %v6102_v56 }
 0x2e1   : > { %v5843_v7 = vpop.permute.xlu0 %5842  ;;  %v3202_v52 = vpop.f32.mrf.mxu2  ;;  %v6183_v16 = vld [vmem:[#allocation3 + $0x8] sm:$0xff] }
 0x2e2   : > { %v6003_v38 = vsel %vm1395_vm12, %v7020_v25, %v5843_v7  ;;  %v3269_v41 = vadd.f32 %v3237_v27, %v3202_v52  ;;  %v4501_v17 = vpop.f32.mrf.mxu3  ;;  %6246 = vst.msk [vmem:[#allocation3] sm:$0xff] %vm1395_vm12, %v6214_v43  ;;  %v7022_v7 = vld [vmem:[%s7274_s23 + $0x8] sm:$0xff] }
 0x2e3   : > { %v6035_v50 = vsel %vm1428_vm13, %v6003_v38, %v5971_v8  ;;  %v4502_v1 = vadd.f32 %v9296_v28, %v4501_v17  ;;  %v5271_v47 = vpop.f32.mrf.mxu0  ;;  %v5348_v34 = vld [vmem:[#allocation3 + $0x10] sm:$0xff]  ;;  %v3824_v8 = vld [vmem:[#allocation2 + $0xc0] sm:$0xf] }
 0x2e4   : > { %3301 = vst.msk [vmem:[#allocation3 + $0xf0] sm:$0xff] %vm1395_vm12, %v3269_v41  ;;  %6590 = vmatmul.msk.bf16.gmra.mxu1 %vm1472_vm14, %v6035_v50  ;;  %v5380_v36 = vadd.f32 %v5348_v34, %v5271_v47 }
 0x2e5   : > { %4577 = vst.msk [vmem:[#allocation3 + $0x18] sm:$0xff] %vm1395_vm12, %v4502_v1  ;;  %v9400_v45 = vpop.permute.xlu2 %5138 }
 0x2e6   : > { %5412 = vst.msk [vmem:[#allocation3 + $0x10] sm:$0xff] %vm1395_vm12, %v5380_v36 }
 0x2e7   : > { %v6104_v48 = vpop.f32.mrf.mxu1  ;;  %v4364_v42 = vpop.permute.xlu1 %4363 }
 0x2e8   : > { %v6215_v51 = vadd.f32 %v6183_v16, %v6104_v48  ;;  %v4428_v2 = vsel %vm1428_vm13, %v4396_v54, %v4364_v42 }
 0x2e9   : > { %v5009_v3 = vpop.permute.xlu0 %5008  ;;  %v3204_v6 = vpop.f32.mrf.mxu2  ;;  %v6278_v24 = vld [vmem:[#allocation3] sm:$0xff]  ;;  %6548 = vmatmul.msk.bf16.gmra.mxu3 %vm1472_vm14, %v4428_v2 }
 0x2ea   : > { %v5169_v4 = vsel %vm1395_vm12, %v7020_v25, %v5009_v3  ;;  %v3270_v21 = vadd.f32 %v3238_v12, %v3204_v6  ;;  %v6310_v18 = vadd.f32 %v7021_v14, %v6278_v24  ;;  %6247 = vst.msk [vmem:[#allocation3 + $0x8] sm:$0xff] %vm1395_vm12, %v6215_v51  ;;  %v7023_v14 = vld [vmem:[%s7274_s23 + $0x10] sm:$0xff] }
 0x2eb   : > { %v3333_v40 = vld [vmem:[#allocation3 + $0xf0] sm:$0xff]  ;;  %v5201_v46 = vsel %vm1428_vm13, %v5169_v4, %v5137_v35  ;;  %v5273_v33 = vpop.f32.mrf.mxu0 }
 0x2ec   : > { %v3365_v58 = vmax.f32 %v3333_v40, 0.0  ;;  %3302 = vst.msk [vmem:[#allocation3 + $0xf8] sm:$0xff] %vm1395_vm12, %v3270_v21  ;;  %6569 = vmatmul.msk.bf16.gmra.mxu0 %vm1472_vm14, %v5201_v46  ;;  %v5349_v37 = vld [vmem:[#allocation3 + $0x18] sm:$0xff]  ;;  %v6342_v31 = vmax.f32 %v6310_v18, 0.0  ;;  %v4504_v30 = vpop.f32.mrf.mxu3  ;;  %v3828_v21 = vld [vmem:[#allocation2 + $0xc8] sm:$0x1] }
 0x2ed   : > { %v5381_v13 = vadd.f32 %v5349_v37, %v5273_v33  ;;  %v4505_v35 = vadd.f32 %v9296_v28, %v4504_v30  ;;  %v6184_v15 = vld [vmem:[#allocation3 + $0x10] sm:$0xff]  ;;  %v9425_v17 = vpop.permute.xlu2 %4239 }
 0x2ee   : > { %v3397_v61 = vpack.c.bf16 %v3365_v58, %v3365_v58  ;;  %6374 = vst.msk [vmem:[%s9410_s14] sm:$0xff] %vm1395_vm12, %v6342_v31 }
 0x2ef   : > { %5413 = vst.msk [vmem:[#allocation3 + $0x18] sm:$0xff] %vm1395_vm12, %v5381_v13  ;;  %v6107_v53 = vpop.f32.mrf.mxu1  ;;  %v5973_v26 = vpop.permute.xlu1 %5972 }
 0x2f0   : > { %v3655_v11 = vshrl.u32 %v3397_v61, 16  ;;  %4578 = vst.msk [vmem:[#allocation3 + $0x20] sm:$0xff] %vm1395_vm12, %v4505_v35  ;;  %v6216_v44 = vadd.f32 %v6184_v15, %v6107_v53  ;;  %v3658_v63 = vshll.u32 %v3397_v61, 16 }
 0x2f1   : > { %v5845_v23 = vpop.permute.xlu0 %5844  ;;  %v6279_v56 = vld [vmem:[#allocation3 + $0x8] sm:$0xff] }
 0x2f2   : > { %v3657_v60 = vrot.slane %v3655_v11, 7  ;;  %v6005_v5 = vsel %vm1395_vm12, %v9084_v55, %v5845_v23  ;;  %v6311_v43 = vadd.f32 %v7022_v7, %v6279_v56  ;;  %6248 = vst.msk [vmem:[#allocation3 + $0x10] sm:$0xff] %vm1395_vm12, %v6216_v44  ;;  %v7024_v23 = vld [vmem:[%s7274_s23 + $0x18] sm:$0xff] }
 0x2f3   : > { %v3334_v52 = vld [vmem:[#allocation3 + $0xf8] sm:$0xff]  ;;  %v6037_v27 = vsel %vm1428_vm13, %v6005_v5, %v5973_v26 }
 0x2f4   : > { %v3660_v25 = vor.u32 %v3658_v63, %v3657_v60  ;;  %v3366_v38 = vmax.f32 %v3334_v52, 0.0  ;;  %6591 = vmatmul.msk.bf16.gmra.mxu1 %vm1472_vm14, %v6037_v27  ;;  %v6343_v41 = vmax.f32 %v6311_v43, 0.0  ;;  %v4506_v50 = vpop.f32.mrf.mxu3  ;;  %v3661_v33 = vrot.slane %v3657_v60, 4  ;;  %v7025_v60 = vld [vmem:[#allocation2 + $0x90] sm:$0xff]  }
 0x2f5   : > { %v4507_v47 = vadd.f32 %v9296_v28, %v4506_v50 }
 0x2f6   : > { %v3825_v55 = vsel %vm7300_vm8, %v3660_v25, %v3824_v8  ;;  %v3398_v1 = vpack.c.bf16 %v3366_v38, %v3366_v38  ;;  %6375 = vst.msk [vmem:[%s9410_s14 + $0x8] sm:$0xff] %vm1395_vm12, %v6343_v41  ;;  %v6185_v16 = vld [vmem:[#allocation3 + $0x18] sm:$0xff] }
 0x2f7   : > { %3826 = vst [vmem:[#allocation2 + $0xc0] sm:$0xf] %v3825_v55  ;;  %v5276_v36 = vpop.f32.mrf.mxu0  ;;  %v5350_v54 = vld [vmem:[#allocation3 + $0x20] sm:$0xff]  ;;  %v6109_v48 = vpop.f32.mrf.mxu1 }
 0x2f8   : > { %v3663_v34 = vshrl.u32 %v3398_v1, 16  ;;  %4579 = vst.msk [vmem:[#allocation3 + $0x28] sm:$0xff] %vm1395_vm12, %v4507_v47  ;;  %v5382_v3 = vadd.f32 %v5350_v54, %v5276_v36  ;;  %v6217_v51 = vadd.f32 %v6185_v16, %v6109_v48  ;;  %v3666_v6 = vshll.u32 %v3398_v1, 16  ;;  %v4366_v4 = vpop.permute.xlu1 %4365 }
 0x2f9   : > { %v5011_v42 = vpop.permute.xlu0 %5010  ;;  %v6280_v12 = vld [vmem:[#allocation3 + $0x10] sm:$0xff]  ;;  %v4430_v40 = vsel %vm1428_vm13, %v4398_v49, %v4366_v4  ;;  %v4400_v36 = vsel %vm1395_vm12, %v7025_v60, %v9425_v17 }
 0x2fa   : > { %v3665_v2 = vrot.slane %v3663_v34, 7  ;;  %v5171_v24 = vsel %vm1395_vm12, %v9108_v32, %v5011_v42  ;;  %v6312_v18 = vadd.f32 %v7023_v14, %v6280_v12  ;;  %5414 = vst.msk [vmem:[#allocation3 + $0x20] sm:$0xff] %vm1395_vm12, %v5382_v3  ;;  %6549 = vmatmul.msk.bf16.gmra.mxu3 %vm1472_vm14, %v4430_v40 }
 0x2fb   : > { %v5203_v46 = vsel %vm1428_vm13, %v5171_v24, %v9400_v45  ;;  %6249 = vst.msk [vmem:[#allocation3 + $0x18] sm:$0xff] %vm1395_vm12, %v6217_v51  ;;  %v9451_v45 = vpop.permute.xlu2 %5140 }
 0x2fc   : > { %v3668_v58 = vor.u32 %v3666_v6, %v3665_v2  ;;  %v3670_v10 = vrot.slane %v3665_v2, 4  ;;  %6570 = vmatmul.msk.bf16.gmra.mxu0 %vm1472_vm14, %v5203_v46  ;;  %v6344_v32 = vmax.f32 %v6312_v18, 0.0  ;;  %v4509_v31 = vpop.f32.mrf.mxu3 }
 0x2fd   : > { %v4510_v13 = vadd.f32 %v9296_v28, %v4509_v31 }
 0x2fe   : > { %v3669_v19 = vsel %vm7290_vm7, %v3661_v33, %v3668_v58  ;;  %v3829_v37 = vsel %vm7250_vm2, %v3670_v10, %v3828_v21  ;;  %6376 = vst.msk [vmem:[%s9410_s14 + $0x10] sm:$0xff] %vm1395_vm12, %v6344_v32  ;;  %v6986_v43 = vld [vmem:[#allocation2 + $0xc0] sm:$0xe] }
 0x2ff   : > { %3827 = vst.msk [vmem:[#allocation2 + $0xc4] sm:$0xf] %vm226_vm6, %v3669_v19  ;;  %v5278_v30 = vpop.f32.mrf.mxu0  ;;  %v5351_v61 = vld [vmem:[#allocation3 + $0x28] sm:$0xff] }
 0x300   : > { %3830 = vst [vmem:[#allocation2 + $0xc8] sm:$0x1] %v3829_v37  ;;  %v6112_v35 = vpop.f32.mrf.mxu1  ;;  %v5383_v11 = vadd.f32 %v5351_v61, %v5278_v30  ;;  %v5975_v0 = vpop.permute.xlu1 %5974  ;;  %v7026_v33 = vld [vmem:[%s7274_s23 + $0x20] sm:$0xff]  ;;  %v9488_v30 = vld [vmem:[#allocation2 + $0xcc] sm:$0xff]  }
 0x301   : > { %4580 = vst.msk [vmem:[#allocation3 + $0x30] sm:$0xff] %vm1395_vm12, %v4510_v13  ;;  %v6186_v39 = vld [vmem:[#allocation3 + $0x20] sm:$0xff]  ;;  %v5847_v15 = vpop.permute.xlu0 %5846  ;;  %v9490_v61 = vld [vmem:[#allocation2 + $0xcc] sm:$0xf0] }
 0x302   : > { %v6281_v53 = vld [vmem:[#allocation3 + $0x18] sm:$0xff]  ;;  %5415 = vst.msk [vmem:[#allocation3 + $0x28] sm:$0xff] %vm1395_vm12, %v5383_v11  ;;  %v6218_v26 = vadd.f32 %v6186_v39, %v6112_v35  ;;  %v6007_v63 = vsel %vm1395_vm12, %v7025_v60, %v5847_v15 }
 0x303   : > { %v6313_v44 = vadd.f32 %v7024_v23, %v6281_v53  ;;  %v6039_v56 = vsel %vm1428_vm13, %v6007_v63, %v5975_v0  ;;  %v9472_v48 = vpop.permute.xlu2 %4241  ;;  %v5489_v23 = vld [vmem:[#allocation2 + $0xd4] sm:$0x1] }
 0x304   : > { %6250 = vst.msk [vmem:[#allocation3 + $0x20] sm:$0xff] %vm1395_vm12, %v6218_v26  ;;  %6592 = vmatmul.msk.bf16.gmra.mxu1 %vm1472_vm14, %v6039_v56  ;;  %v4511_v8 = vpop.f32.mrf.mxu3  ;;  %v5617_v63 = vunpack.c.l.b16 %v5489_v23 }
 0x305   : > { %v6345_v5 = vmax.f32 %v6313_v44, 0.0  ;;  %v4512_v27 = vadd.f32 %v9296_v28, %v4511_v8 }
 0x306   : > { %v6985_v7 = vld [vmem:[#allocation2 + $0xc0] sm:$0xf0] }
 0x307   : > { %v9463_v52 = vld [vmem:[#allocation2 + $0xc0] sm:$0xff]   ;;  %v5488_v25 = vld [vmem:[#allocation2 + $0xc8] sm:$0x1]  ;;  %v6987_v38 = vor.u32 %v6986_v43, %v6985_v7  ;;  %6377 = vst.msk [vmem:[%s9410_s14 + $0x18] sm:$0xff] %vm1395_vm12, %v6345_v5 }
 0x308   : > { %v5805_v41 = vshll.u32 %v9463_v52, 16  ;;  %v4653_v50 = vld [vmem:[#allocation2 + $0xc8] sm:$0x1]  ;;  %v5281_v55 = vpop.f32.mrf.mxu0  ;;  %v6114_v1 = vpop.f32.mrf.mxu1  ;;  %v5616_v47 = vunpack.c.l.b16 %v5488_v25  ;;  %4581 = vst.msk [vmem:[#allocation3 + $0x38] sm:$0xff] %vm1395_vm12, %v4512_v27  ;;  %v5803_v17 = vshrl.u32 %v9463_v52, 16  ;;  %v9503_v27 = vpack.c.b16 %v5617_v63, %v5617_v63 }
 0x309   : > { %v4781_v34 = vunpack.c.l.b16 %v4653_v50  ;;  %v5352_v54 = vld [vmem:[#allocation3 + $0x30] sm:$0xff]  ;;  %v6187_v42 = vld [vmem:[#allocation3 + $0x28] sm:$0xff]  ;;  %v4368_v3 = vpop.permute.xlu1 %4367  ;;  %v5013_v6 = vpop.permute.xlu0 %5012  ;;  %v5948_v4 = vrot.slane %v6987_v38, 1 }
 0x30a   : > { %v5384_v16 = vadd.f32 %v5352_v54, %v5281_v55  ;;  %v5632_v51 = vpack.c.b16 %v5616_v47, %v5616_v47  ;;  %v5807_v49 = vrot.slane %v5805_v41, 1  ;;  %v6219_v12 = vadd.f32 %v6187_v42, %v6114_v1  ;;  %v6954_v39 = vld [vmem:[#allocation2 + $0xc0] sm:$0xf0]  ;;  %v7027_v47 = vld [vmem:[%s7274_s23 + $0x28] sm:$0xff] }
 0x30b   : > { %v9474_v2 = vpack.c.b16 %v4781_v34, %v4781_v34  ;;  %v4432_v24 = vsel %vm1428_vm13, %v4400_v36, %v4368_v3  ;;  %v6282_v21 = vld [vmem:[#allocation3 + $0x20] sm:$0xff]  ;;  %v5173_v14 = vsel %vm1395_vm12, %v7025_v60, %v5013_v6  ;;  %v6955_v60 = vld [vmem:[#allocation2 + $0xc0] sm:$0xe]  ;;  %v5143_v25 = vpop.permute.xlu2 %5142  ;;  %v5815_v55 = vshrl.u32 %v9488_v30, 16 }
 0x30c   : > { %5416 = vst.msk [vmem:[#allocation3 + $0x30] sm:$0xff] %vm1395_vm12, %v5384_v16  ;;  %6550 = vmatmul.msk.bf16.gmra.mxu3 %vm1472_vm14, %v4432_v24  ;;  %v5949_v18 = vrot.slane %v5632_v51, 1  ;;  %v5810_v40 = vshll.u32 %v5632_v51, 16  ;;  %v6314_v58 = vadd.f32 %v7026_v33, %v6282_v21  ;;  %v5205_v10 = vsel %vm1428_vm13, %v5173_v14, %v9451_v45  ;;  %v4514_v32 = vpop.f32.mrf.mxu3 }
 0x30d   : > { %v4986_v46 = vshll.u32 %v9474_v2, 16  ;;  %6251 = vst.msk [vmem:[#allocation3 + $0x28] sm:$0xff] %vm1395_vm12, %v6219_v12  ;;  %6571 = vmatmul.msk.bf16.gmra.mxu0 %vm1472_vm14, %v5205_v10  ;;  %v5808_v37 = vor.u32 %v5807_v49, %v5803_v17  ;;  %v4515_v11 = vadd.f32 %v9296_v28, %v4514_v32  ;;  %v6956_v5 = vor.u32 %v6955_v60, %v6954_v39  ;;  %v7028_v32 = vld [vmem:[%s7274_s23 + $0x30] sm:$0xff] }
 0x30e   : > { %v5950_v19 = vsel %vm1314_vm9, %v5948_v4, %v5949_v18  ;;  %v5812_v31 = vrot.slane %v5810_v40, 1  ;;  %v6346_v35 = vmax.f32 %v6314_v58, 0.0  ;;  %v5116_v43 = vrot.slane %v9474_v2, 1 }
 0x30f   : > { %v4988_v13 = vrot.slane %v4986_v46, 1  ;;  %5982 = vrot.lane.b32.xlu1 %v5950_v19, %s7208_s25  ;;  %v5353_v0 = vld [vmem:[#allocation3 + $0x38] sm:$0xff]  ;;  %4582 = vst.msk [vmem:[#allocation3 + $0x40] sm:$0xff] %vm1395_vm12, %v4515_v11  ;;  %v5817_v1 = vshll.u32 %v9488_v30, 16  ;;  %v5822_v54 = vshll.u32 %v9503_v27, 16  ;;  %v5115_v42 = vrot.slane %v6956_v5, 1 }
 0x310   : > { %v5283_v45 = vpop.f32.mrf.mxu0  ;;  %v5813_v15 = vsel %vm1041_vm10, %v5808_v37, %v5812_v31  ;;  %6378 = vst.msk [vmem:[%s9410_s14 + $0x20] sm:$0xff] %vm1395_vm12, %v6346_v35  ;;  %v4402_v17 = vsel %vm1395_vm12, %v9201_v59, %v9472_v48 }
 0x311   : > { %v6117_v53 = vpop.f32.mrf.mxu1  ;;  %v4989_v26 = vsel %vm1041_vm10, %v5808_v37, %v4988_v13  ;;  %v5385_v44 = vadd.f32 %v5353_v0, %v5283_v45  ;;  %5854 = vrot.lane.b32.xlu0 %v5813_v15, %s7207_s24  ;;  %v5977_v56 = vpop.permute.xlu1 %5976  ;;  %v5819_v3 = vrot.slane %v5817_v1, 1  ;;  %v5824_v49 = vrot.slane %v5822_v54, 1 }
 0x312   : > { %5020 = vrot.lane.b32.xlu2 %v4989_v26, %s7207_s24  ;;  %v5849_v8 = vpop.permute.xlu0 %5848  ;;  %v5117_v12 = vsel %vm1314_vm9, %v5115_v42, %v5116_v43 }
 0x313   : > { %5417 = vst.msk [vmem:[#allocation3 + $0x38] sm:$0xff] %vm1395_vm12, %v5385_v44  ;;  %v6188_v7 = vld [vmem:[#allocation3 + $0x30] sm:$0xff]  ;;  %v6009_v41 = vsel %vm1395_vm12, %v9193_v57, %v5849_v8  ;;  %v5820_v24 = vor.u32 %v5819_v3, %v5815_v55  ;;  %v4244_v10 = vpop.permute.xlu2 %4243  ;;  %v7029_v44 = vld [vmem:[%s7274_s23 + $0x38] sm:$0xff] }
 0x314   : > { %v6283_v38 = vld [vmem:[#allocation3 + $0x28] sm:$0xff]  ;;  %v6220_v50 = vadd.f32 %v6188_v7, %v6117_v53  ;;  %v6041_v36 = vsel %vm1428_vm13, %v6009_v41, %v5977_v56  ;;  %v4516_v16 = vpop.f32.mrf.mxu3 }
 0x315   : > { %v6315_v34 = vadd.f32 %v7027_v47, %v6283_v38  ;;  %6593 = vmatmul.msk.bf16.gmra.mxu1 %vm1472_vm14, %v6041_v36  ;;  %v4517_v51 = vadd.f32 %v9296_v28, %v4516_v16  ;;  %v5825_v40 = vsel %vm1041_vm10, %v5820_v24, %v5824_v49  ;;  %v7179_v47 = vld [vmem:[#allocation2 + $0xcc] sm:$0xe]  ;;  %v7030_v49 = vld [vmem:[%s7274_s23 + $0x40] sm:$0xff] }
 0x316   : > { %6252 = vst.msk [vmem:[#allocation3 + $0x30] sm:$0xff] %vm1395_vm12, %v6220_v50  ;;  %v5354_v4 = vld [vmem:[#allocation3 + $0x40] sm:$0xff]  ;;  %v4404_v50 = vsel %vm1395_vm12, %v9260_v62, %v4244_v10  ;;  %v7031_v10 = vld [vmem:[%s7274_s23 + $0x48] sm:$0xff] }
 0x317   : > { %v6347_v57 = vmax.f32 %v6315_v34, 0.0  ;;  %4583 = vst.msk [vmem:[#allocation3 + $0x48] sm:$0xff] %vm1395_vm12, %v4517_v51  ;;  %5856 = vrot.lane.b32.xlu1 %v5825_v40, %s7207_s24  ;;  %v5952_v51 = vrot.slane %v9503_v27, 1 }
 0x319   : > { %v5286_v2 = vpop.f32.mrf.mxu0  ;;  %v6119_v6 = vpop.f32.mrf.mxu1  ;;  %6379 = vst.msk [vmem:[%s9410_s14 + $0x28] sm:$0xff] %vm1395_vm12, %v6347_v57  ;;  %5148 = vrot.lane.b32.xlu0 %v5117_v12, %s7208_s25  ;;  %v7180_v57 = vor.u32 %v7179_v47, %v9490_v61 }
 0x31a   : > { %v5386_v21 = vadd.f32 %v5354_v4, %v5286_v2  ;;  %v6189_v14 = vld [vmem:[#allocation3 + $0x38] sm:$0xff]  ;;  %v4370_v18 = vpop.permute.xlu1 %4369  ;;  %v5015_v58 = vpop.permute.xlu0 %5014 }
 0x31b   : > { %v6221_v46 = vadd.f32 %v6189_v14, %v6119_v6  ;;  %v4434_v33 = vsel %vm1428_vm13, %v4402_v17, %v4370_v18  ;;  %v5175_v48 = vsel %vm1395_vm12, %v9222_v22, %v5015_v58  ;;  %v5145_v43 = vpop.permute.xlu2 %5144  ;;  %v5951_v4 = vrot.slane %v7180_v57, 1 }
 0x31c   : > { %5418 = vst.msk [vmem:[#allocation3 + $0x40] sm:$0xff] %vm1395_vm12, %v5386_v21  ;;  %6551 = vmatmul.msk.bf16.gmra.mxu3 %vm1472_vm14, %v4434_v33  ;;  %v5207_v37 = vsel %vm1428_vm13, %v5175_v48, %v5143_v25  ;;  %v4519_v31 = vpop.f32.mrf.mxu3 }
 0x31d   : > { %v6284_v59 = vld [vmem:[#allocation3 + $0x30] sm:$0xff]  ;;  %6253 = vst.msk [vmem:[#allocation3 + $0x38] sm:$0xff] %vm1395_vm12, %v6221_v46  ;;  %6572 = vmatmul.msk.bf16.gmra.mxu0 %vm1472_vm14, %v5207_v37  ;;  %v4520_v13 = vadd.f32 %v9296_v28, %v4519_v31  ;;  %v5953_v27 = vsel %vm1314_vm9, %v5951_v4, %v5952_v51 }
 0x31e   : > { %v6316_v19 = vadd.f32 %v7028_v32, %v6284_v59  ;;  %v5355_v39 = vld [vmem:[#allocation3 + $0x48] sm:$0xff]  ;;  %5984 = vrot.lane.b32.xlu2 %v5953_v27, %s7208_s25 }
 0x31f   : > { %4584 = vst.msk [vmem:[#allocation3 + $0x50] sm:$0xff] %vm1395_vm12, %v4520_v13 }
 0x320   : > { %v6348_v35 = vmax.f32 %v6316_v19, 0.0 }
 0x321   : > { %v5288_v11 = vpop.f32.mrf.mxu0  ;;  %v6122_v45 = vpop.f32.mrf.mxu1 }
 0x322   : > { %6380 = vst.msk [vmem:[%s9410_s14 + $0x30] sm:$0xff] %vm1395_vm12, %v6348_v35  ;;  %v5387_v22 = vadd.f32 %v5355_v39, %v5288_v11  ;;  %v5979_v0 = vpop.permute.xlu1 %5978  ;;  %v5851_v26 = vpop.permute.xlu0 %5850 }
 0x323   : > { %v6190_v53 = vld [vmem:[#allocation3 + $0x40] sm:$0xff]  ;;  %v6011_v63 = vsel %vm1395_vm12, %v9260_v62, %v5851_v26  ;;  %v4246_v40 = vpop.permute.xlu2 %4245 }
 0x324   : > { %v6285_v15 = vld [vmem:[#allocation3 + $0x38] sm:$0xff]  ;;  %5419 = vst.msk [vmem:[#allocation3 + $0x48] sm:$0xff] %vm1395_vm12, %v5387_v22  ;;  %v6222_v23 = vadd.f32 %v6190_v53, %v6122_v45  ;;  %v6043_v56 = vsel %vm1428_vm13, %v6011_v63, %v5979_v0  ;;  %v4521_v5 = vpop.f32.mrf.mxu3 }
 0x325   : > { %v6317_v60 = vadd.f32 %v7029_v44, %v6285_v15  ;;  %6594 = vmatmul.msk.bf16.gmra.mxu1 %vm1472_vm14, %v6043_v56  ;;  %v4522_v7 = vadd.f32 %v9296_v28, %v4521_v5 }
 0x326   : > { %6254 = vst.msk [vmem:[#allocation3 + $0x40] sm:$0xff] %vm1395_vm12, %v6222_v23  ;;  %v5356_v25 = vld [vmem:[#allocation3 + $0x50] sm:$0xff] }
 0x327   : > { %v6349_v8 = vmax.f32 %v6317_v60, 0.0  ;;  %4585 = vst.msk [vmem:[#allocation3 + $0x58] sm:$0xff] %vm1395_vm12, %v4522_v7 }
 0x329   : > { %6381 = vst.msk [vmem:[%s9410_s14 + $0x38] sm:$0xff] %vm1395_vm12, %v6349_v8  ;;  %v5291_v38 = vpop.f32.mrf.mxu0  ;;  %v6124_v41 = vpop.f32.mrf.mxu1 }
 0x32a   : > { %v5388_v55 = vadd.f32 %v5356_v25, %v5291_v38  ;;  %v4372_v1 = vpop.permute.xlu1 %4371  ;;  %v5017_v54 = vpop.permute.xlu0 %5016 }
 0x32b   : > { %v6191_v34 = vld [vmem:[#allocation3 + $0x48] sm:$0xff]  ;;  %v4436_v36 = vsel %vm1428_vm13, %v4404_v50, %v4372_v1  ;;  %v5177_v3 = vsel %vm1395_vm12, %v9260_v62, %v5017_v54  ;;  %v5147_v23 = vpop.permute.xlu2 %5146  ;;  %v7033_v1 = vld [vmem:[%s7274_s23 + $0x58] sm:$0xff] }
 0x32c   : > { %5420 = vst.msk [vmem:[#allocation3 + $0x50] sm:$0xff] %vm1395_vm12, %v5388_v55  ;;  %v6223_v16 = vadd.f32 %v6191_v34, %v6124_v41  ;;  %6552 = vmatmul.msk.bf16.gmra.mxu3 %vm1472_vm14, %v4436_v36  ;;  %v5209_v6 = vsel %vm1428_vm13, %v5177_v3, %v5145_v43  ;;  %v4524_v12 = vpop.f32.mrf.mxu3 }
 0x32d   : > { %v6286_v42 = vld [vmem:[#allocation3 + $0x40] sm:$0xff]  ;;  %6573 = vmatmul.msk.bf16.gmra.mxu0 %vm1472_vm14, %v5209_v6  ;;  %v4525_v24 = vadd.f32 %v9296_v28, %v4524_v12  ;;  %v7034_v6 = vld [vmem:[%s7274_s23 + $0x60] sm:$0xff] }
 0x32e   : > { %v6318_v2 = vadd.f32 %v7030_v49, %v6286_v42  ;;  %6255 = vst.msk [vmem:[#allocation3 + $0x48] sm:$0xff] %vm1395_vm12, %v6223_v16  ;;  %v5357_v61 = vld [vmem:[#allocation3 + $0x58] sm:$0xff] }
 0x32f   : > { %4586 = vst.msk [vmem:[#allocation3 + $0x60] sm:$0xff] %vm1395_vm12, %v4525_v24  ;;  %v9607_v24 = vld [vmem:[%s9754_s4] ss:$0 sm:$0xff] }
 0x330   : > { %v6350_v17 = vmax.f32 %v6318_v2, 0.0 }
 0x331   : > { %v5293_v62 = vpop.f32.mrf.mxu0  ;;  %v6127_v21 = vpop.f32.mrf.mxu1 }
 0x332   : > { %6382 = vst.msk [vmem:[%s9410_s14 + $0x40] sm:$0xff] %vm1395_vm12, %v6350_v17  ;;  %v5389_v14 = vadd.f32 %v5357_v61, %v5293_v62  ;;  %v5981_v18 = vpop.permute.xlu1 %5980  ;;  %v5853_v33 = vpop.permute.xlu0 %5852 }
 0x333   : > { %v6192_v46 = vld [vmem:[#allocation3 + $0x50] sm:$0xff]  ;;  %v6013_v48 = vsel %vm1395_vm12, %v9299_v29, %v5853_v33  ;;  %v4406_v29 = vsel %vm1395_vm12, %v9301_v20, %v4246_v40  ;;  %v7032_v20 = vld [vmem:[%s7274_s23 + $0x50] sm:$0xff] }
 0x334   : > { %5421 = vst.msk [vmem:[#allocation3 + $0x58] sm:$0xff] %vm1395_vm12, %v5389_v14  ;;  %v6224_v58 = vadd.f32 %v6192_v46, %v6127_v21  ;;  %v6045_v19 = vsel %vm1428_vm13, %v6013_v48, %v5981_v18  ;;  %v4526_v37 = vpop.f32.mrf.mxu3  ;;  %v7036_v46 = vld [vmem:[%s7274_s23 + $0x68] sm:$0xff] }
 0x335   : > { %v6287_v59 = vld [vmem:[#allocation3 + $0x48] sm:$0xff]  ;;  %6595 = vmatmul.msk.bf16.gmra.mxu1 %vm1472_vm14, %v6045_v19  ;;  %v4527_v31 = vadd.f32 %v9296_v28, %v4526_v37 }
 0x336   : > { %v6319_v32 = vadd.f32 %v7031_v10, %v6287_v59  ;;  %6256 = vst.msk [vmem:[#allocation3 + $0x50] sm:$0xff] %vm1395_vm12, %v6224_v58  ;;  %v5358_v35 = vld [vmem:[#allocation3 + $0x60] sm:$0xff] }
 0x337   : > { %4587 = vst.msk [vmem:[#allocation3 + $0x68] sm:$0xff] %vm1395_vm12, %v4527_v31 }
 0x338   : > { %v6351_v13 = vmax.f32 %v6319_v32, 0.0 }
 0x339   : > { %v5296_v11 = vpop.f32.mrf.mxu0  ;;  %v6129_v39 = vpop.f32.mrf.mxu1 }
 0x33a   : > { %6383 = vst.msk [vmem:[%s9410_s14 + $0x48] sm:$0xff] %vm1395_vm12, %v6351_v13  ;;  %v5390_v45 = vadd.f32 %v5358_v35, %v5296_v11  ;;  %v4374_v22 = vpop.permute.xlu1 %4373  ;;  %v5019_v15 = vpop.permute.xlu0 %5018  ;;  %v7037_v11 = vld [vmem:[%s7274_s23 + $0x70] sm:$0xff] }
 0x33b   : > { %v6193_v0 = vld [vmem:[#allocation3 + $0x58] sm:$0xff]  ;;  %v4438_v53 = vsel %vm1428_vm13, %v4406_v29, %v4374_v22  ;;  %v5179_v60 = vsel %vm1395_vm12, %v9308_v9, %v5019_v15 }
 0x33c   : > { %5422 = vst.msk [vmem:[#allocation3 + $0x60] sm:$0xff] %vm1395_vm12, %v5390_v45  ;;  %v6225_v26 = vadd.f32 %v6193_v0, %v6129_v39  ;;  %6553 = vmatmul.msk.bf16.gmra.mxu3 %vm1472_vm14, %v4438_v53  ;;  %v5211_v56 = vsel %vm1428_vm13, %v5179_v60, %v5147_v23  ;;  %v4529_v5 = vpop.f32.mrf.mxu3 }
 0x33d   : > { %v6288_v44 = vld [vmem:[#allocation3 + $0x50] sm:$0xff]  ;;  %6574 = vmatmul.msk.bf16.gmra.mxu0 %vm1472_vm14, %v5211_v56  ;;  %v4530_v8 = vadd.f32 %v9296_v28, %v4529_v5 }
 0x33e   : > { %v6320_v63 = vadd.f32 %v7032_v20, %v6288_v44  ;;  %6257 = vst.msk [vmem:[#allocation3 + $0x58] sm:$0xff] %vm1395_vm12, %v6225_v26  ;;  %v5359_v43 = vld [vmem:[#allocation3 + $0x68] sm:$0xff]  ;;  %v7038_v20 = vld [vmem:[%s7274_s23 + $0x78] sm:$0xff] }
 0x33f   : > { %4588 = vst.msk [vmem:[#allocation3 + $0x70] sm:$0xff] %vm1395_vm12, %v4530_v8 }
 0x340   : > { %v6352_v7 = vmax.f32 %v6320_v63, 0.0 }
 0x341   : > { %v5298_v25 = vpop.f32.mrf.mxu0  ;;  %v6132_v38 = vpop.f32.mrf.mxu1 }
 0x342   : > { %6384 = vst.msk [vmem:[%s9410_s14 + $0x50] sm:$0xff] %vm1395_vm12, %v6352_v7  ;;  %v5391_v9 = vadd.f32 %v5359_v43, %v5298_v25 }
 0x343   : > { %v6194_v41 = vld [vmem:[#allocation3 + $0x60] sm:$0xff] }
 0x344   : > { %5423 = vst.msk [vmem:[#allocation3 + $0x68] sm:$0xff] %vm1395_vm12, %v5391_v9  ;;  %v6226_v50 = vadd.f32 %v6194_v41, %v6132_v38  ;;  %v4531_v34 = vpop.f32.mrf.mxu3 }
 0x345   : > { %v6289_v55 = vld [vmem:[#allocation3 + $0x58] sm:$0xff]  ;;  %v4532_v36 = vadd.f32 %v9296_v28, %v4531_v34 }
 0x346   : > { %v6321_v47 = vadd.f32 %v7033_v1, %v6289_v55  ;;  %6258 = vst.msk [vmem:[#allocation3 + $0x60] sm:$0xff] %vm1395_vm12, %v6226_v50  ;;  %v5360_v16 = vld [vmem:[#allocation3 + $0x70] sm:$0xff]  ;;  %v7039_v55 = vld [vmem:[%s7274_s23 + $0x80] sm:$0xff] }
 0x347   : > { %4589 = vst.msk [vmem:[#allocation3 + $0x78] sm:$0xff] %vm1395_vm12, %v4532_v36 }
 0x348   : > { %v6353_v54 = vmax.f32 %v6321_v47, 0.0 }
 0x349   : > { %v5301_v42 = vpop.f32.mrf.mxu0  ;;  %v6134_v3 = vpop.f32.mrf.mxu1 }
 0x34a   : > { %6385 = vst.msk [vmem:[%s9410_s14 + $0x58] sm:$0xff] %vm1395_vm12, %v6353_v54  ;;  %v5392_v57 = vadd.f32 %v5360_v16, %v5301_v42 }
 0x34b   : > { %v6195_v51 = vld [vmem:[#allocation3 + $0x68] sm:$0xff] }
 0x34c   : > { %5424 = vst.msk [vmem:[#allocation3 + $0x70] sm:$0xff] %vm1395_vm12, %v5392_v57  ;;  %v6227_v49 = vadd.f32 %v6195_v51, %v6134_v3  ;;  %v4534_v28 = vpop.f32.mrf.mxu3 }
 0x34d   : > { %v6290_v2 = vld [vmem:[#allocation3 + $0x60] sm:$0xff]  ;;  %v4535_v4 = vadd.f32 %v9607_v24, %v4534_v28 }
 0x34e   : > { %v6322_v12 = vadd.f32 %v7034_v6, %v6290_v2  ;;  %6259 = vst.msk [vmem:[#allocation3 + $0x68] sm:$0xff] %vm1395_vm12, %v6227_v49  ;;  %v5361_v62 = vld [vmem:[#allocation3 + $0x78] sm:$0xff]  ;;  %v7040_v2 = vld [vmem:[%s7274_s23 + $0x88] sm:$0xff] }
 0x34f   : > { %4590 = vst.msk [vmem:[#allocation3 + $0x80] sm:$0xff] %vm1395_vm12, %v4535_v4 }
 0x350   : > { %v6354_v17 = vmax.f32 %v6322_v12, 0.0 }
 0x351   : > { %v5303_v61 = vpop.f32.mrf.mxu0  ;;  %v6137_v21 = vpop.f32.mrf.mxu1 }
 0x352   : > { %6386 = vst.msk [vmem:[%s9410_s14 + $0x60] sm:$0xff] %vm1395_vm12, %v6354_v17  ;;  %v5393_v27 = vadd.f32 %v5361_v62, %v5303_v61 }
 0x353   : > { %v6196_v14 = vld [vmem:[#allocation3 + $0x70] sm:$0xff] }
 0x354   : > { %5425 = vst.msk [vmem:[#allocation3 + $0x78] sm:$0xff] %vm1395_vm12, %v5393_v27  ;;  %v6228_v18 = vadd.f32 %v6196_v14, %v6137_v21  ;;  %v4536_v58 = vpop.f32.mrf.mxu3 }
 0x355   : > { %v6291_v40 = vld [vmem:[#allocation3 + $0x68] sm:$0xff]  ;;  %v4537_v59 = vadd.f32 %v9607_v24, %v4536_v58 }
 0x356   : > { %v6323_v33 = vadd.f32 %v7036_v46, %v6291_v40  ;;  %6260 = vst.msk [vmem:[#allocation3 + $0x70] sm:$0xff] %vm1395_vm12, %v6228_v18  ;;  %v5362_v10 = vld [vmem:[#allocation3 + $0x80] sm:$0xff]  ;;  %v7041_v40 = vld [vmem:[%s7274_s23 + $0x90] sm:$0xff] }
 0x357   : > { %4591 = vst.msk [vmem:[#allocation3 + $0x88] sm:$0xff] %vm1395_vm12, %v4537_v59 }
 0x358   : > { %v6355_v48 = vmax.f32 %v6323_v33, 0.0 }
 0x359   : > { %v5306_v32 = vpop.f32.mrf.mxu0  ;;  %v6139_v19 = vpop.f32.mrf.mxu1 }
 0x35a   : > { %6387 = vst.msk [vmem:[%s9410_s14 + $0x68] sm:$0xff] %vm1395_vm12, %v6355_v48  ;;  %v5394_v37 = vadd.f32 %v5362_v10, %v5306_v32 }
 0x35b   : > { %v6197_v31 = vld [vmem:[#allocation3 + $0x78] sm:$0xff] }
 0x35c   : > { %5426 = vst.msk [vmem:[#allocation3 + $0x80] sm:$0xff] %vm1395_vm12, %v5394_v37  ;;  %v6229_v13 = vadd.f32 %v6197_v31, %v6139_v19  ;;  %v4539_v29 = vpop.f32.mrf.mxu3 }
 0x35d   : > { %v6292_v35 = vld [vmem:[#allocation3 + $0x70] sm:$0xff]  ;;  %v4540_v45 = vadd.f32 %v9607_v24, %v4539_v29 }
 0x35e   : > { %v6324_v39 = vadd.f32 %v7037_v11, %v6292_v35  ;;  %6261 = vst.msk [vmem:[#allocation3 + $0x78] sm:$0xff] %vm1395_vm12, %v6229_v13  ;;  %v5363_v0 = vld [vmem:[#allocation3 + $0x88] sm:$0xff] }
 0x35f   : > { %4592 = vst.msk [vmem:[#allocation3 + $0x90] sm:$0xff] %vm1395_vm12, %v4540_v45  ;;  %v7042_v45 = vld [vmem:[%s7274_s23 + $0x98] sm:$0xff] }
 0x360   : > { %v6356_v22 = vmax.f32 %v6324_v39, 0.0 }
 0x361   : > { %v5308_v53 = vpop.f32.mrf.mxu0  ;;  %v6142_v15 = vpop.f32.mrf.mxu1 }
 0x362   : > { %6388 = vst.msk [vmem:[%s9410_s14 + $0x70] sm:$0xff] %vm1395_vm12, %v6356_v22  ;;  %v5395_v26 = vadd.f32 %v5363_v0, %v5308_v53 }
 0x363   : > { %v6198_v23 = vld [vmem:[#allocation3 + $0x80] sm:$0xff] }
 0x364   : > { %5427 = vst.msk [vmem:[#allocation3 + $0x88] sm:$0xff] %vm1395_vm12, %v5395_v26  ;;  %v6230_v44 = vadd.f32 %v6198_v23, %v6142_v15  ;;  %v4541_v56 = vpop.f32.mrf.mxu3 }
 0x365   : > { %v6293_v60 = vld [vmem:[#allocation3 + $0x78] sm:$0xff]  ;;  %v4542_v5 = vadd.f32 %v9607_v24, %v4541_v56 }
 0x366   : > { %v6325_v63 = vadd.f32 %v7038_v20, %v6293_v60  ;;  %6262 = vst.msk [vmem:[#allocation3 + $0x80] sm:$0xff] %vm1395_vm12, %v6230_v44  ;;  %v5364_v7 = vld [vmem:[#allocation3 + $0x90] sm:$0xff] }
 0x367   : > { %4593 = vst.msk [vmem:[#allocation3 + $0x98] sm:$0xff] %vm1395_vm12, %v4542_v5 }
 0x368   : > { %v6357_v8 = vmax.f32 %v6325_v63, 0.0 }
 0x369   : > { %v5311_v43 = vpop.f32.mrf.mxu0  ;;  %v6144_v25 = vpop.f32.mrf.mxu1 }
 0x36a   : > { %6389 = vst.msk [vmem:[%s9410_s14 + $0x78] sm:$0xff] %vm1395_vm12, %v6357_v8  ;;  %v5396_v38 = vadd.f32 %v5364_v7, %v5311_v43 }
 0x36b   : > { %v6199_v9 = vld [vmem:[#allocation3 + $0x88] sm:$0xff] }
 0x36c   : > { %5428 = vst.msk [vmem:[#allocation3 + $0x90] sm:$0xff] %vm1395_vm12, %v5396_v38  ;;  %v6231_v41 = vadd.f32 %v6199_v9, %v6144_v25  ;;  %v4544_v47 = vpop.f32.mrf.mxu3  ;;  %v5021_v53 = vpop.permute.xlu2 %5020  ;;  %v7043_v38 = vld [vmem:[%s7274_s23 + $0xa0] sm:$0xff] }
 0x36d   : > { %v6294_v50 = vld [vmem:[#allocation3 + $0x80] sm:$0xff]  ;;  %v4545_v34 = vadd.f32 %v9607_v24, %v4544_v47  ;;  %v5181_v63 = vsel %vm1395_vm12, %v9463_v52, %v5021_v53 }
 0x36e   : > { %v6326_v1 = vadd.f32 %v7039_v55, %v6294_v50  ;;  %6263 = vst.msk [vmem:[#allocation3 + $0x88] sm:$0xff] %vm1395_vm12, %v6231_v41  ;;  %v5365_v54 = vld [vmem:[#allocation3 + $0x98] sm:$0xff] }
 0x36f   : > { %4594 = vst.msk [vmem:[#allocation3 + $0xa0] sm:$0xff] %vm1395_vm12, %v4545_v34 }
 0x370   : > { %v6358_v36 = vmax.f32 %v6326_v1, 0.0 }
 0x371   : > { %v5313_v16 = vpop.f32.mrf.mxu0  ;;  %v6147_v42 = vpop.f32.mrf.mxu1 }
 0x372   : > { %6390 = vst.msk [vmem:[%s9410_s14 + $0x80] sm:$0xff] %vm1395_vm12, %v6358_v36  ;;  %v5397_v3 = vadd.f32 %v5365_v54, %v5313_v16 }
 0x373   : > { %v6200_v57 = vld [vmem:[#allocation3 + $0x90] sm:$0xff] }
 0x374   : > { %5429 = vst.msk [vmem:[#allocation3 + $0x98] sm:$0xff] %vm1395_vm12, %v5397_v3  ;;  %v6232_v51 = vadd.f32 %v6200_v57, %v6147_v42  ;;  %v4546_v12 = vpop.f32.mrf.mxu3 }
 0x375   : > { %v6295_v49 = vld [vmem:[#allocation3 + $0x88] sm:$0xff]  ;;  %v4547_v28 = vadd.f32 %v9607_v24, %v4546_v12 }
 0x376   : > { %v6327_v6 = vadd.f32 %v7040_v2, %v6295_v49  ;;  %6264 = vst.msk [vmem:[#allocation3 + $0x90] sm:$0xff] %vm1395_vm12, %v6232_v51  ;;  %v5366_v17 = vld [vmem:[#allocation3 + $0xa0] sm:$0xff] }
 0x377   : > { %4595 = vst.msk [vmem:[#allocation3 + $0xa8] sm:$0xff] %vm1395_vm12, %v4547_v28 }
 0x378   : > { %v6359_v4 = vmax.f32 %v6327_v6, 0.0  ;;  %v5985_v1 = vpop.permute.xlu2 %5984 }
 0x379   : > { %v5316_v62 = vpop.f32.mrf.mxu0  ;;  %v6149_v61 = vpop.f32.mrf.mxu1 }
 0x37a   : > { %6391 = vst.msk [vmem:[%s9410_s14 + $0x88] sm:$0xff] %vm1395_vm12, %v6359_v4  ;;  %v5398_v21 = vadd.f32 %v5366_v17, %v5316_v62 }
 0x37b   : > { %v6201_v27 = vld [vmem:[#allocation3 + $0x98] sm:$0xff] }
 0x37c   : > { %5430 = vst.msk [vmem:[#allocation3 + $0xa0] sm:$0xff] %vm1395_vm12, %v5398_v21  ;;  %v6233_v14 = vadd.f32 %v6201_v27, %v6149_v61 }
 0x37d   : > { %v6296_v18 = vld [vmem:[#allocation3 + $0x90] sm:$0xff]  ;;  %v4549_v33 = vpop.f32.mrf.mxu3 }
 0x37e   : > { %v6328_v46 = vadd.f32 %v7041_v40, %v6296_v18  ;;  %6265 = vst.msk [vmem:[#allocation3 + $0x98] sm:$0xff] %vm1395_vm12, %v6233_v14  ;;  %v4550_v59 = vadd.f32 %v9607_v24, %v4549_v33  ;;  %v5367_v48 = vld [vmem:[#allocation3 + $0xa8] sm:$0xff]  ;;  %v7045_v14 = vld [vmem:[%s7274_s23 + $0xb0] sm:$0xff] }
 0x380   : > { %v6360_v58 = vmax.f32 %v6328_v46, 0.0  ;;  %4596 = vst.msk [vmem:[#allocation3 + $0xb0] sm:$0xff] %vm1395_vm12, %v4550_v59 }
 0x381   : > { %v5318_v10 = vpop.f32.mrf.mxu0  ;;  %v6152_v19 = vpop.f32.mrf.mxu1 }
 0x382   : > { %6392 = vst.msk [vmem:[%s9410_s14 + $0x90] sm:$0xff] %vm1395_vm12, %v6360_v58  ;;  %v5399_v32 = vadd.f32 %v5367_v48, %v5318_v10  ;;  %v5983_v35 = vpop.permute.xlu1 %5982 }
 0x383   : > { %v6202_v37 = vld [vmem:[#allocation3 + $0xa0] sm:$0xff]  ;;  %v5855_v31 = vpop.permute.xlu0 %5854 }
 0x384   : > { %5431 = vst.msk [vmem:[#allocation3 + $0xa8] sm:$0xff] %vm1395_vm12, %v5399_v32  ;;  %v6234_v13 = vadd.f32 %v6202_v37, %v6152_v19  ;;  %v6015_v11 = vsel %vm1395_vm12, %v9463_v52, %v5855_v31  ;;  %v7046_v31 = vld [vmem:[%s7274_s23 + $0xb8] sm:$0xff] }
 0x385   : > { %v6297_v39 = vld [vmem:[#allocation3 + $0x98] sm:$0xff]  ;;  %v6047_v29 = vsel %vm1428_vm13, %v6015_v11, %v5983_v35  ;;  %v4551_v0 = vpop.f32.mrf.mxu3 }
 0x386   : > { %v6329_v22 = vadd.f32 %v7042_v45, %v6297_v39  ;;  %6266 = vst.msk [vmem:[#allocation3 + $0xa0] sm:$0xff] %vm1395_vm12, %v6234_v13  ;;  %6596 = vmatmul.msk.bf16.gmra.mxu1 %vm1472_vm14, %v6047_v29  ;;  %v4552_v26 = vadd.f32 %v9607_v24, %v4551_v0 }
 0x387   : > { %v5368_v23 = vld [vmem:[#allocation3 + $0xb0] sm:$0xff] }
 0x388   : > { %v6361_v15 = vmax.f32 %v6329_v22, 0.0  ;;  %4597 = vst.msk [vmem:[#allocation3 + $0xb8] sm:$0xff] %vm1395_vm12, %v4552_v26 }
 0x389   : > { %v6154_v60 = vpop.f32.mrf.mxu1 }
 0x38a   : > { %6393 = vst.msk [vmem:[%s9410_s14 + $0x98] sm:$0xff] %vm1395_vm12, %v6361_v15  ;;  %v5321_v44 = vpop.f32.mrf.mxu0  ;;  %v5857_v25 = vpop.permute.xlu1 %5856 }
 0x38b   : > { %v6203_v20 = vld [vmem:[#allocation3 + $0xa8] sm:$0xff]  ;;  %v5400_v56 = vadd.f32 %v5368_v23, %v5321_v44  ;;  %v5149_v8 = vpop.permute.xlu0 %5148  ;;  %v6017_v55 = vsel %vm1395_vm12, %v9488_v30, %v5857_v25  ;;  %v7044_v30 = vld [vmem:[%s7274_s23 + $0xa8] sm:$0xff] }
 0x38c   : > { %v6235_v5 = vadd.f32 %v6203_v20, %v6154_v60  ;;  %v5213_v43 = vsel %vm1428_vm13, %v5181_v63, %v5149_v8  ;;  %v6049_v54 = vsel %vm1428_vm13, %v6017_v55, %v5985_v1  ;;  %v7047_v44 = vld [vmem:[%s7274_s23 + $0xc0] sm:$0xff] }
 0x38d   : > { %v6298_v7 = vld [vmem:[#allocation3 + $0xa0] sm:$0xff]  ;;  %5432 = vst.msk [vmem:[#allocation3 + $0xb0] sm:$0xff] %vm1395_vm12, %v5400_v56  ;;  %6575 = vmatmul.msk.bf16.gmra.mxu0 %vm1472_vm14, %v5213_v43 }
 0x38e   : > { %v6330_v9 = vadd.f32 %v7043_v38, %v6298_v7  ;;  %6267 = vst.msk [vmem:[#allocation3 + $0xa8] sm:$0xff] %vm1395_vm12, %v6235_v5 }
 0x38f   : > { %v4554_v41 = vpop.f32.mrf.mxu3  ;;  %v5369_v47 = vld [vmem:[#allocation3 + $0xb8] sm:$0xff] }
 0x390   : > { %v6362_v50 = vmax.f32 %v6330_v9, 0.0  ;;  %v4555_v52 = vadd.f32 %v9607_v24, %v4554_v41  ;;  %v7048_v41 = vld [vmem:[%s7274_s23 + $0xc8] sm:$0xff] }
 0x392   : > { %6394 = vst.msk [vmem:[%s9410_s14 + $0xa0] sm:$0xff] %vm1395_vm12, %v6362_v50  ;;  %v5323_v34 = vpop.f32.mrf.mxu0  ;;  %v6157_v36 = vpop.f32.mrf.mxu1 }
 0x393   : > { %4598 = vst.msk [vmem:[#allocation3 + $0xc0] sm:$0xff] %vm1395_vm12, %v4555_v52  ;;  %v5401_v16 = vadd.f32 %v5369_v47, %v5323_v34 }
 0x394   : > { %v6204_v42 = vld [vmem:[#allocation3 + $0xb0] sm:$0xff] }
 0x395   : > { %v6299_v3 = vld [vmem:[#allocation3 + $0xa8] sm:$0xff]  ;;  %5433 = vst.msk [vmem:[#allocation3 + $0xb8] sm:$0xff] %vm1395_vm12, %v5401_v16  ;;  %v6236_v57 = vadd.f32 %v6204_v42, %v6157_v36 }
 0x396   : > { %6597 = vmatmul.msk.bf16.gmra.mxu1 %vm1472_vm14, %v6049_v54  ;;  %v6331_v51 = vadd.f32 %v7044_v30, %v6299_v3 }
 0x397   : > { %v4556_v49 = vpop.f32.mrf.mxu3  ;;  %6268 = vst.msk [vmem:[#allocation3 + $0xb0] sm:$0xff] %vm1395_vm12, %v6236_v57  ;;  %v7049_v57 = vld [vmem:[%s7274_s23 + $0xd0] sm:$0xff] }
 0x398   : > { %v4557_v2 = vadd.f32 %v9607_v24, %v4556_v49  ;;  %v6363_v6 = vmax.f32 %v6331_v51, 0.0 }
 0x39a   : > { %4599 = vst.msk [vmem:[#allocation3 + $0xc8] sm:$0xff] %vm1395_vm12, %v4557_v2  ;;  %v5370_v12 = vld [vmem:[#allocation3 + $0xc0] sm:$0xff]  ;;  %v6159_v28 = vpop.f32.mrf.mxu1  ;;  %v5326_v4 = vpop.f32.mrf.mxu0 }
 0x39b   : > { %6395 = vst.msk [vmem:[%s9410_s14 + $0xa8] sm:$0xff] %vm1395_vm12, %v6363_v6  ;;  %v5402_v17 = vadd.f32 %v5370_v12, %v5326_v4 }
 0x39c   : > { %v6205_v62 = vld [vmem:[#allocation3 + $0xb8] sm:$0xff] }
 0x39d   : > { %v6237_v61 = vadd.f32 %v6205_v62, %v6159_v28  ;;  %5434 = vst.msk [vmem:[#allocation3 + $0xc0] sm:$0xff] %vm1395_vm12, %v5402_v17  ;;  %v7050_v17 = vld [vmem:[%s7274_s23 + $0xd8] sm:$0xff] }
 0x39e   : > { %v6300_v21 = vld [vmem:[#allocation3 + $0xb0] sm:$0xff] }
 0x39f   : > { %v4559_v27 = vpop.f32.mrf.mxu3  ;;  %v6332_v18 = vadd.f32 %v7045_v14, %v6300_v21  ;;  %6269 = vst.msk [vmem:[#allocation3 + $0xb8] sm:$0xff] %vm1395_vm12, %v6237_v61 }
 0x3a0   : > { %v4560_v40 = vadd.f32 %v9607_v24, %v4559_v27 }
 0x3a1   : > { %v6364_v46 = vmax.f32 %v6332_v18, 0.0  ;;  %v5371_v33 = vld [vmem:[#allocation3 + $0xc8] sm:$0xff] }
 0x3a2   : > { %4600 = vst.msk [vmem:[#allocation3 + $0xd0] sm:$0xff] %vm1395_vm12, %v4560_v40  ;;  %v5328_v58 = vpop.f32.mrf.mxu0  ;;  %v6162_v59 = vpop.f32.mrf.mxu1 }
 0x3a3   : > { %6396 = vst.msk [vmem:[%s9410_s14 + $0xb0] sm:$0xff] %vm1395_vm12, %v6364_v46  ;;  %v5403_v48 = vadd.f32 %v5371_v33, %v5328_v58 }
 0x3a4   : > { %v6206_v10 = vld [vmem:[#allocation3 + $0xc0] sm:$0xff] }
 0x3a5   : > { %5435 = vst.msk [vmem:[#allocation3 + $0xc8] sm:$0xff] %vm1395_vm12, %v5403_v48  ;;  %v6238_v19 = vadd.f32 %v6206_v10, %v6162_v59  ;;  %v7051_v48 = vld [vmem:[%s7274_s23 + $0xe0] sm:$0xff] }
 0x3a6   : > { %v6301_v32 = vld [vmem:[#allocation3 + $0xb8] sm:$0xff] }
 0x3a7   : > { %v4561_v37 = vpop.f32.mrf.mxu3  ;;  %v6333_v13 = vadd.f32 %v7046_v31, %v6301_v32  ;;  %6270 = vst.msk [vmem:[#allocation3 + $0xc0] sm:$0xff] %vm1395_vm12, %v6238_v19 }
 0x3a8   : > { %v4562_v35 = vadd.f32 %v9607_v24, %v4561_v37 }
 0x3a9   : > { %v6365_v11 = vmax.f32 %v6333_v13, 0.0  ;;  %v5372_v39 = vld [vmem:[#allocation3 + $0xd0] sm:$0xff] }
 0x3aa   : > { %4601 = vst.msk [vmem:[#allocation3 + $0xd8] sm:$0xff] %vm1395_vm12, %v4562_v35  ;;  %v5331_v29 = vpop.f32.mrf.mxu0  ;;  %v6164_v45 = vpop.f32.mrf.mxu1 }
 0x3ab   : > { %6397 = vst.msk [vmem:[%s9410_s14 + $0xb8] sm:$0xff] %vm1395_vm12, %v6365_v11  ;;  %v5404_v22 = vadd.f32 %v5372_v39, %v5331_v29  ;;  %v7052_v29 = vld [vmem:[%s7274_s23 + $0xe8] sm:$0xff] }
 0x3ac   : > { %v6207_v0 = vld [vmem:[#allocation3 + $0xc8] sm:$0xff] }
 0x3ad   : > { %5436 = vst.msk [vmem:[#allocation3 + $0xd0] sm:$0xff] %vm1395_vm12, %v5404_v22  ;;  %v6239_v53 = vadd.f32 %v6207_v0, %v6164_v45 }
 0x3ae   : > { %v6302_v26 = vld [vmem:[#allocation3 + $0xc0] sm:$0xff] }
 0x3af   : > { %v4564_v15 = vpop.f32.mrf.mxu3  ;;  %v6334_v60 = vadd.f32 %v7047_v44, %v6302_v26  ;;  %6271 = vst.msk [vmem:[#allocation3 + $0xc8] sm:$0xff] %vm1395_vm12, %v6239_v53 }
 0x3b0   : > { %v4565_v23 = vadd.f32 %v9607_v24, %v4564_v15 }
 0x3b1   : > { %v5373_v20 = vld [vmem:[#allocation3 + $0xd8] sm:$0xff]  ;;  %v6366_v63 = vmax.f32 %v6334_v60, 0.0 }
 0x3b2   : > { %4602 = vst.msk [vmem:[#allocation3 + $0xe0] sm:$0xff] %vm1395_vm12, %v4565_v23  ;;  %v5333_v56 = vpop.f32.mrf.mxu0  ;;  %v6167_v5 = vpop.f32.mrf.mxu1  ;;  %v7053_v23 = vld [vmem:[%s7274_s23 + $0xf0] sm:$0xff] }
 0x3b3   : > { %6398 = vst.msk [vmem:[%s9410_s14 + $0xc0] sm:$0xff] %vm1395_vm12, %v6366_v63  ;;  %v5405_v8 = vadd.f32 %v5373_v20, %v5333_v56  ;;  %v7054_v63 = vld [vmem:[%s7274_s23 + $0xf8] sm:$0xff] }
 0x3b4   : > { %v6208_v7 = vld [vmem:[#allocation3 + $0xd0] sm:$0xff] }
 0x3b5   : > { %5437 = vst.msk [vmem:[#allocation3 + $0xd8] sm:$0xff] %vm1395_vm12, %v5405_v8  ;;  %v6240_v43 = vadd.f32 %v6208_v7, %v6167_v5 }
 0x3b6   : > { %v6303_v38 = vld [vmem:[#allocation3 + $0xc8] sm:$0xff] }
 0x3b7   : > { %v4566_v25 = vpop.f32.mrf.mxu3  ;;  %v6335_v50 = vadd.f32 %v7048_v41, %v6303_v38  ;;  %6272 = vst.msk [vmem:[#allocation3 + $0xd0] sm:$0xff] %vm1395_vm12, %v6240_v43 }
 0x3b8   : > { %v4567_v9 = vadd.f32 %v9607_v24, %v4566_v25 }
 0x3b9   : > { %v5374_v52 = vld [vmem:[#allocation3 + $0xe0] sm:$0xff]  ;;  %v6367_v55 = vmax.f32 %v6335_v50, 0.0 }
 0x3ba   : > { %4603 = vst.msk [vmem:[#allocation3 + $0xe8] sm:$0xff] %vm1395_vm12, %v4567_v9  ;;  %v5336_v1 = vpop.f32.mrf.mxu0  ;;  %v6169_v34 = vpop.f32.mrf.mxu1 }
 0x3bb   : > { %6399 = vst.msk [vmem:[%s9410_s14 + $0xc8] sm:$0xff] %vm1395_vm12, %v6367_v55  ;;  %v5406_v47 = vadd.f32 %v5374_v52, %v5336_v1 }
 0x3bc   : > { %v6209_v36 = vld [vmem:[#allocation3 + $0xd8] sm:$0xff] }
 0x3bd   : > { %5438 = vst.msk [vmem:[#allocation3 + $0xe0] sm:$0xff] %vm1395_vm12, %v5406_v47  ;;  %v6241_v54 = vadd.f32 %v6209_v36, %v6169_v34 }
 0x3be   : > { %v6304_v42 = vld [vmem:[#allocation3 + $0xd0] sm:$0xff] }
 0x3bf   : > { %v4569_v16 = vpop.f32.mrf.mxu3  ;;  %v6336_v30 = vadd.f32 %v7049_v57, %v6304_v42  ;;  %6273 = vst.msk [vmem:[#allocation3 + $0xd8] sm:$0xff] %vm1395_vm12, %v6241_v54 }
 0x3c0   : > { %v4570_v3 = vadd.f32 %v9607_v24, %v4569_v16 }
 0x3c1   : > { %v5375_v51 = vld [vmem:[#allocation3 + $0xe8] sm:$0xff]  ;;  %v6368_v49 = vmax.f32 %v6336_v30, 0.0 }
 0x3c2   : > { %4604 = vst.msk [vmem:[#allocation3 + $0xf0] sm:$0xff] %vm1395_vm12, %v4570_v3  ;;  %v5338_v2 = vpop.f32.mrf.mxu0 }
 0x3c3   : > { %6400 = vst.msk [vmem:[%s9410_s14 + $0xd0] sm:$0xff] %vm1395_vm12, %v6368_v49  ;;  %v5407_v6 = vadd.f32 %v5375_v51, %v5338_v2 }
 0x3c4   : > { %v6210_v27 = vld [vmem:[#allocation3 + $0xe0] sm:$0xff] }
 0x3c5   : > { %5439 = vst.msk [vmem:[#allocation3 + $0xe8] sm:$0xff] %vm1395_vm12, %v5407_v6 }
 0x3c6   : > { %v6305_v28 = vld [vmem:[#allocation3 + $0xd8] sm:$0xff] }
 0x3c7   : > { %v4571_v12 = vpop.f32.mrf.mxu3  ;;  %v6337_v62 = vadd.f32 %v7050_v17, %v6305_v28 }
 0x3c8   : > { %v4572_v4 = vadd.f32 %v9607_v24, %v4571_v12 }
 0x3c9   : > { %v6369_v61 = vmax.f32 %v6337_v62, 0.0  ;;  %v5376_v40 = vld [vmem:[#allocation3 + $0xf0] sm:$0xff] }
 0x3ca   : > { %4605 = vst.msk [vmem:[#allocation3 + $0xf8] sm:$0xff] %vm1395_vm12, %v4572_v4 }
 0x3cb   : > { %6401 = vst.msk [vmem:[%s9410_s14 + $0xd8] sm:$0xff] %vm1395_vm12, %v6369_v61 }
 0x3cc   : > { %v6211_v33 = vld [vmem:[#allocation3 + $0xe8] sm:$0xff] }
 0x3d1   : > { %v5377_v37 = vld [vmem:[#allocation3 + $0xf8] sm:$0xff] }
 0x403   : > { %v6172_v21 = vpop.f32.mrf.mxu1 }
 0x404   : > { %v6242_v14 = vadd.f32 %v6210_v27, %v6172_v21 }
 0x406   : > { %6274 = vst.msk [vmem:[#allocation3 + $0xe0] sm:$0xff] %vm1395_vm12, %v6242_v14 }
 0x40a   : > { %v5341_v18 = vpop.f32.mrf.mxu0 }
 0x40b   : > { %v6174_v46 = vpop.f32.mrf.mxu1  ;;  %v5408_v58 = vadd.f32 %v5376_v40, %v5341_v18 }
 0x40c   : > { %v6243_v24 = vadd.f32 %v6211_v33, %v6174_v46 }
 0x40d   : > { %v6306_v59 = vld [vmem:[#allocation3 + $0xe0] sm:$0xff]  ;;  %5440 = vst.msk [vmem:[#allocation3 + $0xf0] sm:$0xff] %vm1395_vm12, %v5408_v58 }
 0x40e   : > { %v6338_v10 = vadd.f32 %v7051_v48, %v6306_v59  ;;  %6275 = vst.msk [vmem:[#allocation3 + $0xe8] sm:$0xff] %vm1395_vm12, %v6243_v24 }
 0x410   : > { %v6370_v32 = vmax.f32 %v6338_v10, 0.0 }
 0x412   : > { %6402 = vst.msk [vmem:[%s9410_s14 + $0xe0] sm:$0xff] %vm1395_vm12, %v6370_v32  ;;  %v5343_v19 = vpop.f32.mrf.mxu0 }
 0x413   : > { %v6177_v31 = vpop.f32.mrf.mxu1  ;;  %v5409_v13 = vadd.f32 %v5377_v37, %v5343_v19 }
 0x414   : > { %v6212_v35 = vld [vmem:[#allocation3 + $0xf0] sm:$0xff] }
 0x415   : > { %v6307_v11 = vld [vmem:[#allocation3 + $0xe8] sm:$0xff]  ;;  %5441 = vst.msk [vmem:[#allocation3 + $0xf8] sm:$0xff] %vm1395_vm12, %v5409_v13  ;;  %v6244_v39 = vadd.f32 %v6212_v35, %v6177_v31 }
 0x416   : > { %v6339_v45 = vadd.f32 %v7052_v29, %v6307_v11 }
 0x417   : > { %6276 = vst.msk [vmem:[#allocation3 + $0xf0] sm:$0xff] %vm1395_vm12, %v6244_v39 }
 0x418   : > { %v6371_v22 = vmax.f32 %v6339_v45, 0.0 }
 0x41a   : > { %6403 = vst.msk [vmem:[%s9410_s14 + $0xe8] sm:$0xff] %vm1395_vm12, %v6371_v22 }
 0x41b   : > { %v6179_v0 = vpop.f32.mrf.mxu1 }
 0x41c   : > { %v6213_v53 = vld [vmem:[#allocation3 + $0xf8] sm:$0xff] }
 0x41d   : > { %v6245_v15 = vadd.f32 %v6213_v53, %v6179_v0 }
 0x41e   : > { %v6308_v26 = vld [vmem:[#allocation3 + $0xf0] sm:$0xff] }
 0x41f   : > { %v6340_v44 = vadd.f32 %v7053_v23, %v6308_v26  ;;  %6277 = vst.msk [vmem:[#allocation3 + $0xf8] sm:$0xff] %vm1395_vm12, %v6245_v15 }
 0x421   : > { %v6372_v60 = vmax.f32 %v6340_v44, 0.0 }
 0x423   : > { %6404 = vst.msk [vmem:[%s9410_s14 + $0xf0] sm:$0xff] %vm1395_vm12, %v6372_v60 }
 0x426   : > { %v6309_v20 = vld [vmem:[#allocation3 + $0xf8] sm:$0xff] }
 0x427   : > { %v6341_v56 = vadd.f32 %v7054_v63, %v6309_v20 }
 0x429   : > { %v6373_v5 = vmax.f32 %v6341_v56, 0.0 }
 0x42b   : > { %6405 = vst.msk [vmem:[%s9410_s14 + $0xf8] sm:$0xff] %vm1395_vm12, %v6373_v5 }
 0x42c PF: > { %s15_s18 = sadd.s32 1, %s7205_s18  }
 0x42d   : > { %p12_p4 = scmp.ge.s32.totalorder %s15_s18, 4  }
 0x42f   :  { %14 = sbr.rel (!%p12_p4) target bundleno = 1 (0x1), region = 77 }

</bundles_post_ra>
